<compile_context>
chip_gen: v5e
topology: v5e:2x2
jax: 0.10.0
libtpu: 0.0.40
codegen_flags: <defaults>
</compile_context>

<pallas_src>
import functools

import jax
import jax.numpy as jnp
import numpy as np
from jax.experimental import pallas as pl
from jax.experimental.pallas import tpu as pltpu

SELU_ALPHA = 1.6732632423543772
SELU_SCALE = 1.0507009873554805

_VMEM = pl.BlockSpec(memory_space=pltpu.MemorySpace.VMEM)


def _apply_act(v, act):
    if act is None:
        return v
    if act == "relu":
        return jnp.maximum(v, 0.0)
    if act == "selu":
        return SELU_SCALE * jnp.where(
            v > 0, v, SELU_ALPHA * jnp.expm1(jnp.minimum(v, 0.0))
        )
    raise ValueError(f"unknown activation {act}")


# ----------------------------------------------------------------------------
# Static geometry of the flattened, channels-last layouts.
#   encoder "padded" layout: width = w + 2, flat length (h+2)*(w+2) + 2
#     (the +2 guard covers the largest shifted im2col read).
#   decoder layout (transposed-conv input): width = w + 1 (high-side pad),
#     flat length (h+1)*(w+1) + 1.
# ----------------------------------------------------------------------------
def _geometry(H, W):
    assert H % 8 == 0 and W % 8 == 0, "spatial dims must be divisible by 8"
    H1, W1, H2, W2, H3, W3 = H // 2, W // 2, H // 4, W // 4, H // 8, W // 8
    g = dict(H=H, W=W, H1=H1, W1=W1, H2=H2, W2=W2, H3=H3, W3=W3)
    g["Wp0"], g["Wp1"], g["Wp2"], g["Wp3"] = W + 2, W1 + 2, W2 + 2, W3 + 2
    g["len0"] = (H + 2) * (W + 2) + 2
    g["len1"] = (H1 + 2) * (W1 + 2) + 2
    g["len2"] = (H2 + 2) * (W2 + 2) + 2
    g["len3"] = (H3 + 2) * (W3 + 2) + 2
    g["n1"] = H * g["Wp0"]      # conv1 output rows
    g["n2"] = H1 * g["Wp1"]     # conv2 / skip1 rows
    g["n3"] = H2 * g["Wp2"]     # conv3 / skip2 rows
    g["g3"] = H3 * g["Wp3"]     # convlstm rows
    g["dWp3"], g["dWp2"], g["dWp1"] = W3 + 1, W2 + 1, W1 + 1
    g["dlen3"] = (H3 + 1) * (W3 + 1) + 1
    g["dlen2"] = (H2 + 1) * (W2 + 1) + 1
    g["dlen1"] = (H1 + 1) * (W1 + 1) + 1
    g["HW"] = H * W
    return g


# ----------------------------------------------------------------------------
# The single fused kernel.
# ----------------------------------------------------------------------------
def _make_kernel(g, act):
    f32 = jnp.float32
    H, W = g["H"], g["W"]
    H1, W1, H2, W2, H3, W3 = g["H1"], g["W1"], g["H2"], g["W2"], g["H3"], g["W3"]
    Wp0, Wp1, Wp2, Wp3 = g["Wp0"], g["Wp1"], g["Wp2"], g["Wp3"]
    n1, n2, n3, g3 = g["n1"], g["n2"], g["n3"], g["g3"]
    dWp3, dWp2, dWp1 = g["dWp3"], g["dWp2"], g["dWp1"]

    def a(v):
        return _apply_act(v, act)

    def kernel(xp0_ref, w0_ref, b0_ref, w1_ref, b1_ref, w2_ref, b2_ref,
               wl3_ref, bl3_ref, wd3_ref, bd3_ref, wd2_ref, bd2_ref,
               wd1_ref, bd1_ref, wc_ref, bc_ref,
               out_ref,
               c1o, c2o, c3o, xp1, xp2, xp3, h1a, h2a, hpd, d3p, d2p, d1d):

        # Zero-init every padded layout (borders/guards must stay zero).
        for ref in (xp1, xp2, xp3, hpd, d3p, d2p):
            ref[...] = jnp.zeros_like(ref)

        def im2col9(src_ref, wp, n):
            # (n, 9*Cin): 9 shifted contiguous reads, lane-concatenated.
            return jnp.concatenate(
                [src_ref[pl.ds(dy * wp + dx, n), :]
                 for dy in range(3) for dx in range(3)], axis=-1)

        def lstm_h(gate, hid):
            # zero initial state: c_next = i * g, h = o * tanh(c_next)
            i = jax.nn.sigmoid(gate[:, 0 * hid:1 * hid])
            o = jax.nn.sigmoid(gate[:, 1 * hid:2 * hid])
            gg = jnp.tanh(gate[:, 2 * hid:3 * hid])
            return o * jnp.tanh(i * gg)

        def pool_into(conv_ref, xp_next, h_out, w_out, wp_in, wp_next):
            # 2x2 max-pool: 4 stride-2 reads per output row, contiguous write
            # into the interior of the next (pre-zeroed) padded layout.
            for y in range(h_out):
                r0 = 2 * y * wp_in
                m = jnp.maximum(
                    jnp.maximum(conv_ref[pl.ds(r0, w_out, stride=2), :],
                                conv_ref[pl.ds(r0 + 1, w_out, stride=2), :]),
                    jnp.maximum(conv_ref[pl.ds(r0 + wp_in, w_out, stride=2), :],
                                conv_ref[pl.ds(r0 + wp_in + 1, w_out,
                                               stride=2), :]))
                xp_next[pl.ds((y + 1) * wp_next + 1, w_out), :] = m

        # ------------------------------ encoder ---------------------------
        y0 = jnp.dot(im2col9(xp0_ref, Wp0, n1), w0_ref[...],
                     preferred_element_type=f32) + b0_ref[...]
        c1o[...] = a(y0)
        pool_into(c1o, xp1, H1, W1, Wp0, Wp1)

        # conv2 + skip1 ConvLSTM fused in one matmul (K=144, N=32+48).
        y1 = jnp.dot(im2col9(xp1, Wp1, n2), w1_ref[...],
                     preferred_element_type=f32) + b1_ref[...]
        c2o[...] = a(y1[:, :32])
        h1a[...] = a(lstm_h(y1[:, 32:], 16))
        pool_into(c2o, xp2, H2, W2, Wp1, Wp2)

        # conv3 + skip2 ConvLSTM fused (K=288, N=64+96).
        y2 = jnp.dot(im2col9(xp2, Wp2, n3), w2_ref[...],
                     preferred_element_type=f32) + b2_ref[...]
        c3o[...] = a(y2[:, :64])
        h2a[...] = a(lstm_h(y2[:, 64:], 32))
        pool_into(c3o, xp3, H3, W3, Wp2, Wp3)

        # convlstm (K=576, N=192).
        y3 = jnp.dot(im2col9(xp3, Wp3, g3), wl3_ref[...],
                     preferred_element_type=f32) + bl3_ref[...]
        h3 = lstm_h(y3, 64)
        # Per-row contiguous copy of h into the (zeroed) decoder layout.
        for yr in range(H3):
            hpd[pl.ds(yr * dWp3, W3), :] = h3[yr * Wp3:yr * Wp3 + W3, :]

        # ------------------------------ decoder ---------------------------
        def deconv_phases(src_ref, wblk_ref, b4_ref, h_src, dwp_src):
            # All 4 polyphase outputs of ConvT(k3,s2,p1,op1) in one matmul:
            # lhs = [x00|x01|x10|x11] (nd, 4*Cin), block weight (4*Cin, 4*Cout).
            nd = h_src * dwp_src
            lhs = jnp.concatenate(
                [src_ref[pl.ds(0, nd), :],
                 src_ref[pl.ds(1, nd), :],
                 src_ref[pl.ds(dwp_src, nd), :],
                 src_ref[pl.ds(dwp_src + 1, nd), :]], axis=-1)
            return a(jnp.dot(lhs, wblk_ref[...], preferred_element_type=f32)
                     + b4_ref[...])

        def interleave_add(p, cout, dst_ref, dwp_dst, h_dst, w_src, dwp_src,
                           skip_ref=None, wp_skip=None):
            # Scatter phase (alpha,beta) rows into destination row 2*yo+alpha,
            # columns 2*xo+beta, via stride-2 stores; fuse the skip-add with a
            # stride-2 read from the (already activated) LSTM output.
            phases = [p[:, q * cout:(q + 1) * cout] for q in range(4)]
            for ydst in range(h_dst):
                alpha, yo = ydst % 2, ydst // 2
                base = yo * dwp_src
                for beta in range(2):
                    row = phases[2 * alpha + beta][base:base + w_src, :]
                    if skip_ref is not None:
                        row = row + skip_ref[
                            pl.ds(ydst * wp_skip + beta, w_src, stride=2), :]
                    dst_ref[pl.ds(ydst * dwp_dst + beta, w_src,
                                  stride=2), :] = row

        # deconv3 (K=256, N=128) + skip2
        p3 = deconv_phases(hpd, wd3_ref, bd3_ref, H3, dWp3)
        interleave_add(p3, 32, d3p, dWp2, H2, W3, dWp3, h2a, Wp2)

        # deconv2 (K=128, N=64) + skip1
        p2 = deconv_phases(d3p, wd2_ref, bd2_ref, H2, dWp2)
        interleave_add(p2, 16, d2p, dWp1, H1, W2, dWp2, h1a, Wp1)

        # deconv1 (K=64, N=32) -> dense (H*W, 8)
        p1 = deconv_phases(d2p, wd1_ref, bd1_ref, H1, dWp1)
        interleave_add(p1, 8, d1d, W, H, W1, dWp1)

        # 1x1 classifier on the dense deconv1 output (single matmul).
        out_ref[...] = jnp.dot(d1d[...], wc_ref[...],
                               preferred_element_type=f32) + bc_ref[...]

    return kernel


# ----------------------------------------------------------------------------
# Full SkipLSTMEnDe forward (batchnorm=False / softmax=False path, s=None).
# ----------------------------------------------------------------------------
def skip_lstm_ende_forward(params, x_nchw, act="relu"):
    # batch must be 1 (the PyTorch module hard-codes self.batchsize = 1)
    x = jnp.transpose(x_nchw[0].astype(jnp.float32), (1, 2, 0))   # (H, W, C)
    H, W, C = x.shape
    g = _geometry(H, W)

    # Input prep: SAME-pad, flatten, +2 guard rows (one tiny XLA op).
    xp0 = jnp.pad(x, ((1, 1), (1, 1), (0, 0))).reshape((H + 2) * (W + 2), C)
    xp0 = jnp.concatenate([xp0, jnp.zeros((2, C), jnp.float32)], axis=0)

    # --- weight prep ---------------------------------------------------
    def conv_flat(w):                               # HWIO -> (9*Cin, Cout)
        kh, kw, ci, co = w.shape
        return w.reshape(kh * kw * ci, co)

    def lstm_flat(w, b, hid):
        # h0 == 0 -> x-half only; c0 == 0 -> drop the forget gate.
        wx = w[:, :, :hid, :].reshape(9, hid, 4 * hid)
        wl = jnp.concatenate([wx[..., 0:hid],               # i
                              wx[..., 2 * hid:3 * hid],     # o
                              wx[..., 3 * hid:4 * hid]],    # g
                             axis=-1).reshape(9 * hid, 3 * hid)
        bl = jnp.concatenate([b[0:hid], b[2 * hid:3 * hid],
                              b[3 * hid:4 * hid]]).reshape(1, 3 * hid)
        return wl, bl

    def deconv_block(w, b):
        # Polyphase block weight (4*Cin, 4*Cout); taps of the equivalent
        # forward-conv kernel, phases ordered (p00, p01, p10, p11).
        kh, kw, ci, co = w.shape
        wt = w.reshape(9, ci, co)
        Z = jnp.zeros((ci, co), jnp.float32)
        cols = [jnp.concatenate([wt[4], Z, Z, Z], axis=0),
                jnp.concatenate([wt[3], wt[5], Z, Z], axis=0),
                jnp.concatenate([wt[1], Z, wt[7], Z], axis=0),
                jnp.concatenate([wt[0], wt[2], wt[6], wt[8]], axis=0)]
        return (jnp.concatenate(cols, axis=1),
                jnp.tile(b.reshape(1, co), (1, 4)))

    w0, b0 = conv_flat(params["conv1_w"]), params["conv1_b"].reshape(1, 16)
    wl1, bl1 = lstm_flat(params["skip1_w"], params["skip1_b"], 16)
    wl2, bl2 = lstm_flat(params["skip2_w"], params["skip2_b"], 32)
    wl3, bl3 = lstm_flat(params["lstm_w"], params["lstm_b"], 64)
    w1 = jnp.concatenate([conv_flat(params["conv2_w"]), wl1], axis=1)
    b1 = jnp.concatenate([params["conv2_b"].reshape(1, 32), bl1], axis=1)
    w2 = jnp.concatenate([conv_flat(params["conv3_w"]), wl2], axis=1)
    b2 = jnp.concatenate([params["conv3_b"].reshape(1, 64), bl2], axis=1)
    wd3, bd3 = deconv_block(params["deconv3_w"], params["deconv3_b"])
    wd2, bd2 = deconv_block(params["deconv2_w"], params["deconv2_b"])
    wd1, bd1 = deconv_block(params["deconv1_w"], params["deconv1_b"])
    wc, bc = params["cls_w"].reshape(8, 1), params["cls_b"].reshape(1, 1)

    fused = pl.pallas_call(
        _make_kernel(g, act),
        out_shape=jax.ShapeDtypeStruct((g["HW"], 1), jnp.float32),
        in_specs=[_VMEM] * 17,
        out_specs=_VMEM,
        scratch_shapes=[
            pltpu.VMEM((g["n1"], 16), jnp.float32),     # conv1 output
            pltpu.VMEM((g["n2"], 32), jnp.float32),     # conv2 output
            pltpu.VMEM((g["n3"], 64), jnp.float32),     # conv3 output
            pltpu.VMEM((g["len1"], 16), jnp.float32),   # padded pooled conv1
            pltpu.VMEM((g["len2"], 32), jnp.float32),   # padded pooled conv2
            pltpu.VMEM((g["len3"], 64), jnp.float32),   # padded pooled conv3
            pltpu.VMEM((g["n2"], 16), jnp.float32),     # act(h1) skip
            pltpu.VMEM((g["n3"], 32), jnp.float32),     # act(h2) skip
            pltpu.VMEM((g["dlen3"], 64), jnp.float32),  # h in decoder layout
            pltpu.VMEM((g["dlen2"], 32), jnp.float32),  # d3 dense
            pltpu.VMEM((g["dlen1"], 16), jnp.float32),  # d2 dense
            pltpu.VMEM((g["HW"], 8), jnp.float32),      # d1 dense
        ],
        compiler_params=pltpu.CompilerParams(
            vmem_limit_bytes=32 * 1024 * 1024),
    )
    score = fused(xp0, w0, b0, w1, b1, w2, b2, wl3, bl3,
                  wd3, bd3, wd2, bd2, wd1, bd1, wc, bc)
    return jnp.transpose(score.reshape(H, W, 1), (2, 0, 1))[None]  # (1,1,H,W)


# ----------------------------------------------------------------------------
# Deterministic synthetic parameter init (weights ~ N(0, sqrt(2/(k*k*Cout)))).
# Transposed-conv weights are stored directly as their equivalent forward-conv
# HWIO kernels.
# ----------------------------------------------------------------------------
def init_params(key, num_channels):
    specs = {
        "conv1": (3, 3, num_channels, 16),
        "conv2": (3, 3, 16, 32),
        "conv3": (3, 3, 32, 64),
        "lstm": (3, 3, 64 + 64, 4 * 64),
        "skip2": (3, 3, 32 + 32, 4 * 32),
        "skip1": (3, 3, 16 + 16, 4 * 16),
        "deconv3": (3, 3, 64, 32),
        "deconv2": (3, 3, 32, 16),
        "deconv1": (3, 3, 16, 8),
        "cls": (1, 1, 8, 1),
    }
    params = {}
    keys = jax.random.split(key, 2 * len(specs))
    for idx, (name, (kh, kw, cin, cout)) in enumerate(specs.items()):
        std = float(np.sqrt(2.0 / (kh * kw * cout)))
        params[name + "_w"] = std * jax.random.normal(
            keys[2 * idx], (kh, kw, cin, cout), jnp.float32
        )
        params[name + "_b"] = 0.1 * jax.random.normal(
            keys[2 * idx + 1], (cout,), jnp.float32
        )
    return params


# ----------------------------------------------------------------------------
# Pure-JAX (XLA conv) reference for numerical verification.
# ----------------------------------------------------------------------------
def reference_forward(params, x_nchw, act="relu"):
    P = jax.lax.Precision.HIGHEST
    dn = ("NHWC", "HWIO", "NHWC")

    def a(v):
        return _apply_act(v, act)

    def conv_same(x, w, b):
        y = jax.lax.conv_general_dilated(
            x[None], w, (1, 1), "SAME", dimension_numbers=dn, precision=P
        )[0]
        return y + b

    def deconv(x, w, b):
        y = jax.lax.conv_general_dilated(
            x[None], w, (1, 1), [(1, 2), (1, 2)], lhs_dilation=(2, 2),
            dimension_numbers=dn, precision=P,
        )[0]
        return y + b

    def pool(x):
        H, W, C = x.shape
        return x.reshape(H // 2, 2, W // 2, 2, C).max(axis=(1, 3))

    def lstm(xin, h, c, w, b):
        gg = conv_same(jnp.concatenate([xin, h], axis=-1), w, b)
        hid = h.shape[-1]
        i = jax.nn.sigmoid(gg[..., :hid])
        f = jax.nn.sigmoid(gg[..., hid:2 * hid])
        o = jax.nn.sigmoid(gg[..., 2 * hid:3 * hid])
        gc = jnp.tanh(gg[..., 3 * hid:])
        c_n = f * c + i * gc
        return o * jnp.tanh(c_n), c_n

    x = jnp.transpose(x_nchw[0].astype(jnp.float32), (1, 2, 0))
    conv1_ = pool(a(conv_same(x, params["conv1_w"], params["conv1_b"])))
    conv2_ = pool(a(conv_same(conv1_, params["conv2_w"], params["conv2_b"])))
    conv3_ = pool(a(conv_same(conv2_, params["conv3_w"], params["conv3_b"])))
    z = lambda r, hid: jnp.zeros(r.shape[:2] + (hid,), jnp.float32)
    h, _ = lstm(conv3_, z(conv3_, 64), z(conv3_, 64),
                params["lstm_w"], params["lstm_b"])
    h2, _ = lstm(conv2_, z(conv2_, 32), z(conv2_, 32),
                 params["skip2_w"], params["skip2_b"])
    h1, _ = lstm(conv1_, z(conv1_, 16), z(conv1_, 16),
                 params["skip1_w"], params["skip1_b"])
    d3 = a(deconv(h, params["deconv3_w"], params["deconv3_b"])) + a(h2)
    d2 = a(deconv(d3, params["deconv2_w"], params["deconv2_b"])) + a(h1)
    d1 = a(deconv(d2, params["deconv1_w"], params["deconv1_b"]))
    score = conv_same(d1, params["cls_w"], params["cls_b"])
    return jnp.transpose(score, (2, 0, 1))[None]


if __name__ == "__main__":
    key = jax.random.PRNGKey(0)
    kp, kx = jax.random.split(key)

    num_channels, H, W = 4, 16, 16   # activation='relu', initType='default'
    params = init_params(kp, num_channels)
    x = jax.random.normal(kx, (1, num_channels, H, W), jnp.float32)

    fwd = jax.jit(functools.partial(skip_lstm_ende_forward, act="relu"))
    out = jax.block_until_ready(fwd(params, x))

    ref = jax.block_until_ready(reference_forward(params, x, act="relu"))

    assert out.shape == (1, 1, H, W), out.shape
    np.testing.assert_allclose(np.asarray(out), np.asarray(ref),
                               atol=2e-3, rtol=2e-3)
    print("KERNEL_OK")
</pallas_src>

<mosaic_0001>
module attributes {stable_mosaic.version = 11 : i64} {
  func.func @kernel(%arg0: memref<326x4xf32, #tpu.memory_space<vmem>>, %arg1: memref<36x16xf32, #tpu.memory_space<vmem>>, %arg2: memref<1x16xf32, #tpu.memory_space<vmem>>, %arg3: memref<144x80xf32, #tpu.memory_space<vmem>>, %arg4: memref<1x80xf32, #tpu.memory_space<vmem>>, %arg5: memref<288x160xf32, #tpu.memory_space<vmem>>, %arg6: memref<1x160xf32, #tpu.memory_space<vmem>>, %arg7: memref<576x192xf32, #tpu.memory_space<vmem>>, %arg8: memref<1x192xf32, #tpu.memory_space<vmem>>, %arg9: memref<256x128xf32, #tpu.memory_space<vmem>>, %arg10: memref<1x128xf32, #tpu.memory_space<vmem>>, %arg11: memref<128x64xf32, #tpu.memory_space<vmem>>, %arg12: memref<1x64xf32, #tpu.memory_space<vmem>>, %arg13: memref<64x32xf32, #tpu.memory_space<vmem>>, %arg14: memref<1x32xf32, #tpu.memory_space<vmem>>, %arg15: memref<8x1xf32, #tpu.memory_space<vmem>>, %arg16: memref<1x1xf32, #tpu.memory_space<vmem>>, %arg17: memref<256x1xf32, #tpu.memory_space<vmem>>, %arg18: memref<288x16xf32, #tpu.memory_space<vmem>>, %arg19: memref<80x32xf32, #tpu.memory_space<vmem>>, %arg20: memref<24x64xf32, #tpu.memory_space<vmem>>, %arg21: memref<102x16xf32, #tpu.memory_space<vmem>>, %arg22: memref<38x32xf32, #tpu.memory_space<vmem>>, %arg23: memref<18x64xf32, #tpu.memory_space<vmem>>, %arg24: memref<80x16xf32, #tpu.memory_space<vmem>>, %arg25: memref<24x32xf32, #tpu.memory_space<vmem>>, %arg26: memref<10x64xf32, #tpu.memory_space<vmem>>, %arg27: memref<26x32xf32, #tpu.memory_space<vmem>>, %arg28: memref<82x16xf32, #tpu.memory_space<vmem>>, %arg29: memref<256x8xf32, #tpu.memory_space<vmem>>) attributes {dimension_semantics = [], scalar_prefetch = 0 : i64, scratch_operands = 12 : i64, tpu.core_type = #tpu.core_type<tc>} {
    %cst = arith.constant 0.000000e+00 : f32
    %0 = vector.broadcast %cst : f32 to vector<102x16xf32>
    %c0 = arith.constant 0 : index
    %c0_0 = arith.constant 0 : index
    %1 = vector.load %arg21[%c0, %c0_0] : memref<102x16xf32, #tpu.memory_space<vmem>>, vector<102x16xf32>
    tpu.vector_store %arg21[%c0, %c0_0], %0 {strides = array<i32>} : memref<102x16xf32, #tpu.memory_space<vmem>>, vector<102x16xf32>,
    %cst_1 = arith.constant 0.000000e+00 : f32
    %2 = vector.broadcast %cst_1 : f32 to vector<38x32xf32>
    %c0_2 = arith.constant 0 : index
    %c0_3 = arith.constant 0 : index
    %3 = vector.load %arg22[%c0_2, %c0_3] : memref<38x32xf32, #tpu.memory_space<vmem>>, vector<38x32xf32>
    tpu.vector_store %arg22[%c0_2, %c0_3], %2 {strides = array<i32>} : memref<38x32xf32, #tpu.memory_space<vmem>>, vector<38x32xf32>,
    %cst_4 = arith.constant 0.000000e+00 : f32
    %4 = vector.broadcast %cst_4 : f32 to vector<18x64xf32>
    %c0_5 = arith.constant 0 : index
    %c0_6 = arith.constant 0 : index
    %5 = vector.load %arg23[%c0_5, %c0_6] : memref<18x64xf32, #tpu.memory_space<vmem>>, vector<18x64xf32>
    tpu.vector_store %arg23[%c0_5, %c0_6], %4 {strides = array<i32>} : memref<18x64xf32, #tpu.memory_space<vmem>>, vector<18x64xf32>,
    %cst_7 = arith.constant 0.000000e+00 : f32
    %6 = vector.broadcast %cst_7 : f32 to vector<10x64xf32>
    %c0_8 = arith.constant 0 : index
    %c0_9 = arith.constant 0 : index
    %7 = vector.load %arg26[%c0_8, %c0_9] : memref<10x64xf32, #tpu.memory_space<vmem>>, vector<10x64xf32>
    tpu.vector_store %arg26[%c0_8, %c0_9], %6 {strides = array<i32>} : memref<10x64xf32, #tpu.memory_space<vmem>>, vector<10x64xf32>,
    %cst_10 = arith.constant 0.000000e+00 : f32
    %8 = vector.broadcast %cst_10 : f32 to vector<26x32xf32>
    %c0_11 = arith.constant 0 : index
    %c0_12 = arith.constant 0 : index
    %9 = vector.load %arg27[%c0_11, %c0_12] : memref<26x32xf32, #tpu.memory_space<vmem>>, vector<26x32xf32>
    tpu.vector_store %arg27[%c0_11, %c0_12], %8 {strides = array<i32>} : memref<26x32xf32, #tpu.memory_space<vmem>>, vector<26x32xf32>,
    %cst_13 = arith.constant 0.000000e+00 : f32
    %10 = vector.broadcast %cst_13 : f32 to vector<82x16xf32>
    %c0_14 = arith.constant 0 : index
    %c0_15 = arith.constant 0 : index
    %11 = vector.load %arg28[%c0_14, %c0_15] : memref<82x16xf32, #tpu.memory_space<vmem>>, vector<82x16xf32>
    tpu.vector_store %arg28[%c0_14, %c0_15], %10 {strides = array<i32>} : memref<82x16xf32, #tpu.memory_space<vmem>>, vector<82x16xf32>,
    %c0_16 = arith.constant 0 : index
    %c0_17 = arith.constant 0 : index
    %12 = vector.load %arg0[%c0_16, %c0_17] : memref<326x4xf32, #tpu.memory_space<vmem>>, vector<288x4xf32>
    %c1 = arith.constant 1 : index
    %c0_18 = arith.constant 0 : index
    %13 = vector.load %arg0[%c1, %c0_18] : memref<326x4xf32, #tpu.memory_space<vmem>>, vector<288x4xf32>
    %c2 = arith.constant 2 : index
    %c0_19 = arith.constant 0 : index
    %14 = vector.load %arg0[%c2, %c0_19] : memref<326x4xf32, #tpu.memory_space<vmem>>, vector<288x4xf32>
    %c18 = arith.constant 18 : index
    %c0_20 = arith.constant 0 : index
    %15 = vector.load %arg0[%c18, %c0_20] : memref<326x4xf32, #tpu.memory_space<vmem>>, vector<288x4xf32>
    %c19 = arith.constant 19 : index
    %c0_21 = arith.constant 0 : index
    %16 = vector.load %arg0[%c19, %c0_21] : memref<326x4xf32, #tpu.memory_space<vmem>>, vector<288x4xf32>
    %c20 = arith.constant 20 : index
    %c0_22 = arith.constant 0 : index
    %17 = vector.load %arg0[%c20, %c0_22] : memref<326x4xf32, #tpu.memory_space<vmem>>, vector<288x4xf32>
    %c36 = arith.constant 36 : index
    %c0_23 = arith.constant 0 : index
    %18 = vector.load %arg0[%c36, %c0_23] : memref<326x4xf32, #tpu.memory_space<vmem>>, vector<288x4xf32>
    %c37 = arith.constant 37 : index
    %c0_24 = arith.constant 0 : index
    %19 = vector.load %arg0[%c37, %c0_24] : memref<326x4xf32, #tpu.memory_space<vmem>>, vector<288x4xf32>
    %c38 = arith.constant 38 : index
    %c0_25 = arith.constant 0 : index
    %20 = vector.load %arg0[%c38, %c0_25] : memref<326x4xf32, #tpu.memory_space<vmem>>, vector<288x4xf32>
    %21 = tpu.concatenate %12, %13, %14, %15, %16, %17, %18, %19, %20 in 1 : vector<288x4xf32>, vector<288x4xf32>, vector<288x4xf32>, vector<288x4xf32>, vector<288x4xf32>, vector<288x4xf32>, vector<288x4xf32>, vector<288x4xf32>, vector<288x4xf32> -> vector<288x36xf32>
    %c0_26 = arith.constant 0 : index
    %c0_27 = arith.constant 0 : index
    %22 = vector.load %arg1[%c0_26, %c0_27] : memref<36x16xf32, #tpu.memory_space<vmem>>, vector<36x16xf32>
    %cst_28 = arith.constant dense<0.000000e+00> : vector<288x16xf32>
    %23 = tpu.matmul %21, %22, %cst_28 {dimension_numbers = #tpu.dot_dimension_numbers<[1], [0], [0], [1], [0, 0, 1, 1], [], []>} : vector<288x36xf32>, vector<36x16xf32>, vector<288x16xf32> -> vector<288x16xf32>
    %c0_29 = arith.constant 0 : index
    %c0_30 = arith.constant 0 : index
    %24 = vector.load %arg2[%c0_29, %c0_30] : memref<1x16xf32, #tpu.memory_space<vmem>>, vector<1x16xf32>
    %25 = vector.broadcast %24 : vector<1x16xf32> to vector<288x16xf32>
    %26 = arith.addf %23, %25 : vector<288x16xf32>
    %cst_31 = arith.constant 0.000000e+00 : f32
    %27 = vector.broadcast %cst_31 : f32 to vector<288x16xf32>
    %28 = arith.maximumf %26, %27 : vector<288x16xf32>
    %c0_32 = arith.constant 0 : index
    %c0_33 = arith.constant 0 : index
    %29 = vector.load %arg18[%c0_32, %c0_33] : memref<288x16xf32, #tpu.memory_space<vmem>>, vector<288x16xf32>
    tpu.vector_store %arg18[%c0_32, %c0_33], %28 {strides = array<i32>} : memref<288x16xf32, #tpu.memory_space<vmem>>, vector<288x16xf32>,
    %c0_34 = arith.constant 0 : index
    %c0_35 = arith.constant 0 : index
    %30 = tpu.strided_load %arg18[%c0_34, %c0_35] {strides = array<i32: 2, 1>} : memref<288x16xf32, #tpu.memory_space<vmem>>, vector<8x16xf32>
    %c1_36 = arith.constant 1 : index
    %c0_37 = arith.constant 0 : index
    %31 = tpu.strided_load %arg18[%c1_36, %c0_37] {strides = array<i32: 2, 1>} : memref<288x16xf32, #tpu.memory_space<vmem>>, vector<8x16xf32>
    %32 = arith.maximumf %30, %31 : vector<8x16xf32>
    %c18_38 = arith.constant 18 : index
    %c0_39 = arith.constant 0 : index
    %33 = tpu.strided_load %arg18[%c18_38, %c0_39] {strides = array<i32: 2, 1>} : memref<288x16xf32, #tpu.memory_space<vmem>>, vector<8x16xf32>
    %c19_40 = arith.constant 19 : index
    %c0_41 = arith.constant 0 : index
    %34 = tpu.strided_load %arg18[%c19_40, %c0_41] {strides = array<i32: 2, 1>} : memref<288x16xf32, #tpu.memory_space<vmem>>, vector<8x16xf32>
    %35 = arith.maximumf %33, %34 : vector<8x16xf32>
    %36 = arith.maximumf %32, %35 : vector<8x16xf32>
    %c11 = arith.constant 11 : index
    %c0_42 = arith.constant 0 : index
    %37 = vector.load %arg21[%c11, %c0_42] : memref<102x16xf32, #tpu.memory_space<vmem>>, vector<8x16xf32>
    tpu.vector_store %arg21[%c11, %c0_42], %36 {strides = array<i32>} : memref<102x16xf32, #tpu.memory_space<vmem>>, vector<8x16xf32>,
    %c36_43 = arith.constant 36 : index
    %c0_44 = arith.constant 0 : index
    %38 = tpu.strided_load %arg18[%c36_43, %c0_44] {strides = array<i32: 2, 1>} : memref<288x16xf32, #tpu.memory_space<vmem>>, vector<8x16xf32>
    %c37_45 = arith.constant 37 : index
    %c0_46 = arith.constant 0 : index
    %39 = tpu.strided_load %arg18[%c37_45, %c0_46] {strides = array<i32: 2, 1>} : memref<288x16xf32, #tpu.memory_space<vmem>>, vector<8x16xf32>
    %40 = arith.maximumf %38, %39 : vector<8x16xf32>
    %c54 = arith.constant 54 : index
    %c0_47 = arith.constant 0 : index
    %41 = tpu.strided_load %arg18[%c54, %c0_47] {strides = array<i32: 2, 1>} : memref<288x16xf32, #tpu.memory_space<vmem>>, vector<8x16xf32>
    %c55 = arith.constant 55 : index
    %c0_48 = arith.constant 0 : index
    %42 = tpu.strided_load %arg18[%c55, %c0_48] {strides = array<i32: 2, 1>} : memref<288x16xf32, #tpu.memory_space<vmem>>, vector<8x16xf32>
    %43 = arith.maximumf %41, %42 : vector<8x16xf32>
    %44 = arith.maximumf %40, %43 : vector<8x16xf32>
    %c21 = arith.constant 21 : index
    %c0_49 = arith.constant 0 : index
    %45 = vector.load %arg21[%c21, %c0_49] : memref<102x16xf32, #tpu.memory_space<vmem>>, vector<8x16xf32>
    tpu.vector_store %arg21[%c21, %c0_49], %44 {strides = array<i32>} : memref<102x16xf32, #tpu.memory_space<vmem>>, vector<8x16xf32>,
    %c72 = arith.constant 72 : index
    %c0_50 = arith.constant 0 : index
    %46 = tpu.strided_load %arg18[%c72, %c0_50] {strides = array<i32: 2, 1>} : memref<288x16xf32, #tpu.memory_space<vmem>>, vector<8x16xf32>
    %c73 = arith.constant 73 : index
    %c0_51 = arith.constant 0 : index
    %47 = tpu.strided_load %arg18[%c73, %c0_51] {strides = array<i32: 2, 1>} : memref<288x16xf32, #tpu.memory_space<vmem>>, vector<8x16xf32>
    %48 = arith.maximumf %46, %47 : vector<8x16xf32>
    %c90 = arith.constant 90 : index
    %c0_52 = arith.constant 0 : index
    %49 = tpu.strided_load %arg18[%c90, %c0_52] {strides = array<i32: 2, 1>} : memref<288x16xf32, #tpu.memory_space<vmem>>, vector<8x16xf32>
    %c91 = arith.constant 91 : index
    %c0_53 = arith.constant 0 : index
    %50 = tpu.strided_load %arg18[%c91, %c0_53] {strides = array<i32: 2, 1>} : memref<288x16xf32, #tpu.memory_space<vmem>>, vector<8x16xf32>
    %51 = arith.maximumf %49, %50 : vector<8x16xf32>
    %52 = arith.maximumf %48, %51 : vector<8x16xf32>
    %c31 = arith.constant 31 : index
    %c0_54 = arith.constant 0 : index
    %53 = vector.load %arg21[%c31, %c0_54] : memref<102x16xf32, #tpu.memory_space<vmem>>, vector<8x16xf32>
    tpu.vector_store %arg21[%c31, %c0_54], %52 {strides = array<i32>} : memref<102x16xf32, #tpu.memory_space<vmem>>, vector<8x16xf32>,
    %c108 = arith.constant 108 : index
    %c0_55 = arith.constant 0 : index
    %54 = tpu.strided_load %arg18[%c108, %c0_55] {strides = array<i32: 2, 1>} : memref<288x16xf32, #tpu.memory_space<vmem>>, vector<8x16xf32>
    %c109 = arith.constant 109 : index
    %c0_56 = arith.constant 0 : index
    %55 = tpu.strided_load %arg18[%c109, %c0_56] {strides = array<i32: 2, 1>} : memref<288x16xf32, #tpu.memory_space<vmem>>, vector<8x16xf32>
    %56 = arith.maximumf %54, %55 : vector<8x16xf32>
    %c126 = arith.constant 126 : index
    %c0_57 = arith.constant 0 : index
    %57 = tpu.strided_load %arg18[%c126, %c0_57] {strides = array<i32: 2, 1>} : memref<288x16xf32, #tpu.memory_space<vmem>>, vector<8x16xf32>
    %c127 = arith.constant 127 : index
    %c0_58 = arith.constant 0 : index
    %58 = tpu.strided_load %arg18[%c127, %c0_58] {strides = array<i32: 2, 1>} : memref<288x16xf32, #tpu.memory_space<vmem>>, vector<8x16xf32>
    %59 = arith.maximumf %57, %58 : vector<8x16xf32>
    %60 = arith.maximumf %56, %59 : vector<8x16xf32>
    %c41 = arith.constant 41 : index
    %c0_59 = arith.constant 0 : index
    %61 = vector.load %arg21[%c41, %c0_59] : memref<102x16xf32, #tpu.memory_space<vmem>>, vector<8x16xf32>
    tpu.vector_store %arg21[%c41, %c0_59], %60 {strides = array<i32>} : memref<102x16xf32, #tpu.memory_space<vmem>>, vector<8x16xf32>,
    %c144 = arith.constant 144 : index
    %c0_60 = arith.constant 0 : index
    %62 = tpu.strided_load %arg18[%c144, %c0_60] {strides = array<i32: 2, 1>} : memref<288x16xf32, #tpu.memory_space<vmem>>, vector<8x16xf32>
    %c145 = arith.constant 145 : index
    %c0_61 = arith.constant 0 : index
    %63 = tpu.strided_load %arg18[%c145, %c0_61] {strides = array<i32: 2, 1>} : memref<288x16xf32, #tpu.memory_space<vmem>>, vector<8x16xf32>
    %64 = arith.maximumf %62, %63 : vector<8x16xf32>
    %c162 = arith.constant 162 : index
    %c0_62 = arith.constant 0 : index
    %65 = tpu.strided_load %arg18[%c162, %c0_62] {strides = array<i32: 2, 1>} : memref<288x16xf32, #tpu.memory_space<vmem>>, vector<8x16xf32>
    %c163 = arith.constant 163 : index
    %c0_63 = arith.constant 0 : index
    %66 = tpu.strided_load %arg18[%c163, %c0_63] {strides = array<i32: 2, 1>} : memref<288x16xf32, #tpu.memory_space<vmem>>, vector<8x16xf32>
    %67 = arith.maximumf %65, %66 : vector<8x16xf32>
    %68 = arith.maximumf %64, %67 : vector<8x16xf32>
    %c51 = arith.constant 51 : index
    %c0_64 = arith.constant 0 : index
    %69 = vector.load %arg21[%c51, %c0_64] : memref<102x16xf32, #tpu.memory_space<vmem>>, vector<8x16xf32>
    tpu.vector_store %arg21[%c51, %c0_64], %68 {strides = array<i32>} : memref<102x16xf32, #tpu.memory_space<vmem>>, vector<8x16xf32>,
    %c180 = arith.constant 180 : index
    %c0_65 = arith.constant 0 : index
    %70 = tpu.strided_load %arg18[%c180, %c0_65] {strides = array<i32: 2, 1>} : memref<288x16xf32, #tpu.memory_space<vmem>>, vector<8x16xf32>
    %c181 = arith.constant 181 : index
    %c0_66 = arith.constant 0 : index
    %71 = tpu.strided_load %arg18[%c181, %c0_66] {strides = array<i32: 2, 1>} : memref<288x16xf32, #tpu.memory_space<vmem>>, vector<8x16xf32>
    %72 = arith.maximumf %70, %71 : vector<8x16xf32>
    %c198 = arith.constant 198 : index
    %c0_67 = arith.constant 0 : index
    %73 = tpu.strided_load %arg18[%c198, %c0_67] {strides = array<i32: 2, 1>} : memref<288x16xf32, #tpu.memory_space<vmem>>, vector<8x16xf32>
    %c199 = arith.constant 199 : index
    %c0_68 = arith.constant 0 : index
    %74 = tpu.strided_load %arg18[%c199, %c0_68] {strides = array<i32: 2, 1>} : memref<288x16xf32, #tpu.memory_space<vmem>>, vector<8x16xf32>
    %75 = arith.maximumf %73, %74 : vector<8x16xf32>
    %76 = arith.maximumf %72, %75 : vector<8x16xf32>
    %c61 = arith.constant 61 : index
    %c0_69 = arith.constant 0 : index
    %77 = vector.load %arg21[%c61, %c0_69] : memref<102x16xf32, #tpu.memory_space<vmem>>, vector<8x16xf32>
    tpu.vector_store %arg21[%c61, %c0_69], %76 {strides = array<i32>} : memref<102x16xf32, #tpu.memory_space<vmem>>, vector<8x16xf32>,
    %c216 = arith.constant 216 : index
    %c0_70 = arith.constant 0 : index
    %78 = tpu.strided_load %arg18[%c216, %c0_70] {strides = array<i32: 2, 1>} : memref<288x16xf32, #tpu.memory_space<vmem>>, vector<8x16xf32>
    %c217 = arith.constant 217 : index
    %c0_71 = arith.constant 0 : index
    %79 = tpu.strided_load %arg18[%c217, %c0_71] {strides = array<i32: 2, 1>} : memref<288x16xf32, #tpu.memory_space<vmem>>, vector<8x16xf32>
    %80 = arith.maximumf %78, %79 : vector<8x16xf32>
    %c234 = arith.constant 234 : index
    %c0_72 = arith.constant 0 : index
    %81 = tpu.strided_load %arg18[%c234, %c0_72] {strides = array<i32: 2, 1>} : memref<288x16xf32, #tpu.memory_space<vmem>>, vector<8x16xf32>
    %c235 = arith.constant 235 : index
    %c0_73 = arith.constant 0 : index
    %82 = tpu.strided_load %arg18[%c235, %c0_73] {strides = array<i32: 2, 1>} : memref<288x16xf32, #tpu.memory_space<vmem>>, vector<8x16xf32>
    %83 = arith.maximumf %81, %82 : vector<8x16xf32>
    %84 = arith.maximumf %80, %83 : vector<8x16xf32>
    %c71 = arith.constant 71 : index
    %c0_74 = arith.constant 0 : index
    %85 = vector.load %arg21[%c71, %c0_74] : memref<102x16xf32, #tpu.memory_space<vmem>>, vector<8x16xf32>
    tpu.vector_store %arg21[%c71, %c0_74], %84 {strides = array<i32>} : memref<102x16xf32, #tpu.memory_space<vmem>>, vector<8x16xf32>,
    %c252 = arith.constant 252 : index
    %c0_75 = arith.constant 0 : index
    %86 = tpu.strided_load %arg18[%c252, %c0_75] {strides = array<i32: 2, 1>} : memref<288x16xf32, #tpu.memory_space<vmem>>, vector<8x16xf32>
    %c253 = arith.constant 253 : index
    %c0_76 = arith.constant 0 : index
    %87 = tpu.strided_load %arg18[%c253, %c0_76] {strides = array<i32: 2, 1>} : memref<288x16xf32, #tpu.memory_space<vmem>>, vector<8x16xf32>
    %88 = arith.maximumf %86, %87 : vector<8x16xf32>
    %c270 = arith.constant 270 : index
    %c0_77 = arith.constant 0 : index
    %89 = tpu.strided_load %arg18[%c270, %c0_77] {strides = array<i32: 2, 1>} : memref<288x16xf32, #tpu.memory_space<vmem>>, vector<8x16xf32>
    %c271 = arith.constant 271 : index
    %c0_78 = arith.constant 0 : index
    %90 = tpu.strided_load %arg18[%c271, %c0_78] {strides = array<i32: 2, 1>} : memref<288x16xf32, #tpu.memory_space<vmem>>, vector<8x16xf32>
    %91 = arith.maximumf %89, %90 : vector<8x16xf32>
    %92 = arith.maximumf %88, %91 : vector<8x16xf32>
    %c81 = arith.constant 81 : index
    %c0_79 = arith.constant 0 : index
    %93 = vector.load %arg21[%c81, %c0_79] : memref<102x16xf32, #tpu.memory_space<vmem>>, vector<8x16xf32>
    tpu.vector_store %arg21[%c81, %c0_79], %92 {strides = array<i32>} : memref<102x16xf32, #tpu.memory_space<vmem>>, vector<8x16xf32>,
    %c0_80 = arith.constant 0 : index
    %c0_81 = arith.constant 0 : index
    %94 = vector.load %arg21[%c0_80, %c0_81] : memref<102x16xf32, #tpu.memory_space<vmem>>, vector<80x16xf32>
    %c1_82 = arith.constant 1 : index
    %c0_83 = arith.constant 0 : index
    %95 = vector.load %arg21[%c1_82, %c0_83] : memref<102x16xf32, #tpu.memory_space<vmem>>, vector<80x16xf32>
    %c2_84 = arith.constant 2 : index
    %c0_85 = arith.constant 0 : index
    %96 = vector.load %arg21[%c2_84, %c0_85] : memref<102x16xf32, #tpu.memory_space<vmem>>, vector<80x16xf32>
    %c10 = arith.constant 10 : index
    %c0_86 = arith.constant 0 : index
    %97 = vector.load %arg21[%c10, %c0_86] : memref<102x16xf32, #tpu.memory_space<vmem>>, vector<80x16xf32>
    %c11_87 = arith.constant 11 : index
    %c0_88 = arith.constant 0 : index
    %98 = vector.load %arg21[%c11_87, %c0_88] : memref<102x16xf32, #tpu.memory_space<vmem>>, vector<80x16xf32>
    %c12 = arith.constant 12 : index
    %c0_89 = arith.constant 0 : index
    %99 = vector.load %arg21[%c12, %c0_89] : memref<102x16xf32, #tpu.memory_space<vmem>>, vector<80x16xf32>
    %c20_90 = arith.constant 20 : index
    %c0_91 = arith.constant 0 : index
    %100 = vector.load %arg21[%c20_90, %c0_91] : memref<102x16xf32, #tpu.memory_space<vmem>>, vector<80x16xf32>
    %c21_92 = arith.constant 21 : index
    %c0_93 = arith.constant 0 : index
    %101 = vector.load %arg21[%c21_92, %c0_93] : memref<102x16xf32, #tpu.memory_space<vmem>>, vector<80x16xf32>
    %c22 = arith.constant 22 : index
    %c0_94 = arith.constant 0 : index
    %102 = vector.load %arg21[%c22, %c0_94] : memref<102x16xf32, #tpu.memory_space<vmem>>, vector<80x16xf32>
    %103 = tpu.concatenate %94, %95, %96, %97, %98, %99, %100, %101, %102 in 1 : vector<80x16xf32>, vector<80x16xf32>, vector<80x16xf32>, vector<80x16xf32>, vector<80x16xf32>, vector<80x16xf32>, vector<80x16xf32>, vector<80x16xf32>, vector<80x16xf32> -> vector<80x144xf32>
    %c0_95 = arith.constant 0 : index
    %c0_96 = arith.constant 0 : index
    %104 = vector.load %arg3[%c0_95, %c0_96] : memref<144x80xf32, #tpu.memory_space<vmem>>, vector<144x80xf32>
    %cst_97 = arith.constant dense<0.000000e+00> : vector<80x80xf32>
    %105 = tpu.matmul %103, %104, %cst_97 {dimension_numbers = #tpu.dot_dimension_numbers<[1], [0], [0], [1], [0, 0, 1, 1], [], []>} : vector<80x144xf32>, vector<144x80xf32>, vector<80x80xf32> -> vector<80x80xf32>
    %c0_98 = arith.constant 0 : index
    %c0_99 = arith.constant 0 : index
    %106 = vector.load %arg4[%c0_98, %c0_99] : memref<1x80xf32, #tpu.memory_space<vmem>>, vector<1x80xf32>
    %107 = vector.broadcast %106 : vector<1x80xf32> to vector<80x80xf32>
    %108 = arith.addf %105, %107 : vector<80x80xf32>
    %109 = vector.extract_strided_slice %108 {offsets = [0, 0], sizes = [80, 32], strides = [1, 1]} : vector<80x80xf32> to vector<80x32xf32>
    %cst_100 = arith.constant 0.000000e+00 : f32
    %110 = vector.broadcast %cst_100 : f32 to vector<80x32xf32>
    %111 = arith.maximumf %109, %110 : vector<80x32xf32>
    %c0_101 = arith.constant 0 : index
    %c0_102 = arith.constant 0 : index
    %112 = vector.load %arg19[%c0_101, %c0_102] : memref<80x32xf32, #tpu.memory_space<vmem>>, vector<80x32xf32>
    tpu.vector_store %arg19[%c0_101, %c0_102], %111 {strides = array<i32>} : memref<80x32xf32, #tpu.memory_space<vmem>>, vector<80x32xf32>,
    %113 = vector.extract_strided_slice %108 {offsets = [0, 32], sizes = [80, 48], strides = [1, 1]} : vector<80x80xf32> to vector<80x48xf32>
    %114 = vector.extract_strided_slice %113 {offsets = [0, 0], sizes = [80, 16], strides = [1, 1]} : vector<80x48xf32> to vector<80x16xf32>
    %115 = arith.negf %114 : vector<80x16xf32>
    %116 = math.exp %115 : vector<80x16xf32>
    %cst_103 = arith.constant 1.000000e+00 : f32
    %117 = vector.broadcast %cst_103 : f32 to vector<80x16xf32>
    %118 = arith.addf %117, %116 : vector<80x16xf32>
    %119 = arith.divf %117, %118 : vector<80x16xf32>
    %120 = vector.extract_strided_slice %113 {offsets = [0, 16], sizes = [80, 16], strides = [1, 1]} : vector<80x48xf32> to vector<80x16xf32>
    %121 = arith.negf %120 : vector<80x16xf32>
    %122 = math.exp %121 : vector<80x16xf32>
    %cst_104 = arith.constant 1.000000e+00 : f32
    %123 = vector.broadcast %cst_104 : f32 to vector<80x16xf32>
    %124 = arith.addf %123, %122 : vector<80x16xf32>
    %125 = arith.divf %123, %124 : vector<80x16xf32>
    %126 = vector.extract_strided_slice %113 {offsets = [0, 32], sizes = [80, 16], strides = [1, 1]} : vector<80x48xf32> to vector<80x16xf32>
    %127 = math.tanh %126 : vector<80x16xf32>
    %128 = arith.mulf %119, %127 : vector<80x16xf32>
    %129 = math.tanh %128 : vector<80x16xf32>
    %130 = arith.mulf %125, %129 : vector<80x16xf32>
    %cst_105 = arith.constant 0.000000e+00 : f32
    %131 = vector.broadcast %cst_105 : f32 to vector<80x16xf32>
    %132 = arith.maximumf %130, %131 : vector<80x16xf32>
    %c0_106 = arith.constant 0 : index
    %c0_107 = arith.constant 0 : index
    %133 = vector.load %arg24[%c0_106, %c0_107] : memref<80x16xf32, #tpu.memory_space<vmem>>, vector<80x16xf32>
    tpu.vector_store %arg24[%c0_106, %c0_107], %132 {strides = array<i32>} : memref<80x16xf32, #tpu.memory_space<vmem>>, vector<80x16xf32>,
    %c0_108 = arith.constant 0 : index
    %c0_109 = arith.constant 0 : index
    %134 = tpu.strided_load %arg19[%c0_108, %c0_109] {strides = array<i32: 2, 1>} : memref<80x32xf32, #tpu.memory_space<vmem>>, vector<4x32xf32>
    %c1_110 = arith.constant 1 : index
    %c0_111 = arith.constant 0 : index
    %135 = tpu.strided_load %arg19[%c1_110, %c0_111] {strides = array<i32: 2, 1>} : memref<80x32xf32, #tpu.memory_space<vmem>>, vector<4x32xf32>
    %136 = arith.maximumf %134, %135 : vector<4x32xf32>
    %c10_112 = arith.constant 10 : index
    %c0_113 = arith.constant 0 : index
    %137 = tpu.strided_load %arg19[%c10_112, %c0_113] {strides = array<i32: 2, 1>} : memref<80x32xf32, #tpu.memory_space<vmem>>, vector<4x32xf32>
    %c11_114 = arith.constant 11 : index
    %c0_115 = arith.constant 0 : index
    %138 = tpu.strided_load %arg19[%c11_114, %c0_115] {strides = array<i32: 2, 1>} : memref<80x32xf32, #tpu.memory_space<vmem>>, vector<4x32xf32>
    %139 = arith.maximumf %137, %138 : vector<4x32xf32>
    %140 = arith.maximumf %136, %139 : vector<4x32xf32>
    %c7 = arith.constant 7 : index
    %c0_116 = arith.constant 0 : index
    %141 = vector.load %arg22[%c7, %c0_116] : memref<38x32xf32, #tpu.memory_space<vmem>>, vector<4x32xf32>
    tpu.vector_store %arg22[%c7, %c0_116], %140 {strides = array<i32>} : memref<38x32xf32, #tpu.memory_space<vmem>>, vector<4x32xf32>,
    %c20_117 = arith.constant 20 : index
    %c0_118 = arith.constant 0 : index
    %142 = tpu.strided_load %arg19[%c20_117, %c0_118] {strides = array<i32: 2, 1>} : memref<80x32xf32, #tpu.memory_space<vmem>>, vector<4x32xf32>
    %c21_119 = arith.constant 21 : index
    %c0_120 = arith.constant 0 : index
    %143 = tpu.strided_load %arg19[%c21_119, %c0_120] {strides = array<i32: 2, 1>} : memref<80x32xf32, #tpu.memory_space<vmem>>, vector<4x32xf32>
    %144 = arith.maximumf %142, %143 : vector<4x32xf32>
    %c30 = arith.constant 30 : index
    %c0_121 = arith.constant 0 : index
    %145 = tpu.strided_load %arg19[%c30, %c0_121] {strides = array<i32: 2, 1>} : memref<80x32xf32, #tpu.memory_space<vmem>>, vector<4x32xf32>
    %c31_122 = arith.constant 31 : index
    %c0_123 = arith.constant 0 : index
    %146 = tpu.strided_load %arg19[%c31_122, %c0_123] {strides = array<i32: 2, 1>} : memref<80x32xf32, #tpu.memory_space<vmem>>, vector<4x32xf32>
    %147 = arith.maximumf %145, %146 : vector<4x32xf32>
    %148 = arith.maximumf %144, %147 : vector<4x32xf32>
    %c13 = arith.constant 13 : index
    %c0_124 = arith.constant 0 : index
    %149 = vector.load %arg22[%c13, %c0_124] : memref<38x32xf32, #tpu.memory_space<vmem>>, vector<4x32xf32>
    tpu.vector_store %arg22[%c13, %c0_124], %148 {strides = array<i32>} : memref<38x32xf32, #tpu.memory_space<vmem>>, vector<4x32xf32>,
    %c40 = arith.constant 40 : index
    %c0_125 = arith.constant 0 : index
    %150 = tpu.strided_load %arg19[%c40, %c0_125] {strides = array<i32: 2, 1>} : memref<80x32xf32, #tpu.memory_space<vmem>>, vector<4x32xf32>
    %c41_126 = arith.constant 41 : index
    %c0_127 = arith.constant 0 : index
    %151 = tpu.strided_load %arg19[%c41_126, %c0_127] {strides = array<i32: 2, 1>} : memref<80x32xf32, #tpu.memory_space<vmem>>, vector<4x32xf32>
    %152 = arith.maximumf %150, %151 : vector<4x32xf32>
    %c50 = arith.constant 50 : index
    %c0_128 = arith.constant 0 : index
    %153 = tpu.strided_load %arg19[%c50, %c0_128] {strides = array<i32: 2, 1>} : memref<80x32xf32, #tpu.memory_space<vmem>>, vector<4x32xf32>
    %c51_129 = arith.constant 51 : index
    %c0_130 = arith.constant 0 : index
    %154 = tpu.strided_load %arg19[%c51_129, %c0_130] {strides = array<i32: 2, 1>} : memref<80x32xf32, #tpu.memory_space<vmem>>, vector<4x32xf32>
    %155 = arith.maximumf %153, %154 : vector<4x32xf32>
    %156 = arith.maximumf %152, %155 : vector<4x32xf32>
    %c19_131 = arith.constant 19 : index
    %c0_132 = arith.constant 0 : index
    %157 = vector.load %arg22[%c19_131, %c0_132] : memref<38x32xf32, #tpu.memory_space<vmem>>, vector<4x32xf32>
    tpu.vector_store %arg22[%c19_131, %c0_132], %156 {strides = array<i32>} : memref<38x32xf32, #tpu.memory_space<vmem>>, vector<4x32xf32>,
    %c60 = arith.constant 60 : index
    %c0_133 = arith.constant 0 : index
    %158 = tpu.strided_load %arg19[%c60, %c0_133] {strides = array<i32: 2, 1>} : memref<80x32xf32, #tpu.memory_space<vmem>>, vector<4x32xf32>
    %c61_134 = arith.constant 61 : index
    %c0_135 = arith.constant 0 : index
    %159 = tpu.strided_load %arg19[%c61_134, %c0_135] {strides = array<i32: 2, 1>} : memref<80x32xf32, #tpu.memory_space<vmem>>, vector<4x32xf32>
    %160 = arith.maximumf %158, %159 : vector<4x32xf32>
    %c70 = arith.constant 70 : index
    %c0_136 = arith.constant 0 : index
    %161 = tpu.strided_load %arg19[%c70, %c0_136] {strides = array<i32: 2, 1>} : memref<80x32xf32, #tpu.memory_space<vmem>>, vector<4x32xf32>
    %c71_137 = arith.constant 71 : index
    %c0_138 = arith.constant 0 : index
    %162 = tpu.strided_load %arg19[%c71_137, %c0_138] {strides = array<i32: 2, 1>} : memref<80x32xf32, #tpu.memory_space<vmem>>, vector<4x32xf32>
    %163 = arith.maximumf %161, %162 : vector<4x32xf32>
    %164 = arith.maximumf %160, %163 : vector<4x32xf32>
    %c25 = arith.constant 25 : index
    %c0_139 = arith.constant 0 : index
    %165 = vector.load %arg22[%c25, %c0_139] : memref<38x32xf32, #tpu.memory_space<vmem>>, vector<4x32xf32>
    tpu.vector_store %arg22[%c25, %c0_139], %164 {strides = array<i32>} : memref<38x32xf32, #tpu.memory_space<vmem>>, vector<4x32xf32>,
    %c0_140 = arith.constant 0 : index
    %c0_141 = arith.constant 0 : index
    %166 = vector.load %arg22[%c0_140, %c0_141] : memref<38x32xf32, #tpu.memory_space<vmem>>, vector<24x32xf32>
    %c1_142 = arith.constant 1 : index
    %c0_143 = arith.constant 0 : index
    %167 = vector.load %arg22[%c1_142, %c0_143] : memref<38x32xf32, #tpu.memory_space<vmem>>, vector<24x32xf32>
    %c2_144 = arith.constant 2 : index
    %c0_145 = arith.constant 0 : index
    %168 = vector.load %arg22[%c2_144, %c0_145] : memref<38x32xf32, #tpu.memory_space<vmem>>, vector<24x32xf32>
    %c6 = arith.constant 6 : index
    %c0_146 = arith.constant 0 : index
    %169 = vector.load %arg22[%c6, %c0_146] : memref<38x32xf32, #tpu.memory_space<vmem>>, vector<24x32xf32>
    %c7_147 = arith.constant 7 : index
    %c0_148 = arith.constant 0 : index
    %170 = vector.load %arg22[%c7_147, %c0_148] : memref<38x32xf32, #tpu.memory_space<vmem>>, vector<24x32xf32>
    %c8 = arith.constant 8 : index
    %c0_149 = arith.constant 0 : index
    %171 = vector.load %arg22[%c8, %c0_149] : memref<38x32xf32, #tpu.memory_space<vmem>>, vector<24x32xf32>
    %c12_150 = arith.constant 12 : index
    %c0_151 = arith.constant 0 : index
    %172 = vector.load %arg22[%c12_150, %c0_151] : memref<38x32xf32, #tpu.memory_space<vmem>>, vector<24x32xf32>
    %c13_152 = arith.constant 13 : index
    %c0_153 = arith.constant 0 : index
    %173 = vector.load %arg22[%c13_152, %c0_153] : memref<38x32xf32, #tpu.memory_space<vmem>>, vector<24x32xf32>
    %c14 = arith.constant 14 : index
    %c0_154 = arith.constant 0 : index
    %174 = vector.load %arg22[%c14, %c0_154] : memref<38x32xf32, #tpu.memory_space<vmem>>, vector<24x32xf32>
    %175 = tpu.concatenate %166, %167, %168, %169, %170, %171, %172, %173, %174 in 1 : vector<24x32xf32>, vector<24x32xf32>, vector<24x32xf32>, vector<24x32xf32>, vector<24x32xf32>, vector<24x32xf32>, vector<24x32xf32>, vector<24x32xf32>, vector<24x32xf32> -> vector<24x288xf32>
    %c0_155 = arith.constant 0 : index
    %c0_156 = arith.constant 0 : index
    %176 = vector.load %arg5[%c0_155, %c0_156] : memref<288x160xf32, #tpu.memory_space<vmem>>, vector<288x160xf32>
    %cst_157 = arith.constant dense<0.000000e+00> : vector<24x160xf32>
    %177 = tpu.matmul %175, %176, %cst_157 {dimension_numbers = #tpu.dot_dimension_numbers<[1], [0], [0], [1], [0, 0, 1, 1], [], []>} : vector<24x288xf32>, vector<288x160xf32>, vector<24x160xf32> -> vector<24x160xf32>
    %c0_158 = arith.constant 0 : index
    %c0_159 = arith.constant 0 : index
    %178 = vector.load %arg6[%c0_158, %c0_159] : memref<1x160xf32, #tpu.memory_space<vmem>>, vector<1x160xf32>
    %179 = vector.broadcast %178 : vector<1x160xf32> to vector<24x160xf32>
    %180 = arith.addf %177, %179 : vector<24x160xf32>
    %181 = vector.extract_strided_slice %180 {offsets = [0, 0], sizes = [24, 64], strides = [1, 1]} : vector<24x160xf32> to vector<24x64xf32>
    %cst_160 = arith.constant 0.000000e+00 : f32
    %182 = vector.broadcast %cst_160 : f32 to vector<24x64xf32>
    %183 = arith.maximumf %181, %182 : vector<24x64xf32>
    %c0_161 = arith.constant 0 : index
    %c0_162 = arith.constant 0 : index
    %184 = vector.load %arg20[%c0_161, %c0_162] : memref<24x64xf32, #tpu.memory_space<vmem>>, vector<24x64xf32>
    tpu.vector_store %arg20[%c0_161, %c0_162], %183 {strides = array<i32>} : memref<24x64xf32, #tpu.memory_space<vmem>>, vector<24x64xf32>,
    %185 = vector.extract_strided_slice %180 {offsets = [0, 64], sizes = [24, 96], strides = [1, 1]} : vector<24x160xf32> to vector<24x96xf32>
    %186 = vector.extract_strided_slice %185 {offsets = [0, 0], sizes = [24, 32], strides = [1, 1]} : vector<24x96xf32> to vector<24x32xf32>
    %187 = arith.negf %186 : vector<24x32xf32>
    %188 = math.exp %187 : vector<24x32xf32>
    %cst_163 = arith.constant 1.000000e+00 : f32
    %189 = vector.broadcast %cst_163 : f32 to vector<24x32xf32>
    %190 = arith.addf %189, %188 : vector<24x32xf32>
    %191 = arith.divf %189, %190 : vector<24x32xf32>
    %192 = vector.extract_strided_slice %185 {offsets = [0, 32], sizes = [24, 32], strides = [1, 1]} : vector<24x96xf32> to vector<24x32xf32>
    %193 = arith.negf %192 : vector<24x32xf32>
    %194 = math.exp %193 : vector<24x32xf32>
    %cst_164 = arith.constant 1.000000e+00 : f32
    %195 = vector.broadcast %cst_164 : f32 to vector<24x32xf32>
    %196 = arith.addf %195, %194 : vector<24x32xf32>
    %197 = arith.divf %195, %196 : vector<24x32xf32>
    %198 = vector.extract_strided_slice %185 {offsets = [0, 64], sizes = [24, 32], strides = [1, 1]} : vector<24x96xf32> to vector<24x32xf32>
    %199 = math.tanh %198 : vector<24x32xf32>
    %200 = arith.mulf %191, %199 : vector<24x32xf32>
    %201 = math.tanh %200 : vector<24x32xf32>
    %202 = arith.mulf %197, %201 : vector<24x32xf32>
    %cst_165 = arith.constant 0.000000e+00 : f32
    %203 = vector.broadcast %cst_165 : f32 to vector<24x32xf32>
    %204 = arith.maximumf %202, %203 : vector<24x32xf32>
    %c0_166 = arith.constant 0 : index
    %c0_167 = arith.constant 0 : index
    %205 = vector.load %arg25[%c0_166, %c0_167] : memref<24x32xf32, #tpu.memory_space<vmem>>, vector<24x32xf32>
    tpu.vector_store %arg25[%c0_166, %c0_167], %204 {strides = array<i32>} : memref<24x32xf32, #tpu.memory_space<vmem>>, vector<24x32xf32>,
    %c0_168 = arith.constant 0 : index
    %c0_169 = arith.constant 0 : index
    %206 = tpu.strided_load %arg20[%c0_168, %c0_169] {strides = array<i32: 2, 1>} : memref<24x64xf32, #tpu.memory_space<vmem>>, vector<2x64xf32>
    %c1_170 = arith.constant 1 : index
    %c0_171 = arith.constant 0 : index
    %207 = tpu.strided_load %arg20[%c1_170, %c0_171] {strides = array<i32: 2, 1>} : memref<24x64xf32, #tpu.memory_space<vmem>>, vector<2x64xf32>
    %208 = arith.maximumf %206, %207 : vector<2x64xf32>
    %c6_172 = arith.constant 6 : index
    %c0_173 = arith.constant 0 : index
    %209 = tpu.strided_load %arg20[%c6_172, %c0_173] {strides = array<i32: 2, 1>} : memref<24x64xf32, #tpu.memory_space<vmem>>, vector<2x64xf32>
    %c7_174 = arith.constant 7 : index
    %c0_175 = arith.constant 0 : index
    %210 = tpu.strided_load %arg20[%c7_174, %c0_175] {strides = array<i32: 2, 1>} : memref<24x64xf32, #tpu.memory_space<vmem>>, vector<2x64xf32>
    %211 = arith.maximumf %209, %210 : vector<2x64xf32>
    %212 = arith.maximumf %208, %211 : vector<2x64xf32>
    %c5 = arith.constant 5 : index
    %c0_176 = arith.constant 0 : index
    %213 = vector.load %arg23[%c5, %c0_176] : memref<18x64xf32, #tpu.memory_space<vmem>>, vector<2x64xf32>
    tpu.vector_store %arg23[%c5, %c0_176], %212 {strides = array<i32>} : memref<18x64xf32, #tpu.memory_space<vmem>>, vector<2x64xf32>,
    %c12_177 = arith.constant 12 : index
    %c0_178 = arith.constant 0 : index
    %214 = tpu.strided_load %arg20[%c12_177, %c0_178] {strides = array<i32: 2, 1>} : memref<24x64xf32, #tpu.memory_space<vmem>>, vector<2x64xf32>
    %c13_179 = arith.constant 13 : index
    %c0_180 = arith.constant 0 : index
    %215 = tpu.strided_load %arg20[%c13_179, %c0_180] {strides = array<i32: 2, 1>} : memref<24x64xf32, #tpu.memory_space<vmem>>, vector<2x64xf32>
    %216 = arith.maximumf %214, %215 : vector<2x64xf32>
    %c18_181 = arith.constant 18 : index
    %c0_182 = arith.constant 0 : index
    %217 = tpu.strided_load %arg20[%c18_181, %c0_182] {strides = array<i32: 2, 1>} : memref<24x64xf32, #tpu.memory_space<vmem>>, vector<2x64xf32>
    %c19_183 = arith.constant 19 : index
    %c0_184 = arith.constant 0 : index
    %218 = tpu.strided_load %arg20[%c19_183, %c0_184] {strides = array<i32: 2, 1>} : memref<24x64xf32, #tpu.memory_space<vmem>>, vector<2x64xf32>
    %219 = arith.maximumf %217, %218 : vector<2x64xf32>
    %220 = arith.maximumf %216, %219 : vector<2x64xf32>
    %c9 = arith.constant 9 : index
    %c0_185 = arith.constant 0 : index
    %221 = vector.load %arg23[%c9, %c0_185] : memref<18x64xf32, #tpu.memory_space<vmem>>, vector<2x64xf32>
    tpu.vector_store %arg23[%c9, %c0_185], %220 {strides = array<i32>} : memref<18x64xf32, #tpu.memory_space<vmem>>, vector<2x64xf32>,
    %c0_186 = arith.constant 0 : index
    %c0_187 = arith.constant 0 : index
    %222 = vector.load %arg23[%c0_186, %c0_187] : memref<18x64xf32, #tpu.memory_space<vmem>>, vector<8x64xf32>
    %c1_188 = arith.constant 1 : index
    %c0_189 = arith.constant 0 : index
    %223 = vector.load %arg23[%c1_188, %c0_189] : memref<18x64xf32, #tpu.memory_space<vmem>>, vector<8x64xf32>
    %c2_190 = arith.constant 2 : index
    %c0_191 = arith.constant 0 : index
    %224 = vector.load %arg23[%c2_190, %c0_191] : memref<18x64xf32, #tpu.memory_space<vmem>>, vector<8x64xf32>
    %c4 = arith.constant 4 : index
    %c0_192 = arith.constant 0 : index
    %225 = vector.load %arg23[%c4, %c0_192] : memref<18x64xf32, #tpu.memory_space<vmem>>, vector<8x64xf32>
    %c5_193 = arith.constant 5 : index
    %c0_194 = arith.constant 0 : index
    %226 = vector.load %arg23[%c5_193, %c0_194] : memref<18x64xf32, #tpu.memory_space<vmem>>, vector<8x64xf32>
    %c6_195 = arith.constant 6 : index
    %c0_196 = arith.constant 0 : index
    %227 = vector.load %arg23[%c6_195, %c0_196] : memref<18x64xf32, #tpu.memory_space<vmem>>, vector<8x64xf32>
    %c8_197 = arith.constant 8 : index
    %c0_198 = arith.constant 0 : index
    %228 = vector.load %arg23[%c8_197, %c0_198] : memref<18x64xf32, #tpu.memory_space<vmem>>, vector<8x64xf32>
    %c9_199 = arith.constant 9 : index
    %c0_200 = arith.constant 0 : index
    %229 = vector.load %arg23[%c9_199, %c0_200] : memref<18x64xf32, #tpu.memory_space<vmem>>, vector<8x64xf32>
    %c10_201 = arith.constant 10 : index
    %c0_202 = arith.constant 0 : index
    %230 = vector.load %arg23[%c10_201, %c0_202] : memref<18x64xf32, #tpu.memory_space<vmem>>, vector<8x64xf32>
    %231 = tpu.concatenate %222, %223, %224, %225, %226, %227, %228, %229, %230 in 1 : vector<8x64xf32>, vector<8x64xf32>, vector<8x64xf32>, vector<8x64xf32>, vector<8x64xf32>, vector<8x64xf32>, vector<8x64xf32>, vector<8x64xf32>, vector<8x64xf32> -> vector<8x576xf32>
    %c0_203 = arith.constant 0 : index
    %c0_204 = arith.constant 0 : index
    %232 = vector.load %arg7[%c0_203, %c0_204] : memref<576x192xf32, #tpu.memory_space<vmem>>, vector<576x192xf32>
    %cst_205 = arith.constant dense<0.000000e+00> : vector<8x192xf32>
    %233 = tpu.matmul %231, %232, %cst_205 {dimension_numbers = #tpu.dot_dimension_numbers<[1], [0], [0], [1], [0, 0, 1, 1], [], []>} : vector<8x576xf32>, vector<576x192xf32>, vector<8x192xf32> -> vector<8x192xf32>
    %c0_206 = arith.constant 0 : index
    %c0_207 = arith.constant 0 : index
    %234 = vector.load %arg8[%c0_206, %c0_207] : memref<1x192xf32, #tpu.memory_space<vmem>>, vector<1x192xf32>
    %235 = vector.broadcast %234 : vector<1x192xf32> to vector<8x192xf32>
    %236 = arith.addf %233, %235 : vector<8x192xf32>
    %237 = vector.extract_strided_slice %236 {offsets = [0, 0], sizes = [8, 64], strides = [1, 1]} : vector<8x192xf32> to vector<8x64xf32>
    %238 = arith.negf %237 : vector<8x64xf32>
    %239 = math.exp %238 : vector<8x64xf32>
    %cst_208 = arith.constant 1.000000e+00 : f32
    %240 = vector.broadcast %cst_208 : f32 to vector<8x64xf32>
    %241 = arith.addf %240, %239 : vector<8x64xf32>
    %242 = arith.divf %240, %241 : vector<8x64xf32>
    %243 = vector.extract_strided_slice %236 {offsets = [0, 64], sizes = [8, 64], strides = [1, 1]} : vector<8x192xf32> to vector<8x64xf32>
    %244 = arith.negf %243 : vector<8x64xf32>
    %245 = math.exp %244 : vector<8x64xf32>
    %cst_209 = arith.constant 1.000000e+00 : f32
    %246 = vector.broadcast %cst_209 : f32 to vector<8x64xf32>
    %247 = arith.addf %246, %245 : vector<8x64xf32>
    %248 = arith.divf %246, %247 : vector<8x64xf32>
    %249 = vector.extract_strided_slice %236 {offsets = [0, 128], sizes = [8, 64], strides = [1, 1]} : vector<8x192xf32> to vector<8x64xf32>
    %250 = math.tanh %249 : vector<8x64xf32>
    %251 = arith.mulf %242, %250 : vector<8x64xf32>
    %252 = math.tanh %251 : vector<8x64xf32>
    %253 = arith.mulf %248, %252 : vector<8x64xf32>
    %254 = vector.extract_strided_slice %253 {offsets = [0, 0], sizes = [2, 64], strides = [1, 1]} : vector<8x64xf32> to vector<2x64xf32>
    %c0_210 = arith.constant 0 : index
    %c0_211 = arith.constant 0 : index
    %255 = vector.load %arg26[%c0_210, %c0_211] : memref<10x64xf32, #tpu.memory_space<vmem>>, vector<2x64xf32>
    tpu.vector_store %arg26[%c0_210, %c0_211], %254 {strides = array<i32>} : memref<10x64xf32, #tpu.memory_space<vmem>>, vector<2x64xf32>,
    %256 = vector.extract_strided_slice %253 {offsets = [4, 0], sizes = [2, 64], strides = [1, 1]} : vector<8x64xf32> to vector<2x64xf32>
    %c3 = arith.constant 3 : index
    %c0_212 = arith.constant 0 : index
    %257 = vector.load %arg26[%c3, %c0_212] : memref<10x64xf32, #tpu.memory_space<vmem>>, vector<2x64xf32>
    tpu.vector_store %arg26[%c3, %c0_212], %256 {strides = array<i32>} : memref<10x64xf32, #tpu.memory_space<vmem>>, vector<2x64xf32>,
    %c0_213 = arith.constant 0 : index
    %c0_214 = arith.constant 0 : index
    %258 = vector.load %arg26[%c0_213, %c0_214] : memref<10x64xf32, #tpu.memory_space<vmem>>, vector<6x64xf32>
    %c1_215 = arith.constant 1 : index
    %c0_216 = arith.constant 0 : index
    %259 = vector.load %arg26[%c1_215, %c0_216] : memref<10x64xf32, #tpu.memory_space<vmem>>, vector<6x64xf32>
    %c3_217 = arith.constant 3 : index
    %c0_218 = arith.constant 0 : index
    %260 = vector.load %arg26[%c3_217, %c0_218] : memref<10x64xf32, #tpu.memory_space<vmem>>, vector<6x64xf32>
    %c4_219 = arith.constant 4 : index
    %c0_220 = arith.constant 0 : index
    %261 = vector.load %arg26[%c4_219, %c0_220] : memref<10x64xf32, #tpu.memory_space<vmem>>, vector<6x64xf32>
    %262 = tpu.concatenate %258, %259, %260, %261 in 1 : vector<6x64xf32>, vector<6x64xf32>, vector<6x64xf32>, vector<6x64xf32> -> vector<6x256xf32>
    %c0_221 = arith.constant 0 : index
    %c0_222 = arith.constant 0 : index
    %263 = vector.load %arg9[%c0_221, %c0_222] : memref<256x128xf32, #tpu.memory_space<vmem>>, vector<256x128xf32>
    %cst_223 = arith.constant dense<0.000000e+00> : vector<6x128xf32>
    %264 = tpu.matmul %262, %263, %cst_223 {dimension_numbers = #tpu.dot_dimension_numbers<[1], [0], [0], [1], [0, 0, 1, 1], [], []>} : vector<6x256xf32>, vector<256x128xf32>, vector<6x128xf32> -> vector<6x128xf32>
    %c0_224 = arith.constant 0 : index
    %c0_225 = arith.constant 0 : index
    %265 = vector.load %arg10[%c0_224, %c0_225] : memref<1x128xf32, #tpu.memory_space<vmem>>, vector<1x128xf32>
    %266 = vector.broadcast %265 : vector<1x128xf32> to vector<6x128xf32>
    %267 = arith.addf %264, %266 : vector<6x128xf32>
    %cst_226 = arith.constant 0.000000e+00 : f32
    %268 = vector.broadcast %cst_226 : f32 to vector<6x128xf32>
    %269 = arith.maximumf %267, %268 : vector<6x128xf32>
    %270 = vector.extract_strided_slice %269 {offsets = [0, 0], sizes = [6, 32], strides = [1, 1]} : vector<6x128xf32> to vector<6x32xf32>
    %271 = vector.extract_strided_slice %269 {offsets = [0, 32], sizes = [6, 32], strides = [1, 1]} : vector<6x128xf32> to vector<6x32xf32>
    %272 = vector.extract_strided_slice %269 {offsets = [0, 64], sizes = [6, 32], strides = [1, 1]} : vector<6x128xf32> to vector<6x32xf32>
    %273 = vector.extract_strided_slice %269 {offsets = [0, 96], sizes = [6, 32], strides = [1, 1]} : vector<6x128xf32> to vector<6x32xf32>
    %274 = vector.extract_strided_slice %270 {offsets = [0, 0], sizes = [2, 32], strides = [1, 1]} : vector<6x32xf32> to vector<2x32xf32>
    %c0_227 = arith.constant 0 : index
    %c0_228 = arith.constant 0 : index
    %275 = tpu.strided_load %arg25[%c0_227, %c0_228] {strides = array<i32: 2, 1>} : memref<24x32xf32, #tpu.memory_space<vmem>>, vector<2x32xf32>
    %276 = arith.addf %274, %275 : vector<2x32xf32>
    %c0_229 = arith.constant 0 : index
    %c0_230 = arith.constant 0 : index
    %277 = tpu.strided_load %arg27[%c0_229, %c0_230] {strides = array<i32: 2, 1>} : memref<26x32xf32, #tpu.memory_space<vmem>>, vector<2x32xf32>
    tpu.strided_store %arg27[%c0_229, %c0_230], %276 {strides = array<i32: 2, 1>} : memref<26x32xf32, #tpu.memory_space<vmem>>, vector<2x32xf32>
    %278 = vector.extract_strided_slice %271 {offsets = [0, 0], sizes = [2, 32], strides = [1, 1]} : vector<6x32xf32> to vector<2x32xf32>
    %c1_231 = arith.constant 1 : index
    %c0_232 = arith.constant 0 : index
    %279 = tpu.strided_load %arg25[%c1_231, %c0_232] {strides = array<i32: 2, 1>} : memref<24x32xf32, #tpu.memory_space<vmem>>, vector<2x32xf32>
    %280 = arith.addf %278, %279 : vector<2x32xf32>
    %c1_233 = arith.constant 1 : index
    %c0_234 = arith.constant 0 : index
    %281 = tpu.strided_load %arg27[%c1_233, %c0_234] {strides = array<i32: 2, 1>} : memref<26x32xf32, #tpu.memory_space<vmem>>, vector<2x32xf32>
    tpu.strided_store %arg27[%c1_233, %c0_234], %280 {strides = array<i32: 2, 1>} : memref<26x32xf32, #tpu.memory_space<vmem>>, vector<2x32xf32>
    %282 = vector.extract_strided_slice %272 {offsets = [0, 0], sizes = [2, 32], strides = [1, 1]} : vector<6x32xf32> to vector<2x32xf32>
    %c6_235 = arith.constant 6 : index
    %c0_236 = arith.constant 0 : index
    %283 = tpu.strided_load %arg25[%c6_235, %c0_236] {strides = array<i32: 2, 1>} : memref<24x32xf32, #tpu.memory_space<vmem>>, vector<2x32xf32>
    %284 = arith.addf %282, %283 : vector<2x32xf32>
    %c5_237 = arith.constant 5 : index
    %c0_238 = arith.constant 0 : index
    %285 = tpu.strided_load %arg27[%c5_237, %c0_238] {strides = array<i32: 2, 1>} : memref<26x32xf32, #tpu.memory_space<vmem>>, vector<2x32xf32>
    tpu.strided_store %arg27[%c5_237, %c0_238], %284 {strides = array<i32: 2, 1>} : memref<26x32xf32, #tpu.memory_space<vmem>>, vector<2x32xf32>
    %286 = vector.extract_strided_slice %273 {offsets = [0, 0], sizes = [2, 32], strides = [1, 1]} : vector<6x32xf32> to vector<2x32xf32>
    %c7_239 = arith.constant 7 : index
    %c0_240 = arith.constant 0 : index
    %287 = tpu.strided_load %arg25[%c7_239, %c0_240] {strides = array<i32: 2, 1>} : memref<24x32xf32, #tpu.memory_space<vmem>>, vector<2x32xf32>
    %288 = arith.addf %286, %287 : vector<2x32xf32>
    %c6_241 = arith.constant 6 : index
    %c0_242 = arith.constant 0 : index
    %289 = tpu.strided_load %arg27[%c6_241, %c0_242] {strides = array<i32: 2, 1>} : memref<26x32xf32, #tpu.memory_space<vmem>>, vector<2x32xf32>
    tpu.strided_store %arg27[%c6_241, %c0_242], %288 {strides = array<i32: 2, 1>} : memref<26x32xf32, #tpu.memory_space<vmem>>, vector<2x32xf32>
    %290 = vector.extract_strided_slice %270 {offsets = [3, 0], sizes = [2, 32], strides = [1, 1]} : vector<6x32xf32> to vector<2x32xf32>
    %c12_243 = arith.constant 12 : index
    %c0_244 = arith.constant 0 : index
    %291 = tpu.strided_load %arg25[%c12_243, %c0_244] {strides = array<i32: 2, 1>} : memref<24x32xf32, #tpu.memory_space<vmem>>, vector<2x32xf32>
    %292 = arith.addf %290, %291 : vector<2x32xf32>
    %c10_245 = arith.constant 10 : index
    %c0_246 = arith.constant 0 : index
    %293 = tpu.strided_load %arg27[%c10_245, %c0_246] {strides = array<i32: 2, 1>} : memref<26x32xf32, #tpu.memory_space<vmem>>, vector<2x32xf32>
    tpu.strided_store %arg27[%c10_245, %c0_246], %292 {strides = array<i32: 2, 1>} : memref<26x32xf32, #tpu.memory_space<vmem>>, vector<2x32xf32>
    %294 = vector.extract_strided_slice %271 {offsets = [3, 0], sizes = [2, 32], strides = [1, 1]} : vector<6x32xf32> to vector<2x32xf32>
    %c13_247 = arith.constant 13 : index
    %c0_248 = arith.constant 0 : index
    %295 = tpu.strided_load %arg25[%c13_247, %c0_248] {strides = array<i32: 2, 1>} : memref<24x32xf32, #tpu.memory_space<vmem>>, vector<2x32xf32>
    %296 = arith.addf %294, %295 : vector<2x32xf32>
    %c11_249 = arith.constant 11 : index
    %c0_250 = arith.constant 0 : index
    %297 = tpu.strided_load %arg27[%c11_249, %c0_250] {strides = array<i32: 2, 1>} : memref<26x32xf32, #tpu.memory_space<vmem>>, vector<2x32xf32>
    tpu.strided_store %arg27[%c11_249, %c0_250], %296 {strides = array<i32: 2, 1>} : memref<26x32xf32, #tpu.memory_space<vmem>>, vector<2x32xf32>
    %298 = vector.extract_strided_slice %272 {offsets = [3, 0], sizes = [2, 32], strides = [1, 1]} : vector<6x32xf32> to vector<2x32xf32>
    %c18_251 = arith.constant 18 : index
    %c0_252 = arith.constant 0 : index
    %299 = tpu.strided_load %arg25[%c18_251, %c0_252] {strides = array<i32: 2, 1>} : memref<24x32xf32, #tpu.memory_space<vmem>>, vector<2x32xf32>
    %300 = arith.addf %298, %299 : vector<2x32xf32>
    %c15 = arith.constant 15 : index
    %c0_253 = arith.constant 0 : index
    %301 = tpu.strided_load %arg27[%c15, %c0_253] {strides = array<i32: 2, 1>} : memref<26x32xf32, #tpu.memory_space<vmem>>, vector<2x32xf32>
    tpu.strided_store %arg27[%c15, %c0_253], %300 {strides = array<i32: 2, 1>} : memref<26x32xf32, #tpu.memory_space<vmem>>, vector<2x32xf32>
    %302 = vector.extract_strided_slice %273 {offsets = [3, 0], sizes = [2, 32], strides = [1, 1]} : vector<6x32xf32> to vector<2x32xf32>
    %c19_254 = arith.constant 19 : index
    %c0_255 = arith.constant 0 : index
    %303 = tpu.strided_load %arg25[%c19_254, %c0_255] {strides = array<i32: 2, 1>} : memref<24x32xf32, #tpu.memory_space<vmem>>, vector<2x32xf32>
    %304 = arith.addf %302, %303 : vector<2x32xf32>
    %c16 = arith.constant 16 : index
    %c0_256 = arith.constant 0 : index
    %305 = tpu.strided_load %arg27[%c16, %c0_256] {strides = array<i32: 2, 1>} : memref<26x32xf32, #tpu.memory_space<vmem>>, vector<2x32xf32>
    tpu.strided_store %arg27[%c16, %c0_256], %304 {strides = array<i32: 2, 1>} : memref<26x32xf32, #tpu.memory_space<vmem>>, vector<2x32xf32>
    %c0_257 = arith.constant 0 : index
    %c0_258 = arith.constant 0 : index
    %306 = vector.load %arg27[%c0_257, %c0_258] : memref<26x32xf32, #tpu.memory_space<vmem>>, vector<20x32xf32>
    %c1_259 = arith.constant 1 : index
    %c0_260 = arith.constant 0 : index
    %307 = vector.load %arg27[%c1_259, %c0_260] : memref<26x32xf32, #tpu.memory_space<vmem>>, vector<20x32xf32>
    %c5_261 = arith.constant 5 : index
    %c0_262 = arith.constant 0 : index
    %308 = vector.load %arg27[%c5_261, %c0_262] : memref<26x32xf32, #tpu.memory_space<vmem>>, vector<20x32xf32>
    %c6_263 = arith.constant 6 : index
    %c0_264 = arith.constant 0 : index
    %309 = vector.load %arg27[%c6_263, %c0_264] : memref<26x32xf32, #tpu.memory_space<vmem>>, vector<20x32xf32>
    %310 = tpu.concatenate %306, %307, %308, %309 in 1 : vector<20x32xf32>, vector<20x32xf32>, vector<20x32xf32>, vector<20x32xf32> -> vector<20x128xf32>
    %c0_265 = arith.constant 0 : index
    %c0_266 = arith.constant 0 : index
    %311 = vector.load %arg11[%c0_265, %c0_266] : memref<128x64xf32, #tpu.memory_space<vmem>>, vector<128x64xf32>
    %cst_267 = arith.constant dense<0.000000e+00> : vector<20x64xf32>
    %312 = tpu.matmul %310, %311, %cst_267 {dimension_numbers = #tpu.dot_dimension_numbers<[1], [0], [0], [1], [0, 0, 1, 1], [], []>} : vector<20x128xf32>, vector<128x64xf32>, vector<20x64xf32> -> vector<20x64xf32>
    %c0_268 = arith.constant 0 : index
    %c0_269 = arith.constant 0 : index
    %313 = vector.load %arg12[%c0_268, %c0_269] : memref<1x64xf32, #tpu.memory_space<vmem>>, vector<1x64xf32>
    %314 = vector.broadcast %313 : vector<1x64xf32> to vector<20x64xf32>
    %315 = arith.addf %312, %314 : vector<20x64xf32>
    %cst_270 = arith.constant 0.000000e+00 : f32
    %316 = vector.broadcast %cst_270 : f32 to vector<20x64xf32>
    %317 = arith.maximumf %315, %316 : vector<20x64xf32>
    %318 = vector.extract_strided_slice %317 {offsets = [0, 0], sizes = [20, 16], strides = [1, 1]} : vector<20x64xf32> to vector<20x16xf32>
    %319 = vector.extract_strided_slice %317 {offsets = [0, 16], sizes = [20, 16], strides = [1, 1]} : vector<20x64xf32> to vector<20x16xf32>
    %320 = vector.extract_strided_slice %317 {offsets = [0, 32], sizes = [20, 16], strides = [1, 1]} : vector<20x64xf32> to vector<20x16xf32>
    %321 = vector.extract_strided_slice %317 {offsets = [0, 48], sizes = [20, 16], strides = [1, 1]} : vector<20x64xf32> to vector<20x16xf32>
    %322 = vector.extract_strided_slice %318 {offsets = [0, 0], sizes = [4, 16], strides = [1, 1]} : vector<20x16xf32> to vector<4x16xf32>
    %c0_271 = arith.constant 0 : index
    %c0_272 = arith.constant 0 : index
    %323 = tpu.strided_load %arg24[%c0_271, %c0_272] {strides = array<i32: 2, 1>} : memref<80x16xf32, #tpu.memory_space<vmem>>, vector<4x16xf32>
    %324 = arith.addf %322, %323 : vector<4x16xf32>
    %c0_273 = arith.constant 0 : index
    %c0_274 = arith.constant 0 : index
    %325 = tpu.strided_load %arg28[%c0_273, %c0_274] {strides = array<i32: 2, 1>} : memref<82x16xf32, #tpu.memory_space<vmem>>, vector<4x16xf32>
    tpu.strided_store %arg28[%c0_273, %c0_274], %324 {strides = array<i32: 2, 1>} : memref<82x16xf32, #tpu.memory_space<vmem>>, vector<4x16xf32>
    %326 = vector.extract_strided_slice %319 {offsets = [0, 0], sizes = [4, 16], strides = [1, 1]} : vector<20x16xf32> to vector<4x16xf32>
    %c1_275 = arith.constant 1 : index
    %c0_276 = arith.constant 0 : index
    %327 = tpu.strided_load %arg24[%c1_275, %c0_276] {strides = array<i32: 2, 1>} : memref<80x16xf32, #tpu.memory_space<vmem>>, vector<4x16xf32>
    %328 = arith.addf %326, %327 : vector<4x16xf32>
    %c1_277 = arith.constant 1 : index
    %c0_278 = arith.constant 0 : index
    %329 = tpu.strided_load %arg28[%c1_277, %c0_278] {strides = array<i32: 2, 1>} : memref<82x16xf32, #tpu.memory_space<vmem>>, vector<4x16xf32>
    tpu.strided_store %arg28[%c1_277, %c0_278], %328 {strides = array<i32: 2, 1>} : memref<82x16xf32, #tpu.memory_space<vmem>>, vector<4x16xf32>
    %330 = vector.extract_strided_slice %320 {offsets = [0, 0], sizes = [4, 16], strides = [1, 1]} : vector<20x16xf32> to vector<4x16xf32>
    %c10_279 = arith.constant 10 : index
    %c0_280 = arith.constant 0 : index
    %331 = tpu.strided_load %arg24[%c10_279, %c0_280] {strides = array<i32: 2, 1>} : memref<80x16xf32, #tpu.memory_space<vmem>>, vector<4x16xf32>
    %332 = arith.addf %330, %331 : vector<4x16xf32>
    %c9_281 = arith.constant 9 : index
    %c0_282 = arith.constant 0 : index
    %333 = tpu.strided_load %arg28[%c9_281, %c0_282] {strides = array<i32: 2, 1>} : memref<82x16xf32, #tpu.memory_space<vmem>>, vector<4x16xf32>
    tpu.strided_store %arg28[%c9_281, %c0_282], %332 {strides = array<i32: 2, 1>} : memref<82x16xf32, #tpu.memory_space<vmem>>, vector<4x16xf32>
    %334 = vector.extract_strided_slice %321 {offsets = [0, 0], sizes = [4, 16], strides = [1, 1]} : vector<20x16xf32> to vector<4x16xf32>
    %c11_283 = arith.constant 11 : index
    %c0_284 = arith.constant 0 : index
    %335 = tpu.strided_load %arg24[%c11_283, %c0_284] {strides = array<i32: 2, 1>} : memref<80x16xf32, #tpu.memory_space<vmem>>, vector<4x16xf32>
    %336 = arith.addf %334, %335 : vector<4x16xf32>
    %c10_285 = arith.constant 10 : index
    %c0_286 = arith.constant 0 : index
    %337 = tpu.strided_load %arg28[%c10_285, %c0_286] {strides = array<i32: 2, 1>} : memref<82x16xf32, #tpu.memory_space<vmem>>, vector<4x16xf32>
    tpu.strided_store %arg28[%c10_285, %c0_286], %336 {strides = array<i32: 2, 1>} : memref<82x16xf32, #tpu.memory_space<vmem>>, vector<4x16xf32>
    %338 = vector.extract_strided_slice %318 {offsets = [5, 0], sizes = [4, 16], strides = [1, 1]} : vector<20x16xf32> to vector<4x16xf32>
    %c20_287 = arith.constant 20 : index
    %c0_288 = arith.constant 0 : index
    %339 = tpu.strided_load %arg24[%c20_287, %c0_288] {strides = array<i32: 2, 1>} : memref<80x16xf32, #tpu.memory_space<vmem>>, vector<4x16xf32>
    %340 = arith.addf %338, %339 : vector<4x16xf32>
    %c18_289 = arith.constant 18 : index
    %c0_290 = arith.constant 0 : index
    %341 = tpu.strided_load %arg28[%c18_289, %c0_290] {strides = array<i32: 2, 1>} : memref<82x16xf32, #tpu.memory_space<vmem>>, vector<4x16xf32>
    tpu.strided_store %arg28[%c18_289, %c0_290], %340 {strides = array<i32: 2, 1>} : memref<82x16xf32, #tpu.memory_space<vmem>>, vector<4x16xf32>
    %342 = vector.extract_strided_slice %319 {offsets = [5, 0], sizes = [4, 16], strides = [1, 1]} : vector<20x16xf32> to vector<4x16xf32>
    %c21_291 = arith.constant 21 : index
    %c0_292 = arith.constant 0 : index
    %343 = tpu.strided_load %arg24[%c21_291, %c0_292] {strides = array<i32: 2, 1>} : memref<80x16xf32, #tpu.memory_space<vmem>>, vector<4x16xf32>
    %344 = arith.addf %342, %343 : vector<4x16xf32>
    %c19_293 = arith.constant 19 : index
    %c0_294 = arith.constant 0 : index
    %345 = tpu.strided_load %arg28[%c19_293, %c0_294] {strides = array<i32: 2, 1>} : memref<82x16xf32, #tpu.memory_space<vmem>>, vector<4x16xf32>
    tpu.strided_store %arg28[%c19_293, %c0_294], %344 {strides = array<i32: 2, 1>} : memref<82x16xf32, #tpu.memory_space<vmem>>, vector<4x16xf32>
    %346 = vector.extract_strided_slice %320 {offsets = [5, 0], sizes = [4, 16], strides = [1, 1]} : vector<20x16xf32> to vector<4x16xf32>
    %c30_295 = arith.constant 30 : index
    %c0_296 = arith.constant 0 : index
    %347 = tpu.strided_load %arg24[%c30_295, %c0_296] {strides = array<i32: 2, 1>} : memref<80x16xf32, #tpu.memory_space<vmem>>, vector<4x16xf32>
    %348 = arith.addf %346, %347 : vector<4x16xf32>
    %c27 = arith.constant 27 : index
    %c0_297 = arith.constant 0 : index
    %349 = tpu.strided_load %arg28[%c27, %c0_297] {strides = array<i32: 2, 1>} : memref<82x16xf32, #tpu.memory_space<vmem>>, vector<4x16xf32>
    tpu.strided_store %arg28[%c27, %c0_297], %348 {strides = array<i32: 2, 1>} : memref<82x16xf32, #tpu.memory_space<vmem>>, vector<4x16xf32>
    %350 = vector.extract_strided_slice %321 {offsets = [5, 0], sizes = [4, 16], strides = [1, 1]} : vector<20x16xf32> to vector<4x16xf32>
    %c31_298 = arith.constant 31 : index
    %c0_299 = arith.constant 0 : index
    %351 = tpu.strided_load %arg24[%c31_298, %c0_299] {strides = array<i32: 2, 1>} : memref<80x16xf32, #tpu.memory_space<vmem>>, vector<4x16xf32>
    %352 = arith.addf %350, %351 : vector<4x16xf32>
    %c28 = arith.constant 28 : index
    %c0_300 = arith.constant 0 : index
    %353 = tpu.strided_load %arg28[%c28, %c0_300] {strides = array<i32: 2, 1>} : memref<82x16xf32, #tpu.memory_space<vmem>>, vector<4x16xf32>
    tpu.strided_store %arg28[%c28, %c0_300], %352 {strides = array<i32: 2, 1>} : memref<82x16xf32, #tpu.memory_space<vmem>>, vector<4x16xf32>
    %354 = vector.extract_strided_slice %318 {offsets = [10, 0], sizes = [4, 16], strides = [1, 1]} : vector<20x16xf32> to vector<4x16xf32>
    %c40_301 = arith.constant 40 : index
    %c0_302 = arith.constant 0 : index
    %355 = tpu.strided_load %arg24[%c40_301, %c0_302] {strides = array<i32: 2, 1>} : memref<80x16xf32, #tpu.memory_space<vmem>>, vector<4x16xf32>
    %356 = arith.addf %354, %355 : vector<4x16xf32>
    %c36_303 = arith.constant 36 : index
    %c0_304 = arith.constant 0 : index
    %357 = tpu.strided_load %arg28[%c36_303, %c0_304] {strides = array<i32: 2, 1>} : memref<82x16xf32, #tpu.memory_space<vmem>>, vector<4x16xf32>
    tpu.strided_store %arg28[%c36_303, %c0_304], %356 {strides = array<i32: 2, 1>} : memref<82x16xf32, #tpu.memory_space<vmem>>, vector<4x16xf32>
    %358 = vector.extract_strided_slice %319 {offsets = [10, 0], sizes = [4, 16], strides = [1, 1]} : vector<20x16xf32> to vector<4x16xf32>
    %c41_305 = arith.constant 41 : index
    %c0_306 = arith.constant 0 : index
    %359 = tpu.strided_load %arg24[%c41_305, %c0_306] {strides = array<i32: 2, 1>} : memref<80x16xf32, #tpu.memory_space<vmem>>, vector<4x16xf32>
    %360 = arith.addf %358, %359 : vector<4x16xf32>
    %c37_307 = arith.constant 37 : index
    %c0_308 = arith.constant 0 : index
    %361 = tpu.strided_load %arg28[%c37_307, %c0_308] {strides = array<i32: 2, 1>} : memref<82x16xf32, #tpu.memory_space<vmem>>, vector<4x16xf32>
    tpu.strided_store %arg28[%c37_307, %c0_308], %360 {strides = array<i32: 2, 1>} : memref<82x16xf32, #tpu.memory_space<vmem>>, vector<4x16xf32>
    %362 = vector.extract_strided_slice %320 {offsets = [10, 0], sizes = [4, 16], strides = [1, 1]} : vector<20x16xf32> to vector<4x16xf32>
    %c50_309 = arith.constant 50 : index
    %c0_310 = arith.constant 0 : index
    %363 = tpu.strided_load %arg24[%c50_309, %c0_310] {strides = array<i32: 2, 1>} : memref<80x16xf32, #tpu.memory_space<vmem>>, vector<4x16xf32>
    %364 = arith.addf %362, %363 : vector<4x16xf32>
    %c45 = arith.constant 45 : index
    %c0_311 = arith.constant 0 : index
    %365 = tpu.strided_load %arg28[%c45, %c0_311] {strides = array<i32: 2, 1>} : memref<82x16xf32, #tpu.memory_space<vmem>>, vector<4x16xf32>
    tpu.strided_store %arg28[%c45, %c0_311], %364 {strides = array<i32: 2, 1>} : memref<82x16xf32, #tpu.memory_space<vmem>>, vector<4x16xf32>
    %366 = vector.extract_strided_slice %321 {offsets = [10, 0], sizes = [4, 16], strides = [1, 1]} : vector<20x16xf32> to vector<4x16xf32>
    %c51_312 = arith.constant 51 : index
    %c0_313 = arith.constant 0 : index
    %367 = tpu.strided_load %arg24[%c51_312, %c0_313] {strides = array<i32: 2, 1>} : memref<80x16xf32, #tpu.memory_space<vmem>>, vector<4x16xf32>
    %368 = arith.addf %366, %367 : vector<4x16xf32>
    %c46 = arith.constant 46 : index
    %c0_314 = arith.constant 0 : index
    %369 = tpu.strided_load %arg28[%c46, %c0_314] {strides = array<i32: 2, 1>} : memref<82x16xf32, #tpu.memory_space<vmem>>, vector<4x16xf32>
    tpu.strided_store %arg28[%c46, %c0_314], %368 {strides = array<i32: 2, 1>} : memref<82x16xf32, #tpu.memory_space<vmem>>, vector<4x16xf32>
    %370 = vector.extract_strided_slice %318 {offsets = [15, 0], sizes = [4, 16], strides = [1, 1]} : vector<20x16xf32> to vector<4x16xf32>
    %c60_315 = arith.constant 60 : index
    %c0_316 = arith.constant 0 : index
    %371 = tpu.strided_load %arg24[%c60_315, %c0_316] {strides = array<i32: 2, 1>} : memref<80x16xf32, #tpu.memory_space<vmem>>, vector<4x16xf32>
    %372 = arith.addf %370, %371 : vector<4x16xf32>
    %c54_317 = arith.constant 54 : index
    %c0_318 = arith.constant 0 : index
    %373 = tpu.strided_load %arg28[%c54_317, %c0_318] {strides = array<i32: 2, 1>} : memref<82x16xf32, #tpu.memory_space<vmem>>, vector<4x16xf32>
    tpu.strided_store %arg28[%c54_317, %c0_318], %372 {strides = array<i32: 2, 1>} : memref<82x16xf32, #tpu.memory_space<vmem>>, vector<4x16xf32>
    %374 = vector.extract_strided_slice %319 {offsets = [15, 0], sizes = [4, 16], strides = [1, 1]} : vector<20x16xf32> to vector<4x16xf32>
    %c61_319 = arith.constant 61 : index
    %c0_320 = arith.constant 0 : index
    %375 = tpu.strided_load %arg24[%c61_319, %c0_320] {strides = array<i32: 2, 1>} : memref<80x16xf32, #tpu.memory_space<vmem>>, vector<4x16xf32>
    %376 = arith.addf %374, %375 : vector<4x16xf32>
    %c55_321 = arith.constant 55 : index
    %c0_322 = arith.constant 0 : index
    %377 = tpu.strided_load %arg28[%c55_321, %c0_322] {strides = array<i32: 2, 1>} : memref<82x16xf32, #tpu.memory_space<vmem>>, vector<4x16xf32>
    tpu.strided_store %arg28[%c55_321, %c0_322], %376 {strides = array<i32: 2, 1>} : memref<82x16xf32, #tpu.memory_space<vmem>>, vector<4x16xf32>
    %378 = vector.extract_strided_slice %320 {offsets = [15, 0], sizes = [4, 16], strides = [1, 1]} : vector<20x16xf32> to vector<4x16xf32>
    %c70_323 = arith.constant 70 : index
    %c0_324 = arith.constant 0 : index
    %379 = tpu.strided_load %arg24[%c70_323, %c0_324] {strides = array<i32: 2, 1>} : memref<80x16xf32, #tpu.memory_space<vmem>>, vector<4x16xf32>
    %380 = arith.addf %378, %379 : vector<4x16xf32>
    %c63 = arith.constant 63 : index
    %c0_325 = arith.constant 0 : index
    %381 = tpu.strided_load %arg28[%c63, %c0_325] {strides = array<i32: 2, 1>} : memref<82x16xf32, #tpu.memory_space<vmem>>, vector<4x16xf32>
    tpu.strided_store %arg28[%c63, %c0_325], %380 {strides = array<i32: 2, 1>} : memref<82x16xf32, #tpu.memory_space<vmem>>, vector<4x16xf32>
    %382 = vector.extract_strided_slice %321 {offsets = [15, 0], sizes = [4, 16], strides = [1, 1]} : vector<20x16xf32> to vector<4x16xf32>
    %c71_326 = arith.constant 71 : index
    %c0_327 = arith.constant 0 : index
    %383 = tpu.strided_load %arg24[%c71_326, %c0_327] {strides = array<i32: 2, 1>} : memref<80x16xf32, #tpu.memory_space<vmem>>, vector<4x16xf32>
    %384 = arith.addf %382, %383 : vector<4x16xf32>
    %c64 = arith.constant 64 : index
    %c0_328 = arith.constant 0 : index
    %385 = tpu.strided_load %arg28[%c64, %c0_328] {strides = array<i32: 2, 1>} : memref<82x16xf32, #tpu.memory_space<vmem>>, vector<4x16xf32>
    tpu.strided_store %arg28[%c64, %c0_328], %384 {strides = array<i32: 2, 1>} : memref<82x16xf32, #tpu.memory_space<vmem>>, vector<4x16xf32>
    %c0_329 = arith.constant 0 : index
    %c0_330 = arith.constant 0 : index
    %386 = vector.load %arg28[%c0_329, %c0_330] : memref<82x16xf32, #tpu.memory_space<vmem>>, vector<72x16xf32>
    %c1_331 = arith.constant 1 : index
    %c0_332 = arith.constant 0 : index
    %387 = vector.load %arg28[%c1_331, %c0_332] : memref<82x16xf32, #tpu.memory_space<vmem>>, vector<72x16xf32>
    %c9_333 = arith.constant 9 : index
    %c0_334 = arith.constant 0 : index
    %388 = vector.load %arg28[%c9_333, %c0_334] : memref<82x16xf32, #tpu.memory_space<vmem>>, vector<72x16xf32>
    %c10_335 = arith.constant 10 : index
    %c0_336 = arith.constant 0 : index
    %389 = vector.load %arg28[%c10_335, %c0_336] : memref<82x16xf32, #tpu.memory_space<vmem>>, vector<72x16xf32>
    %390 = tpu.concatenate %386, %387, %388, %389 in 1 : vector<72x16xf32>, vector<72x16xf32>, vector<72x16xf32>, vector<72x16xf32> -> vector<72x64xf32>
    %c0_337 = arith.constant 0 : index
    %c0_338 = arith.constant 0 : index
    %391 = vector.load %arg13[%c0_337, %c0_338] : memref<64x32xf32, #tpu.memory_space<vmem>>, vector<64x32xf32>
    %cst_339 = arith.constant dense<0.000000e+00> : vector<72x32xf32>
    %392 = tpu.matmul %390, %391, %cst_339 {dimension_numbers = #tpu.dot_dimension_numbers<[1], [0], [0], [1], [0, 0, 1, 1], [], []>} : vector<72x64xf32>, vector<64x32xf32>, vector<72x32xf32> -> vector<72x32xf32>
    %c0_340 = arith.constant 0 : index
    %c0_341 = arith.constant 0 : index
    %393 = vector.load %arg14[%c0_340, %c0_341] : memref<1x32xf32, #tpu.memory_space<vmem>>, vector<1x32xf32>
    %394 = vector.broadcast %393 : vector<1x32xf32> to vector<72x32xf32>
    %395 = arith.addf %392, %394 : vector<72x32xf32>
    %cst_342 = arith.constant 0.000000e+00 : f32
    %396 = vector.broadcast %cst_342 : f32 to vector<72x32xf32>
    %397 = arith.maximumf %395, %396 : vector<72x32xf32>
    %398 = vector.extract_strided_slice %397 {offsets = [0, 0], sizes = [72, 8], strides = [1, 1]} : vector<72x32xf32> to vector<72x8xf32>
    %399 = vector.extract_strided_slice %397 {offsets = [0, 8], sizes = [72, 8], strides = [1, 1]} : vector<72x32xf32> to vector<72x8xf32>
    %400 = vector.extract_strided_slice %397 {offsets = [0, 16], sizes = [72, 8], strides = [1, 1]} : vector<72x32xf32> to vector<72x8xf32>
    %401 = vector.extract_strided_slice %397 {offsets = [0, 24], sizes = [72, 8], strides = [1, 1]} : vector<72x32xf32> to vector<72x8xf32>
    %402 = vector.extract_strided_slice %398 {offsets = [0, 0], sizes = [8, 8], strides = [1, 1]} : vector<72x8xf32> to vector<8x8xf32>
    %c0_343 = arith.constant 0 : index
    %c0_344 = arith.constant 0 : index
    %403 = tpu.strided_load %arg29[%c0_343, %c0_344] {strides = array<i32: 2, 1>} : memref<256x8xf32, #tpu.memory_space<vmem>>, vector<8x8xf32>
    tpu.strided_store %arg29[%c0_343, %c0_344], %402 {strides = array<i32: 2, 1>} : memref<256x8xf32, #tpu.memory_space<vmem>>, vector<8x8xf32>
    %404 = vector.extract_strided_slice %399 {offsets = [0, 0], sizes = [8, 8], strides = [1, 1]} : vector<72x8xf32> to vector<8x8xf32>
    %c1_345 = arith.constant 1 : index
    %c0_346 = arith.constant 0 : index
    %405 = tpu.strided_load %arg29[%c1_345, %c0_346] {strides = array<i32: 2, 1>} : memref<256x8xf32, #tpu.memory_space<vmem>>, vector<8x8xf32>
    tpu.strided_store %arg29[%c1_345, %c0_346], %404 {strides = array<i32: 2, 1>} : memref<256x8xf32, #tpu.memory_space<vmem>>, vector<8x8xf32>
    %406 = vector.extract_strided_slice %400 {offsets = [0, 0], sizes = [8, 8], strides = [1, 1]} : vector<72x8xf32> to vector<8x8xf32>
    %c16_347 = arith.constant 16 : index
    %c0_348 = arith.constant 0 : index
    %407 = tpu.strided_load %arg29[%c16_347, %c0_348] {strides = array<i32: 2, 1>} : memref<256x8xf32, #tpu.memory_space<vmem>>, vector<8x8xf32>
    tpu.strided_store %arg29[%c16_347, %c0_348], %406 {strides = array<i32: 2, 1>} : memref<256x8xf32, #tpu.memory_space<vmem>>, vector<8x8xf32>
    %408 = vector.extract_strided_slice %401 {offsets = [0, 0], sizes = [8, 8], strides = [1, 1]} : vector<72x8xf32> to vector<8x8xf32>
    %c17 = arith.constant 17 : index
    %c0_349 = arith.constant 0 : index
    %409 = tpu.strided_load %arg29[%c17, %c0_349] {strides = array<i32: 2, 1>} : memref<256x8xf32, #tpu.memory_space<vmem>>, vector<8x8xf32>
    tpu.strided_store %arg29[%c17, %c0_349], %408 {strides = array<i32: 2, 1>} : memref<256x8xf32, #tpu.memory_space<vmem>>, vector<8x8xf32>
    %410 = vector.extract_strided_slice %398 {offsets = [9, 0], sizes = [8, 8], strides = [1, 1]} : vector<72x8xf32> to vector<8x8xf32>
    %c32 = arith.constant 32 : index
    %c0_350 = arith.constant 0 : index
    %411 = tpu.strided_load %arg29[%c32, %c0_350] {strides = array<i32: 2, 1>} : memref<256x8xf32, #tpu.memory_space<vmem>>, vector<8x8xf32>
    tpu.strided_store %arg29[%c32, %c0_350], %410 {strides = array<i32: 2, 1>} : memref<256x8xf32, #tpu.memory_space<vmem>>, vector<8x8xf32>
    %412 = vector.extract_strided_slice %399 {offsets = [9, 0], sizes = [8, 8], strides = [1, 1]} : vector<72x8xf32> to vector<8x8xf32>
    %c33 = arith.constant 33 : index
    %c0_351 = arith.constant 0 : index
    %413 = tpu.strided_load %arg29[%c33, %c0_351] {strides = array<i32: 2, 1>} : memref<256x8xf32, #tpu.memory_space<vmem>>, vector<8x8xf32>
    tpu.strided_store %arg29[%c33, %c0_351], %412 {strides = array<i32: 2, 1>} : memref<256x8xf32, #tpu.memory_space<vmem>>, vector<8x8xf32>
    %414 = vector.extract_strided_slice %400 {offsets = [9, 0], sizes = [8, 8], strides = [1, 1]} : vector<72x8xf32> to vector<8x8xf32>
    %c48 = arith.constant 48 : index
    %c0_352 = arith.constant 0 : index
    %415 = tpu.strided_load %arg29[%c48, %c0_352] {strides = array<i32: 2, 1>} : memref<256x8xf32, #tpu.memory_space<vmem>>, vector<8x8xf32>
    tpu.strided_store %arg29[%c48, %c0_352], %414 {strides = array<i32: 2, 1>} : memref<256x8xf32, #tpu.memory_space<vmem>>, vector<8x8xf32>
    %416 = vector.extract_strided_slice %401 {offsets = [9, 0], sizes = [8, 8], strides = [1, 1]} : vector<72x8xf32> to vector<8x8xf32>
    %c49 = arith.constant 49 : index
    %c0_353 = arith.constant 0 : index
    %417 = tpu.strided_load %arg29[%c49, %c0_353] {strides = array<i32: 2, 1>} : memref<256x8xf32, #tpu.memory_space<vmem>>, vector<8x8xf32>
    tpu.strided_store %arg29[%c49, %c0_353], %416 {strides = array<i32: 2, 1>} : memref<256x8xf32, #tpu.memory_space<vmem>>, vector<8x8xf32>
    %418 = vector.extract_strided_slice %398 {offsets = [18, 0], sizes = [8, 8], strides = [1, 1]} : vector<72x8xf32> to vector<8x8xf32>
    %c64_354 = arith.constant 64 : index
    %c0_355 = arith.constant 0 : index
    %419 = tpu.strided_load %arg29[%c64_354, %c0_355] {strides = array<i32: 2, 1>} : memref<256x8xf32, #tpu.memory_space<vmem>>, vector<8x8xf32>
    tpu.strided_store %arg29[%c64_354, %c0_355], %418 {strides = array<i32: 2, 1>} : memref<256x8xf32, #tpu.memory_space<vmem>>, vector<8x8xf32>
    %420 = vector.extract_strided_slice %399 {offsets = [18, 0], sizes = [8, 8], strides = [1, 1]} : vector<72x8xf32> to vector<8x8xf32>
    %c65 = arith.constant 65 : index
    %c0_356 = arith.constant 0 : index
    %421 = tpu.strided_load %arg29[%c65, %c0_356] {strides = array<i32: 2, 1>} : memref<256x8xf32, #tpu.memory_space<vmem>>, vector<8x8xf32>
    tpu.strided_store %arg29[%c65, %c0_356], %420 {strides = array<i32: 2, 1>} : memref<256x8xf32, #tpu.memory_space<vmem>>, vector<8x8xf32>
    %422 = vector.extract_strided_slice %400 {offsets = [18, 0], sizes = [8, 8], strides = [1, 1]} : vector<72x8xf32> to vector<8x8xf32>
    %c80 = arith.constant 80 : index
    %c0_357 = arith.constant 0 : index
    %423 = tpu.strided_load %arg29[%c80, %c0_357] {strides = array<i32: 2, 1>} : memref<256x8xf32, #tpu.memory_space<vmem>>, vector<8x8xf32>
    tpu.strided_store %arg29[%c80, %c0_357], %422 {strides = array<i32: 2, 1>} : memref<256x8xf32, #tpu.memory_space<vmem>>, vector<8x8xf32>
    %424 = vector.extract_strided_slice %401 {offsets = [18, 0], sizes = [8, 8], strides = [1, 1]} : vector<72x8xf32> to vector<8x8xf32>
    %c81_358 = arith.constant 81 : index
    %c0_359 = arith.constant 0 : index
    %425 = tpu.strided_load %arg29[%c81_358, %c0_359] {strides = array<i32: 2, 1>} : memref<256x8xf32, #tpu.memory_space<vmem>>, vector<8x8xf32>
    tpu.strided_store %arg29[%c81_358, %c0_359], %424 {strides = array<i32: 2, 1>} : memref<256x8xf32, #tpu.memory_space<vmem>>, vector<8x8xf32>
    %426 = vector.extract_strided_slice %398 {offsets = [27, 0], sizes = [8, 8], strides = [1, 1]} : vector<72x8xf32> to vector<8x8xf32>
    %c96 = arith.constant 96 : index
    %c0_360 = arith.constant 0 : index
    %427 = tpu.strided_load %arg29[%c96, %c0_360] {strides = array<i32: 2, 1>} : memref<256x8xf32, #tpu.memory_space<vmem>>, vector<8x8xf32>
    tpu.strided_store %arg29[%c96, %c0_360], %426 {strides = array<i32: 2, 1>} : memref<256x8xf32, #tpu.memory_space<vmem>>, vector<8x8xf32>
    %428 = vector.extract_strided_slice %399 {offsets = [27, 0], sizes = [8, 8], strides = [1, 1]} : vector<72x8xf32> to vector<8x8xf32>
    %c97 = arith.constant 97 : index
    %c0_361 = arith.constant 0 : index
    %429 = tpu.strided_load %arg29[%c97, %c0_361] {strides = array<i32: 2, 1>} : memref<256x8xf32, #tpu.memory_space<vmem>>, vector<8x8xf32>
    tpu.strided_store %arg29[%c97, %c0_361], %428 {strides = array<i32: 2, 1>} : memref<256x8xf32, #tpu.memory_space<vmem>>, vector<8x8xf32>
    %430 = vector.extract_strided_slice %400 {offsets = [27, 0], sizes = [8, 8], strides = [1, 1]} : vector<72x8xf32> to vector<8x8xf32>
    %c112 = arith.constant 112 : index
    %c0_362 = arith.constant 0 : index
    %431 = tpu.strided_load %arg29[%c112, %c0_362] {strides = array<i32: 2, 1>} : memref<256x8xf32, #tpu.memory_space<vmem>>, vector<8x8xf32>
    tpu.strided_store %arg29[%c112, %c0_362], %430 {strides = array<i32: 2, 1>} : memref<256x8xf32, #tpu.memory_space<vmem>>, vector<8x8xf32>
    %432 = vector.extract_strided_slice %401 {offsets = [27, 0], sizes = [8, 8], strides = [1, 1]} : vector<72x8xf32> to vector<8x8xf32>
    %c113 = arith.constant 113 : index
    %c0_363 = arith.constant 0 : index
    %433 = tpu.strided_load %arg29[%c113, %c0_363] {strides = array<i32: 2, 1>} : memref<256x8xf32, #tpu.memory_space<vmem>>, vector<8x8xf32>
    tpu.strided_store %arg29[%c113, %c0_363], %432 {strides = array<i32: 2, 1>} : memref<256x8xf32, #tpu.memory_space<vmem>>, vector<8x8xf32>
    %434 = vector.extract_strided_slice %398 {offsets = [36, 0], sizes = [8, 8], strides = [1, 1]} : vector<72x8xf32> to vector<8x8xf32>
    %c128 = arith.constant 128 : index
    %c0_364 = arith.constant 0 : index
    %435 = tpu.strided_load %arg29[%c128, %c0_364] {strides = array<i32: 2, 1>} : memref<256x8xf32, #tpu.memory_space<vmem>>, vector<8x8xf32>
    tpu.strided_store %arg29[%c128, %c0_364], %434 {strides = array<i32: 2, 1>} : memref<256x8xf32, #tpu.memory_space<vmem>>, vector<8x8xf32>
    %436 = vector.extract_strided_slice %399 {offsets = [36, 0], sizes = [8, 8], strides = [1, 1]} : vector<72x8xf32> to vector<8x8xf32>
    %c129 = arith.constant 129 : index
    %c0_365 = arith.constant 0 : index
    %437 = tpu.strided_load %arg29[%c129, %c0_365] {strides = array<i32: 2, 1>} : memref<256x8xf32, #tpu.memory_space<vmem>>, vector<8x8xf32>
    tpu.strided_store %arg29[%c129, %c0_365], %436 {strides = array<i32: 2, 1>} : memref<256x8xf32, #tpu.memory_space<vmem>>, vector<8x8xf32>
    %438 = vector.extract_strided_slice %400 {offsets = [36, 0], sizes = [8, 8], strides = [1, 1]} : vector<72x8xf32> to vector<8x8xf32>
    %c144_366 = arith.constant 144 : index
    %c0_367 = arith.constant 0 : index
    %439 = tpu.strided_load %arg29[%c144_366, %c0_367] {strides = array<i32: 2, 1>} : memref<256x8xf32, #tpu.memory_space<vmem>>, vector<8x8xf32>
    tpu.strided_store %arg29[%c144_366, %c0_367], %438 {strides = array<i32: 2, 1>} : memref<256x8xf32, #tpu.memory_space<vmem>>, vector<8x8xf32>
    %440 = vector.extract_strided_slice %401 {offsets = [36, 0], sizes = [8, 8], strides = [1, 1]} : vector<72x8xf32> to vector<8x8xf32>
    %c145_368 = arith.constant 145 : index
    %c0_369 = arith.constant 0 : index
    %441 = tpu.strided_load %arg29[%c145_368, %c0_369] {strides = array<i32: 2, 1>} : memref<256x8xf32, #tpu.memory_space<vmem>>, vector<8x8xf32>
    tpu.strided_store %arg29[%c145_368, %c0_369], %440 {strides = array<i32: 2, 1>} : memref<256x8xf32, #tpu.memory_space<vmem>>, vector<8x8xf32>
    %442 = vector.extract_strided_slice %398 {offsets = [45, 0], sizes = [8, 8], strides = [1, 1]} : vector<72x8xf32> to vector<8x8xf32>
    %c160 = arith.constant 160 : index
    %c0_370 = arith.constant 0 : index
    %443 = tpu.strided_load %arg29[%c160, %c0_370] {strides = array<i32: 2, 1>} : memref<256x8xf32, #tpu.memory_space<vmem>>, vector<8x8xf32>
    tpu.strided_store %arg29[%c160, %c0_370], %442 {strides = array<i32: 2, 1>} : memref<256x8xf32, #tpu.memory_space<vmem>>, vector<8x8xf32>
    %444 = vector.extract_strided_slice %399 {offsets = [45, 0], sizes = [8, 8], strides = [1, 1]} : vector<72x8xf32> to vector<8x8xf32>
    %c161 = arith.constant 161 : index
    %c0_371 = arith.constant 0 : index
    %445 = tpu.strided_load %arg29[%c161, %c0_371] {strides = array<i32: 2, 1>} : memref<256x8xf32, #tpu.memory_space<vmem>>, vector<8x8xf32>
    tpu.strided_store %arg29[%c161, %c0_371], %444 {strides = array<i32: 2, 1>} : memref<256x8xf32, #tpu.memory_space<vmem>>, vector<8x8xf32>
    %446 = vector.extract_strided_slice %400 {offsets = [45, 0], sizes = [8, 8], strides = [1, 1]} : vector<72x8xf32> to vector<8x8xf32>
    %c176 = arith.constant 176 : index
    %c0_372 = arith.constant 0 : index
    %447 = tpu.strided_load %arg29[%c176, %c0_372] {strides = array<i32: 2, 1>} : memref<256x8xf32, #tpu.memory_space<vmem>>, vector<8x8xf32>
    tpu.strided_store %arg29[%c176, %c0_372], %446 {strides = array<i32: 2, 1>} : memref<256x8xf32, #tpu.memory_space<vmem>>, vector<8x8xf32>
    %448 = vector.extract_strided_slice %401 {offsets = [45, 0], sizes = [8, 8], strides = [1, 1]} : vector<72x8xf32> to vector<8x8xf32>
    %c177 = arith.constant 177 : index
    %c0_373 = arith.constant 0 : index
    %449 = tpu.strided_load %arg29[%c177, %c0_373] {strides = array<i32: 2, 1>} : memref<256x8xf32, #tpu.memory_space<vmem>>, vector<8x8xf32>
    tpu.strided_store %arg29[%c177, %c0_373], %448 {strides = array<i32: 2, 1>} : memref<256x8xf32, #tpu.memory_space<vmem>>, vector<8x8xf32>
    %450 = vector.extract_strided_slice %398 {offsets = [54, 0], sizes = [8, 8], strides = [1, 1]} : vector<72x8xf32> to vector<8x8xf32>
    %c192 = arith.constant 192 : index
    %c0_374 = arith.constant 0 : index
    %451 = tpu.strided_load %arg29[%c192, %c0_374] {strides = array<i32: 2, 1>} : memref<256x8xf32, #tpu.memory_space<vmem>>, vector<8x8xf32>
    tpu.strided_store %arg29[%c192, %c0_374], %450 {strides = array<i32: 2, 1>} : memref<256x8xf32, #tpu.memory_space<vmem>>, vector<8x8xf32>
    %452 = vector.extract_strided_slice %399 {offsets = [54, 0], sizes = [8, 8], strides = [1, 1]} : vector<72x8xf32> to vector<8x8xf32>
    %c193 = arith.constant 193 : index
    %c0_375 = arith.constant 0 : index
    %453 = tpu.strided_load %arg29[%c193, %c0_375] {strides = array<i32: 2, 1>} : memref<256x8xf32, #tpu.memory_space<vmem>>, vector<8x8xf32>
    tpu.strided_store %arg29[%c193, %c0_375], %452 {strides = array<i32: 2, 1>} : memref<256x8xf32, #tpu.memory_space<vmem>>, vector<8x8xf32>
    %454 = vector.extract_strided_slice %400 {offsets = [54, 0], sizes = [8, 8], strides = [1, 1]} : vector<72x8xf32> to vector<8x8xf32>
    %c208 = arith.constant 208 : index
    %c0_376 = arith.constant 0 : index
    %455 = tpu.strided_load %arg29[%c208, %c0_376] {strides = array<i32: 2, 1>} : memref<256x8xf32, #tpu.memory_space<vmem>>, vector<8x8xf32>
    tpu.strided_store %arg29[%c208, %c0_376], %454 {strides = array<i32: 2, 1>} : memref<256x8xf32, #tpu.memory_space<vmem>>, vector<8x8xf32>
    %456 = vector.extract_strided_slice %401 {offsets = [54, 0], sizes = [8, 8], strides = [1, 1]} : vector<72x8xf32> to vector<8x8xf32>
    %c209 = arith.constant 209 : index
    %c0_377 = arith.constant 0 : index
    %457 = tpu.strided_load %arg29[%c209, %c0_377] {strides = array<i32: 2, 1>} : memref<256x8xf32, #tpu.memory_space<vmem>>, vector<8x8xf32>
    tpu.strided_store %arg29[%c209, %c0_377], %456 {strides = array<i32: 2, 1>} : memref<256x8xf32, #tpu.memory_space<vmem>>, vector<8x8xf32>
    %458 = vector.extract_strided_slice %398 {offsets = [63, 0], sizes = [8, 8], strides = [1, 1]} : vector<72x8xf32> to vector<8x8xf32>
    %c224 = arith.constant 224 : index
    %c0_378 = arith.constant 0 : index
    %459 = tpu.strided_load %arg29[%c224, %c0_378] {strides = array<i32: 2, 1>} : memref<256x8xf32, #tpu.memory_space<vmem>>, vector<8x8xf32>
    tpu.strided_store %arg29[%c224, %c0_378], %458 {strides = array<i32: 2, 1>} : memref<256x8xf32, #tpu.memory_space<vmem>>, vector<8x8xf32>
    %460 = vector.extract_strided_slice %399 {offsets = [63, 0], sizes = [8, 8], strides = [1, 1]} : vector<72x8xf32> to vector<8x8xf32>
    %c225 = arith.constant 225 : index
    %c0_379 = arith.constant 0 : index
    %461 = tpu.strided_load %arg29[%c225, %c0_379] {strides = array<i32: 2, 1>} : memref<256x8xf32, #tpu.memory_space<vmem>>, vector<8x8xf32>
    tpu.strided_store %arg29[%c225, %c0_379], %460 {strides = array<i32: 2, 1>} : memref<256x8xf32, #tpu.memory_space<vmem>>, vector<8x8xf32>
    %462 = vector.extract_strided_slice %400 {offsets = [63, 0], sizes = [8, 8], strides = [1, 1]} : vector<72x8xf32> to vector<8x8xf32>
    %c240 = arith.constant 240 : index
    %c0_380 = arith.constant 0 : index
    %463 = tpu.strided_load %arg29[%c240, %c0_380] {strides = array<i32: 2, 1>} : memref<256x8xf32, #tpu.memory_space<vmem>>, vector<8x8xf32>
    tpu.strided_store %arg29[%c240, %c0_380], %462 {strides = array<i32: 2, 1>} : memref<256x8xf32, #tpu.memory_space<vmem>>, vector<8x8xf32>
    %464 = vector.extract_strided_slice %401 {offsets = [63, 0], sizes = [8, 8], strides = [1, 1]} : vector<72x8xf32> to vector<8x8xf32>
    %c241 = arith.constant 241 : index
    %c0_381 = arith.constant 0 : index
    %465 = tpu.strided_load %arg29[%c241, %c0_381] {strides = array<i32: 2, 1>} : memref<256x8xf32, #tpu.memory_space<vmem>>, vector<8x8xf32>
    tpu.strided_store %arg29[%c241, %c0_381], %464 {strides = array<i32: 2, 1>} : memref<256x8xf32, #tpu.memory_space<vmem>>, vector<8x8xf32>
    %c0_382 = arith.constant 0 : index
    %c0_383 = arith.constant 0 : index
    %466 = vector.load %arg29[%c0_382, %c0_383] : memref<256x8xf32, #tpu.memory_space<vmem>>, vector<256x8xf32>
    %c0_384 = arith.constant 0 : index
    %c0_385 = arith.constant 0 : index
    %467 = vector.load %arg15[%c0_384, %c0_385] : memref<8x1xf32, #tpu.memory_space<vmem>>, vector<8x1xf32>
    %cst_386 = arith.constant dense<0.000000e+00> : vector<256x1xf32>
    %468 = tpu.matmul %466, %467, %cst_386 {dimension_numbers = #tpu.dot_dimension_numbers<[1], [0], [0], [1], [0, 0, 1, 1], [], []>} : vector<256x8xf32>, vector<8x1xf32>, vector<256x1xf32> -> vector<256x1xf32>
    %c0_387 = arith.constant 0 : index
    %c0_388 = arith.constant 0 : index
    %469 = vector.load %arg16[%c0_387, %c0_388] : memref<1x1xf32, #tpu.memory_space<vmem>>, vector<1x1xf32>
    %470 = vector.broadcast %469 : vector<1x1xf32> to vector<256x1xf32>
    %471 = arith.addf %468, %470 : vector<256x1xf32>
    %c0_389 = arith.constant 0 : index
    %c0_390 = arith.constant 0 : index
    %472 = vector.load %arg17[%c0_389, %c0_390] : memref<256x1xf32, #tpu.memory_space<vmem>>, vector<256x1xf32>
    tpu.vector_store %arg17[%c0_389, %c0_390], %471 {strides = array<i32>} : memref<256x1xf32, #tpu.memory_space<vmem>>, vector<256x1xf32>,
    return
  }
}

</mosaic_0001>

<bundles_post_ra>
// kernel: skip_lstm_ende_forward.1
= control target key start
LH: loop header
LB: loop body
LE: loop exit
PB: predicated region body
PF: predicated region fallthrough
CT: control target
= control target key end

     0   :  { %s9620_s30 = smov 20   ;;  %s9624_s18 = smov 12   ;;  %vm1856_vm0 = vcmask 1043456   ;;  %vm1444_vm1 = vcmask 31744   ;;  %vm1481_vm2 = vcmask 64512   ;;  %vm1518_vm3 = vcmask 97280   ;;  %s9600_s0 = inlined_call_operand.vmem [shape: f32[326,4], index: 0, kind: input, shape index: {}]   ;;  %s9601_s1 = inlined_call_operand.vmem [shape: f32[36,16], index: 1, kind: input, shape index: {}]   ;;  %s9602_s2 = inlined_call_operand.vmem [shape: f32[1,16], index: 2, kind: input, shape index: {}]   ;;  %s9603_s3 = inlined_call_operand.vmem [shape: f32[144,80], index: 3, kind: input, shape index: {}]   ;;  %s9604_s4 = inlined_call_operand.vmem [shape: f32[1,80], index: 4, kind: input, shape index: {}]   ;;  %s9605_s5 = inlined_call_operand.vmem [shape: f32[288,160], index: 5, kind: input, shape index: {}]   ;;  %s9606_s6 = inlined_call_operand.vmem [shape: f32[1,160], index: 6, kind: input, shape index: {}]   ;;  %s9607_s7 = inlined_call_operand.vmem [shape: f32[576,192], index: 7, kind: input, shape index: {}]   ;;  %s9608_s8 = inlined_call_operand.vmem [shape: f32[1,192], index: 8, kind: input, shape index: {}]   ;;  %s9609_s9 = inlined_call_operand.vmem [shape: f32[256,128], index: 9, kind: input, shape index: {}]   ;;  %s9610_s10 = inlined_call_operand.vmem [shape: f32[1,128], index: 10, kind: input, shape index: {}]   ;;  %s9611_s11 = inlined_call_operand.vmem [shape: f32[128,64], index: 11, kind: input, shape index: {}]   ;;  %s9612_s12 = inlined_call_operand.vmem [shape: f32[1,64], index: 12, kind: input, shape index: {}]   ;;  %s9613_s13 = inlined_call_operand.vmem [shape: f32[64,32], index: 13, kind: input, shape index: {}]   ;;  %s9614_s14 = inlined_call_operand.vmem [shape: f32[1,32], index: 14, kind: input, shape index: {}]   ;;  %s9615_s15 = inlined_call_operand.vmem [shape: f32[8,1], index: 15, kind: input, shape index: {}]   ;;  %s9616_s16 = inlined_call_operand.<no memory space> [shape: f32[1,1], index: 16, kind: input, shape index: {}]   ;;  %s9617_s17 = inlined_call_operand.vmem [shape: f32[256,1], index: 17, kind: output, shape index: {}]  }
   0x1   :  { %9638 = sst [smem:[#allocation15_spill]] %s9600_s0  ;;  %s9628_s19 = smov 4   ;;  %vm58_vm4 = vcmask 130048   ;;  %vm1591_vm5 = vcmask 162816   ;;  %vm1628_vm6 = vcmask 195584   ;;  %vm1665_vm7 = vcmask 228352  }
   0x2   :  { %9639 = sst [smem:[#allocation16_spill]] %s9601_s1  ;;  %s9622_s25 = smov 24   ;;  %vm73_vm8 = vcmask 261120   ;;  %vm1747_vm9 = vcmask 293888   ;;  %vm71_vm10 = vcmask 128000   ;;  %vm80_vm11 = vcmask 523264  }
   0x3   :  { %9640 = sst [smem:[#allocation17_spill]] %s9613_s13  ;;  %s9626_s27 = smov 16   ;;  %vm2506_vm12 = vcmask 392192   ;;  %vm2527_vm13 = vcmask 654336   ;;  %vm2538_vm14 = vcmask 785408   ;;  %vm2549_vm15 = vcmask 916480  }
   0x4   :  { %9641 = sst [smem:[#allocation18_spill]] %s9614_s14  ;;  %s9630_s28 = smov 8  }
   0x5   :  { %9642 = sst [smem:[#allocation19_spill]] %s9615_s15  ;;  %s9634_s23 = smov 32  }
   0x6   :  { %9643 = sst [smem:[#allocation20_spill]] %s9616_s16  ;;  %s9632_s24 = smov 28  }
   0x7   :  { %9644 = sst [smem:[#allocation21_spill]] %s9617_s17  ;;  %s9646_s1 = smov 24  }
   0x8   :  { %s9645_s26 = sld [smem:[#allocation15_spill]]  ;;  %s9647_s20 = smov 20  }
   0x9   :  { %s5773_s13 = smov 80   ;;  %s5774_s14 = smov 64  }
   0xa   :  { %s5777_s22 = smov 120   ;;  %s9671_s17 = sld [smem:[#allocation21_spill]] }
   0xe   :  { %v250_v0 = vld [vmem:[%s9645_s26 + $0x14] sm:$0xff]  ;;  %v140_v2 = vld [vmem:[%s9645_s26 + $0x1] sm:$0xff]  ;;  %v141_v7 = vld [vmem:[%s9645_s26 + $0x9] sm:$0xff] }
   0xf   :  { %v178_v1 = vld [vmem:[%s9645_s26 + $0x12] sm:$0xff]  ;;  %938 = vrot.lane.b32.xlu2 %v250_v0, %s9620_s30  ;;  %396 = vrot.lane.b32.xlu0 %v140_v2, %s9628_s19  ;;  %v252_v3 = vld [vmem:[%s9645_s26 + $0x24] sm:$0xff]  ;;  %s9654_s30 = sld [smem:[#allocation16_spill]] }
  0x10   :  { %650 = vrot.lane.b32.xlu1 %v178_v1, %s9624_s18  ;;  %v214_v4 = vld [vmem:[%s9645_s26 + $0x13] sm:$0xff]  ;;  %v176_v5 = vld [vmem:[%s9645_s26 + $0x2] sm:$0xff]  ;;  %v177_v11 = vld [vmem:[%s9645_s26 + $0xa] sm:$0xff] }
  0x11   :  { %v324_v6 = vld [vmem:[%s9645_s26 + $0x26] sm:$0xff]  ;;  %v179_v9 = vld [vmem:[%s9645_s26 + $0x1a] sm:$0xff]  ;;  %v142_v15 = vld [vmem:[%s9645_s26 + $0x11] sm:$0xff] }
  0x12   :  { %v288_v8 = vld [vmem:[%s9645_s26 + $0x25] sm:$0xff]  ;;  %v215_v10 = vld [vmem:[%s9645_s26 + $0x1b] sm:$0xff]  ;;  %v289_v13 = vld [vmem:[%s9645_s26 + $0x2d] sm:$0xff] }
  0x13   :  { %v253_v12 = vld [vmem:[%s9645_s26 + $0x2c] sm:$0xff]  ;;  %v251_v14 = vld [vmem:[%s9645_s26 + $0x1c] sm:$0xff]  ;;  %v254_v21 = vld [vmem:[%s9645_s26 + $0x34] sm:$0xff] }
  0x14   :  { %v325_v16 = vld [vmem:[%s9645_s26 + $0x2e] sm:$0xff]  ;;  %v216_v17 = vld [vmem:[%s9645_s26 + $0x23] sm:$0xff]  ;;  %v326_v20 = vld [vmem:[%s9645_s26 + $0x36] sm:$0xff] }
  0x15   :  { %v180_v18 = vld [vmem:[%s9645_s26 + $0x22] sm:$0xff]  ;;  %v290_v19 = vld [vmem:[%s9645_s26 + $0x35] sm:$0xff]  ;;  %v181_v22 = vld [vmem:[%s9645_s26 + $0x2a] sm:$0xff] }
  0x16   :  { %v143_v23 = vld [vmem:[%s9645_s26 + $0x19] sm:$0xff]  ;;  %v217_v25 = vld [vmem:[%s9645_s26 + $0x2b] sm:$0xff]  ;;  %v144_v27 = vld [vmem:[%s9645_s26 + $0x21] sm:$0xff] }
  0x17   :  { %1048 = vrot.lane.b32.xlu2 %v252_v3, %s9622_s25  ;;  %540 = vrot.lane.b32.xlu0 %v176_v5, %s9630_s28  ;;  %v255_v24 = vld [vmem:[%s9645_s26 + $0x3c] sm:$0xff]  ;;  %v182_v29 = vld [vmem:[%s9645_s26 + $0x32] sm:$0xff] }
  0x18   :  { %794 = vrot.lane.b32.xlu1 %v214_v4, %s9626_s27  ;;  %v327_v26 = vld [vmem:[%s9645_s26 + $0x3e] sm:$0xff]  ;;  %v218_v30 = vld [vmem:[%s9645_s26 + $0x33] sm:$0xff]  ;;  %v1739_v37 = vld [vmem:[%s9654_s30 + $0x8] sm:$0xff] }
  0x19   :  { %v291_v28 = vld [vmem:[%s9645_s26 + $0x3d] sm:$0xff]  ;;  %v292_v34 = vld [vmem:[%s9645_s26 + $0x45] sm:$0xff]  ;;  %v1740_v36 = vld [vmem:[%s9654_s30 + $0x10] sm:$0xff] }
  0x1a   :  { %v1742_v32 = vld [vmem:[%s9654_s30 + $0x20] sm:$0xf]  ;;  %v6003_v33 = vld [vmem:[%s9645_s26 + $0x44] sm:$0xff]  ;;  %v1741_v35 = vld [vmem:[%s9654_s30 + $0x18] sm:$0xff] }
  0x1b   :  { %5299 = vmatpush.msk.msra.mxu0 %vm1856_vm0, %v1742_v32  ;;  %v1738_v39 = vld [vmem:[%s9654_s30] sm:$0xff]  ;;  %v145_v40 = vld [vmem:[%s9645_s26 + $0x29] sm:$0xff]  ;;  %v146_v60 = vld [vmem:[%s9645_s26 + $0x31] sm:$0xff] }
  0x1c   :  { %v328_v41 = vld [vmem:[%s9645_s26 + $0x46] sm:$0xff]  ;;  %v219_v43 = vld [vmem:[%s9645_s26 + $0x3b] sm:$0xff]  ;;  %v329_v49 = vld [vmem:[%s9645_s26 + $0x4e] sm:$0xff] }
  0x1d   :  { %1872 = vmatpush.msra.mxu0 %v1741_v35  ;;  %v6040_v44 = vld [vmem:[%s9645_s26 + $0x3a] sm:$0xff]  ;;  %v293_v48 = vld [vmem:[%s9645_s26 + $0x4d] sm:$0xff]  ;;  %v6070_v58 = vld [vmem:[%s9645_s26 + $0x42] sm:$0xff] }
  0x1e   :  { %v6055_v50 = vld [vmem:[%s9645_s26 + $0x4c] sm:$0xff]  ;;  %v104_v51 = vld [vmem:[%s9645_s26] sm:$0xff]  ;;  %v6087_v4 = vld [vmem:[%s9645_s26 + $0x54] sm:$0xff] }
  0x1f   :  { %398 = vrot.lane.b32.xlu2 %v141_v7, %s9628_s19  ;;  %1192 = vrot.lane.b32.xlu0 %v288_v8, %s9632_s24  ;;  %v220_v5 = vld [vmem:[%s9645_s26 + $0x43] sm:$0xff] }
  0x20   :  { %1336 = vrot.lane.b32.xlu1 %v324_v6, %s9634_s23  ;;  %1873 = vmatpush.msra.mxu0 %v1740_v36  ;;  %v105_v6 = vld [vmem:[%s9645_s26 + $0x8] sm:$0xff] }
  0x22   :  { %1874 = vmatpush.msra.mxu0 %v1739_v37 }
  0x24   :  { %1875 = vmatpush.msra.mxu0 %v1738_v39  ;;  %v331_v39 = vld [vmem:[%s9645_s26 + $0x5e] sm:$0xff] }
  0x27   :  { %796 = vrot.lane.b32.xlu2 %v215_v10, %s9626_s27  ;;  %542 = vrot.lane.b32.xlu0 %v177_v11, %s9630_s28  ;;  %s9649_s27 = smov 12   ;;  %v330_v11 = vld [vmem:[%s9645_s26 + $0x56] sm:$0xff] }
  0x28   :  { %652 = vrot.lane.b32.xlu1 %v179_v9, %s9624_s18  ;;  %s9648_s18 = smov 16  }
  0x2f   :  { %1194 = vrot.lane.b32.xlu2 %v289_v13, %s9632_s24  ;;  %940 = vrot.lane.b32.xlu0 %v251_v14, %s9647_s20  ;;  %v294_v14 = vld [vmem:[%s9645_s26 + $0x55] sm:$0xff] }
  0x30   :  { %1050 = vrot.lane.b32.xlu1 %v253_v12, %s9646_s1 }
  0x37   :  { %544 = vrot.lane.b32.xlu2 %v178_v1, %s9630_s28  ;;  %1338 = vrot.lane.b32.xlu0 %v325_v16, %s9634_s23  ;;  %s9651_s28 = smov 4  }
  0x38   :  { %400 = vrot.lane.b32.xlu1 %v142_v15, %s9628_s19  ;;  %s9650_s19 = smov 8  }
  0x3f   :  { %942 = vrot.lane.b32.xlu2 %v252_v3, %s9647_s20  ;;  %654 = vrot.lane.b32.xlu0 %v180_v18, %s9649_s27 }
  0x40   :  { %798 = vrot.lane.b32.xlu1 %v216_v17, %s9648_s18 }
  0x47   :  { %1340 = vrot.lane.b32.xlu2 %v326_v20, %s9634_s23  ;;  %1052 = vrot.lane.b32.xlu0 %v254_v21, %s9646_s1  ;;  %s9652_s23 = smov 32  }
  0x48   :  { %1196 = vrot.lane.b32.xlu1 %v290_v19, %s9632_s24  ;;  %s9653_s24 = smov 28  }
  0x4f   :  { %656 = vrot.lane.b32.xlu2 %v181_v22, %s9649_s27  ;;  %402 = vrot.lane.b32.xlu0 %v143_v23, %s9651_s28 }
  0x50   :  { %546 = vrot.lane.b32.xlu1 %v179_v9, %s9650_s19 }
  0x57   :  { %1054 = vrot.lane.b32.xlu2 %v255_v24, %s9646_s1  ;;  %800 = vrot.lane.b32.xlu0 %v217_v25, %s9648_s18 }
  0x58   :  { %944 = vrot.lane.b32.xlu1 %v253_v12, %s9647_s20  ;;  %v147_v12 = vld [vmem:[%s9645_s26 + $0x39] sm:$0xff] }
  0x5f   :  { %404 = vrot.lane.b32.xlu2 %v144_v27, %s9651_s28  ;;  %1198 = vrot.lane.b32.xlu0 %v291_v28, %s9653_s24 }
  0x60   :  { %1342 = vrot.lane.b32.xlu1 %v327_v26, %s9652_s23 }
  0x67   :  { %802 = vrot.lane.b32.xlu2 %v218_v30, %s9648_s18  ;;  %548 = vrot.lane.b32.xlu0 %v180_v18, %s9650_s19  ;;  %v295_v30 = vld [vmem:[%s9645_s26 + $0x5d] sm:$0xff] }
  0x68   :  { %658 = vrot.lane.b32.xlu1 %v182_v29, %s9649_s27 }
  0x69   :  { %v939_v31 = vpop.permute.xlu2 %938 }
  0x6f   :  { %1200 = vrot.lane.b32.xlu2 %v292_v34, %s9653_s24  ;;  %946 = vrot.lane.b32.xlu0 %v254_v21, %s9647_s20  ;;  %v6121_v21 = vld [vmem:[%s9645_s26 + $0x4a] sm:$0xff] }
  0x70   :  { %1056 = vrot.lane.b32.xlu1 %v6003_v33, %s9646_s1 }
  0x71   :  { %v1049_v38 = vpop.permute.xlu2 %1048 }
  0x77   :  { %550 = vrot.lane.b32.xlu2 %v181_v22, %s9650_s19  ;;  %1344 = vrot.lane.b32.xlu0 %v328_v41, %s9652_s23  ;;  %v221_v22 = vld [vmem:[%s9645_s26 + $0x4b] sm:$0xff] }
  0x78   :  { %406 = vrot.lane.b32.xlu1 %v145_v40, %s9651_s28 }
  0x79   :  { %v399_v42 = vpop.permute.xlu2 %398 }
  0x7a   :  { %v1446_v10 = vsel %vm1444_vm1, %v105_v6, %v399_v42 }
  0x7f   :  { %948 = vrot.lane.b32.xlu2 %v255_v24, %s9647_s20  ;;  %660 = vrot.lane.b32.xlu0 %v6040_v44, %s9649_s27 }
  0x80   :  { %804 = vrot.lane.b32.xlu1 %v219_v43, %s9648_s18 }
  0x81   :  { %v797_v46 = vpop.permute.xlu2 %796  ;;  %v397_v47 = vpop.permute.xlu0 %396 }
  0x82   :  { %v651_v45 = vpop.permute.xlu1 %650  ;;  %v1445_v54 = vsel %vm1444_vm1, %v104_v51, %v397_v47  ;;  %v222_v47 = vld [vmem:[%s9645_s26 + $0x53] sm:$0xff] }
  0x87   :  { %1346 = vrot.lane.b32.xlu2 %v329_v49, %s9652_s23  ;;  %1058 = vrot.lane.b32.xlu0 %v6055_v50, %s9646_s1  ;;  %v186_v49 = vld [vmem:[%s9645_s26 + $0x52] sm:$0xff] }
  0x88   :  { %1202 = vrot.lane.b32.xlu1 %v293_v48, %s9653_s24 }
  0x89   :  { %v1195_v53 = vpop.permute.xlu2 %1194  ;;  %v541_v55 = vpop.permute.xlu0 %540 }
  0x8a   :  { %v795_v52 = vpop.permute.xlu1 %794  ;;  %v1482_v56 = vsel %vm1481_vm2, %v1445_v54, %v541_v55  ;;  %v296_v54 = vld [vmem:[%s9645_s26 + $0x65] sm:$0xff] }
  0x8b   :  { %v1519_v57 = vsel %vm1518_vm3, %v1482_v56, %v651_v45  ;;  %v332_v55 = vld [vmem:[%s9645_s26 + $0x66] sm:$0xff] }
  0x8c   :  { %v1555_v59 = vsel %vm58_vm4, %v1519_v57, %v795_v52  ;;  %v6190_v57 = vld [vmem:[%s9645_s26 + $0x64] sm:$0xff] }
  0x8d   :  { %v1592_v61 = vsel %vm1591_vm5, %v1555_v59, %v939_v31  ;;  %v106_v31 = vld [vmem:[%s9645_s26 + $0x10] sm:$0xff] }
  0x8e   :  { %v1629_v1 = vsel %vm1628_vm6, %v1592_v61, %v1049_v38  ;;  %v148_v38 = vld [vmem:[%s9645_s26 + $0x41] sm:$0xff] }
  0x8f   :  { %662 = vrot.lane.b32.xlu2 %v6070_v58, %s9649_s27  ;;  %408 = vrot.lane.b32.xlu0 %v146_v60, %s9651_s28 }
  0x90   :  { %552 = vrot.lane.b32.xlu1 %v182_v29, %s9650_s19  ;;  %v259_v29 = vld [vmem:[%s9645_s26 + $0x5c] sm:$0xff] }
  0x91   :  { %v545_v63 = vpop.permute.xlu2 %544  ;;  %v1193_v0 = vpop.permute.xlu0 %1192 }
  0x92   :  { %v1337_v62 = vpop.permute.xlu1 %1336  ;;  %v1666_v2 = vsel %vm1665_vm7, %v1629_v1, %v1193_v0  ;;  %v6202_v0 = vld [vmem:[%s9645_s26 + $0x5a] sm:$0xff]  ;;  %v149_v1 = vld [vmem:[%s9645_s26 + $0x49] sm:$0xff] }
  0x93   :  { %v1702_v3 = vsel %vm73_vm8, %v1666_v2, %v1337_v62 }
  0x94   :  { %5300 = vmatmul.msk.f32.vlgmr.msra.gmra.mxu0 %vm1747_vm9, %v1702_v3 }
  0x97   :  { %1060 = vrot.lane.b32.xlu2 %v6087_v4, %s9646_s1  ;;  %806 = vrot.lane.b32.xlu0 %v220_v5, %s9648_s18 }
  0x98   :  { %950 = vrot.lane.b32.xlu1 %v6003_v33, %s9647_s20 }
  0x99   :  { %v943_v8 = vpop.permute.xlu2 %942  ;;  %v543_v9 = vpop.permute.xlu0 %542 }
  0x9a   :  { %v653_v7 = vpop.permute.xlu1 %652  ;;  %v1483_v13 = vsel %vm1481_vm2, %v1446_v10, %v543_v9  ;;  %v6219_v9 = vld [vmem:[%s9645_s26 + $0x6c] sm:$0xff]  ;;  %v223_v10 = vld [vmem:[%s9645_s26 + $0x5b] sm:$0xff] }
  0x9b   :  { %v1520_v15 = vsel %vm1518_vm3, %v1483_v13, %v653_v7 }
  0x9c   :  { %v1556_v19 = vsel %vm58_vm4, %v1520_v15, %v797_v46 }
  0x9f   :  { %410 = vrot.lane.b32.xlu2 %v147_v12, %s9651_s28  ;;  %1204 = vrot.lane.b32.xlu0 %v294_v14, %s9653_s24 }
  0xa0   :  { %1348 = vrot.lane.b32.xlu1 %v330_v11, %s9652_s23  ;;  %v108_v11 = vld [vmem:[%s9645_s26 + $0x20] sm:$0xff] }
  0xa1   :  { %v1341_v17 = vpop.permute.xlu2 %1340  ;;  %v941_v18 = vpop.permute.xlu0 %940 }
  0xa2   :  { %v1051_v16 = vpop.permute.xlu1 %1050  ;;  %v1593_v20 = vsel %vm1591_vm5, %v1556_v19, %v941_v18  ;;  %v297_v19 = vld [vmem:[%s9645_s26 + $0x6d] sm:$0xff] }
  0xa3   :  { %v1630_v23 = vsel %vm1628_vm6, %v1593_v20, %v1051_v16  ;;  %v333_v16 = vld [vmem:[%s9645_s26 + $0x6e] sm:$0xff] }
  0xa4   :  { %v1667_v27 = vsel %vm1665_vm7, %v1630_v23, %v1195_v53  ;;  %v107_v53 = vld [vmem:[%s9645_s26 + $0x18] sm:$0xff] }
  0xa7   :  { %808 = vrot.lane.b32.xlu2 %v221_v22, %s9648_s18  ;;  %554 = vrot.lane.b32.xlu0 %v6040_v44, %s9650_s19 }
  0xa8   :  { %664 = vrot.lane.b32.xlu1 %v6121_v21, %s9649_s27 }
  0xa9   :  { %v657_v25 = vpop.permute.xlu2 %656  ;;  %v1339_v26 = vpop.permute.xlu0 %1338 }
  0xaa   :  { %v401_v24 = vpop.permute.xlu1 %400  ;;  %v1703_v28 = vsel %vm73_vm8, %v1667_v27, %v1339_v26  ;;  %v6252_v26 = vld [vmem:[%s9645_s26 + $0x62] sm:$0xff] }
  0xab   :  { %5301 = vmatmul.msk.f32.gmra.mxu0 %vm1747_vm9, %v1703_v28  ;;  %v1447_v32 = vsel %vm1444_vm1, %v106_v31, %v401_v24  ;;  %v224_v27 = vld [vmem:[%s9645_s26 + $0x63] sm:$0xff] }
  0xac   :  { %v1484_v36 = vsel %vm1481_vm2, %v1447_v32, %v545_v63 }
  0xaf   :  { %1206 = vrot.lane.b32.xlu2 %v295_v30, %s9653_s24  ;;  %952 = vrot.lane.b32.xlu0 %v6055_v50, %s9647_s20 }
  0xb0   :  { %1062 = vrot.lane.b32.xlu1 %v259_v29, %s9646_s1 }
  0xb1   :  { %v1055_v34 = vpop.permute.xlu2 %1054  ;;  %v655_v35 = vpop.permute.xlu0 %654 }
  0xb2   :  { %v799_v33 = vpop.permute.xlu1 %798  ;;  %v1521_v37 = vsel %vm1518_vm3, %v1484_v36, %v655_v35  ;;  %v298_v35 = vld [vmem:[%s9645_s26 + $0x75] sm:$0xff]  ;;  %v109_v36 = vld [vmem:[%s9645_s26 + $0x28] sm:$0xff] }
  0xb3   :  { %v1557_v40 = vsel %vm58_vm4, %v1521_v37, %v799_v33 }
  0xb4   :  { %v1594_v44 = vsel %vm1591_vm5, %v1557_v40, %v943_v8 }
  0xb7   :  { %556 = vrot.lane.b32.xlu2 %v6070_v58, %s9650_s19  ;;  %1350 = vrot.lane.b32.xlu0 %v331_v39, %s9652_s23 }
  0xb8   :  { %412 = vrot.lane.b32.xlu1 %v148_v38, %s9651_s28 }
  0xb9   :  { %v405_v42 = vpop.permute.xlu2 %404  ;;  %v1053_v43 = vpop.permute.xlu0 %1052 }
  0xba   :  { %v1197_v41 = vpop.permute.xlu1 %1196  ;;  %v1631_v45 = vsel %vm1628_vm6, %v1594_v44, %v1053_v43  ;;  %v1449_v15 = vsel %vm1444_vm1, %v108_v11, %v405_v42  ;;  %v151_v43 = vld [vmem:[%s9645_s26 + $0x59] sm:$0xff] }
  0xbb   :  { %v1668_v46 = vsel %vm1665_vm7, %v1631_v45, %v1197_v41  ;;  %v334_v44 = vld [vmem:[%s9645_s26 + $0x76] sm:$0xff] }
  0xbc   :  { %v1704_v48 = vsel %vm73_vm8, %v1668_v46, %v1341_v17  ;;  %v150_v17 = vld [vmem:[%s9645_s26 + $0x51] sm:$0xff] }
  0xbd   :  { %5302 = vmatmul.msk.f32.gmra.mxu0 %vm1747_vm9, %v1704_v48 }
  0xbf   :  { %954 = vrot.lane.b32.xlu2 %v6087_v4, %s9647_s20  ;;  %666 = vrot.lane.b32.xlu0 %v186_v49, %s9649_s27 }
  0xc0   :  { %810 = vrot.lane.b32.xlu1 %v222_v47, %s9648_s18 }
  0xc1   :  { %v803_v51 = vpop.permute.xlu2 %802  ;;  %v403_v52 = vpop.permute.xlu0 %402 }
  0xc2   :  { %v547_v50 = vpop.permute.xlu1 %546  ;;  %v1448_v56 = vsel %vm1444_vm1, %v107_v53, %v403_v52  ;;  %v225_v52 = vld [vmem:[%s9645_s26 + $0x6b] sm:$0xff] }
  0xc3   :  { %v1485_v58 = vsel %vm1481_vm2, %v1448_v56, %v547_v50 }
  0xc4   :  { %v1522_v62 = vsel %vm1518_vm3, %v1485_v58, %v657_v25  ;;  %v110_v58 = vld [vmem:[%s9645_s26 + $0x30] sm:$0xff] }
  0xc7   :  { %1352 = vrot.lane.b32.xlu2 %v332_v55, %s9652_s23  ;;  %1064 = vrot.lane.b32.xlu0 %v6190_v57, %s9646_s1 }
  0xc8   :  { %1208 = vrot.lane.b32.xlu1 %v296_v54, %s9653_s24  ;;  %v6305_v54 = vld [vmem:[%s9645_s26 + $0x6a] sm:$0xff] }
  0xc9   :  { %v1201_v60 = vpop.permute.xlu2 %1200  ;;  %v801_v61 = vpop.permute.xlu0 %800 }
  0xca   :  { %v945_v59 = vpop.permute.xlu1 %944  ;;  %v1558_v63 = vsel %vm58_vm4, %v1522_v62, %v801_v61  ;;  %v6326_v62 = vld [vmem:[%s9645_s26 + $0x7c] sm:$0xff] }
  0xcb   :  { %v1595_v2 = vsel %vm1591_vm5, %v1558_v63, %v945_v59  ;;  %v299_v59 = vld [vmem:[%s9645_s26 + $0x7d] sm:$0xff] }
  0xcc   :  { %v1632_v6 = vsel %vm1628_vm6, %v1595_v2, %v1055_v34  ;;  %v6268_v34 = vld [vmem:[%s9645_s26 + $0x74] sm:$0xff] }
  0xcf   :  { %668 = vrot.lane.b32.xlu2 %v6202_v0, %s9649_s27  ;;  %414 = vrot.lane.b32.xlu0 %v149_v1, %s9651_s28 }
  0xd0   :  { %558 = vrot.lane.b32.xlu1 %v6121_v21, %s9650_s19 }
  0xd1   :  { %v551_v4 = vpop.permute.xlu2 %550  ;;  %v1199_v5 = vpop.permute.xlu0 %1198 }
  0xd2   :  { %v1343_v3 = vpop.permute.xlu1 %1342  ;;  %v1669_v7 = vsel %vm1665_vm7, %v1632_v6, %v1199_v5  ;;  %v6338_v5 = vld [vmem:[%s9645_s26 + $0x72] sm:$0xff]  ;;  %v152_v6 = vld [vmem:[%s9645_s26 + $0x61] sm:$0xff] }
  0xd3   :  { %v1705_v8 = vsel %vm73_vm8, %v1669_v7, %v1343_v3 }
  0xd4   :  { %5303 = vmatmul.msk.f32.gmra.mxu0 %vm1747_vm9, %v1705_v8  ;;  %v6351_v8 = vld [vmem:[%s9602_s2] ss:$0 sm:$0xff] }
  0xd7   :  { %1066 = vrot.lane.b32.xlu2 %v6219_v9, %s9646_s1  ;;  %812 = vrot.lane.b32.xlu0 %v223_v10, %s9648_s18 }
  0xd8   :  { %956 = vrot.lane.b32.xlu1 %v259_v29, %s9647_s20 }
  0xd9   :  { %v949_v13 = vpop.permute.xlu2 %948  ;;  %v549_v14 = vpop.permute.xlu0 %548 }
  0xda   :  { %v659_v12 = vpop.permute.xlu1 %658  ;;  %v1486_v18 = vsel %vm1481_vm2, %v1449_v15, %v549_v14 }
  0xdb   :  { %v1523_v20 = vsel %vm1518_vm3, %v1486_v18, %v659_v12 }
  0xdc   :  { %v1559_v24 = vsel %vm58_vm4, %v1523_v20, %v803_v51  ;;  %v111_v20 = vld [vmem:[%s9645_s26 + $0x38] sm:$0xff] }
  0xdf   :  { %416 = vrot.lane.b32.xlu2 %v150_v17, %s9651_s28  ;;  %1210 = vrot.lane.b32.xlu0 %v297_v19, %s9653_s24  ;;  %v6361_v17 = vld [vmem:[%s9645_s26 + $0x84] sm:$0xff]  ;;  %v226_v19 = vld [vmem:[%s9645_s26 + $0x73] sm:$0xff] }
  0xe0   :  { %1354 = vrot.lane.b32.xlu1 %v333_v16, %s9652_s23 }
  0xe1   :  { %v1347_v22 = vpop.permute.xlu2 %1346  ;;  %v947_v23 = vpop.permute.xlu0 %946 }
  0xe2   :  { %v1057_v21 = vpop.permute.xlu1 %1056  ;;  %v1596_v25 = vsel %vm1591_vm5, %v1559_v24, %v947_v23 }
  0xe3   :  { %v1633_v28 = vsel %vm1628_vm6, %v1596_v25, %v1057_v21  ;;  %v336_v25 = vld [vmem:[%s9645_s26 + $0x86] sm:$0xff] }
  0xe4   :  { %v1670_v32 = vsel %vm1665_vm7, %v1633_v28, %v1201_v60  ;;  %v335_v60 = vld [vmem:[%s9645_s26 + $0x7e] sm:$0xff] }
  0xe5   :  { %v300_v28 = vld [vmem:[%s9645_s26 + $0x85] sm:$0xff] }
  0xe7   :  { %814 = vrot.lane.b32.xlu2 %v224_v27, %s9648_s18  ;;  %560 = vrot.lane.b32.xlu0 %v186_v49, %s9650_s19 }
  0xe8   :  { %670 = vrot.lane.b32.xlu1 %v6252_v26, %s9649_s27 }
  0xe9   :  { %v663_v30 = vpop.permute.xlu2 %662  ;;  %v1345_v31 = vpop.permute.xlu0 %1344 }
  0xea   :  { %v407_v29 = vpop.permute.xlu1 %406  ;;  %v1706_v33 = vsel %vm73_vm8, %v1670_v32, %v1345_v31 }
  0xeb   :  { %5304 = vmatmul.msk.f32.gmra.mxu0 %vm1747_vm9, %v1706_v33  ;;  %v1450_v37 = vsel %vm1444_vm1, %v109_v36, %v407_v29  ;;  %v227_v36 = vld [vmem:[%s9645_s26 + $0x7b] sm:$0xff] }
  0xec   :  { %v1487_v41 = vsel %vm1481_vm2, %v1450_v37, %v551_v4 }
  0xef   :  { %1212 = vrot.lane.b32.xlu2 %v298_v35, %s9653_s24  ;;  %958 = vrot.lane.b32.xlu0 %v6190_v57, %s9647_s20  ;;  %v6396_v35 = vld [vmem:[%s9645_s26 + $0x7a] sm:$0xff] }
  0xf0   :  { %1068 = vrot.lane.b32.xlu1 %v6268_v34, %s9646_s1 }
  0xf1   :  { %v1061_v39 = vpop.permute.xlu2 %1060  ;;  %v661_v40 = vpop.permute.xlu0 %660 }
  0xf2   :  { %v805_v38 = vpop.permute.xlu1 %804  ;;  %v1524_v42 = vsel %vm1518_vm3, %v1487_v41, %v661_v40 }
  0xf3   :  { %v1560_v45 = vsel %vm58_vm4, %v1524_v42, %v805_v38 }
  0xf4   :  { %v1597_v49 = vsel %vm1591_vm5, %v1560_v45, %v949_v13 }
  0xf7   :  { %562 = vrot.lane.b32.xlu2 %v6202_v0, %s9650_s19  ;;  %1356 = vrot.lane.b32.xlu0 %v334_v44, %s9652_s23 }
  0xf8   :  { %418 = vrot.lane.b32.xlu1 %v151_v43, %s9651_s28 }
  0xf9   :  { %v411_v47 = vpop.permute.xlu2 %410  ;;  %v1059_v48 = vpop.permute.xlu0 %1058 }
  0xfa   :  { %v1203_v46 = vpop.permute.xlu1 %1202  ;;  %v1634_v50 = vsel %vm1628_vm6, %v1597_v49, %v1059_v48  ;;  %v1452_v24 = vsel %vm1444_vm1, %v111_v20, %v411_v47  ;;  %v301_v47 = vld [vmem:[%s9645_s26 + $0x8d] sm:$0xff]  ;;  %v112_v48 = vld [vmem:[%s9645_s26 + $0x40] sm:$0xff] }
  0xfb   :  { %v1671_v51 = vsel %vm1665_vm7, %v1634_v50, %v1203_v46  ;;  %v6414_v46 = vld [vmem:[%s9645_s26 + $0x8c] sm:$0xff] }
  0xfc   :  { %v1707_v53 = vsel %vm73_vm8, %v1671_v51, %v1347_v22 }
  0xfd   :  { %5305 = vmatmul.msk.f32.gmra.mxu0 %vm1747_vm9, %v1707_v53 }
  0xff   :  { %960 = vrot.lane.b32.xlu2 %v6219_v9, %s9647_s20  ;;  %672 = vrot.lane.b32.xlu0 %v6305_v54, %s9649_s27 }
 0x100   :  { %816 = vrot.lane.b32.xlu1 %v225_v52, %s9648_s18 }
 0x101   :  { %v809_v56 = vpop.permute.xlu2 %808  ;;  %v409_v57 = vpop.permute.xlu0 %408 }
 0x102   :  { %v553_v55 = vpop.permute.xlu1 %552  ;;  %v1451_v61 = vsel %vm1444_vm1, %v110_v58, %v409_v57 }
 0x103   :  { %v1488_v63 = vsel %vm1481_vm2, %v1451_v61, %v553_v55  ;;  %v154_v55 = vld [vmem:[%s9645_s26 + $0x71] sm:$0xff] }
 0x104   :  { %v1525_v3 = vsel %vm1518_vm3, %v1488_v63, %v663_v30 }
 0x107   :  { %1358 = vrot.lane.b32.xlu2 %v335_v60, %s9652_s23  ;;  %1070 = vrot.lane.b32.xlu0 %v6326_v62, %s9646_s1 }
 0x108   :  { %1214 = vrot.lane.b32.xlu1 %v299_v59, %s9653_s24 }
 0x109   :  { %v1207_v1 = vpop.permute.xlu2 %1206  ;;  %v807_v2 = vpop.permute.xlu0 %806 }
 0x10a   :  { %v951_v0 = vpop.permute.xlu1 %950  ;;  %v1561_v4 = vsel %vm58_vm4, %v1525_v3, %v807_v2  ;;  %v228_v2 = vld [vmem:[%s9645_s26 + $0x83] sm:$0xff] }
 0x10b   :  { %v1598_v7 = vsel %vm1591_vm5, %v1561_v4, %v951_v0  ;;  %v6455_v4 = vld [vmem:[%s9645_s26 + $0x82] sm:$0xff] }
 0x10c   :  { %v1635_v12 = vsel %vm1628_vm6, %v1598_v7, %v1061_v39 }
 0x10f   :  { %674 = vrot.lane.b32.xlu2 %v6338_v5, %s9649_s27  ;;  %420 = vrot.lane.b32.xlu0 %v152_v6, %s9651_s28 }
 0x110   :  { %564 = vrot.lane.b32.xlu1 %v6252_v26, %s9650_s19  ;;  %v153_v26 = vld [vmem:[%s9645_s26 + $0x69] sm:$0xff] }
 0x111   :  { %v557_v10 = vpop.permute.xlu2 %556  ;;  %v1205_v11 = vpop.permute.xlu0 %1204 }
 0x112   :  { %v1349_v9 = vpop.permute.xlu1 %1348  ;;  %v1877_v13 = vpop.f32.mrf.mxu0  ;;  %v1672_v14 = vsel %vm1665_vm7, %v1635_v12, %v1205_v11  ;;  %v302_v11 = vld [vmem:[%s9645_s26 + $0x95] sm:$0xff] }
 0x113   :  { %v1878_v15 = vadd.f32 %v6351_v8, %v1877_v13  ;;  %v1708_v16 = vsel %vm73_vm8, %v1672_v14, %v1349_v9  ;;  %v338_v12 = vld [vmem:[%s9645_s26 + $0x96] sm:$0xff] }
 0x114   :  { %5306 = vmatmul.msk.f32.gmra.mxu0 %vm1747_vm9, %v1708_v16  ;;  %v6479_v14 = vld [vmem:[%s9645_s26 + $0x94] sm:$0xff] }
 0x115   :  { %v1985_v18 = vmax.f32 %v1878_v15, 0.0 }
 0x117   :  { %2021 = vst.msk [vmem:[#allocation2] sm:$0xff] %vm58_vm4, %v1985_v18  ;;  %1072 = vrot.lane.b32.xlu2 %v6361_v17, %s9646_s1  ;;  %818 = vrot.lane.b32.xlu0 %v226_v19, %s9648_s18 }
 0x118   :  { %962 = vrot.lane.b32.xlu1 %v6268_v34, %s9647_s20 }
 0x119   :  { %v955_v22 = vpop.permute.xlu2 %954  ;;  %v555_v23 = vpop.permute.xlu0 %554 }
 0x11a   :  { %v665_v21 = vpop.permute.xlu1 %664  ;;  %v1489_v27 = vsel %vm1481_vm2, %v1452_v24, %v555_v23 }
 0x11b   :  { %v1526_v29 = vsel %vm1518_vm3, %v1489_v27, %v665_v21  ;;  %v6493_v21 = vld [vmem:[%s9645_s26 + $0x8a] sm:$0xff] }
 0x11c   :  { %v1562_v33 = vsel %vm58_vm4, %v1526_v29, %v809_v56  ;;  %v337_v56 = vld [vmem:[%s9645_s26 + $0x8e] sm:$0xff] }
 0x11f   :  { %422 = vrot.lane.b32.xlu2 %v153_v26, %s9651_s28  ;;  %1216 = vrot.lane.b32.xlu0 %v300_v28, %s9653_s24 }
 0x120   :  { %1360 = vrot.lane.b32.xlu1 %v336_v25, %s9652_s23 }
 0x121   :  { %v1353_v31 = vpop.permute.xlu2 %1352  ;;  %v953_v32 = vpop.permute.xlu0 %952 }
 0x122   :  { %v1063_v30 = vpop.permute.xlu1 %1062  ;;  %v1599_v34 = vsel %vm1591_vm5, %v1562_v33, %v953_v32  ;;  %v6513_v32 = vld [vmem:[%s9645_s26 + $0x9c] sm:$0xff]  ;;  %v229_v33 = vld [vmem:[%s9645_s26 + $0x8b] sm:$0xff] }
 0x123   :  { %v1636_v37 = vsel %vm1628_vm6, %v1599_v34, %v1063_v30 }
 0x124   :  { %v1673_v43 = vsel %vm1665_vm7, %v1636_v37, %v1207_v1 }
 0x127   :  { %820 = vrot.lane.b32.xlu2 %v227_v36, %s9648_s18  ;;  %566 = vrot.lane.b32.xlu0 %v6305_v54, %s9650_s19 }
 0x128   :  { %676 = vrot.lane.b32.xlu1 %v6396_v35, %s9649_s27  ;;  %v1880_v38 = vpop.f32.mrf.mxu0 }
 0x129   :  { %v1881_v40 = vadd.f32 %v6351_v8, %v1880_v38  ;;  %v669_v41 = vpop.permute.xlu2 %668  ;;  %v1351_v42 = vpop.permute.xlu0 %1350 }
 0x12a   :  { %v413_v39 = vpop.permute.xlu1 %412  ;;  %v1709_v44 = vsel %vm73_vm8, %v1673_v43, %v1351_v42  ;;  %v156_v42 = vld [vmem:[%s9645_s26 + $0x81] sm:$0xff] }
 0x12b   :  { %v1986_v45 = vmax.f32 %v1881_v40, 0.0  ;;  %5307 = vmatmul.msk.f32.gmra.mxu0 %vm1747_vm9, %v1709_v44  ;;  %v1453_v49 = vsel %vm1444_vm1, %v112_v48, %v413_v39  ;;  %v5770_v39 = vmov 0.0   ;;  %v303_v44 = vld [vmem:[%s9645_s26 + $0x9d] sm:$0xff] }
 0x12c   :  { %v1490_v53 = vsel %vm1481_vm2, %v1453_v49, %v557_v10  ;;  %v113_v10 = vld [vmem:[%s9645_s26 + $0x48] sm:$0xff]  ;;  %61 = vst.msk [vmem:[#allocation5 + $0x10] sm:$0xff] %vm58_vm4, %v5770_v39 }
 0x12d   :  { %2022 = vst.msk [vmem:[#allocation2 + $0x8] sm:$0xff] %vm58_vm4, %v1986_v45 }
 0x12e   :  { %62 = vst.msk [vmem:[#allocation5 + $0x18] sm:$0xff] %vm58_vm4, %v5770_v39 }
 0x12f   :  { %1218 = vrot.lane.b32.xlu2 %v301_v47, %s9653_s24  ;;  %964 = vrot.lane.b32.xlu0 %v6326_v62, %s9647_s20  ;;  %59 = vst.msk [vmem:[#allocation5] sm:$0xff] %vm58_vm4, %v5770_v39 }
 0x130   :  { %1074 = vrot.lane.b32.xlu1 %v6414_v46, %s9646_s1  ;;  %60 = vst.msk [vmem:[#allocation5 + $0x8] sm:$0xff] %vm58_vm4, %v5770_v39 }
 0x131   :  { %v1067_v51 = vpop.permute.xlu2 %1066  ;;  %v667_v52 = vpop.permute.xlu0 %666  ;;  %63 = vst.msk [vmem:[#allocation5 + $0x20] sm:$0xff] %vm58_vm4, %v5770_v39 }
 0x132   :  { %v811_v50 = vpop.permute.xlu1 %810  ;;  %v1527_v54 = vsel %vm1518_vm3, %v1490_v53, %v667_v52  ;;  %64 = vst.msk [vmem:[#allocation5 + $0x28] sm:$0xff] %vm58_vm4, %v5770_v39  ;;  %v230_v52 = vld [vmem:[%s9645_s26 + $0x93] sm:$0xff] }
 0x133   :  { %v1563_v57 = vsel %vm58_vm4, %v1527_v54, %v811_v50  ;;  %65 = vst.msk [vmem:[#allocation5 + $0x30] sm:$0xff] %vm58_vm4, %v5770_v39 }
 0x134   :  { %v1600_v61 = vsel %vm1591_vm5, %v1563_v57, %v955_v22  ;;  %v155_v22 = vld [vmem:[%s9645_s26 + $0x79] sm:$0xff]  ;;  %66 = vst.msk [vmem:[#allocation5 + $0x38] sm:$0xff] %vm58_vm4, %v5770_v39 }
 0x135   :  { %67 = vst.msk [vmem:[#allocation5 + $0x40] sm:$0xff] %vm58_vm4, %v5770_v39 }
 0x136   :  { %68 = vst.msk [vmem:[#allocation5 + $0x48] sm:$0xff] %vm58_vm4, %v5770_v39 }
 0x137   :  { %568 = vrot.lane.b32.xlu2 %v6338_v5, %s9650_s19  ;;  %1362 = vrot.lane.b32.xlu0 %v337_v56, %s9652_s23  ;;  %69 = vst.msk [vmem:[#allocation5 + $0x50] sm:$0xff] %vm58_vm4, %v5770_v39 }
 0x138   :  { %424 = vrot.lane.b32.xlu1 %v154_v55, %s9651_s28  ;;  %70 = vst.msk [vmem:[#allocation5 + $0x58] sm:$0xff] %vm58_vm4, %v5770_v39 }
 0x139   :  { %v6442_v59 = vpop.permute.xlu2 %416  ;;  %v1065_v60 = vpop.permute.xlu0 %1064  ;;  %74 = vst.msk [vmem:[#allocation6] sm:$0xff] %vm73_vm8, %v5770_v39 }
 0x13a   :  { %v1209_v58 = vpop.permute.xlu1 %1208  ;;  %v1637_v62 = vsel %vm1628_vm6, %v1600_v61, %v1065_v60  ;;  %v1883_v63 = vpop.f32.mrf.mxu0  ;;  %75 = vst.msk [vmem:[#allocation6 + $0x8] sm:$0xff] %vm73_vm8, %v5770_v39 }
 0x13b   :  { %v1884_v0 = vadd.f32 %v6351_v8, %v1883_v63  ;;  %v1674_v1 = vsel %vm1665_vm7, %v1637_v62, %v1209_v58  ;;  %76 = vst.msk [vmem:[#allocation6 + $0x10] sm:$0xff] %vm73_vm8, %v5770_v39  ;;  %v6611_v62 = vld [vmem:[%s9645_s26 + $0xa4] sm:$0xff] }
 0x13c   :  { %v1710_v3 = vsel %vm73_vm8, %v1674_v1, %v1353_v31  ;;  %77 = vst.msk [vmem:[#allocation6 + $0x18] sm:$0xff] %vm73_vm8, %v5770_v39  ;;  %v304_v63 = vld [vmem:[%s9645_s26 + $0xa5] sm:$0xff] }
 0x13d   :  { %v1987_v5 = vmax.f32 %v1884_v0, 0.0  ;;  %5308 = vmatmul.msk.f32.gmra.mxu0 %vm1747_vm9, %v1710_v3  ;;  %87 = vst.msk [vmem:[#allocation11] sm:$0xff] %vm73_vm8, %v5770_v39  ;;  %v115_v0 = vld [vmem:[%s9645_s26 + $0x58] sm:$0xff] }
 0x13e   :  { %88 = vst.msk [vmem:[#allocation11 + $0x8] sm:$0xff] %vm73_vm8, %v5770_v39 }
 0x13f   :  { %966 = vrot.lane.b32.xlu2 %v6361_v17, %s9647_s20  ;;  %2023 = vst.msk [vmem:[#allocation2 + $0x10] sm:$0xff] %vm58_vm4, %v1987_v5  ;;  %678 = vrot.lane.b32.xlu0 %v6455_v4, %s9649_s27  ;;  %v2057_v5 = vld [vmem:[#allocation2] ss:$2 sm:$0xff] }
 0x140   :  { %822 = vrot.lane.b32.xlu1 %v228_v2, %s9648_s18  ;;  %89 = vst.msk [vmem:[#allocation11 + $0x10] sm:$0xff] %vm73_vm8, %v5770_v39 }
 0x141   :  { %v6464_v7 = vpop.permute.xlu2 %814  ;;  %v415_v9 = vpop.permute.xlu0 %414  ;;  %92 = vst.msk [vmem:[#allocation12] sm:$0xff] %vm58_vm4, %v5770_v39 }
 0x142   :  { %v559_v6 = vpop.permute.xlu1 %558  ;;  %v1454_v13 = vsel %vm1444_vm1, %v113_v10, %v415_v9  ;;  %93 = vst.msk [vmem:[#allocation12 + $0x8] sm:$0xff] %vm58_vm4, %v5770_v39  ;;  %v157_v10 = vld [vmem:[%s9645_s26 + $0x89] sm:$0xff] }
 0x143   :  { %v1491_v15 = vsel %vm1481_vm2, %v1454_v13, %v559_v6  ;;  %94 = vst.msk [vmem:[#allocation12 + $0x10] sm:$0xff] %vm58_vm4, %v5770_v39  ;;  %v2059_v6 = vld [vmem:[#allocation2 + $0x1] ss:$2 sm:$0xff] }
 0x144   :  { %v1528_v19 = vsel %vm1518_vm3, %v1491_v15, %v669_v41  ;;  %v339_v41 = vld [vmem:[%s9645_s26 + $0x9e] sm:$0xff]  ;;  %95 = vst.msk [vmem:[#allocation12 + $0x18] sm:$0xff] %vm58_vm4, %v5770_v39  ;;  %v340_v13 = vld [vmem:[%s9645_s26 + $0xa6] sm:$0xff] }
 0x145   :  { %96 = vst.msk [vmem:[#allocation12 + $0x20] sm:$0xff] %vm58_vm4, %v5770_v39 }
 0x146   :  { %97 = vst.msk [vmem:[#allocation12 + $0x28] sm:$0xff] %vm58_vm4, %v5770_v39 }
 0x147   :  { %1364 = vrot.lane.b32.xlu2 %v338_v12, %s9652_s23  ;;  %1076 = vrot.lane.b32.xlu0 %v6479_v14, %s9646_s1  ;;  %98 = vst.msk [vmem:[#allocation12 + $0x30] sm:$0xff] %vm58_vm4, %v5770_v39 }
 0x148   :  { %1220 = vrot.lane.b32.xlu1 %v302_v11, %s9653_s24  ;;  %99 = vst.msk [vmem:[#allocation12 + $0x38] sm:$0xff] %vm58_vm4, %v5770_v39 }
 0x149   :  { %v6486_v17 = vpop.permute.xlu2 %1212  ;;  %v813_v18 = vpop.permute.xlu0 %812  ;;  %100 = vst.msk [vmem:[#allocation12 + $0x40] sm:$0xff] %vm58_vm4, %v5770_v39 }
 0x14a   :  { %v957_v16 = vpop.permute.xlu1 %956  ;;  %v1564_v20 = vsel %vm58_vm4, %v1528_v19, %v813_v18  ;;  %101 = vst.msk [vmem:[#allocation12 + $0x48] sm:$0xff] %vm58_vm4, %v5770_v39 }
 0x14b   :  { %v1601_v23 = vsel %vm1591_vm5, %v1564_v20, %v957_v16  ;;  %72 = vst.msk [vmem:[#allocation5 + $0x60] sm:$0x3f] %vm71_vm10, %v5770_v39 }
 0x14c   :  { %v1638_v27 = vsel %vm1628_vm6, %v1601_v23, %v1067_v51  ;;  %v6574_v51 = vld [vmem:[%s9645_s26 + $0x92] sm:$0xff]  ;;  %81 = vst.msk [vmem:[#allocation7] sm:$0xff] %vm80_vm11, %v5770_v39 }
 0x14d   :  { %82 = vst.msk [vmem:[#allocation7 + $0x8] sm:$0xff] %vm80_vm11, %v5770_v39 }
 0x14e   :  { %85 = vst.msk [vmem:[#allocation10] sm:$0xff] %vm80_vm11, %v5770_v39 }
 0x14f   :  { %680 = vrot.lane.b32.xlu2 %v6493_v21, %s9649_s27  ;;  %426 = vrot.lane.b32.xlu0 %v155_v22, %s9651_s28 }
 0x150   :  { %570 = vrot.lane.b32.xlu1 %v6396_v35, %s9650_s19  ;;  %v114_v35 = vld [vmem:[%s9645_s26 + $0x50] sm:$0xff] }
 0x151   :  { %v6504_v25 = vpop.permute.xlu2 %562  ;;  %v1211_v26 = vpop.permute.xlu0 %1210  ;;  %v1455_v40 = vsel %vm1444_vm1, %v114_v35, %v6442_v59  ;;  %v305_v35 = vld [vmem:[%s9645_s26 + $0xad] sm:$0xff] }
 0x152   :  { %v1355_v24 = vpop.permute.xlu1 %1354  ;;  %v1675_v28 = vsel %vm1665_vm7, %v1638_v27, %v1211_v26  ;;  %v1886_v29 = vpop.f32.mrf.mxu0  ;;  %v231_v26 = vld [vmem:[%s9645_s26 + $0x9b] sm:$0xff] }
 0x153   :  { %v1887_v30 = vadd.f32 %v6351_v8, %v1886_v29  ;;  %v1711_v31 = vsel %vm73_vm8, %v1675_v28, %v1355_v24  ;;  %v6678_v28 = vld [vmem:[%s9645_s26 + $0x9a] sm:$0xff] }
 0x154   :  { %5309 = vmatmul.msk.f32.gmra.mxu0 %vm1747_vm9, %v1711_v31 }
 0x155   :  { %v1988_v34 = vmax.f32 %v1887_v30, 0.0 }
 0x157   :  { %1078 = vrot.lane.b32.xlu2 %v6513_v32, %s9646_s1  ;;  %2024 = vst.msk [vmem:[#allocation2 + $0x18] sm:$0xff] %vm58_vm4, %v1988_v34  ;;  %824 = vrot.lane.b32.xlu0 %v229_v33, %s9648_s18  ;;  %v116_v34 = vld [vmem:[%s9645_s26 + $0x60] sm:$0xff] }
 0x158   :  { %968 = vrot.lane.b32.xlu1 %v6414_v46, %s9647_s20 }
 0x159   :  { %v6528_v37 = vpop.permute.xlu2 %960  ;;  %v561_v38 = vpop.permute.xlu0 %560 }
 0x15a   :  { %v671_v36 = vpop.permute.xlu1 %670  ;;  %v1492_v43 = vsel %vm1481_vm2, %v1455_v40, %v561_v38 }
 0x15b   :  { %v1529_v45 = vsel %vm1518_vm3, %v1492_v43, %v671_v36 }
 0x15c   :  { %v1565_v49 = vsel %vm58_vm4, %v1529_v45, %v6464_v7  ;;  %v6713_v45 = vld [vmem:[%s9645_s26 + $0xa2] sm:$0xff] }
 0x15f   :  { %428 = vrot.lane.b32.xlu2 %v156_v42, %s9651_s28  ;;  %1222 = vrot.lane.b32.xlu0 %v303_v44, %s9653_s24 }
 0x160   :  { %1366 = vrot.lane.b32.xlu1 %v339_v41, %s9652_s23 }
 0x161   :  { %v6562_v47 = vpop.permute.xlu2 %1358  ;;  %v959_v48 = vpop.permute.xlu0 %958 }
 0x162   :  { %v1069_v46 = vpop.permute.xlu1 %1068  ;;  %v1602_v50 = vsel %vm1591_vm5, %v1565_v49, %v959_v48 }
 0x163   :  { %v1639_v53 = vsel %vm1628_vm6, %v1602_v50, %v1069_v46  ;;  %v158_v46 = vld [vmem:[%s9645_s26 + $0x91] sm:$0xff] }
 0x164   :  { %v1676_v59 = vsel %vm1665_vm7, %v1639_v53, %v6486_v17 }
 0x167   :  { %826 = vrot.lane.b32.xlu2 %v230_v52, %s9648_s18  ;;  %572 = vrot.lane.b32.xlu0 %v6455_v4, %s9650_s19 }
 0x168   :  { %682 = vrot.lane.b32.xlu1 %v6574_v51, %s9649_s27  ;;  %v1889_v54 = vpop.f32.mrf.mxu0 }
 0x169   :  { %v1890_v56 = vadd.f32 %v6351_v8, %v1889_v54  ;;  %v6598_v57 = vpop.permute.xlu2 %674  ;;  %v1357_v58 = vpop.permute.xlu0 %1356 }
 0x16a   :  { %v419_v55 = vpop.permute.xlu1 %418  ;;  %v1712_v60 = vsel %vm73_vm8, %v1676_v59, %v1357_v58  ;;  %v117_v59 = vld [vmem:[%s9645_s26 + $0x68] sm:$0xff] }
 0x16b   :  { %v1989_v61 = vmax.f32 %v1890_v56, 0.0  ;;  %5310 = vmatmul.msk.f32.gmra.mxu0 %vm1747_vm9, %v1712_v60  ;;  %v1456_v1 = vsel %vm1444_vm1, %v115_v0, %v419_v55 }
 0x16c   :  { %v1493_v7 = vsel %vm1481_vm2, %v1456_v1, %v6504_v25  ;;  %v159_v1 = vld [vmem:[%s9645_s26 + $0x99] sm:$0xff] }
 0x16d   :  { %2025 = vst.msk [vmem:[#allocation2 + $0x20] sm:$0xff] %vm58_vm4, %v1989_v61 }
 0x16f   :  { %1224 = vrot.lane.b32.xlu2 %v304_v63, %s9653_s24  ;;  %970 = vrot.lane.b32.xlu0 %v6479_v14, %s9647_s20  ;;  %v2060_v14 = vmax.f32 %v2057_v5, %v2059_v6 }
 0x170   :  { %1080 = vrot.lane.b32.xlu1 %v6611_v62, %s9646_s1 }
 0x171   :  { %v6636_v3 = vpop.permute.xlu2 %1072  ;;  %v673_v4 = vpop.permute.xlu0 %672 }
 0x172   :  { %v817_v2 = vpop.permute.xlu1 %816  ;;  %v1530_v9 = vsel %vm1518_vm3, %v1493_v7, %v673_v4 }
 0x173   :  { %v1566_v16 = vsel %vm58_vm4, %v1530_v9, %v817_v2 }
 0x174   :  { %v2062_v11 = vld [vmem:[#allocation2 + $0x12] ss:$2 sm:$0xff]  ;;  %v2064_v12 = vld [vmem:[#allocation2 + $0x13] ss:$2 sm:$0xff]  ;;  %v1603_v22 = vsel %vm1591_vm5, %v1566_v16, %v6528_v37 }
 0x175   :  { %v2065_v15 = vmax.f32 %v2062_v11, %v2064_v12  ;;  %v6700_v37 = vld [vmem:[%s9645_s26 + $0xac] sm:$0xff] }
 0x176   :  { %v6769_v11 = vld [vmem:[%s9645_s26 + $0xaa] sm:$0xff] }
 0x177   :  { %574 = vrot.lane.b32.xlu2 %v6493_v21, %s9650_s19  ;;  %v2066_v17 = vmax.f32 %v2060_v14, %v2065_v15  ;;  %1368 = vrot.lane.b32.xlu0 %v340_v13, %s9652_s23  ;;  %v233_v12 = vld [vmem:[%s9645_s26 + $0xab] sm:$0xff] }
 0x178   :  { %430 = vrot.lane.b32.xlu1 %v157_v10, %s9651_s28 }
 0x179   :  { %v423_v19 = vpop.permute.xlu2 %422  ;;  %v1071_v20 = vpop.permute.xlu0 %1070  ;;  %2067 = vst.msk [vmem:[#allocation5 + $0xb] sm:$0xff] %vm58_vm4, %v2066_v17 }
 0x17a   :  { %v1215_v18 = vpop.permute.xlu1 %1214  ;;  %v1640_v23 = vsel %vm1628_vm6, %v1603_v22, %v1071_v20  ;;  %v1892_v24 = vpop.f32.mrf.mxu0  ;;  %v1458_v0 = vsel %vm1444_vm1, %v117_v59, %v423_v19 }
 0x17b   :  { %v1893_v25 = vadd.f32 %v6351_v8, %v1892_v24  ;;  %v1677_v21 = vsel %vm1665_vm7, %v1640_v23, %v1215_v18  ;;  %v6789_v23 = vld [vmem:[%s9645_s26 + $0xbc] sm:$0xff] }
 0x17c   :  { %v1713_v27 = vsel %vm73_vm8, %v1677_v21, %v6562_v47  ;;  %v307_v24 = vld [vmem:[%s9645_s26 + $0xbd] sm:$0xff] }
 0x17d   :  { %v1990_v29 = vmax.f32 %v1893_v25, 0.0  ;;  %5311 = vmatmul.msk.f32.gmra.mxu0 %vm1747_vm9, %v1713_v27  ;;  %v118_v25 = vld [vmem:[%s9645_s26 + $0x70] sm:$0xff] }
 0x17f   :  { %972 = vrot.lane.b32.xlu2 %v6513_v32, %s9647_s20  ;;  %2026 = vst.msk [vmem:[#allocation2 + $0x28] sm:$0xff] %vm58_vm4, %v1990_v29  ;;  %684 = vrot.lane.b32.xlu0 %v6678_v28, %s9649_s27  ;;  %v341_v32 = vld [vmem:[%s9645_s26 + $0xae] sm:$0xff] }
 0x180   :  { %828 = vrot.lane.b32.xlu1 %v231_v26, %s9648_s18  ;;  %v2577_v26 = vld [vmem:[%s9603_s3 + $0x88] sm:$0xff] }
 0x181   :  { %v821_v31 = vpop.permute.xlu2 %820  ;;  %v421_v33 = vpop.permute.xlu0 %420  ;;  %2673 = vmatpush.msra.mxu2 %v2577_v26 }
 0x182   :  { %v565_v30 = vpop.permute.xlu1 %564  ;;  %v1457_v36 = vsel %vm1444_vm1, %v116_v34, %v421_v33  ;;  %v160_v34 = vld [vmem:[%s9645_s26 + $0xa1] sm:$0xff] }
 0x183   :  { %v1494_v38 = vsel %vm1481_vm2, %v1457_v36, %v565_v30 }
 0x184   :  { %v1531_v43 = vsel %vm1518_vm3, %v1494_v38, %v6598_v57  ;;  %v232_v57 = vld [vmem:[%s9645_s26 + $0xa3] sm:$0xff] }
 0x187   :  { %1370 = vrot.lane.b32.xlu2 %v341_v32, %s9652_s23  ;;  %1082 = vrot.lane.b32.xlu0 %v6700_v37, %s9646_s1 }
 0x188   :  { %1226 = vrot.lane.b32.xlu1 %v305_v35, %s9653_s24  ;;  %v343_v35 = vld [vmem:[%s9645_s26 + $0xbe] sm:$0xff] }
 0x189   :  { %v1219_v41 = vpop.permute.xlu2 %1218  ;;  %v819_v42 = vpop.permute.xlu0 %818 }
 0x18a   :  { %v963_v40 = vpop.permute.xlu1 %962  ;;  %v1567_v44 = vsel %vm58_vm4, %v1531_v43, %v819_v42 }
 0x18b   :  { %v1604_v47 = vsel %vm1591_vm5, %v1567_v44, %v963_v40 }
 0x18c   :  { %v1641_v52 = vsel %vm1628_vm6, %v1604_v47, %v6636_v3  ;;  %v306_v3 = vld [vmem:[%s9645_s26 + $0xb5] sm:$0xff] }
 0x18d   :  { %v6839_v47 = vld [vmem:[%s9645_s26 + $0xb2] sm:$0xff] }
 0x18f   :  { %686 = vrot.lane.b32.xlu2 %v6713_v45, %s9649_s27  ;;  %432 = vrot.lane.b32.xlu0 %v158_v46, %s9651_s28  ;;  %v234_v46 = vld [vmem:[%s9645_s26 + $0xb3] sm:$0xff] }
 0x190   :  { %576 = vrot.lane.b32.xlu1 %v6574_v51, %s9650_s19  ;;  %v6734_v51 = vld [vmem:[%s9645_s26 + $0xb4] sm:$0xff] }
 0x191   :  { %v6724_v49 = vpop.permute.xlu2 %568  ;;  %v1217_v50 = vpop.permute.xlu0 %1216 }
 0x192   :  { %v1361_v48 = vpop.permute.xlu1 %1360  ;;  %v1678_v53 = vsel %vm1665_vm7, %v1641_v52, %v1217_v50  ;;  %v1895_v54 = vpop.f32.mrf.mxu0 }
 0x193   :  { %v1896_v55 = vadd.f32 %v6351_v8, %v1895_v54  ;;  %v1714_v56 = vsel %vm73_vm8, %v1678_v53, %v1361_v48  ;;  %v119_v53 = vld [vmem:[%s9645_s26 + $0x78] sm:$0xff]  ;;  %v308_v54 = vld [vmem:[%s9645_s26 + $0xc5] sm:$0xff] }
 0x194   :  { %5312 = vmatmul.msk.f32.gmra.mxu0 %vm1747_vm9, %v1714_v56 }
 0x195   :  { %v1991_v58 = vmax.f32 %v1896_v55, 0.0  ;;  %v344_v55 = vld [vmem:[%s9645_s26 + $0xc6] sm:$0xff] }
 0x197   :  { %1084 = vrot.lane.b32.xlu2 %v6734_v51, %s9646_s1  ;;  %2027 = vst.msk [vmem:[#allocation2 + $0x30] sm:$0xff] %vm58_vm4, %v1991_v58  ;;  %830 = vrot.lane.b32.xlu0 %v232_v57, %s9648_s18  ;;  %v6863_v58 = vld [vmem:[%s9645_s26 + $0xc4] sm:$0xff] }
 0x198   :  { %974 = vrot.lane.b32.xlu1 %v6611_v62, %s9647_s20  ;;  %v342_v62 = vld [vmem:[%s9645_s26 + $0xb6] sm:$0xff] }
 0x199   :  { %v967_v61 = vpop.permute.xlu2 %966  ;;  %v567_v63 = vpop.permute.xlu0 %566 }
 0x19a   :  { %v677_v60 = vpop.permute.xlu1 %676  ;;  %v1495_v2 = vsel %vm1481_vm2, %v1458_v0, %v567_v63 }
 0x19b   :  { %v1532_v4 = vsel %vm1518_vm3, %v1495_v2, %v677_v60 }
 0x19c   :  { %v1568_v9 = vsel %vm58_vm4, %v1532_v4, %v821_v31  ;;  %v2576_v31 = vld [vmem:[%s9603_s3 + $0x80] sm:$0xff] }
 0x19d   :  { %2674 = vmatpush.msra.mxu2 %v2576_v31 }
 0x19e   :  { %v2069_v56 = vld [vmem:[#allocation2 + $0x24] ss:$2 sm:$0xff] }
 0x19f   :  { %434 = vrot.lane.b32.xlu2 %v159_v1, %s9651_s28  ;;  %1228 = vrot.lane.b32.xlu0 %v306_v3, %s9653_s24 }
 0x1a0   :  { %1372 = vrot.lane.b32.xlu1 %v342_v62, %s9652_s23 }
 0x1a1   :  { %v1365_v6 = vpop.permute.xlu2 %1364  ;;  %v965_v7 = vpop.permute.xlu0 %964 }
 0x1a2   :  { %v1075_v5 = vpop.permute.xlu1 %1074  ;;  %v1605_v10 = vsel %vm1591_vm5, %v1568_v9, %v965_v7  ;;  %v161_v7 = vld [vmem:[%s9645_s26 + $0xa9] sm:$0xff] }
 0x1a3   :  { %v1642_v13 = vsel %vm1628_vm6, %v1605_v10, %v1075_v5 }
 0x1a4   :  { %v1679_v19 = vsel %vm1665_vm7, %v1642_v13, %v1219_v41 }
 0x1a7   :  { %832 = vrot.lane.b32.xlu2 %v233_v12, %s9648_s18  ;;  %578 = vrot.lane.b32.xlu0 %v6678_v28, %s9650_s19 }
 0x1a8   :  { %688 = vrot.lane.b32.xlu1 %v6769_v11, %s9649_s27  ;;  %v1898_v14 = vpop.f32.mrf.mxu0 }
 0x1a9   :  { %v1899_v16 = vadd.f32 %v6351_v8, %v1898_v14  ;;  %v6781_v17 = vpop.permute.xlu2 %680  ;;  %v1363_v18 = vpop.permute.xlu0 %1362 }
 0x1aa   :  { %v425_v15 = vpop.permute.xlu1 %424  ;;  %v1715_v20 = vsel %vm73_vm8, %v1679_v19, %v1363_v18  ;;  %v6897_v19 = vld [vmem:[%s9645_s26 + $0xcc] sm:$0xff] }
 0x1ab   :  { %v1992_v22 = vmax.f32 %v1899_v16, 0.0  ;;  %5313 = vmatmul.msk.f32.gmra.mxu0 %vm1747_vm9, %v1715_v20  ;;  %v1459_v21 = vsel %vm1444_vm1, %v118_v25, %v425_v15  ;;  %v235_v20 = vld [vmem:[%s9645_s26 + $0xbb] sm:$0xff] }
 0x1ac   :  { %v1496_v30 = vsel %vm1481_vm2, %v1459_v21, %v6724_v49 }
 0x1ad   :  { %2028 = vst.msk [vmem:[#allocation2 + $0x38] sm:$0xff] %vm58_vm4, %v1992_v22 }
 0x1af   :  { %1230 = vrot.lane.b32.xlu2 %v307_v24, %s9653_s24  ;;  %976 = vrot.lane.b32.xlu0 %v6700_v37, %s9647_s20  ;;  %v120_v24 = vld [vmem:[%s9645_s26 + $0x80] sm:$0xff] }
 0x1b0   :  { %1086 = vrot.lane.b32.xlu1 %v6789_v23, %s9646_s1 }
 0x1b1   :  { %v6807_v28 = vpop.permute.xlu2 %1078  ;;  %v679_v29 = vpop.permute.xlu0 %678 }
 0x1b2   :  { %v823_v27 = vpop.permute.xlu1 %822  ;;  %v1533_v33 = vsel %vm1518_vm3, %v1496_v30, %v679_v29  ;;  %v309_v30 = vld [vmem:[%s9645_s26 + $0xcd] sm:$0xff] }
 0x1b3   :  { %v1569_v32 = vsel %vm58_vm4, %v1533_v33, %v823_v27 }
 0x1b4   :  { %v1606_v40 = vsel %vm1591_vm5, %v1569_v32, %v967_v61 }
 0x1b7   :  { %580 = vrot.lane.b32.xlu2 %v6713_v45, %s9650_s19  ;;  %1374 = vrot.lane.b32.xlu0 %v343_v35, %s9652_s23 }
 0x1b8   :  { %436 = vrot.lane.b32.xlu1 %v160_v34, %s9651_s28 }
 0x1b9   :  { %v6826_v37 = vpop.permute.xlu2 %428  ;;  %v1077_v38 = vpop.permute.xlu0 %1076 }
 0x1ba   :  { %v1221_v36 = vpop.permute.xlu1 %1220  ;;  %v1643_v41 = vsel %vm1628_vm6, %v1606_v40, %v1077_v38  ;;  %v1901_v42 = vpop.f32.mrf.mxu0  ;;  %v1461_v27 = vsel %vm1444_vm1, %v120_v24, %v6826_v37  ;;  %v6934_v37 = vld [vmem:[%s9645_s26 + $0xc2] sm:$0xff] }
 0x1bb   :  { %v1902_v43 = vadd.f32 %v6351_v8, %v1901_v42  ;;  %v1680_v44 = vsel %vm1665_vm7, %v1643_v41, %v1221_v36  ;;  %v236_v38 = vld [vmem:[%s9645_s26 + $0xc3] sm:$0xff] }
 0x1bc   :  { %v1716_v45 = vsel %vm73_vm8, %v1680_v44, %v1365_v6  ;;  %v6876_v6 = vld [vmem:[%s9645_s26 + $0xba] sm:$0xff] }
 0x1bd   :  { %v1993_v48 = vmax.f32 %v1902_v43, 0.0  ;;  %5314 = vmatmul.msk.f32.gmra.mxu0 %vm1747_vm9, %v1716_v45 }
 0x1bf   :  { %978 = vrot.lane.b32.xlu2 %v6734_v51, %s9647_s20  ;;  %2029 = vst.msk [vmem:[#allocation2 + $0x40] sm:$0xff] %vm58_vm4, %v1993_v48  ;;  %690 = vrot.lane.b32.xlu0 %v6839_v47, %s9649_s27  ;;  %v2071_v51 = vld [vmem:[#allocation2 + $0x25] ss:$2 sm:$0xff] }
 0x1c0   :  { %834 = vrot.lane.b32.xlu1 %v234_v46, %s9648_s18  ;;  %v2072_v61 = vmax.f32 %v2069_v56, %v2071_v51 }
 0x1c1   :  { %v6848_v50 = vpop.permute.xlu2 %826  ;;  %v427_v52 = vpop.permute.xlu0 %426 }
 0x1c2   :  { %v571_v49 = vpop.permute.xlu1 %570  ;;  %v1460_v57 = vsel %vm1444_vm1, %v119_v53, %v427_v52  ;;  %v121_v52 = vld [vmem:[%s9645_s26 + $0x88] sm:$0xff] }
 0x1c3   :  { %v1497_v0 = vsel %vm1481_vm2, %v1460_v57, %v571_v49 }
 0x1c4   :  { %v1534_v4 = vsel %vm1518_vm3, %v1497_v0, %v6781_v17 }
 0x1c6   :  { %v2074_v59 = vld [vmem:[#allocation2 + $0x36] ss:$2 sm:$0xff]  ;;  %v2076_v60 = vld [vmem:[#allocation2 + $0x37] ss:$2 sm:$0xff] }
 0x1c7   :  { %1376 = vrot.lane.b32.xlu2 %v344_v55, %s9652_s23  ;;  %v2077_v63 = vmax.f32 %v2074_v59, %v2076_v60  ;;  %1088 = vrot.lane.b32.xlu0 %v6863_v58, %s9646_s1  ;;  %v163_v59 = vld [vmem:[%s9645_s26 + $0xb9] sm:$0xff] }
 0x1c8   :  { %1232 = vrot.lane.b32.xlu1 %v308_v54, %s9653_s24  ;;  %v346_v60 = vld [vmem:[%s9645_s26 + $0xd6] sm:$0xff] }
 0x1c9   :  { %v2078_v1 = vmax.f32 %v2072_v61, %v2077_v63  ;;  %v1225_v2 = vpop.permute.xlu2 %1224  ;;  %v825_v3 = vpop.permute.xlu0 %824 }
 0x1ca   :  { %v969_v62 = vpop.permute.xlu1 %968  ;;  %v1570_v5 = vsel %vm58_vm4, %v1534_v4, %v825_v3 }
 0x1cb   :  { %2079 = vst.msk [vmem:[#allocation5 + $0x15] sm:$0xff] %vm58_vm4, %v2078_v1  ;;  %v1607_v9 = vsel %vm1591_vm5, %v1570_v5, %v969_v62  ;;  %v237_v5 = vld [vmem:[%s9645_s26 + $0xcb] sm:$0xff] }
 0x1cc   :  { %v1644_v14 = vsel %vm1628_vm6, %v1607_v9, %v6807_v28  ;;  %v162_v28 = vld [vmem:[%s9645_s26 + $0xb1] sm:$0xff] }
 0x1cf   :  { %692 = vrot.lane.b32.xlu2 %v6876_v6, %s9649_s27  ;;  %438 = vrot.lane.b32.xlu0 %v161_v7, %s9651_s28  ;;  %v6991_v7 = vld [vmem:[%s9645_s26 + $0xca] sm:$0xff] }
 0x1d0   :  { %582 = vrot.lane.b32.xlu1 %v6769_v11, %s9650_s19 }
 0x1d1   :  { %v575_v12 = vpop.permute.xlu2 %574  ;;  %v1223_v13 = vpop.permute.xlu0 %1222 }
 0x1d2   :  { %v1367_v10 = vpop.permute.xlu1 %1366  ;;  %v1681_v15 = vsel %vm1665_vm7, %v1644_v14, %v1223_v13  ;;  %v1904_v16 = vpop.f32.mrf.mxu0  ;;  %v2214_v17 = vld [vmem:[#allocation5 + $0x16] sm:$0xff]  ;;  %v122_v14 = vld [vmem:[%s9645_s26 + $0x90] sm:$0xff] }
 0x1d3   :  { %v1905_v18 = vadd.f32 %v6351_v8, %v1904_v16  ;;  %5336 = vmatmul.msk.f32.vlgmr.msra.gmra.mxu2 %vm58_vm4, %v2214_v17  ;;  %v1717_v11 = vsel %vm73_vm8, %v1681_v15, %v1367_v10  ;;  %v311_v15 = vld [vmem:[%s9645_s26 + $0xdd] sm:$0xff] }
 0x1d4   :  { %5315 = vmatmul.msk.f32.gmra.mxu0 %vm1747_vm9, %v1717_v11  ;;  %v347_v16 = vld [vmem:[%s9645_s26 + $0xde] sm:$0xff] }
 0x1d5   :  { %v1994_v22 = vmax.f32 %v1905_v18, 0.0  ;;  %v7013_v18 = vld [vmem:[%s9645_s26 + $0xdc] sm:$0xff] }
 0x1d7   :  { %1090 = vrot.lane.b32.xlu2 %v6897_v19, %s9646_s1  ;;  %2030 = vst.msk [vmem:[#allocation2 + $0x48] sm:$0xff] %vm58_vm4, %v1994_v22  ;;  %836 = vrot.lane.b32.xlu0 %v235_v20, %s9648_s18 }
 0x1d8   :  { %980 = vrot.lane.b32.xlu1 %v6789_v23, %s9647_s20  ;;  %v345_v23 = vld [vmem:[%s9645_s26 + $0xce] sm:$0xff] }
 0x1d9   :  { %v973_v21 = vpop.permute.xlu2 %972  ;;  %v573_v26 = vpop.permute.xlu0 %572 }
 0x1da   :  { %v683_v25 = vpop.permute.xlu1 %682  ;;  %v1498_v29 = vsel %vm1481_vm2, %v1461_v27, %v573_v26  ;;  %v164_v26 = vld [vmem:[%s9645_s26 + $0xc1] sm:$0xff] }
 0x1db   :  { %v1535_v31 = vsel %vm1518_vm3, %v1498_v29, %v683_v25 }
 0x1dc   :  { %v1571_v32 = vsel %vm58_vm4, %v1535_v31, %v6848_v50  ;;  %v6952_v50 = vld [vmem:[%s9645_s26 + $0xd4] sm:$0xff] }
 0x1df   :  { %440 = vrot.lane.b32.xlu2 %v162_v28, %s9651_s28  ;;  %1234 = vrot.lane.b32.xlu0 %v309_v30, %s9653_s24 }
 0x1e0   :  { %1378 = vrot.lane.b32.xlu1 %v345_v23, %s9652_s23 }
 0x1e1   :  { %v1371_v34 = vpop.permute.xlu2 %1370  ;;  %v971_v35 = vpop.permute.xlu0 %970 }
 0x1e2   :  { %v1081_v33 = vpop.permute.xlu1 %1080  ;;  %v1608_v36 = vsel %vm1591_vm5, %v1571_v32, %v971_v35  ;;  %v7045_v32 = vld [vmem:[%s9645_s26 + $0xe4] sm:$0xff] }
 0x1e3   :  { %v1645_v40 = vsel %vm1628_vm6, %v1608_v36, %v1081_v33  ;;  %v238_v36 = vld [vmem:[%s9645_s26 + $0xd3] sm:$0xff] }
 0x1e4   :  { %v1682_v45 = vsel %vm1665_vm7, %v1645_v40, %v1225_v2 }
 0x1e7   :  { %838 = vrot.lane.b32.xlu2 %v236_v38, %s9648_s18  ;;  %584 = vrot.lane.b32.xlu0 %v6839_v47, %s9650_s19  ;;  %v310_v47 = vld [vmem:[%s9645_s26 + $0xd5] sm:$0xff] }
 0x1e8   :  { %694 = vrot.lane.b32.xlu1 %v6934_v37, %s9649_s27  ;;  %v1907_v41 = vpop.f32.mrf.mxu0 }
 0x1e9   :  { %v1908_v43 = vadd.f32 %v6351_v8, %v1907_v41  ;;  %v687_v44 = vpop.permute.xlu2 %686  ;;  %v1369_v46 = vpop.permute.xlu0 %1368 }
 0x1ea   :  { %v431_v42 = vpop.permute.xlu1 %430  ;;  %v1718_v48 = vsel %vm73_vm8, %v1682_v45, %v1369_v46  ;;  %v312_v45 = vld [vmem:[%s9645_s26 + $0xe5] sm:$0xff] }
 0x1eb   :  { %v1995_v49 = vmax.f32 %v1908_v43, 0.0  ;;  %5316 = vmatmul.msk.f32.gmra.mxu0 %vm1747_vm9, %v1718_v48  ;;  %v1462_v53 = vsel %vm1444_vm1, %v121_v52, %v431_v42  ;;  %v348_v43 = vld [vmem:[%s9645_s26 + $0xe6] sm:$0xff] }
 0x1ec   :  { %v1499_v51 = vsel %vm1481_vm2, %v1462_v53, %v575_v12 }
 0x1ed   :  { %2031 = vst.msk [vmem:[#allocation2 + $0x50] sm:$0xff] %vm58_vm4, %v1995_v49 }
 0x1ef   :  { %1236 = vrot.lane.b32.xlu2 %v310_v47, %s9653_s24  ;;  %982 = vrot.lane.b32.xlu0 %v6863_v58, %s9647_s20 }
 0x1f0   :  { %1092 = vrot.lane.b32.xlu1 %v6952_v50, %s9646_s1 }
 0x1f1   :  { %v1085_v55 = vpop.permute.xlu2 %1084  ;;  %v685_v56 = vpop.permute.xlu0 %684 }
 0x1f2   :  { %v829_v54 = vpop.permute.xlu1 %828  ;;  %v1536_v57 = vsel %vm1518_vm3, %v1499_v51, %v685_v56 }
 0x1f3   :  { %v1572_v61 = vsel %vm58_vm4, %v1536_v57, %v829_v54  ;;  %v7082_v54 = vld [vmem:[%s9645_s26 + $0xda] sm:$0xff] }
 0x1f4   :  { %v1609_v62 = vsel %vm1591_vm5, %v1572_v61, %v973_v21  ;;  %v7025_v21 = vld [vmem:[%s9645_s26 + $0xd2] sm:$0xff] }
 0x1f7   :  { %586 = vrot.lane.b32.xlu2 %v6876_v6, %s9650_s19  ;;  %1380 = vrot.lane.b32.xlu0 %v346_v60, %s9652_s23 }
 0x1f8   :  { %442 = vrot.lane.b32.xlu1 %v163_v59, %s9651_s28  ;;  %v7096_v59 = vld [vmem:[%s9602_s2] ss:$0 sm:$0xff] }
 0x1f9   :  { %v435_v63 = vpop.permute.xlu2 %434  ;;  %v1083_v0 = vpop.permute.xlu0 %1082 }
 0x1fa   :  { %v1227_v58 = vpop.permute.xlu1 %1226  ;;  %v1646_v1 = vsel %vm1628_vm6, %v1609_v62, %v1083_v0  ;;  %v1910_v2 = vpop.f32.mrf.mxu0 }
 0x1fb   :  { %v1911_v3 = vadd.f32 %v6351_v8, %v1910_v2  ;;  %v1683_v4 = vsel %vm1665_vm7, %v1646_v1, %v1227_v58  ;;  %v7107_v1 = vld [vmem:[%s9645_s26 + $0xec] sm:$0xff] }
 0x1fc   :  { %v1719_v6 = vsel %vm73_vm8, %v1683_v4, %v1371_v34  ;;  %v313_v2 = vld [vmem:[%s9645_s26 + $0xed] sm:$0xff] }
 0x1fd   :  { %v1996_v9 = vmax.f32 %v1911_v3, 0.0  ;;  %5317 = vmatmul.msk.f32.gmra.mxu0 %vm1747_vm9, %v1719_v6  ;;  %v124_v3 = vld [vmem:[%s9645_s26 + $0xa0] sm:$0xff] }
 0x1ff   :  { %984 = vrot.lane.b32.xlu2 %v6897_v19, %s9647_s20  ;;  %2032 = vst.msk [vmem:[#allocation2 + $0x58] sm:$0xff] %vm58_vm4, %v1996_v9  ;;  %696 = vrot.lane.b32.xlu0 %v6991_v7, %s9649_s27  ;;  %v2081_v9 = vld [vmem:[#allocation2 + $0x48] ss:$2 sm:$0xff] }
 0x200   :  { %840 = vrot.lane.b32.xlu1 %v237_v5, %s9648_s18 }
 0x201   :  { %v833_v12 = vpop.permute.xlu2 %832  ;;  %v433_v13 = vpop.permute.xlu0 %432 }
 0x202   :  { %v577_v10 = vpop.permute.xlu1 %576  ;;  %v1463_v17 = vsel %vm1444_vm1, %v122_v14, %v433_v13  ;;  %v166_v14 = vld [vmem:[%s9645_s26 + $0xd1] sm:$0xff] }
 0x203   :  { %v1500_v11 = vsel %vm1481_vm2, %v1463_v17, %v577_v10  ;;  %v2083_v10 = vld [vmem:[#allocation2 + $0x49] ss:$2 sm:$0xff] }
 0x204   :  { %v1537_v24 = vsel %vm1518_vm3, %v1500_v11, %v687_v44  ;;  %v165_v44 = vld [vmem:[%s9645_s26 + $0xc9] sm:$0xff] }
 0x205   :  { %v349_v17 = vld [vmem:[%s9645_s26 + $0xee] sm:$0xff] }
 0x207   :  { %1382 = vrot.lane.b32.xlu2 %v347_v16, %s9652_s23  ;;  %1094 = vrot.lane.b32.xlu0 %v7013_v18, %s9646_s1 }
 0x208   :  { %1238 = vrot.lane.b32.xlu1 %v311_v15, %s9653_s24 }
 0x209   :  { %v1231_v20 = vpop.permute.xlu2 %1230  ;;  %v831_v22 = vpop.permute.xlu0 %830 }
 0x20a   :  { %v975_v19 = vpop.permute.xlu1 %974  ;;  %v1573_v25 = vsel %vm58_vm4, %v1537_v24, %v831_v22 }
 0x20b   :  { %v1610_v27 = vsel %vm1591_vm5, %v1573_v25, %v975_v19 }
 0x20c   :  { %v1647_v30 = vsel %vm1628_vm6, %v1610_v27, %v1085_v55  ;;  %v239_v55 = vld [vmem:[%s9645_s26 + $0xdb] sm:$0xff] }
 0x20f   :  { %698 = vrot.lane.b32.xlu2 %v7025_v21, %s9649_s27  ;;  %444 = vrot.lane.b32.xlu0 %v164_v26, %s9651_s28 }
 0x210   :  { %588 = vrot.lane.b32.xlu1 %v6934_v37, %s9650_s19 }
 0x211   :  { %v7036_v28 = vpop.permute.xlu2 %580  ;;  %v1229_v29 = vpop.permute.xlu0 %1228 }
 0x212   :  { %v1373_v23 = vpop.permute.xlu1 %1372  ;;  %v1684_v31 = vsel %vm1665_vm7, %v1647_v30, %v1229_v29  ;;  %v1913_v33 = vpop.f32.mrf.mxu0 }
 0x213   :  { %v1914_v34 = vadd.f32 %v6351_v8, %v1913_v33  ;;  %v1720_v35 = vsel %vm73_vm8, %v1684_v31, %v1373_v23  ;;  %v123_v8 = vld [vmem:[%s9645_s26 + $0x98] sm:$0xff]  ;;  %v7151_v31 = vld [vmem:[%s9645_s26 + $0xe2] sm:$0xff] }
 0x214   :  { %5318 = vmatmul.msk.f32.gmra.mxu0 %vm1747_vm9, %v1720_v35  ;;  %v1464_v42 = vsel %vm1444_vm1, %v123_v8, %v435_v63  ;;  %v125_v8 = vld [vmem:[%s9645_s26 + $0xa8] sm:$0xff] }
 0x215   :  { %v1997_v37 = vmax.f32 %v1914_v34, 0.0 }
 0x217   :  { %1096 = vrot.lane.b32.xlu2 %v7045_v32, %s9646_s1  ;;  %2033 = vst.msk [vmem:[#allocation2 + $0x60] sm:$0xff] %vm58_vm4, %v1997_v37  ;;  %842 = vrot.lane.b32.xlu0 %v238_v36, %s9648_s18 }
 0x218   :  { %986 = vrot.lane.b32.xlu1 %v6952_v50, %s9647_s20 }
 0x219   :  { %v7060_v40 = vpop.permute.xlu2 %978  ;;  %v579_v41 = vpop.permute.xlu0 %578 }
 0x21a   :  { %v689_v38 = vpop.permute.xlu1 %688  ;;  %v1501_v46 = vsel %vm1481_vm2, %v1464_v42, %v579_v41  ;;  %v7174_v41 = vld [vmem:[%s9645_s26 + $0xf4] sm:$0xff] }
 0x21b   :  { %v1538_v48 = vsel %vm1518_vm3, %v1501_v46, %v689_v38  ;;  %v314_v38 = vld [vmem:[%s9645_s26 + $0xf5] sm:$0xff] }
 0x21c   :  { %v1574_v52 = vsel %vm58_vm4, %v1538_v48, %v833_v12 }
 0x21f   :  { %446 = vrot.lane.b32.xlu2 %v165_v44, %s9651_s28  ;;  %1240 = vrot.lane.b32.xlu0 %v312_v45, %s9653_s24 }
 0x220   :  { %1384 = vrot.lane.b32.xlu1 %v348_v43, %s9652_s23 }
 0x221   :  { %v1377_v50 = vpop.permute.xlu2 %1376  ;;  %v977_v47 = vpop.permute.xlu0 %976 }
 0x222   :  { %v1087_v49 = vpop.permute.xlu1 %1086  ;;  %v1611_v53 = vsel %vm1591_vm5, %v1574_v52, %v977_v47 }
 0x223   :  { %v1648_v56 = vsel %vm1628_vm6, %v1611_v53, %v1087_v49  ;;  %v7187_v49 = vld [vmem:[%s9645_s26 + $0xea] sm:$0xff] }
 0x224   :  { %v1685_v63 = vsel %vm1665_vm7, %v1648_v56, %v1231_v20 }
 0x227   :  { %844 = vrot.lane.b32.xlu2 %v239_v55, %s9648_s18  ;;  %590 = vrot.lane.b32.xlu0 %v6991_v7, %s9650_s19 }
 0x228   :  { %700 = vrot.lane.b32.xlu1 %v7082_v54, %s9649_s27  ;;  %v1916_v51 = vpop.f32.mrf.mxu0 }
 0x229   :  { %v1917_v60 = vadd.f32 %v7096_v59, %v1916_v51  ;;  %v7099_v61 = vpop.permute.xlu2 %692  ;;  %v1375_v58 = vpop.permute.xlu0 %1374 }
 0x22a   :  { %v437_v57 = vpop.permute.xlu1 %436  ;;  %v1721_v0 = vsel %vm73_vm8, %v1685_v63, %v1375_v58  ;;  %v241_v58 = vld [vmem:[%s9645_s26 + $0xeb] sm:$0xff] }
 0x22b   :  { %v1998_v62 = vmax.f32 %v1917_v60, 0.0  ;;  %5319 = vmatmul.msk.f32.gmra.mxu0 %vm1747_vm9, %v1721_v0  ;;  %v1465_v4 = vsel %vm1444_vm1, %v124_v3, %v437_v57  ;;  %v126_v0 = vld [vmem:[%s9645_s26 + $0xb0] sm:$0xff] }
 0x22c   :  { %v1502_v12 = vsel %vm1481_vm2, %v1465_v4, %v7036_v28 }
 0x22d   :  { %2034 = vst.msk [vmem:[#allocation2 + $0x68] sm:$0xff] %vm58_vm4, %v1998_v62 }
 0x22f   :  { %1242 = vrot.lane.b32.xlu2 %v313_v2, %s9653_s24  ;;  %988 = vrot.lane.b32.xlu0 %v7013_v18, %s9647_s20  ;;  %v2084_v18 = vmax.f32 %v2081_v9, %v2083_v10 }
 0x230   :  { %1098 = vrot.lane.b32.xlu1 %v7107_v1, %s9646_s1 }
 0x231   :  { %v7122_v6 = vpop.permute.xlu2 %1090  ;;  %v691_v7 = vpop.permute.xlu0 %690 }
 0x232   :  { %v835_v5 = vpop.permute.xlu1 %834  ;;  %v1539_v13 = vsel %vm1518_vm3, %v1502_v12, %v691_v7  ;;  %v315_v7 = vld [vmem:[%s9645_s26 + $0xfd] sm:$0xff] }
 0x233   :  { %v1575_v19 = vsel %vm58_vm4, %v1539_v13, %v835_v5  ;;  %v168_v5 = vld [vmem:[%s9645_s26 + $0xe1] sm:$0xff] }
 0x234   :  { %v2086_v15 = vld [vmem:[#allocation2 + $0x5a] ss:$2 sm:$0xff]  ;;  %v2088_v16 = vld [vmem:[#allocation2 + $0x5b] ss:$2 sm:$0xff]  ;;  %v1612_v26 = vsel %vm1591_vm5, %v1575_v19, %v7060_v40 }
 0x235   :  { %v2089_v11 = vmax.f32 %v2086_v15, %v2088_v16  ;;  %v7241_v16 = vld [vmem:[%s9645_s26 + $0xf2] sm:$0xff] }
 0x237   :  { %592 = vrot.lane.b32.xlu2 %v7025_v21, %s9650_s19  ;;  %v2090_v20 = vmax.f32 %v2084_v18, %v2089_v11  ;;  %1386 = vrot.lane.b32.xlu0 %v349_v17, %s9652_s23  ;;  %v240_v21 = vld [vmem:[%s9645_s26 + $0xe3] sm:$0xff]  ;;  %v242_v17 = vld [vmem:[%s9645_s26 + $0xf3] sm:$0xff] }
 0x238   :  { %448 = vrot.lane.b32.xlu1 %v166_v14, %s9651_s28 }
 0x239   :  { %2091 = vst.msk [vmem:[#allocation5 + $0x1f] sm:$0xff] %vm58_vm4, %v2090_v20  ;;  %v441_v24 = vpop.permute.xlu2 %440  ;;  %v1089_v25 = vpop.permute.xlu0 %1088 }
 0x23a   :  { %v1233_v22 = vpop.permute.xlu1 %1232  ;;  %v1649_v27 = vsel %vm1628_vm6, %v1612_v26, %v1089_v25  ;;  %v1919_v23 = vpop.f32.mrf.mxu0  ;;  %v1467_v4 = vsel %vm1444_vm1, %v126_v0, %v441_v24 }
 0x23b   :  { %v1920_v28 = vadd.f32 %v7096_v59, %v1919_v23  ;;  %v1686_v29 = vsel %vm1665_vm7, %v1649_v27, %v1233_v22  ;;  %v7261_v23 = vld [vmem:[%s9645_s26 + $0x104] sm:$0xff] }
 0x23c   :  { %v1722_v30 = vsel %vm73_vm8, %v1686_v29, %v1377_v50  ;;  %v167_v50 = vld [vmem:[%s9645_s26 + $0xd9] sm:$0xff] }
 0x23d   :  { %v1999_v33 = vmax.f32 %v1920_v28, 0.0  ;;  %5320 = vmatmul.msk.f32.gmra.mxu0 %vm1747_vm9, %v1722_v30  ;;  %v316_v28 = vld [vmem:[%s9645_s26 + $0x105] sm:$0xff]  ;;  %v127_v29 = vld [vmem:[%s9645_s26 + $0xb8] sm:$0xff] }
 0x23f   :  { %990 = vrot.lane.b32.xlu2 %v7045_v32, %s9647_s20  ;;  %2035 = vst.msk [vmem:[#allocation2 + $0x70] sm:$0xff] %vm58_vm4, %v1999_v33  ;;  %702 = vrot.lane.b32.xlu0 %v7151_v31, %s9649_s27  ;;  %v350_v32 = vld [vmem:[%s9645_s26 + $0xf6] sm:$0xff] }
 0x240   :  { %846 = vrot.lane.b32.xlu1 %v240_v21, %s9648_s18  ;;  %v2215_v35 = vld [vmem:[#allocation5 + $0x1e] sm:$0xff] }
 0x241   :  { %v839_v36 = vpop.permute.xlu2 %838  ;;  %v439_v37 = vpop.permute.xlu0 %438  ;;  %5337 = vmatmul.msk.f32.gmra.mxu2 %vm58_vm4, %v2215_v35 }
 0x242   :  { %v583_v34 = vpop.permute.xlu1 %582  ;;  %v1466_v40 = vsel %vm1444_vm1, %v125_v8, %v439_v37  ;;  %v352_v37 = vld [vmem:[%s9645_s26 + $0x106] sm:$0xff] }
 0x243   :  { %v1503_v42 = vsel %vm1481_vm2, %v1466_v40, %v583_v34 }
 0x244   :  { %v1540_v45 = vsel %vm1518_vm3, %v1503_v42, %v7099_v61 }
 0x247   :  { %1388 = vrot.lane.b32.xlu2 %v350_v32, %s9652_s23  ;;  %1100 = vrot.lane.b32.xlu0 %v7174_v41, %s9646_s1 }
 0x248   :  { %1244 = vrot.lane.b32.xlu1 %v314_v38, %s9653_s24 }
 0x249   :  { %v1237_v44 = vpop.permute.xlu2 %1236  ;;  %v837_v46 = vpop.permute.xlu0 %836 }
 0x24a   :  { %v981_v43 = vpop.permute.xlu1 %980  ;;  %v1576_v48 = vsel %vm58_vm4, %v1540_v45, %v837_v46  ;;  %v243_v45 = vld [vmem:[%s9645_s26 + $0xfb] sm:$0xff] }
 0x24b   :  { %v1613_v47 = vsel %vm1591_vm5, %v1576_v48, %v981_v43 }
 0x24c   :  { %v1650_v56 = vsel %vm1628_vm6, %v1613_v47, %v7122_v6 }
 0x24f   :  { %704 = vrot.lane.b32.xlu2 %v7187_v49, %s9649_s27  ;;  %450 = vrot.lane.b32.xlu0 %v167_v50, %s9651_s28 }
 0x250   :  { %594 = vrot.lane.b32.xlu1 %v7082_v54, %s9650_s19  ;;  %v7206_v54 = vld [vmem:[%s9645_s26 + $0xfc] sm:$0xff] }
 0x251   :  { %v587_v53 = vpop.permute.xlu2 %586  ;;  %v1235_v55 = vpop.permute.xlu0 %1234 }
 0x252   :  { %v1379_v52 = vpop.permute.xlu1 %1378  ;;  %v1687_v51 = vsel %vm1665_vm7, %v1650_v56, %v1235_v55  ;;  %v1922_v57 = vpop.f32.mrf.mxu0  ;;  %v128_v55 = vld [vmem:[%s9645_s26 + $0xc0] sm:$0xff]  ;;  %v317_v56 = vld [vmem:[%s9645_s26 + $0x10d] sm:$0xff] }
 0x253   :  { %v1923_v60 = vadd.f32 %v7096_v59, %v1922_v57  ;;  %v1723_v61 = vsel %vm73_vm8, %v1687_v51, %v1379_v52  ;;  %v353_v51 = vld [vmem:[%s9645_s26 + $0x10e] sm:$0xff] }
 0x254   :  { %5321 = vmatmul.msk.f32.gmra.mxu0 %vm1747_vm9, %v1723_v61 }
 0x255   :  { %v2000_v63 = vmax.f32 %v1923_v60, 0.0 }
 0x257   :  { %1102 = vrot.lane.b32.xlu2 %v7206_v54, %s9646_s1  ;;  %2036 = vst.msk [vmem:[#allocation2 + $0x78] sm:$0xff] %vm58_vm4, %v2000_v63  ;;  %848 = vrot.lane.b32.xlu0 %v241_v58, %s9648_s18 }
 0x258   :  { %992 = vrot.lane.b32.xlu1 %v7107_v1, %s9647_s20  ;;  %v351_v1 = vld [vmem:[%s9645_s26 + $0xfe] sm:$0xff] }
 0x259   :  { %v985_v2 = vpop.permute.xlu2 %984  ;;  %v585_v3 = vpop.permute.xlu0 %584 }
 0x25a   :  { %v695_v62 = vpop.permute.xlu1 %694  ;;  %v1504_v6 = vsel %vm1481_vm2, %v1467_v4, %v585_v3 }
 0x25b   :  { %v1541_v9 = vsel %vm1518_vm3, %v1504_v6, %v695_v62 }
 0x25c   :  { %v1577_v14 = vsel %vm58_vm4, %v1541_v9, %v839_v36  ;;  %v169_v36 = vld [vmem:[%s9645_s26 + $0xe9] sm:$0xff] }
 0x25d   :  { %v7340_v9 = vld [vmem:[%s9645_s26 + $0x102] sm:$0xff] }
 0x25e   :  { %v2093_v57 = vld [vmem:[#allocation2 + $0x6c] ss:$2 sm:$0xff]  ;;  %v2095_v60 = vld [vmem:[#allocation2 + $0x6d] ss:$2 sm:$0xff] }
 0x25f   :  { %452 = vrot.lane.b32.xlu2 %v168_v5, %s9651_s28  ;;  %1246 = vrot.lane.b32.xlu0 %v315_v7, %s9653_s24  ;;  %v2096_v0 = vmax.f32 %v2093_v57, %v2095_v60 }
 0x260   :  { %1390 = vrot.lane.b32.xlu1 %v351_v1, %s9652_s23 }
 0x261   :  { %v1383_v12 = vpop.permute.xlu2 %1382  ;;  %v983_v13 = vpop.permute.xlu0 %982 }
 0x262   :  { %v1093_v10 = vpop.permute.xlu1 %1092  ;;  %v1614_v15 = vsel %vm1591_vm5, %v1577_v14, %v983_v13 }
 0x263   :  { %v1651_v18 = vsel %vm1628_vm6, %v1614_v15, %v1093_v10  ;;  %v170_v10 = vld [vmem:[%s9645_s26 + $0xf1] sm:$0xff] }
 0x264   :  { %v1688_v25 = vsel %vm1665_vm7, %v1651_v18, %v1237_v44 }
 0x267   :  { %850 = vrot.lane.b32.xlu2 %v242_v17, %s9648_s18  ;;  %596 = vrot.lane.b32.xlu0 %v7151_v31, %s9650_s19 }
 0x268   :  { %706 = vrot.lane.b32.xlu1 %v7241_v16, %s9649_s27  ;;  %v1925_v11 = vpop.f32.mrf.mxu0 }
 0x269   :  { %v1926_v20 = vadd.f32 %v7096_v59, %v1925_v11  ;;  %v7253_v22 = vpop.permute.xlu2 %698  ;;  %v1381_v24 = vpop.permute.xlu0 %1380 }
 0x26a   :  { %v443_v19 = vpop.permute.xlu1 %442  ;;  %v1724_v26 = vsel %vm73_vm8, %v1688_v25, %v1381_v24  ;;  %v244_v24 = vld [vmem:[%s9645_s26 + $0x103] sm:$0xff] }
 0x26b   :  { %v2001_v27 = vmax.f32 %v1926_v20, 0.0  ;;  %5322 = vmatmul.msk.f32.gmra.mxu0 %vm1747_vm9, %v1724_v26  ;;  %v1468_v21 = vsel %vm1444_vm1, %v127_v29, %v443_v19  ;;  %v129_v26 = vld [vmem:[%s9645_s26 + $0xc8] sm:$0xff] }
 0x26c   :  { %v1505_v34 = vsel %vm1481_vm2, %v1468_v21, %v587_v53 }
 0x26d   :  { %2037 = vst.msk [vmem:[#allocation2 + $0x80] sm:$0xff] %vm58_vm4, %v2001_v27 }
 0x26f   :  { %1248 = vrot.lane.b32.xlu2 %v316_v28, %s9653_s24  ;;  %994 = vrot.lane.b32.xlu0 %v7174_v41, %s9647_s20 }
 0x270   :  { %1104 = vrot.lane.b32.xlu1 %v7261_v23, %s9646_s1 }
 0x271   :  { %v1097_v31 = vpop.permute.xlu2 %1096  ;;  %v697_v33 = vpop.permute.xlu0 %696 }
 0x272   :  { %v841_v30 = vpop.permute.xlu1 %840  ;;  %v1542_v35 = vsel %vm1518_vm3, %v1505_v34, %v697_v33  ;;  %v318_v33 = vld [vmem:[%s9645_s26 + $0x115] sm:$0xff] }
 0x273   :  { %v1578_v8 = vsel %vm58_vm4, %v1542_v35, %v841_v30  ;;  %v171_v30 = vld [vmem:[%s9645_s26 + $0xf9] sm:$0xff] }
 0x274   :  { %v1615_v41 = vsel %vm1591_vm5, %v1578_v8, %v985_v2 }
 0x277   :  { %598 = vrot.lane.b32.xlu2 %v7187_v49, %s9650_s19  ;;  %1392 = vrot.lane.b32.xlu0 %v352_v37, %s9652_s23  ;;  %v7302_v49 = vld [vmem:[%s9645_s26 + $0xfa] sm:$0xff] }
 0x278   :  { %454 = vrot.lane.b32.xlu1 %v169_v36, %s9651_s28 }
 0x279   :  { %v7289_v32 = vpop.permute.xlu2 %446  ;;  %v1095_v40 = vpop.permute.xlu0 %1094 }
 0x27a   :  { %v1239_v38 = vpop.permute.xlu1 %1238  ;;  %v1652_v42 = vsel %vm1628_vm6, %v1615_v41, %v1095_v40  ;;  %v1928_v43 = vpop.f32.mrf.mxu0  ;;  %v1470_v21 = vsel %vm1444_vm1, %v129_v26, %v7289_v32  ;;  %v7396_v32 = vld [vmem:[%s9645_s26 + $0x10a] sm:$0xff] }
 0x27b   :  { %v1929_v44 = vadd.f32 %v7096_v59, %v1928_v43  ;;  %v1689_v46 = vsel %vm1665_vm7, %v1652_v42, %v1239_v38  ;;  %v245_v40 = vld [vmem:[%s9645_s26 + $0x10b] sm:$0xff] }
 0x27c   :  { %v1725_v48 = vsel %vm73_vm8, %v1689_v46, %v1383_v12 }
 0x27d   :  { %v2002_v50 = vmax.f32 %v1929_v44, 0.0  ;;  %5323 = vmatmul.msk.f32.gmra.mxu0 %vm1747_vm9, %v1725_v48 }
 0x27f   :  { %996 = vrot.lane.b32.xlu2 %v7206_v54, %s9647_s20  ;;  %2038 = vst.msk [vmem:[#allocation2 + $0x88] sm:$0xff] %vm58_vm4, %v2002_v50  ;;  %708 = vrot.lane.b32.xlu0 %v7302_v49, %s9649_s27  ;;  %v7326_v54 = vld [vmem:[%s9645_s26 + $0x10c] sm:$0xff] }
 0x280   :  { %852 = vrot.lane.b32.xlu1 %v243_v45, %s9648_s18 }
 0x281   :  { %v7311_v52 = vpop.permute.xlu2 %844  ;;  %v445_v53 = vpop.permute.xlu0 %444 }
 0x282   :  { %v589_v47 = vpop.permute.xlu1 %588  ;;  %v1469_v61 = vsel %vm1444_vm1, %v128_v55, %v445_v53  ;;  %v130_v53 = vld [vmem:[%s9645_s26 + $0xd0] sm:$0xff] }
 0x283   :  { %v1506_v2 = vsel %vm1481_vm2, %v1469_v61, %v589_v47 }
 0x284   :  { %v1543_v6 = vsel %vm1518_vm3, %v1506_v2, %v7253_v22  ;;  %v7359_v22 = vld [vmem:[%s9645_s26 + $0x114] sm:$0xff] }
 0x286   :  { %v2098_v58 = vld [vmem:[#allocation2 + $0x7e] ss:$2 sm:$0xff]  ;;  %v2100_v63 = vld [vmem:[#allocation2 + $0x7f] ss:$2 sm:$0xff] }
 0x287   :  { %1394 = vrot.lane.b32.xlu2 %v353_v51, %s9652_s23  ;;  %v2101_v62 = vmax.f32 %v2098_v58, %v2100_v63  ;;  %1106 = vrot.lane.b32.xlu0 %v7326_v54, %s9646_s1  ;;  %v172_v58 = vld [vmem:[%s9645_s26 + $0x101] sm:$0xff] }
 0x288   :  { %1250 = vrot.lane.b32.xlu1 %v317_v56, %s9653_s24  ;;  %v355_v63 = vld [vmem:[%s9645_s26 + $0x11e] sm:$0xff] }
 0x289   :  { %v2102_v4 = vmax.f32 %v2096_v0, %v2101_v62  ;;  %v1243_v1 = vpop.permute.xlu2 %1242  ;;  %v843_v5 = vpop.permute.xlu0 %842 }
 0x28a   :  { %v987_v3 = vpop.permute.xlu1 %986  ;;  %v1579_v7 = vsel %vm58_vm4, %v1543_v6, %v843_v5 }
 0x28b   :  { %2103 = vst.msk [vmem:[#allocation5 + $0x29] sm:$0xff] %vm58_vm4, %v2102_v4  ;;  %v1616_v12 = vsel %vm1591_vm5, %v1579_v7, %v987_v3  ;;  %v246_v7 = vld [vmem:[%s9645_s26 + $0x113] sm:$0xff] }
 0x28c   :  { %v1653_v17 = vsel %vm1628_vm6, %v1616_v12, %v1097_v31 }
 0x28f   :  { %710 = vrot.lane.b32.xlu2 %v7340_v9, %s9649_s27  ;;  %456 = vrot.lane.b32.xlu0 %v170_v10, %s9651_s28  ;;  %v7453_v10 = vld [vmem:[%s9645_s26 + $0x112] sm:$0xff] }
 0x290   :  { %600 = vrot.lane.b32.xlu1 %v7241_v16, %s9650_s19 }
 0x291   :  { %v593_v14 = vpop.permute.xlu2 %592  ;;  %v1241_v15 = vpop.permute.xlu0 %1240 }
 0x292   :  { %v1385_v13 = vpop.permute.xlu1 %1384  ;;  %v1690_v18 = vsel %vm1665_vm7, %v1653_v17, %v1241_v15  ;;  %v1931_v11 = vpop.f32.mrf.mxu0  ;;  %v2216_v19 = vld [vmem:[#allocation5 + $0x26] sm:$0xff]  ;;  %v131_v17 = vld [vmem:[%s9645_s26 + $0xd8] sm:$0xff] }
 0x293   :  { %v1932_v20 = vadd.f32 %v7096_v59, %v1931_v11  ;;  %5338 = vmatmul.msk.f32.gmra.mxu2 %vm58_vm4, %v2216_v19  ;;  %v1726_v16 = vsel %vm73_vm8, %v1690_v18, %v1385_v13  ;;  %v320_v18 = vld [vmem:[%s9645_s26 + $0x125] sm:$0xff] }
 0x294   :  { %5324 = vmatmul.msk.f32.gmra.mxu0 %vm1747_vm9, %v1726_v16  ;;  %v356_v11 = vld [vmem:[%s9645_s26 + $0x126] sm:$0xff] }
 0x295   :  { %v2003_v25 = vmax.f32 %v1932_v20, 0.0  ;;  %v7475_v20 = vld [vmem:[%s9645_s26 + $0x124] sm:$0xff] }
 0x297   :  { %1108 = vrot.lane.b32.xlu2 %v7359_v22, %s9646_s1  ;;  %2039 = vst.msk [vmem:[#allocation2 + $0x90] sm:$0xff] %vm58_vm4, %v2003_v25  ;;  %854 = vrot.lane.b32.xlu0 %v244_v24, %s9648_s18 }
 0x298   :  { %998 = vrot.lane.b32.xlu1 %v7261_v23, %s9647_s20  ;;  %v354_v23 = vld [vmem:[%s9645_s26 + $0x116] sm:$0xff] }
 0x299   :  { %v991_v28 = vpop.permute.xlu2 %990  ;;  %v591_v29 = vpop.permute.xlu0 %590 }
 0x29a   :  { %v701_v27 = vpop.permute.xlu1 %700  ;;  %v1507_v31 = vsel %vm1481_vm2, %v1470_v21, %v591_v29  ;;  %v173_v29 = vld [vmem:[%s9645_s26 + $0x109] sm:$0xff] }
 0x29b   :  { %v1544_v34 = vsel %vm1518_vm3, %v1507_v31, %v701_v27 }
 0x29c   :  { %v1580_v8 = vsel %vm58_vm4, %v1544_v34, %v7311_v52  ;;  %v7414_v52 = vld [vmem:[%s9645_s26 + $0x11c] sm:$0xff] }
 0x29f   :  { %458 = vrot.lane.b32.xlu2 %v171_v30, %s9651_s28  ;;  %1252 = vrot.lane.b32.xlu0 %v318_v33, %s9653_s24 }
 0x2a0   :  { %1396 = vrot.lane.b32.xlu1 %v354_v23, %s9652_s23 }
 0x2a1   :  { %v1389_v36 = vpop.permute.xlu2 %1388  ;;  %v989_v37 = vpop.permute.xlu0 %988 }
 0x2a2   :  { %v1099_v35 = vpop.permute.xlu1 %1098  ;;  %v1617_v38 = vsel %vm1591_vm5, %v1580_v8, %v989_v37  ;;  %v7505_v8 = vld [vmem:[%s9645_s26 + $0x12c] sm:$0xff] }
 0x2a3   :  { %v1654_v41 = vsel %vm1628_vm6, %v1617_v38, %v1099_v35  ;;  %v247_v38 = vld [vmem:[%s9645_s26 + $0x11b] sm:$0xff] }
 0x2a4   :  { %v1691_v48 = vsel %vm1665_vm7, %v1654_v41, %v1243_v1 }
 0x2a7   :  { %856 = vrot.lane.b32.xlu2 %v245_v40, %s9648_s18  ;;  %602 = vrot.lane.b32.xlu0 %v7302_v49, %s9650_s19  ;;  %v319_v49 = vld [vmem:[%s9645_s26 + $0x11d] sm:$0xff] }
 0x2a8   :  { %712 = vrot.lane.b32.xlu1 %v7396_v32, %s9649_s27  ;;  %v1934_v42 = vpop.f32.mrf.mxu0  ;;  %v132_v40 = vld [vmem:[%s9645_s26 + $0xe0] sm:$0xff] }
 0x2a9   :  { %v1935_v44 = vadd.f32 %v7096_v59, %v1934_v42  ;;  %v705_v46 = vpop.permute.xlu2 %704  ;;  %v1387_v45 = vpop.permute.xlu0 %1386 }
 0x2aa   :  { %v449_v43 = vpop.permute.xlu1 %448  ;;  %v1727_v50 = vsel %vm73_vm8, %v1691_v48, %v1387_v45  ;;  %v174_v45 = vld [vmem:[%s9645_s26 + $0x111] sm:$0xff] }
 0x2ab   :  { %v2004_v47 = vmax.f32 %v1935_v44, 0.0  ;;  %5325 = vmatmul.msk.f32.gmra.mxu0 %vm1747_vm9, %v1727_v50  ;;  %v1471_v55 = vsel %vm1444_vm1, %v130_v53, %v449_v43  ;;  %v321_v50 = vld [vmem:[%s9645_s26 + $0x12d] sm:$0xff] }
 0x2ac   :  { %v1508_v60 = vsel %vm1481_vm2, %v1471_v55, %v593_v14 }
 0x2ad   :  { %2040 = vst.msk [vmem:[#allocation2 + $0x98] sm:$0xff] %vm58_vm4, %v2004_v47 }
 0x2af   :  { %1254 = vrot.lane.b32.xlu2 %v319_v49, %s9653_s24  ;;  %1000 = vrot.lane.b32.xlu0 %v7326_v54, %s9647_s20 }
 0x2b0   :  { %1110 = vrot.lane.b32.xlu1 %v7414_v52, %s9646_s1 }
 0x2b1   :  { %v1103_v51 = vpop.permute.xlu2 %1102  ;;  %v703_v57 = vpop.permute.xlu0 %702 }
 0x2b2   :  { %v847_v56 = vpop.permute.xlu1 %846  ;;  %v1545_v61 = vsel %vm1518_vm3, %v1508_v60, %v703_v57  ;;  %v248_v57 = vld [vmem:[%s9645_s26 + $0x123] sm:$0xff] }
 0x2b3   :  { %v1581_v0 = vsel %vm58_vm4, %v1545_v61, %v847_v56 }
 0x2b4   :  { %v1618_v3 = vsel %vm1591_vm5, %v1581_v0, %v991_v28  ;;  %v7487_v28 = vld [vmem:[%s9645_s26 + $0x11a] sm:$0xff] }
 0x2b7   :  { %604 = vrot.lane.b32.xlu2 %v7340_v9, %s9650_s19  ;;  %1398 = vrot.lane.b32.xlu0 %v355_v63, %s9652_s23 }
 0x2b8   :  { %460 = vrot.lane.b32.xlu1 %v172_v58, %s9651_s28 }
 0x2b9   :  { %v453_v62 = vpop.permute.xlu2 %452  ;;  %v1101_v2 = vpop.permute.xlu0 %1100 }
 0x2ba   :  { %v1245_v54 = vpop.permute.xlu1 %1244  ;;  %v1655_v4 = vsel %vm1628_vm6, %v1618_v3, %v1101_v2  ;;  %v1937_v1 = vpop.f32.mrf.mxu0  ;;  %v1473_v44 = vsel %vm1444_vm1, %v132_v40, %v453_v62 }
 0x2bb   :  { %v1692_v5 = vsel %vm1665_vm7, %v1655_v4, %v1245_v54  ;;  %v1938_v6 = vadd.f32 %v7096_v59, %v1937_v1  ;;  %v286_v4 = vld [vmem:[%s9645_s26 + $0x134] sm:$0xff] }
 0x2bc   :  { %v1728_v9 = vsel %vm73_vm8, %v1692_v5, %v1389_v36  ;;  %v322_v1 = vld [vmem:[%s9645_s26 + $0x135] sm:$0xff]  ;;  %v133_v5 = vld [vmem:[%s9645_s26 + $0xe8] sm:$0xff] }
 0x2bd   :  { %v2005_v12 = vmax.f32 %v1938_v6, 0.0  ;;  %5326 = vmatmul.msk.f32.gmra.mxu0 %vm1747_vm9, %v1728_v9 }
 0x2bf   :  { %1002 = vrot.lane.b32.xlu2 %v7359_v22, %s9647_s20  ;;  %2041 = vst.msk [vmem:[#allocation2 + $0xa0] sm:$0xff] %vm58_vm4, %v2005_v12  ;;  %714 = vrot.lane.b32.xlu0 %v7453_v10, %s9649_s27  ;;  %v2105_v12 = vld [vmem:[#allocation2 + $0x90] ss:$2 sm:$0xff] }
 0x2c0   :  { %858 = vrot.lane.b32.xlu1 %v246_v7, %s9648_s18 }
 0x2c1   :  { %v851_v14 = vpop.permute.xlu2 %850  ;;  %v451_v15 = vpop.permute.xlu0 %450 }
 0x2c2   :  { %v595_v13 = vpop.permute.xlu1 %594  ;;  %v1472_v19 = vsel %vm1444_vm1, %v131_v17, %v451_v15  ;;  %v175_v17 = vld [vmem:[%s9645_s26 + $0x119] sm:$0xff] }
 0x2c3   :  { %v1509_v16 = vsel %vm1481_vm2, %v1472_v19, %v595_v13  ;;  %v2107_v13 = vld [vmem:[#allocation2 + $0x91] ss:$2 sm:$0xff] }
 0x2c4   :  { %v1546_v26 = vsel %vm1518_vm3, %v1509_v16, %v705_v46  ;;  %v357_v46 = vld [vmem:[%s9645_s26 + $0x12e] sm:$0xff]  ;;  %v358_v19 = vld [vmem:[%s9645_s26 + $0x136] sm:$0xff] }
 0x2c7   :  { %1400 = vrot.lane.b32.xlu2 %v356_v11, %s9652_s23  ;;  %1112 = vrot.lane.b32.xlu0 %v7475_v20, %s9646_s1 }
 0x2c8   :  { %1256 = vrot.lane.b32.xlu1 %v320_v18, %s9653_s24 }
 0x2c9   :  { %v1249_v24 = vpop.permute.xlu2 %1248  ;;  %v849_v25 = vpop.permute.xlu0 %848 }
 0x2ca   :  { %v993_v22 = vpop.permute.xlu1 %992  ;;  %v1582_v27 = vsel %vm58_vm4, %v1546_v26, %v849_v25 }
 0x2cb   :  { %v1619_v21 = vsel %vm1591_vm5, %v1582_v27, %v993_v22 }
 0x2cc   :  { %v1656_v33 = vsel %vm1628_vm6, %v1619_v21, %v1103_v51  ;;  %v212_v51 = vld [vmem:[%s9645_s26 + $0x122] sm:$0xff] }
 0x2cf   :  { %716 = vrot.lane.b32.xlu2 %v7487_v28, %s9649_s27  ;;  %462 = vrot.lane.b32.xlu0 %v173_v29, %s9651_s28 }
 0x2d0   :  { %606 = vrot.lane.b32.xlu1 %v7396_v32, %s9650_s19 }
 0x2d1   :  { %v599_v30 = vpop.permute.xlu2 %598  ;;  %v1247_v31 = vpop.permute.xlu0 %1246 }
 0x2d2   :  { %v1391_v23 = vpop.permute.xlu1 %1390  ;;  %v1693_v34 = vsel %vm1665_vm7, %v1656_v33, %v1247_v31  ;;  %v1940_v35 = vpop.f32.mrf.mxu0 }
 0x2d3   :  { %v1941_v36 = vadd.f32 %v7096_v59, %v1940_v35  ;;  %v1729_v37 = vsel %vm73_vm8, %v1693_v34, %v1391_v23  ;;  %v213_v34 = vld [vmem:[%s9645_s26 + $0x12a] sm:$0xff] }
 0x2d4   :  { %5327 = vmatmul.msk.f32.gmra.mxu0 %vm1747_vm9, %v1729_v37 }
 0x2d5   :  { %v2006_v32 = vmax.f32 %v1941_v36, 0.0 }
 0x2d7   :  { %1114 = vrot.lane.b32.xlu2 %v7505_v8, %s9646_s1  ;;  %2042 = vst.msk [vmem:[#allocation2 + $0xa8] sm:$0xff] %vm58_vm4, %v2006_v32  ;;  %860 = vrot.lane.b32.xlu0 %v247_v38, %s9648_s18  ;;  %v134_v32 = vld [vmem:[%s9645_s26 + $0xf0] sm:$0xff] }
 0x2d8   :  { %1004 = vrot.lane.b32.xlu1 %v7414_v52, %s9647_s20 }
 0x2d9   :  { %v997_v42 = vpop.permute.xlu2 %996  ;;  %v597_v43 = vpop.permute.xlu0 %596 }
 0x2da   :  { %v707_v41 = vpop.permute.xlu1 %706  ;;  %v1510_v48 = vsel %vm1481_vm2, %v1473_v44, %v597_v43  ;;  %v287_v43 = vld [vmem:[%s9645_s26 + $0x13c] sm:$0xff] }
 0x2db   :  { %v1547_v47 = vsel %vm1518_vm3, %v1510_v48, %v707_v41  ;;  %v323_v41 = vld [vmem:[%s9645_s26 + $0x13d] sm:$0xff]  ;;  %v2173_v48 = vld [vmem:[#allocation5 + $0xa] sm:$0xff] }
 0x2dc   :  { %v1583_v55 = vsel %vm58_vm4, %v1547_v47, %v851_v14  ;;  %v2172_v47 = vld [vmem:[#allocation5 + $0x2] sm:$0xff] }
 0x2df   :  { %464 = vrot.lane.b32.xlu2 %v174_v45, %s9651_s28  ;;  %1258 = vrot.lane.b32.xlu0 %v321_v50, %s9653_s24  ;;  %v2174_v50 = vld [vmem:[#allocation5 + $0x12] sm:$0xff] }
 0x2e0   :  { %1402 = vrot.lane.b32.xlu1 %v357_v46, %s9652_s23 }
 0x2e1   :  { %v1395_v49 = vpop.permute.xlu2 %1394  ;;  %v995_v53 = vpop.permute.xlu0 %994 }
 0x2e2   :  { %v1105_v52 = vpop.permute.xlu1 %1104  ;;  %v1620_v56 = vsel %vm1591_vm5, %v1583_v55, %v995_v53  ;;  %v2163_v53 = vld [vmem:[#allocation5 + $0x9] sm:$0xff] }
 0x2e3   :  { %v1657_v60 = vsel %vm1628_vm6, %v1620_v56, %v1105_v52 }
 0x2e4   :  { %v1694_v62 = vsel %vm1665_vm7, %v1657_v60, %v1249_v24 }
 0x2e7   :  { %862 = vrot.lane.b32.xlu2 %v248_v57, %s9648_s18  ;;  %608 = vrot.lane.b32.xlu0 %v7453_v10, %s9650_s19  ;;  %v5447_v57 = vpack.i.bf16 %v2173_v48, %v2172_v47 }
 0x2e8   :  { %718 = vrot.lane.b32.xlu1 %v212_v51, %s9649_s27  ;;  %v1943_v61 = vpop.f32.mrf.mxu0  ;;  %v5452_v51 = vpack.i.bf16 %v2174_v50, %v2173_v48 }
 0x2e9   :  { %v1944_v63 = vadd.f32 %v7096_v59, %v1943_v61  ;;  %v7549_v0 = vpop.permute.xlu2 %710  ;;  %v1393_v54 = vpop.permute.xlu0 %1392 }
 0x2ea   :  { %v455_v58 = vpop.permute.xlu1 %454  ;;  %v1730_v2 = vsel %vm73_vm8, %v1694_v62, %v1393_v54  ;;  %v2194_v54 = vld [vmem:[#allocation5 + $0x14] sm:$0xff]  ;;  %v7635_v62 = vld [vmem:[#allocation5 + $0x1c] sm:$0xff] }
 0x2eb   :  { %v2007_v3 = vmax.f32 %v1944_v63, 0.0  ;;  %5328 = vmatmul.msk.f32.gmra.mxu0 %vm1747_vm9, %v1730_v2  ;;  %v1474_v6 = vsel %vm1444_vm1, %v133_v5, %v455_v58 }
 0x2ec   :  { %v1511_v14 = vsel %vm1481_vm2, %v1474_v6, %v599_v30  ;;  %v2193_v6 = vld [vmem:[#allocation5 + $0xc] sm:$0xff] }
 0x2ed   :  { %2043 = vst.msk [vmem:[#allocation2 + $0xb0] sm:$0xff] %vm58_vm4, %v2007_v3 }
 0x2ef   :  { %1260 = vrot.lane.b32.xlu2 %v322_v1, %s9653_s24  ;;  %1006 = vrot.lane.b32.xlu0 %v7475_v20, %s9647_s20  ;;  %v2108_v20 = vmax.f32 %v2105_v12, %v2107_v13  ;;  %v2183_v12 = vld [vmem:[#allocation5 + $0xb] sm:$0xff] }
 0x2f0   :  { %1116 = vrot.lane.b32.xlu1 %v286_v4, %s9646_s1  ;;  %v2184_v4 = vld [vmem:[#allocation5 + $0x13] sm:$0xff] }
 0x2f1   :  { %v7569_v9 = vpop.permute.xlu2 %1108  ;;  %v709_v10 = vpop.permute.xlu0 %708 }
 0x2f2   :  { %v853_v7 = vpop.permute.xlu1 %852  ;;  %v1548_v15 = vsel %vm1518_vm3, %v1511_v14, %v709_v10  ;;  %v5462_v10 = vpack.i.bf16 %v2194_v54, %v2193_v6 }
 0x2f3   :  { %v1584_v22 = vsel %vm58_vm4, %v1548_v15, %v853_v7  ;;  %v5467_v7 = vpack.i.bf16 %v7635_v62, %v2194_v54  ;;  %v135_v15 = vld [vmem:[%s9645_s26 + $0xf8] sm:$0xff]  ;;  %v137_v54 = vld [vmem:[%s9645_s26 + $0x108] sm:$0xff] }
 0x2f4   :  { %v2110_v18 = vld [vmem:[#allocation2 + $0xa2] ss:$2 sm:$0xff]  ;;  %v2112_v11 = vld [vmem:[#allocation2 + $0xa3] ss:$2 sm:$0xff]  ;;  %v1621_v29 = vsel %vm1591_vm5, %v1584_v22, %v997_v42  ;;  %v2164_v22 = vld [vmem:[#allocation5 + $0x11] sm:$0xff] }
 0x2f5   :  { %v2113_v16 = vmax.f32 %v2110_v18, %v2112_v11 }
 0x2f7   :  { %610 = vrot.lane.b32.xlu2 %v7487_v28, %s9650_s19  ;;  %v2114_v24 = vmax.f32 %v2108_v20, %v2113_v16  ;;  %1404 = vrot.lane.b32.xlu0 %v358_v19, %s9652_s23  ;;  %v249_v28 = vld [vmem:[%s9645_s26 + $0x12b] sm:$0xff]  ;;  %s5775_s19 = smov 112  }
 0x2f8   :  { %466 = vrot.lane.b32.xlu1 %v175_v17, %s9651_s28  ;;  %v2205_v20 = vld [vmem:[#allocation5 + $0x1d] sm:$0xff]  ;;  %s9670_s28 = sld [smem:[#allocation20_spill]] }
 0x2f9   :  { %2115 = vst.msk [vmem:[#allocation5 + $0x33] sm:$0xff] %vm58_vm4, %v2114_v24  ;;  %v7585_v26 = vpop.permute.xlu2 %458  ;;  %v1107_v27 = vpop.permute.xlu0 %1106 }
 0x2fa   :  { %v1251_v25 = vpop.permute.xlu1 %1250  ;;  %v1658_v21 = vsel %vm1628_vm6, %v1621_v29, %v1107_v27  ;;  %v1946_v23 = vpop.f32.mrf.mxu0  ;;  %v1476_v16 = vsel %vm1444_vm1, %v135_v15, %v7585_v26  ;;  %v2204_v29 = vld [vmem:[#allocation5 + $0x15] sm:$0xff] }
 0x2fb   :  { %v1695_v30 = vsel %vm1665_vm7, %v1658_v21, %v1251_v25  ;;  %v1947_v31 = vadd.f32 %v7096_v59, %v1946_v23  ;;  %v5472_v21 = vpack.i.bf16 %v2205_v20, %v2204_v29 }
 0x2fc   :  { %v1731_v33 = vsel %vm73_vm8, %v1695_v30, %v1395_v49  ;;  %v2162_v49 = vld [vmem:[#allocation5 + $0x1] sm:$0xff] }
 0x2fd   :  { %v2008_v35 = vmax.f32 %v1947_v31, 0.0  ;;  %5329 = vmatmul.msk.f32.gmra.mxu0 %vm1747_vm9, %v1731_v33  ;;  %v5442_v60 = vpack.i.bf16 %v2163_v53, %v2162_v49 }
 0x2ff   :  { %1008 = vrot.lane.b32.xlu2 %v7505_v8, %s9647_s20  ;;  %2044 = vst.msk [vmem:[#allocation2 + $0xb8] sm:$0xff] %vm58_vm4, %v2008_v35  ;;  %720 = vrot.lane.b32.xlu0 %v213_v34, %s9649_s27  ;;  %v359_v8 = vld [vmem:[%s9645_s26 + $0x13e] sm:$0xff] }
 0x300   :  { %864 = vrot.lane.b32.xlu1 %v249_v28, %s9648_s18  ;;  %v2217_v37 = vld [vmem:[#allocation5 + $0x2e] sm:$0xff] }
 0x301   :  { %v457_v38 = vpop.permute.xlu0 %456  ;;  %5339 = vmatmul.msk.f32.gmra.mxu2 %vm58_vm4, %v2217_v37  ;;  %v7608_v40 = vpop.permute.xlu2 %856  ;;  %v7649_v11 = vld [vmem:[#allocation5 + $0x32] sm:$0xff] }
 0x302   :  { %v601_v36 = vpop.permute.xlu1 %600  ;;  %v1475_v42 = vsel %vm1444_vm1, %v134_v32, %v457_v38  ;;  %v2168_v19 = vld [vmem:[#allocation5 + $0x31] sm:$0xff]  ;;  %v5482_v25 = vpack.i.bf16 %v7649_v11, %v2174_v50 }
 0x303   :  { %v1512_v44 = vsel %vm1481_vm2, %v1475_v42, %v601_v36  ;;  %v5477_v27 = vpack.i.bf16 %v2168_v19, %v2164_v22  ;;  %v2185_v22 = vld [vmem:[#allocation5 + $0x1b] sm:$0xff] }
 0x304   :  { %v1549_v52 = vsel %vm1518_vm3, %v1512_v44, %v7549_v0 }
 0x307   :  { %1406 = vrot.lane.b32.xlu2 %v359_v8, %s9652_s23  ;;  %1118 = vrot.lane.b32.xlu0 %v287_v43, %s9646_s1  ;;  %s5771_s1 = smov 48  }
 0x308   :  { %1262 = vrot.lane.b32.xlu1 %v323_v41, %s9653_s24  ;;  %s5772_s24 = smov 96  }
 0x309   :  { %v855_v45 = vpop.permute.xlu0 %854  ;;  %v7627_v56 = vpop.permute.xlu2 %1254 }
 0x30a   :  { %v999_v46 = vpop.permute.xlu1 %998  ;;  %v1585_v55 = vsel %vm58_vm4, %v1549_v52, %v855_v45 }
 0x30b   :  { %v1622_v61 = vsel %vm1591_vm5, %v1585_v55, %v999_v46 }
 0x30c   :  { %v1659_v0 = vsel %vm1628_vm6, %v1622_v61, %v7569_v9  ;;  %v5457_v9 = vpack.i.bf16 %v2184_v4, %v2183_v12 }
 0x30f   :  { %5453 = vrot.lane.b32.xlu2 %v5452_v51, %s5771_s1  ;;  %5443 = vrot.lane.b32.xlu0 %v5442_v60, %s9648_s18 }
 0x310   :  { %5448 = vrot.lane.b32.xlu1 %v5447_v57, %s9652_s23 }
 0x311   :  { %v1253_v63 = vpop.permute.xlu0 %1252  ;;  %v1949_v3 = vpop.f32.mrf.mxu0 }
 0x312   :  { %v1397_v58 = vpop.permute.xlu1 %1396  ;;  %v1696_v2 = vsel %vm1665_vm7, %v1659_v0, %v1253_v63  ;;  %v1950_v1 = vadd.f32 %v7096_v59, %v1949_v3  ;;  %v605_v14 = vpop.permute.xlu2 %604 }
 0x313   :  { %v1732_v5 = vsel %vm73_vm8, %v1696_v2, %v1397_v58  ;;  %v2575_v2 = vld [vmem:[%s9603_s3 + $0x78] sm:$0xff] }
 0x314   :  { %5330 = vmatmul.msk.f32.gmra.mxu0 %vm1747_vm9, %v1732_v5  ;;  %v2009_v13 = vmax.f32 %v1950_v1, 0.0  ;;  %5409 = vmatpush.msra.mxu3 %v2575_v2 }
 0x315   :  { %2612 = vmatpush.msrb.mxu0 %v2575_v2 }
 0x316   :  { %2045 = vst.msk [vmem:[#allocation2 + $0xc0] sm:$0xff] %vm58_vm4, %v2009_v13 }
 0x317   :  { %5468 = vrot.lane.b32.xlu2 %v5467_v7, %s5772_s24  ;;  %5458 = vrot.lane.b32.xlu0 %v5457_v9, %s5774_s14 }
 0x318   :  { %5463 = vrot.lane.b32.xlu1 %v5462_v10, %s5773_s13 }
 0x319   :  { %v603_v18 = vpop.permute.xlu0 %602 }
 0x31a   :  { %v713_v17 = vpop.permute.xlu1 %712  ;;  %v1513_v24 = vsel %vm1481_vm2, %v1476_v16, %v603_v18  ;;  %v1003_v30 = vpop.permute.xlu2 %1002 }
 0x31b   :  { %v1550_v23 = vsel %vm1518_vm3, %v1513_v24, %v713_v17 }
 0x31c   :  { %v1586_v28 = vsel %vm58_vm4, %v1550_v23, %v7608_v40  ;;  %v136_v40 = vld [vmem:[%s9645_s26 + $0x100] sm:$0xff] }
 0x31d   :  { %v2117_v3 = vld [vmem:[#allocation2 + $0xb4] ss:$2 sm:$0xff] }
 0x31f   :  { %5483 = vrot.lane.b32.xlu2 %v5482_v25, %s9652_s23  ;;  %5473 = vrot.lane.b32.xlu0 %v5472_v21, %s5775_s19 }
 0x320   :  { %5478 = vrot.lane.b32.xlu1 %v5477_v27, %s9648_s18 }
 0x321   :  { %v1001_v26 = vpop.permute.xlu0 %1000 }
 0x322   :  { %v1111_v31 = vpop.permute.xlu1 %1110  ;;  %v1623_v33 = vsel %vm1591_vm5, %v1586_v28, %v1001_v26  ;;  %v1401_v41 = vpop.permute.xlu2 %1400 }
 0x323   :  { %v1660_v34 = vsel %vm1628_vm6, %v1623_v33, %v1111_v31 }
 0x324   :  { %v1697_v32 = vsel %vm1665_vm7, %v1660_v34, %v7627_v56  ;;  %v2175_v34 = vld [vmem:[#allocation5 + $0x1a] sm:$0xff] }
 0x328   :  { %v1952_v35 = vpop.f32.mrf.mxu0 }
 0x329   :  { %v1953_v37 = vadd.f32 %v7096_v59, %v1952_v35  ;;  %v1399_v38 = vpop.permute.xlu0 %1398 }
 0x32a   :  { %v461_v36 = vpop.permute.xlu1 %460  ;;  %v1733_v8 = vsel %vm73_vm8, %v1697_v32, %v1399_v38  ;;  %v717_v50 = vpop.permute.xlu2 %716  ;;  %v2574_v38 = vld [vmem:[%s9603_s3 + $0x70] sm:$0xff] }
 0x32b   :  { %v2010_v42 = vmax.f32 %v1953_v37, 0.0  ;;  %5331 = vmatmul.msk.f32.gmra.mxu0 %vm1747_vm9, %v1733_v8  ;;  %v1477_v43 = vsel %vm1444_vm1, %v136_v40, %v461_v36  ;;  %5410 = vmatpush.msra.mxu3 %v2574_v38  ;;  %v2165_v40 = vld [vmem:[#allocation5 + $0x19] sm:$0xff] }
 0x32c   :  { %v1514_v45 = vsel %vm1481_vm2, %v1477_v43, %v605_v14  ;;  %2613 = vmatpush.msrb.mxu0 %v2574_v38  ;;  %v2573_v43 = vld [vmem:[%s9603_s3 + $0x68] sm:$0xff] }
 0x32d   :  { %2046 = vst.msk [vmem:[#allocation2 + $0xc8] sm:$0xff] %vm58_vm4, %v2010_v42  ;;  %5411 = vmatpush.msra.mxu3 %v2573_v43 }
 0x32e   :  { %2614 = vmatpush.msrb.mxu0 %v2573_v43 }
 0x331   :  { %v715_v46 = vpop.permute.xlu0 %714 }
 0x332   :  { %v859_v44 = vpop.permute.xlu1 %858  ;;  %v1551_v48 = vsel %vm1518_vm3, %v1514_v45, %v715_v46  ;;  %v1115_v58 = vpop.permute.xlu2 %1114 }
 0x333   :  { %v1587_v47 = vsel %vm58_vm4, %v1551_v48, %v859_v44 }
 0x334   :  { %v1624_v53 = vsel %vm1591_vm5, %v1587_v47, %v1003_v30  ;;  %v7703_v30 = vld [vmem:[%s9602_s2] ss:$0 sm:$0xff]  ;;  %v2571_v47 = vld [vmem:[%s9603_s3 + $0x58] sm:$0xff] }
 0x339   :  { %v1113_v49 = vpop.permute.xlu0 %1112 }
 0x33a   :  { %v1257_v52 = vpop.permute.xlu1 %1256  ;;  %v1661_v55 = vsel %vm1628_vm6, %v1624_v53, %v1113_v49  ;;  %v1955_v56 = vpop.f32.mrf.mxu0  ;;  %v2570_v49 = vld [vmem:[%s9603_s3 + $0x50] sm:$0xff] }
 0x33b   :  { %v1698_v51 = vsel %vm1665_vm7, %v1661_v55, %v1257_v52  ;;  %v1956_v57 = vadd.f32 %v7096_v59, %v1955_v56  ;;  %v2119_v59 = vld [vmem:[#allocation2 + $0xb5] ss:$2 sm:$0xff]  ;;  %v465_v12 = vpop.permute.xlu2 %464 }
 0x33c   :  { %v1734_v60 = vsel %vm73_vm8, %v1698_v51, %v1401_v41  ;;  %v2120_v6 = vmax.f32 %v2117_v3, %v2119_v59  ;;  %v2569_v51 = vld [vmem:[%s9603_s3 + $0x48] sm:$0xff] }
 0x33d   :  { %v2011_v61 = vmax.f32 %v1956_v57, 0.0  ;;  %5332 = vmatmul.msk.f32.gmra.mxu0 %vm1747_vm9, %v1734_v60  ;;  %v2568_v60 = vld [vmem:[%s9603_s3 + $0x40] sm:$0xff] }
 0x33f   :  { %2047 = vst.msk [vmem:[#allocation2 + $0xd0] sm:$0xff] %vm58_vm4, %v2011_v61  ;;  %v2567_v61 = vld [vmem:[%s9603_s3 + $0x38] sm:$0xff] }
 0x341   :  { %v463_v0 = vpop.permute.xlu0 %462 }
 0x342   :  { %v607_v63 = vpop.permute.xlu1 %606  ;;  %v1478_v4 = vsel %vm1444_vm1, %v137_v54, %v463_v0  ;;  %v2566_v0 = vld [vmem:[%s9603_s3 + $0x30] sm:$0xff] }
 0x343   :  { %v1515_v10 = vsel %vm1481_vm2, %v1478_v4, %v607_v63  ;;  %v863_v24 = vpop.permute.xlu2 %862 }
 0x344   :  { %v1552_v15 = vsel %vm1518_vm3, %v1515_v10, %v717_v50  ;;  %v2572_v50 = vld [vmem:[%s9603_s3 + $0x60] sm:$0xff] }
 0x345   :  { %2615 = vmatpush.msrb.mxu0 %v2572_v50  ;;  %5412 = vmatpush.msra.mxu3 %v2572_v50  ;;  %v2564_v10 = vld [vmem:[%s9603_s3 + $0x20] sm:$0xff] }
 0x346   :  { %v2122_v1 = vld [vmem:[#allocation2 + $0xc6] ss:$2 sm:$0xff]  ;;  %v2124_v5 = vld [vmem:[#allocation2 + $0xc7] ss:$2 sm:$0xff] }
 0x347   :  { %v2125_v7 = vmax.f32 %v2122_v1, %v2124_v5  ;;  %2616 = vmatpush.msrb.mxu0 %v2571_v47  ;;  %5413 = vmatpush.msra.mxu3 %v2571_v47  ;;  %v2565_v5 = vld [vmem:[%s9603_s3 + $0x28] sm:$0xff] }
 0x349   :  { %v2126_v9 = vmax.f32 %v2120_v6, %v2125_v7  ;;  %v861_v14 = vpop.permute.xlu0 %860  ;;  %2617 = vmatpush.msrb.mxu0 %v2570_v49  ;;  %5414 = vmatpush.msra.mxu3 %v2570_v49  ;;  %v139_v7 = vld [vmem:[%s9645_s26 + $0x118] sm:$0xff] }
 0x34a   :  { %v1005_v13 = vpop.permute.xlu1 %1004  ;;  %v1588_v17 = vsel %vm58_vm4, %v1552_v15, %v861_v14 }
 0x34b   :  { %2127 = vst.msk [vmem:[#allocation5 + $0x3d] sm:$0xff] %vm58_vm4, %v2126_v9  ;;  %v1625_v18 = vsel %vm1591_vm5, %v1588_v17, %v1005_v13  ;;  %v1261_v45 = vpop.permute.xlu2 %1260  ;;  %2618 = vmatpush.msrb.mxu0 %v2569_v51  ;;  %5415 = vmatpush.msra.mxu3 %v2569_v51  ;;  %v2562_v9 = vld [vmem:[%s9603_s3 + $0x10] sm:$0xff] }
 0x34c   :  { %v1662_v16 = vsel %vm1628_vm6, %v1625_v18, %v1115_v58 }
 0x34d   :  { %2619 = vmatpush.msrb.mxu0 %v2568_v60  ;;  %5416 = vmatpush.msra.mxu3 %v2568_v60 }
 0x34f   :  { %2620 = vmatpush.msrb.mxu0 %v2567_v61  ;;  %5417 = vmatpush.msra.mxu3 %v2567_v61 }
 0x351   :  { %v1259_v20 = vpop.permute.xlu0 %1258  ;;  %v1958_v27 = vpop.f32.mrf.mxu0  ;;  %2621 = vmatpush.msrb.mxu0 %v2566_v0  ;;  %5418 = vmatpush.msra.mxu3 %v2566_v0 }
 0x352   :  { %v1403_v19 = vpop.permute.xlu1 %1402  ;;  %v1699_v25 = vsel %vm1665_vm7, %v1662_v16, %v1259_v20  ;;  %v2218_v29 = vld [vmem:[#allocation5 + $0x36] sm:$0xff]  ;;  %v1959_v31 = vadd.f32 %v7703_v30, %v1958_v27  ;;  %v2219_v42 = vld [vmem:[#allocation5 + $0x3e] sm:$0xff] }
 0x353   :  { %v7698_v21 = vld [vmem:[#allocation5 + $0x3c] sm:$0xff]  ;;  %5340 = vmatmul.msk.f32.gmra.mxu2 %vm58_vm4, %v2218_v29  ;;  %v1735_v26 = vsel %vm73_vm8, %v1699_v25, %v1403_v19  ;;  %v611_v58 = vpop.permute.xlu2 %610  ;;  %2622 = vmatpush.msrb.mxu0 %v2565_v5 }
 0x354   :  { %v2189_v23 = vld [vmem:[#allocation5 + $0x3b] sm:$0xff]  ;;  %v5497_v28 = vpack.i.bf16 %v7698_v21, %v7635_v62  ;;  %5333 = vmatmul.msk.f32.gmra.mxu0 %vm1747_vm9, %v1735_v26  ;;  %v2012_v37 = vmax.f32 %v1959_v31, 0.0  ;;  %v138_v62 = vld [vmem:[%s9645_s26 + $0x110] sm:$0xff]  ;;  %5419 = vmatpush.msra.mxu3 %v2565_v5  ;;  %s9669_s26 = sld [smem:[#allocation19_spill]] }
 0x355   :  { %v5492_v33 = vpack.i.bf16 %v2189_v23, %v2185_v22  ;;  %v2179_v35 = vld [vmem:[#allocation5 + $0x3a] sm:$0xff]  ;;  %v1479_v44 = vsel %vm1444_vm1, %v138_v62, %v465_v12  ;;  %v2563_v12 = vld [vmem:[%s9603_s3 + $0x18] sm:$0xff]  ;;  %2623 = vmatpush.msrb.mxu0 %v2564_v10 }
 0x356   :  { %v7711_v36 = vpack.i.bf16 %v2179_v35, %v2175_v34  ;;  %5498 = vrot.lane.b32.xlu2 %v5497_v28, %s5773_s13  ;;  %2048 = vst.msk [vmem:[#allocation2 + $0xd8] sm:$0xff] %vm58_vm4, %v2012_v37  ;;  %v2169_v41 = vld [vmem:[#allocation5 + $0x39] sm:$0xff]  ;;  %5420 = vmatpush.msra.mxu3 %v2564_v10 }
 0x357   :  { %5493 = vrot.lane.b32.xlu1 %v5492_v33, %s5774_s14  ;;  %v5512_v46 = vpack.i.bf16 %v2169_v41, %v2165_v40  ;;  %2624 = vmatpush.msrb.mxu0 %v2563_v12  ;;  %v2561_v20 = vld [vmem:[%s9603_s3 + $0x8] sm:$0xff]  ;;  %v2560_v16 = vld [vmem:[%s9603_s3] sm:$0xff] }
 0x358   :  { %5488 = vrot.lane.b32.xlu0 %v7711_v36, %s5771_s1  ;;  %5421 = vmatpush.msra.mxu3 %v2563_v12  ;;  %v2152_v62 = vld [vmem:[#allocation5] sm:$0xff] }
 0x359   :  { %v609_v8 = vpop.permute.xlu0 %608  ;;  %2625 = vmatpush.msrb.mxu0 %v2562_v9 }
 0x35a   :  { %v719_v32 = vpop.permute.xlu1 %718  ;;  %v1516_v48 = vsel %vm1481_vm2, %v1479_v44, %v609_v8  ;;  %5422 = vmatpush.msra.mxu3 %v2562_v9 }
 0x35b   :  { %5341 = vmatmul.msk.f32.gmra.mxu2 %vm58_vm4, %v2219_v42  ;;  %v1553_v52 = vsel %vm1518_vm3, %v1516_v48, %v719_v32  ;;  %v1009_v14 = vpop.permute.xlu2 %1008  ;;  %2626 = vmatpush.msrb.mxu0 %v2561_v20 }
 0x35c   :  { %v1589_v56 = vsel %vm58_vm4, %v1553_v52, %v863_v24  ;;  %5423 = vmatpush.msra.mxu3 %v2561_v20  ;;  %v2153_v52 = vld [vmem:[#allocation5 + $0x8] sm:$0xff] }
 0x35d   :  { %2627 = vmatpush.msrb.mxu0 %v2560_v16 }
 0x35e   :  { %5513 = vrot.lane.b32.xlu2 %v5512_v46, %s9648_s18  ;;  %5424 = vmatpush.msra.mxu3 %v2560_v16 }
 0x361   :  { %v1007_v55 = vpop.permute.xlu0 %1006 }
 0x362   :  { %v1117_v53 = vpop.permute.xlu1 %1116  ;;  %v1626_v57 = vsel %vm1591_vm5, %v1589_v56, %v1007_v55 }
 0x363   :  { %v1663_v63 = vsel %vm1628_vm6, %v1626_v57, %v1117_v53  ;;  %v1407_v29 = vpop.permute.xlu2 %1406 }
 0x364   :  { %v1700_v4 = vsel %vm1665_vm7, %v1663_v63, %v1261_v45 }
 0x368   :  { %v1961_v54 = vpop.f32.mrf.mxu0 }
 0x369   :  { %v1962_v3 = vadd.f32 %v7703_v30, %v1961_v54  ;;  %v1405_v59 = vpop.permute.xlu0 %1404 }
 0x36a   :  { %v467_v2 = vpop.permute.xlu1 %466  ;;  %v1736_v1 = vsel %vm73_vm8, %v1700_v4, %v1405_v59 }
 0x36b   :  { %v2013_v6 = vmax.f32 %v1962_v3, 0.0  ;;  %5334 = vmatmul.msk.f32.gmra.mxu0 %vm1747_vm9, %v1736_v1  ;;  %v1480_v13 = vsel %vm1444_vm1, %v139_v7, %v467_v2  ;;  %v5454_v32 = vpop.permute.xlu2 %5453  ;;  %vm3106_vm1 = vcmask 257024  }
 0x36c   :  { %v1517_v18 = vsel %vm1481_vm2, %v1480_v13, %v611_v58  ;;  %v5455_v44 = vunpack.i.l.bf16 %v5454_v32  ;;  %v5456_v63 = vunpack.i.h.bf16 %v5454_v32 }
 0x36d   :  { %2049 = vst.msk [vmem:[#allocation2 + $0xe0] sm:$0xff] %vm58_vm4, %v2013_v6 }
 0x371   :  { %v721_v17 = vpop.permute.xlu0 %720 }
 0x372   :  { %v865_v15 = vpop.permute.xlu1 %864  ;;  %v1554_v19 = vsel %vm1518_vm3, %v1517_v18, %v721_v17  ;;  %vm78_vm3 = vcmask 259072  }
 0x373   :  { %v1590_v22 = vsel %vm58_vm4, %v1554_v19, %v865_v15  ;;  %v5469_v53 = vpop.permute.xlu2 %5468  ;;  %79 = vst.msk [vmem:[#allocation6 + $0x20] sm:$0x3f] %vm78_vm3, %v5770_v39 }
 0x374   :  { %v1627_v27 = vsel %vm1591_vm5, %v1590_v22, %v1009_v14  ;;  %v5470_v51 = vunpack.i.l.bf16 %v5469_v53  ;;  %v5471_v10 = vunpack.i.h.bf16 %v5469_v53  ;;  %v2129_v17 = vld [vmem:[#allocation2 + $0xd8] ss:$2 sm:$0xff]  ;;  %v2131_v18 = vld [vmem:[#allocation2 + $0xd9] ss:$2 sm:$0xff]  ;;  %vm83_vm5 = vcmask 517120  }
 0x375   :  { %v2132_v16 = vmax.f32 %v2129_v17, %v2131_v18  ;;  %v2177_v18 = vld [vmem:[#allocation5 + $0x2a] sm:$0xff]  ;;  %84 = vst.msk [vmem:[#allocation7 + $0x10] sm:$0x3] %vm83_vm5, %v5770_v39 }
 0x376   :  { %86 = vst.msk [vmem:[#allocation10 + $0x8] sm:$0x3] %vm83_vm5, %v5770_v39 }
 0x379   :  { %v1119_v25 = vpop.permute.xlu0 %1118 }
 0x37a   :  { %v1263_v24 = vpop.permute.xlu1 %1262  ;;  %v1664_v23 = vsel %vm1628_vm6, %v1627_v27, %v1119_v25  ;;  %v1964_v31 = vpop.f32.mrf.mxu0 }
 0x37b   :  { %v1701_v26 = vsel %vm1665_vm7, %v1664_v23, %v1263_v24  ;;  %v1965_v28 = vadd.f32 %v7703_v30, %v1964_v31  ;;  %v2186_v23 = vld [vmem:[#allocation5 + $0x23] sm:$0xff] }
 0x37c   :  { %v1737_v33 = vsel %vm73_vm8, %v1701_v26, %v1407_v29  ;;  %v2206_v31 = vld [vmem:[#allocation5 + $0x25] sm:$0xff] }
 0x37d   :  { %v2014_v34 = vmax.f32 %v1965_v28, 0.0  ;;  %5335 = vmatmul.msk.f32.gmra.mxu0 %vm1747_vm9, %v1737_v33 }
 0x37f   :  { %2050 = vst.msk [vmem:[#allocation2 + $0xe8] sm:$0xff] %vm58_vm4, %v2014_v34 }
 0x381   :  { %v5444_v37 = vpop.permute.xlu0 %5443 }
 0x382   :  { %v5449_v35 = vpop.permute.xlu1 %5448  ;;  %v5445_v38 = vunpack.i.l.bf16 %v5444_v37  ;;  %v5446_v46 = vunpack.i.h.bf16 %v5444_v37  ;;  %v2196_v37 = vld [vmem:[#allocation5 + $0x24] sm:$0xff] }
 0x383   :  { %v5450_v41 = vunpack.i.l.bf16 %v5449_v35  ;;  %v5451_v47 = vunpack.i.h.bf16 %v5449_v35 }
 0x384   :  { %v2486_v8 = vsel %vm58_vm4, %v2152_v62, %v5445_v38  ;;  %v2487_v55 = vsel %vm58_vm4, %v2153_v52, %v5446_v46  ;;  %v2166_v46 = vld [vmem:[#allocation5 + $0x21] sm:$0xff] }
 0x385   :  { %v2496_v42 = vsel %vm73_vm8, %v2486_v8, %v5450_v41  ;;  %v2497_v57 = vsel %vm73_vm8, %v2487_v55, %v5451_v47  ;;  %v2176_v41 = vld [vmem:[#allocation5 + $0x22] sm:$0xff] }
 0x386   :  { %v2507_v50 = vsel %vm2506_vm12, %v2496_v42, %v5455_v44  ;;  %v2508_v59 = vsel %vm2506_vm12, %v2497_v57, %v5456_v63  ;;  %v2207_v63 = vld [vmem:[#allocation5 + $0x2d] sm:$0xff] }
 0x389   :  { %v5459_v43 = vpop.permute.xlu0 %5458 }
 0x38a   :  { %v5464_v40 = vpop.permute.xlu1 %5463  ;;  %v5460_v45 = vunpack.i.l.bf16 %v5459_v43  ;;  %v5461_v60 = vunpack.i.h.bf16 %v5459_v43 }
 0x38b   :  { %v5465_v48 = vunpack.i.l.bf16 %v5464_v40  ;;  %v5466_v3 = vunpack.i.h.bf16 %v5464_v40 }
 0x38c   :  { %v2517_v49 = vsel %vm80_vm11, %v2507_v50, %v5460_v45  ;;  %v2518_v5 = vsel %vm80_vm11, %v2508_v59, %v5461_v60 }
 0x38d   :  { %v2528_v56 = vsel %vm2527_vm13, %v2517_v49, %v5465_v48  ;;  %v2529_v7 = vsel %vm2527_vm13, %v2518_v5, %v5466_v3  ;;  %v2187_v5 = vld [vmem:[#allocation5 + $0x2b] sm:$0xff] }
 0x38e   :  { %v2539_v2 = vsel %vm2538_vm14, %v2528_v56, %v5470_v51  ;;  %v2540_v12 = vsel %vm2538_vm14, %v2529_v7, %v5471_v10  ;;  %v2676_v7 = vpop.f32.mrf.mxu2 }
 0x391   :  { %v1967_v61 = vpop.f32.mrf.mxu0  ;;  %v5474_v58 = vpop.permute.xlu0 %5473 }
 0x392   :  { %v1968_v0 = vadd.f32 %v7703_v30, %v1967_v61  ;;  %v5475_v54 = vunpack.i.l.bf16 %v5474_v58  ;;  %v5476_v6 = vunpack.i.h.bf16 %v5474_v58  ;;  %v7839_v58 = vld [vmem:[%s9604_s4] ss:$0 sm:$0xff] }
 0x394   :  { %v2015_v4 = vmax.f32 %v1968_v0, 0.0  ;;  %v2550_v1 = vsel %vm2549_vm15, %v2539_v2, %v5475_v54  ;;  %v2551_v13 = vsel %vm2549_vm15, %v2540_v12, %v5476_v6  ;;  %v2197_v0 = vld [vmem:[#allocation5 + $0x2c] sm:$0xff] }
 0x395   :  { %2628 = vmatmul.f32.vlgmr.msrb.gmra.mxu0 %v2550_v1 }
 0x396   :  { %2051 = vst.msk [vmem:[#allocation2 + $0xf0] sm:$0xff] %vm58_vm4, %v2015_v4 }
 0x39d   :  { %2631 = vmatmul.f32.gmra.mxu0 %v2551_v13 }
 0x3a8   :  { %v1970_v9 = vpop.f32.mrf.mxu0 }
 0x3a9   :  { %v1971_v14 = vadd.f32 %v7703_v30, %v1970_v9 }
 0x3ab   :  { %v2016_v15 = vmax.f32 %v1971_v14, 0.0 }
 0x3ad   :  { %2052 = vst.msk [vmem:[#allocation2 + $0xf8] sm:$0xff] %vm58_vm4, %v2016_v15 }
 0x3b4   :  { %v2134_v19 = vld [vmem:[#allocation2 + $0xea] ss:$2 sm:$0xff]  ;;  %v2136_v20 = vld [vmem:[#allocation2 + $0xeb] ss:$2 sm:$0xff] }
 0x3b5   :  { %v2137_v22 = vmax.f32 %v2134_v19, %v2136_v20 }
 0x3b7   :  { %v2138_v24 = vmax.f32 %v2132_v16, %v2137_v22  ;;  %v2208_v16 = vld [vmem:[#allocation5 + $0x35] sm:$0xff]  ;;  %v2679_v22 = vpop.f32.mrf.mxu2 }
 0x3b9   :  { %2139 = vst.msk [vmem:[#allocation5 + $0x47] sm:$0xff] %vm58_vm4, %v2138_v24 }
 0x3ba   :  { %v1973_v25 = vpop.f32.mrf.mxu0 }
 0x3bb   :  { %v1974_v27 = vadd.f32 %v7703_v30, %v1973_v25 }
 0x3bd   :  { %v2017_v29 = vmax.f32 %v1974_v27, 0.0 }
 0x3bf   :  { %2053 = vst.msk [vmem:[#allocation2 + $0x100] sm:$0xff] %vm58_vm4, %v2017_v29 }
 0x3c0   :  { %v2220_v26 = vld [vmem:[#allocation5 + $0x46] sm:$0xff] }
 0x3c1   :  { %v2190_v28 = vld [vmem:[#allocation5 + $0x43] sm:$0xff]  ;;  %5342 = vmatmul.msk.f32.gmra.mxu2 %vm58_vm4, %v2220_v26 }
 0x3c2   :  { %v2210_v33 = vld [vmem:[#allocation5 + $0x45] sm:$0xff]  ;;  %v5527_v34 = vpack.i.bf16 %v2190_v28, %v2186_v23 }
 0x3c3   :  { %v5507_v35 = vpack.i.bf16 %v2210_v33, %v2206_v31  ;;  %v2200_v38 = vld [vmem:[#allocation5 + $0x44] sm:$0xff]  ;;  %v2198_v31 = vld [vmem:[#allocation5 + $0x34] sm:$0xff]  ;;  %v5479_v33 = vpop.permute.xlu1 %5478 }
 0x3c4   :  { %v2180_v62 = vld [vmem:[#allocation5 + $0x42] sm:$0xff]  ;;  %v5502_v32 = vpack.i.bf16 %v2200_v38, %v2196_v37  ;;  %5528 = vrot.lane.b32.xlu2 %v5527_v34, %s5774_s14  ;;  %v5481_v37 = vunpack.i.h.bf16 %v5479_v33  ;;  %v5480_v38 = vunpack.i.l.bf16 %v5479_v33 }
 0x3c5   :  { %5508 = vrot.lane.b32.xlu1 %v5507_v35, %s5775_s19  ;;  %v5552_v8 = vpack.i.bf16 %v2180_v62, %v2176_v41  ;;  %v2170_v44 = vld [vmem:[#allocation5 + $0x41] sm:$0xff]  ;;  %v2171_v34 = vld [vmem:[#allocation5 + $0x49] sm:$0xff] }
 0x3c6   :  { %5503 = vrot.lane.b32.xlu0 %v5502_v32, %s5772_s24  ;;  %v5547_v45 = vpack.i.bf16 %v2170_v44, %v2166_v46  ;;  %v2203_v35 = vld [vmem:[#allocation5 + $0x5c] sm:$0xff]  ;;  %v2167_v62 = vld [vmem:[#allocation5 + $0x29] sm:$0xff] }
 0x3ca   :  { %v5489_v41 = vpop.permute.xlu0 %5488 }
 0x3cd   :  { %5523 = vrot.lane.b32.xlu1 %v5552_v8, %s5771_s1 }
 0x3ce   :  { %5518 = vrot.lane.b32.xlu0 %v7711_v36, %s9652_s23 }
 0x3d1   :  { %v1976_v42 = vpop.f32.mrf.mxu0 }
 0x3d2   :  { %v1977_v40 = vadd.f32 %v7703_v30, %v1976_v42  ;;  %v5607_v42 = vpack.i.bf16 %v2203_v35, %v7698_v21 }
 0x3d4   :  { %v2018_v43 = vmax.f32 %v1977_v40, 0.0  ;;  %v2158_v40 = vld [vmem:[#allocation5 + $0x30] sm:$0xff] }
 0x3d5   :  { %v2492_v44 = vsel %vm58_vm4, %v2158_v40, %v5481_v37 }
 0x3d6   :  { %5533 = vrot.lane.b32.xlu0 %v5502_v32, %s5773_s13  ;;  %2054 = vst.msk [vmem:[#allocation2 + $0x108] sm:$0xff] %vm58_vm4, %v2018_v43  ;;  %v5484_v32 = vpop.permute.xlu2 %5483  ;;  %v2154_v43 = vld [vmem:[#allocation5 + $0x10] sm:$0xff] }
 0x3d7   :  { %v2488_v46 = vsel %vm58_vm4, %v2154_v43, %v5480_v38 }
 0x3dd   :  { %v2141_v53 = vld [vmem:[#allocation2 + $0xfc] ss:$2 sm:$0xff]  ;;  %v2143_v55 = vld [vmem:[#allocation2 + $0xfd] ss:$2 sm:$0xff] }
 0x3de   :  { %5548 = vrot.lane.b32.xlu0 %v5547_v45, %s9648_s18  ;;  %v2144_v57 = vmax.f32 %v2141_v53, %v2143_v55  ;;  %v5491_v45 = vunpack.i.h.bf16 %v5489_v41 }
 0x3e8   :  { %v1979_v48 = vpop.f32.mrf.mxu0 }
 0x3e9   :  { %v1980_v50 = vadd.f32 %v7703_v30, %v1979_v48  ;;  %v5490_v48 = vunpack.i.l.bf16 %v5489_v41 }
 0x3eb   :  { %v2019_v47 = vmax.f32 %v1980_v50, 0.0  ;;  %v5486_v50 = vunpack.i.h.bf16 %v5484_v32 }
 0x3ed   :  { %2055 = vst.msk [vmem:[#allocation2 + $0x110] sm:$0xff] %vm58_vm4, %v2019_v47  ;;  %v5485_v47 = vunpack.i.l.bf16 %v5484_v32 }
 0x3ef   :  { %v2498_v53 = vsel %vm73_vm8, %v2488_v46, %v5485_v47 }
 0x3fa   :  { %v1982_v36 = vpop.f32.mrf.mxu0 }
 0x3fb   :  { %v1983_v52 = vadd.f32 %v7703_v30, %v1982_v36 }
 0x3fd   :  { %v2020_v49 = vmax.f32 %v1983_v52, 0.0 }
 0x3ff   :  { %2056 = vst.msk [vmem:[#allocation2 + $0x118] sm:$0xff] %vm58_vm4, %v2020_v49  ;;  %v2502_v49 = vsel %vm73_vm8, %v2492_v44, %v5486_v50 }
 0x400   :  { %v2513_v55 = vsel %vm2506_vm12, %v2502_v49, %v5491_v45 }
 0x406   :  { %v2146_v56 = vld [vmem:[#allocation2 + $0x10e] ss:$2 sm:$0xff]  ;;  %v2148_v51 = vld [vmem:[#allocation2 + $0x10f] ss:$2 sm:$0xff] }
 0x407   :  { %v2149_v60 = vmax.f32 %v2146_v56, %v2148_v51  ;;  %v2509_v56 = vsel %vm2506_vm12, %v2498_v53, %v5490_v48  ;;  %v2188_v51 = vld [vmem:[#allocation5 + $0x33] sm:$0xff] }
 0x409   :  { %v2150_v61 = vmax.f32 %v2144_v57, %v2149_v60  ;;  %v5499_v57 = vpop.permute.xlu2 %5498 }
 0x40b   :  { %2151 = vst.msk [vmem:[#allocation5 + $0x51] sm:$0xff] %vm58_vm4, %v2150_v61 }
 0x412   :  { %v2629_v30 = vpop.f32.mrf.mxu0  ;;  %v2221_v54 = vld [vmem:[#allocation5 + $0x4e] sm:$0xff]  ;;  %v2222_v17 = vld [vmem:[#allocation5 + $0x56] sm:$0xff] }
 0x413   :  { %v2211_v2 = vld [vmem:[#allocation5 + $0x4d] sm:$0xff]  ;;  %v2630_v59 = vadd.f32 %v7839_v58, %v2629_v30  ;;  %5343 = vmatmul.msk.f32.gmra.mxu2 %vm58_vm4, %v2221_v54  ;;  %v2212_v14 = vld [vmem:[#allocation5 + $0x55] sm:$0xff]  ;;  %v5501_v30 = vunpack.i.h.bf16 %v5499_v57  ;;  %v5500_v54 = vunpack.i.l.bf16 %v5499_v57 }
 0x414   :  { %v2201_v3 = vld [vmem:[#allocation5 + $0x4c] sm:$0xff]  ;;  %v5542_v4 = vpack.i.bf16 %v2211_v2, %v2207_v63  ;;  %v5577_v24 = vpack.i.bf16 %v2212_v14, %v2208_v16  ;;  %v2202_v29 = vld [vmem:[#allocation5 + $0x54] sm:$0xff] }
 0x415   :  { %v5537_v1 = vpack.i.bf16 %v2201_v3, %v2197_v0  ;;  %v2191_v6 = vld [vmem:[#allocation5 + $0x4b] sm:$0xff]  ;;  %v7843_v12 = vadd.f32 %v2676_v7, %v2630_v59  ;;  %v5572_v26 = vpack.i.bf16 %v2202_v29, %v2198_v31  ;;  %v2192_v36 = vld [vmem:[#allocation5 + $0x53] sm:$0xff]  ;;  %v2209_v7 = vld [vmem:[#allocation5 + $0x3d] sm:$0xff] }
 0x416   :  { %v5562_v10 = vpack.i.bf16 %v2191_v6, %v2187_v5  ;;  %5543 = vrot.lane.b32.xlu2 %v5542_v4, %s5775_s19  ;;  %v2181_v9 = vld [vmem:[#allocation5 + $0x4a] sm:$0xff]  ;;  %v2182_v23 = vld [vmem:[#allocation5 + $0x52] sm:$0xff]  ;;  %v5597_v60 = vpack.i.bf16 %v2192_v36, %v2188_v51 }
 0x417   :  { %5538 = vrot.lane.b32.xlu1 %v5537_v1, %s5772_s24  ;;  %v2706_v13 = vmax.f32 %v7843_v12, 0.0  ;;  %v5557_v20 = vpack.i.bf16 %v2181_v9, %v2177_v18  ;;  %v5592_v28 = vpack.i.bf16 %v2182_v23, %v7649_v11  ;;  %v5494_v11 = vpop.permute.xlu1 %5493  ;;  %v5514_v18 = vpop.permute.xlu2 %5513  ;;  %v2155_v31 = vld [vmem:[#allocation5 + $0x18] sm:$0xff] }
 0x418   :  { %5563 = vrot.lane.b32.xlu0 %v5562_v10, %s5774_s14  ;;  %v5496_v52 = vunpack.i.h.bf16 %v5494_v11  ;;  %v5495_v21 = vunpack.i.l.bf16 %v5494_v11  ;;  %v2213_v10 = vld [vmem:[#allocation5 + $0x5d] sm:$0xff] }
 0x419   :  { %2716 = vst.msk [vmem:[#allocation3] sm:$0xff] %vm73_vm8, %v2706_v13 }
 0x41a   :  { %v2632_v15 = vpop.f32.mrf.mxu0  ;;  %v2519_v63 = vsel %vm80_vm11, %v2509_v56, %v5495_v21  ;;  %v2523_v0 = vsel %vm80_vm11, %v2513_v55, %v5496_v52 }
 0x41b   :  { %v2633_v19 = vadd.f32 %v7839_v58, %v2632_v15  ;;  %5344 = vmatmul.msk.f32.gmra.mxu2 %vm58_vm4, %v2222_v17  ;;  %v2530_v5 = vsel %vm2527_vm13, %v2519_v63, %v5500_v54  ;;  %v2534_v6 = vsel %vm2527_vm13, %v2523_v0, %v5501_v30  ;;  %v5612_v17 = vpack.i.bf16 %v2213_v10, %v2209_v7  ;;  %v2156_v54 = vld [vmem:[#allocation5 + $0x20] sm:$0xff] }
 0x41d   :  { %v7852_v25 = vadd.f32 %v2679_v22, %v2633_v19  ;;  %v5516_v22 = vunpack.i.h.bf16 %v5514_v18 }
 0x41e   :  { %5558 = vrot.lane.b32.xlu2 %v5557_v20, %s5771_s1 }
 0x41f   :  { %5553 = vrot.lane.b32.xlu1 %v5552_v8, %s9652_s23  ;;  %v2707_v27 = vmax.f32 %v7852_v25, 0.0  ;;  %v5582_v8 = vpack.i.bf16 %v2171_v34, %v2167_v62 }
 0x420   :  { %5578 = vrot.lane.b32.xlu0 %v5577_v24, %s5775_s19  ;;  %v5515_v24 = vunpack.i.l.bf16 %v5514_v18 }
 0x421   :  { %2717 = vst.msk [vmem:[#allocation3 + $0x8] sm:$0xff] %vm73_vm8, %v2707_v27 }
 0x422   :  { %v2489_v33 = vsel %vm58_vm4, %v2155_v31, %v5515_v24 }
 0x426   :  { %5573 = vrot.lane.b32.xlu2 %v5572_v26, %s5772_s24 }
 0x427   :  { %5568 = vrot.lane.b32.xlu1 %v5537_v1, %s5773_s13 }
 0x428   :  { %5593 = vrot.lane.b32.xlu0 %v5592_v28, %s5771_s1 }
 0x42e   :  { %5588 = vrot.lane.b32.xlu2 %v5557_v20, %s9652_s23  ;;  %v5529_v20 = vpop.permute.xlu2 %5528 }
 0x42f   :  { %5583 = vrot.lane.b32.xlu1 %v5582_v8, %s9648_s18  ;;  %v5531_v43 = vunpack.i.h.bf16 %v5529_v20  ;;  %v5530_v11 = vunpack.i.l.bf16 %v5529_v20 }
 0x430   :  { %5608 = vrot.lane.b32.xlu0 %v5607_v42, %s5772_s24 }
 0x436   :  { %5603 = vrot.lane.b32.xlu2 %v5572_v26, %s5773_s13  ;;  %v2159_v26 = vld [vmem:[#allocation5 + $0x38] sm:$0xff] }
 0x437   :  { %5598 = vrot.lane.b32.xlu1 %v5597_v60, %s5774_s14  ;;  %v5509_v61 = vpop.permute.xlu1 %5508  ;;  %v2493_v28 = vsel %vm58_vm4, %v2159_v26, %v5516_v22 }
 0x438   :  { %v5511_v2 = vunpack.i.h.bf16 %v5509_v61  ;;  %v5510_v3 = vunpack.i.l.bf16 %v5509_v61  ;;  %v5504_v59 = vpop.permute.xlu0 %5503 }
 0x439   :  { %v5506_v4 = vunpack.i.h.bf16 %v5504_v59  ;;  %v5505_v1 = vunpack.i.l.bf16 %v5504_v59 }
 0x43b   :  { %v2541_v13 = vsel %vm2538_vm14, %v2530_v5, %v5505_v1  ;;  %v2545_v9 = vsel %vm2538_vm14, %v2534_v6, %v5506_v4  ;;  %v2223_v5 = vld [vmem:[#allocation5 + $0x5e] sm:$0xff] }
 0x43c   :  { %v2552_v14 = vsel %vm2549_vm15, %v2541_v13, %v5510_v3  ;;  %v2556_v15 = vsel %vm2549_vm15, %v2545_v9, %v5511_v2  ;;  %v2160_v2 = vld [vmem:[#allocation5 + $0x40] sm:$0xff]  ;;  %5345 = vmatmul.msk.f32.gmra.mxu2 %vm58_vm4, %v2223_v5 }
 0x43d   :  { %2634 = vmatmul.f32.gmra.mxu0 %v2552_v14  ;;  %2646 = vmatmul.f32.vlgmr.msra.gmra.mxu3 %v2556_v15 }
 0x43f   :  { %5613 = vrot.lane.b32.xlu1 %v5612_v17, %s5775_s19  ;;  %v5524_v27 = vpop.permute.xlu1 %5523 }
 0x440   :  { %v5519_v19 = vpop.permute.xlu0 %5518  ;;  %v5526_v34 = vunpack.i.h.bf16 %v5524_v27  ;;  %v5525_v35 = vunpack.i.l.bf16 %v5524_v27 }
 0x441   :  { %v5521_v29 = vunpack.i.h.bf16 %v5519_v19  ;;  %v5520_v23 = vunpack.i.l.bf16 %v5519_v19 }
 0x443   :  { %v2503_v38 = vsel %vm73_vm8, %v2493_v28, %v5521_v29  ;;  %v2499_v62 = vsel %vm73_vm8, %v2489_v33, %v5520_v23 }
 0x444   :  { %v2510_v32 = vsel %vm2506_vm12, %v2499_v62, %v5525_v35  ;;  %v2514_v40 = vsel %vm2506_vm12, %v2503_v38, %v5526_v34 }
 0x445   :  { %v2520_v48 = vsel %vm80_vm11, %v2510_v32, %v5530_v11  ;;  %v2524_v50 = vsel %vm80_vm11, %v2514_v40, %v5531_v43  ;;  %v2161_v40 = vld [vmem:[#allocation5 + $0x48] sm:$0xff] }
 0x448   :  { %v5534_v16 = vpop.permute.xlu0 %5533 }
 0x449   :  { %v5536_v41 = vunpack.i.h.bf16 %v5534_v16  ;;  %v5535_v8 = vunpack.i.l.bf16 %v5534_v16 }
 0x44b   :  { %v2531_v52 = vsel %vm2527_vm13, %v2520_v48, %v5535_v8  ;;  %v2535_v21 = vsel %vm2527_vm13, %v2524_v50, %v5536_v41 }
 0x450   :  { %v5549_v42 = vpop.permute.xlu0 %5548 }
 0x451   :  { %v5551_v60 = vunpack.i.h.bf16 %v5549_v42  ;;  %v5550_v61 = vunpack.i.l.bf16 %v5549_v42  ;;  %v2157_v42 = vld [vmem:[#allocation5 + $0x28] sm:$0xff] }
 0x453   :  { %v2494_v3 = vsel %vm58_vm4, %v2160_v2, %v5551_v60  ;;  %v2490_v59 = vsel %vm58_vm4, %v2156_v54, %v5550_v61 }
 0x470   :  { %v5544_v37 = vpop.permute.xlu2 %5543 }
 0x471   :  { %v5546_v47 = vunpack.i.h.bf16 %v5544_v37  ;;  %v5545_v36 = vunpack.i.l.bf16 %v5544_v37  ;;  %v2682_v37 = vpop.f32.mrf.mxu2 }
 0x478   :  { %v5559_v55 = vpop.permute.xlu2 %5558 }
 0x479   :  { %v5561_v6 = vunpack.i.h.bf16 %v5559_v55  ;;  %v5560_v7 = vunpack.i.l.bf16 %v5559_v55 }
 0x480   :  { %v5574_v10 = vpop.permute.xlu2 %5573 }
 0x481   :  { %v5576_v16 = vunpack.i.h.bf16 %v5574_v10  ;;  %v5575_v22 = vunpack.i.l.bf16 %v5574_v10 }
 0x488   :  { %v5589_v38 = vpop.permute.xlu2 %5588 }
 0x489   :  { %v5539_v44 = vpop.permute.xlu1 %5538 }
 0x48a   :  { %v5541_v46 = vunpack.i.h.bf16 %v5539_v44  ;;  %v5540_v45 = vunpack.i.l.bf16 %v5539_v44  ;;  %v5564_v57 = vpop.permute.xlu0 %5563  ;;  %v5591_v44 = vunpack.i.h.bf16 %v5589_v38 }
 0x48b   :  { %v5566_v14 = vunpack.i.h.bf16 %v5564_v57  ;;  %v5565_v15 = vunpack.i.l.bf16 %v5564_v57 }
 0x48c   :  { %v2542_v49 = vsel %vm2538_vm14, %v2531_v52, %v5540_v45  ;;  %v2546_v53 = vsel %vm2538_vm14, %v2535_v21, %v5541_v46  ;;  %v5590_v46 = vunpack.i.l.bf16 %v5589_v38  ;;  %v2685_v45 = vpop.f32.mrf.mxu2 }
 0x48d   :  { %v2553_v56 = vsel %vm2549_vm15, %v2542_v49, %v5545_v36  ;;  %v2557_v51 = vsel %vm2549_vm15, %v2546_v53, %v5546_v47 }
 0x48e   :  { %2637 = vmatmul.f32.gmra.mxu0 %v2553_v56  ;;  %2649 = vmatmul.f32.gmra.mxu3 %v2557_v51 }
 0x490   :  { %v5604_v53 = vpop.permute.xlu2 %5603 }
 0x491   :  { %v5554_v63 = vpop.permute.xlu1 %5553  ;;  %v5606_v60 = vunpack.i.h.bf16 %v5604_v53  ;;  %v5605_v61 = vunpack.i.l.bf16 %v5604_v53  ;;  %v3326_v53 = vld [vmem:[%s9605_s5 + $0x228] sm:$0xff] }
 0x492   :  { %v5556_v0 = vunpack.i.h.bf16 %v5554_v63  ;;  %v5555_v30 = vunpack.i.l.bf16 %v5554_v63  ;;  %v5579_v17 = vpop.permute.xlu0 %5578 }
 0x493   :  { %v5581_v29 = vunpack.i.h.bf16 %v5579_v17  ;;  %v5580_v23 = vunpack.i.l.bf16 %v5579_v17 }
 0x494   :  { %v2500_v4 = vsel %vm73_vm8, %v2490_v59, %v5555_v30  ;;  %v2504_v1 = vsel %vm73_vm8, %v2494_v3, %v5556_v0  ;;  %v2688_v0 = vpop.f32.mrf.mxu2 }
 0x495   :  { %v2511_v13 = vsel %vm2506_vm12, %v2500_v4, %v5560_v7  ;;  %v2515_v9 = vsel %vm2506_vm12, %v2504_v1, %v5561_v6 }
 0x496   :  { %v2521_v24 = vsel %vm80_vm11, %v2511_v13, %v5565_v15  ;;  %v2525_v27 = vsel %vm80_vm11, %v2515_v9, %v5566_v14 }
 0x499   :  { %v5569_v18 = vpop.permute.xlu1 %5568 }
 0x49a   :  { %v5571_v19 = vunpack.i.h.bf16 %v5569_v18  ;;  %v5570_v20 = vunpack.i.l.bf16 %v5569_v18  ;;  %v5594_v8 = vpop.permute.xlu0 %5593 }
 0x49b   :  { %v5596_v36 = vunpack.i.h.bf16 %v5594_v8  ;;  %v5595_v52 = vunpack.i.l.bf16 %v5594_v8 }
 0x49c   :  { %v2532_v31 = vsel %vm2527_vm13, %v2521_v24, %v5570_v20  ;;  %v2536_v26 = vsel %vm2527_vm13, %v2525_v27, %v5571_v19  ;;  %v7927_v13 = vpop.f32.mrf.mxu2  ;;  %v3096_v24 = vld [vmem:[#allocation3] ss:$2 sm:$0xf]  ;;  %v3098_v27 = vld [vmem:[#allocation3 + $0x1] ss:$2 sm:$0xf] }
 0x49d   :  { %v2543_v28 = vsel %vm2538_vm14, %v2532_v31, %v5575_v22  ;;  %v2547_v33 = vsel %vm2538_vm14, %v2536_v26, %v5576_v16  ;;  %v3099_v31 = vmax.f32 %v3096_v24, %v3098_v27 }
 0x49e   :  { %v2554_v34 = vsel %vm2549_vm15, %v2543_v28, %v5580_v23  ;;  %v2558_v35 = vsel %vm2549_vm15, %v2547_v33, %v5581_v29 }
 0x49f   :  { %2640 = vmatmul.f32.gmra.mxu0 %v2554_v34  ;;  %2652 = vmatmul.f32.gmra.mxu3 %v2558_v35 }
 0x4a1   :  { %v5584_v62 = vpop.permute.xlu1 %5583 }
 0x4a2   :  { %v5586_v32 = vunpack.i.h.bf16 %v5584_v62  ;;  %v5585_v41 = vunpack.i.l.bf16 %v5584_v62  ;;  %v5609_v63 = vpop.permute.xlu0 %5608 }
 0x4a3   :  { %v5611_v2 = vunpack.i.h.bf16 %v5609_v63  ;;  %v5610_v3 = vunpack.i.l.bf16 %v5609_v63  ;;  %v3321_v63 = vld [vmem:[%s9605_s5 + $0x200] sm:$0xff] }
 0x4a4   :  { %v2495_v43 = vsel %vm58_vm4, %v2161_v40, %v5586_v32  ;;  %v2491_v11 = vsel %vm58_vm4, %v2157_v42, %v5585_v41  ;;  %v2694_v20 = vpop.f32.mrf.mxu2 }
 0x4a5   :  { %v2505_v48 = vsel %vm73_vm8, %v2495_v43, %v5591_v44  ;;  %v2501_v50 = vsel %vm73_vm8, %v2491_v11, %v5590_v46 }
 0x4a6   :  { %v2512_v55 = vsel %vm2506_vm12, %v2501_v50, %v5595_v52  ;;  %v2516_v56 = vsel %vm2506_vm12, %v2505_v48, %v5596_v36  ;;  %v3327_v36 = vld [vmem:[%s9605_s5 + $0x230] sm:$0xff]  ;;  %v3328_v52 = vld [vmem:[%s9605_s5 + $0x238] sm:$0xff] }
 0x4a7   :  { %3406 = vmatpush.msra.mxu1 %v3327_v36  ;;  %3484 = vmatpush.msrb.mxu2 %v3328_v52 }
 0x4a9   :  { %v5599_v47 = vpop.permute.xlu1 %5598  ;;  %3485 = vmatpush.msrb.mxu2 %v3326_v53 }
 0x4aa   :  { %v5601_v21 = vunpack.i.h.bf16 %v5599_v47  ;;  %v5600_v49 = vunpack.i.l.bf16 %v5599_v47 }
 0x4ac   :  { %v2522_v51 = vsel %vm80_vm11, %v2512_v55, %v5600_v49  ;;  %v2526_v57 = vsel %vm80_vm11, %v2516_v56, %v5601_v21  ;;  %v2697_v32 = vpop.f32.mrf.mxu2  ;;  %v3325_v21 = vld [vmem:[%s9605_s5 + $0x220] sm:$0xff]  ;;  %v3323_v56 = vld [vmem:[%s9605_s5 + $0x210] sm:$0xff] }
 0x4ad   :  { %v2533_v30 = vsel %vm2527_vm13, %v2522_v51, %v5605_v61  ;;  %v2537_v54 = vsel %vm2527_vm13, %v2526_v57, %v5606_v60  ;;  %v3324_v51 = vld [vmem:[%s9605_s5 + $0x218] sm:$0xff]  ;;  %3407 = vmatpush.msra.mxu1 %v3325_v21 }
 0x4ae   :  { %v2544_v5 = vsel %vm2538_vm14, %v2533_v30, %v5610_v3  ;;  %v2548_v6 = vsel %vm2538_vm14, %v2537_v54, %v5611_v2  ;;  %3486 = vmatpush.msrb.mxu2 %v3324_v51  ;;  %v3165_v51 = vld [vmem:[#allocation6 + $0x1d] sm:$0xff] }
 0x4af   :  { %3408 = vmatpush.msra.mxu1 %v3323_v56 }
 0x4b1   :  { %v5614_v59 = vpop.permute.xlu1 %5613  ;;  %3409 = vmatpush.msra.mxu1 %v3321_v63  ;;  %v3271_v63 = vld [vmem:[%s9605_s5 + $0x70] sm:$0xff] }
 0x4b2   :  { %v5616_v4 = vunpack.i.h.bf16 %v5614_v59  ;;  %v5615_v1 = vunpack.i.l.bf16 %v5614_v59 }
 0x4b4   :  { %v2555_v7 = vsel %vm2549_vm15, %v2544_v5, %v5615_v1  ;;  %v2559_v10 = vsel %vm2549_vm15, %v2548_v6, %v5616_v4 }
 0x4b5   :  { %2643 = vmatmul.f32.gmra.mxu0 %v2555_v7  ;;  %2655 = vmatmul.f32.gmra.mxu3 %v2559_v10 }
 0x4ba   :  { %v2635_v9 = vpop.f32.mrf.mxu0 }
 0x4bb   :  { %v2636_v14 = vadd.f32 %v7839_v58, %v2635_v9 }
 0x4bd   :  { %v7930_v15 = vadd.f32 %v2682_v37, %v2636_v14 }
 0x4bf   :  { %v2708_v17 = vmax.f32 %v7930_v15, 0.0 }
 0x4c0   :  { %v2647_v18 = vpop.f32.mrf.mxu3 }
 0x4c1   :  { %2718 = vst.msk [vmem:[#allocation3 + $0x10] sm:$0xff] %vm73_vm8, %v2708_v17  ;;  %v2648_v19 = vadd.f32 %v7839_v58, %v2647_v18 }
 0x4c3   :  { %v7935_v16 = vadd.f32 %v2694_v20, %v2648_v19 }
 0x4c5   :  { %v2712_v22 = vmax.f32 %v7935_v16, 0.0 }
 0x4c7   :  { %2722 = vst.msk [vmem:[#allocation3 + $0x30] sm:$0xff] %vm73_vm8, %v2712_v22 }
 0x4c8   :  { %v3101_v29 = vld [vmem:[#allocation3 + $0xa] ss:$2 sm:$0xf]  ;;  %v3103_v23 = vld [vmem:[#allocation3 + $0xb] ss:$2 sm:$0xf] }
 0x4c9   :  { %v3104_v26 = vmax.f32 %v3101_v29, %v3103_v23 }
 0x4cb   :  { %v3105_v28 = vmax.f32 %v3099_v31, %v3104_v26 }
 0x4cd   :  { %3107 = vst.msk [vmem:[#allocation6 + $0x7] sm:$0xf] %vm3106_vm1, %v3105_v28 }
 0x4d4   :  { %v3150_v59 = vld [vmem:[#allocation6 + $0x2] sm:$0xff] }
 0x4d5   :  { %v3147_v4 = vld [vmem:[#allocation6 + $0x1] sm:$0xff] }
 0x50b   :  { %v2638_v33 = vpop.f32.mrf.mxu0 }
 0x50c   :  { %v2639_v34 = vadd.f32 %v7839_v58, %v2638_v33 }
 0x50e   :  { %v7941_v35 = vadd.f32 %v2685_v45, %v2639_v34  ;;  %v2700_v45 = vpop.f32.mrf.mxu2 }
 0x510   :  { %v2709_v37 = vmax.f32 %v7941_v35, 0.0 }
 0x511   :  { %v2650_v38 = vpop.f32.mrf.mxu3 }
 0x512   :  { %2719 = vst.msk [vmem:[#allocation3 + $0x18] sm:$0xff] %vm73_vm8, %v2709_v37  ;;  %v2651_v62 = vadd.f32 %v7839_v58, %v2650_v38 }
 0x514   :  { %v7946_v41 = vadd.f32 %v2697_v32, %v2651_v62  ;;  %v3287_v62 = vld [vmem:[%s9605_s5 + $0xf0] sm:$0xff]  ;;  %v3285_v32 = vld [vmem:[%s9605_s5 + $0xe0] sm:$0xff] }
 0x515   :  { %3342 = vmatpush.msrb.mxu3 %v3287_v62  ;;  %v3293_v62 = vld [vmem:[%s9605_s5 + $0x120] sm:$0xff] }
 0x516   :  { %v2713_v8 = vmax.f32 %v7946_v41, 0.0  ;;  %v2703_v17 = vpop.f32.mrf.mxu2 }
 0x517   :  { %3343 = vmatpush.msrb.mxu3 %v3285_v32  ;;  %v3300_v32 = vld [vmem:[%s9605_s5 + $0x158] sm:$0xff] }
 0x518   :  { %2723 = vst.msk [vmem:[#allocation3 + $0x38] sm:$0xff] %vm73_vm8, %v2713_v8 }
 0x519   :  { %v3109_v50 = vld [vmem:[#allocation3 + $0x14] ss:$2 sm:$0xf]  ;;  %v3111_v49 = vld [vmem:[#allocation3 + $0x15] ss:$2 sm:$0xf] }
 0x51a   :  { %v3112_v60 = vmax.f32 %v3109_v50, %v3111_v49 }
 0x51c   :  { %v2641_v42 = vpop.f32.mrf.mxu0 }
 0x51d   :  { %v2642_v40 = vadd.f32 %v7839_v58, %v2641_v42 }
 0x51f   :  { %v7951_v43 = vadd.f32 %v2688_v0, %v2642_v40  ;;  %v3322_v0 = vld [vmem:[%s9605_s5 + $0x208] sm:$0xff]  ;;  %v3126_v20 = vld [vmem:[#allocation3 + $0x32] ss:$2 sm:$0xf] }
 0x520   :  { %3487 = vmatpush.msrb.mxu2 %v3322_v0  ;;  %v3128_v22 = vld [vmem:[#allocation3 + $0x33] ss:$2 sm:$0xf]  ;;  %v3269_v0 = vld [vmem:[%s9605_s5 + $0x60] sm:$0xff] }
 0x521   :  { %v2710_v11 = vmax.f32 %v7951_v43, 0.0  ;;  %v3129_v23 = vmax.f32 %v3126_v20, %v3128_v22  ;;  %v3307_v20 = vld [vmem:[%s9605_s5 + $0x190] sm:$0xff]  ;;  %v3314_v22 = vld [vmem:[%s9605_s5 + $0x1c8] sm:$0xff] }
 0x522   :  { %v2653_v44 = vpop.f32.mrf.mxu3 }
 0x523   :  { %2720 = vst.msk [vmem:[#allocation3 + $0x20] sm:$0xff] %vm73_vm8, %v2710_v11  ;;  %v2654_v46 = vadd.f32 %v7839_v58, %v2653_v44  ;;  %v3283_v44 = vld [vmem:[%s9605_s5 + $0xd0] sm:$0xff] }
 0x524   :  { %3344 = vmatpush.msrb.mxu3 %v3283_v44  ;;  %v3166_v44 = vld [vmem:[#allocation6 + $0x1e] sm:$0xff] }
 0x525   :  { %v7956_v48 = vadd.f32 %v2700_v45, %v2654_v46  ;;  %v3281_v46 = vld [vmem:[%s9605_s5 + $0xc0] sm:$0xff]  ;;  %v3279_v45 = vld [vmem:[%s9605_s5 + $0xb0] sm:$0xff] }
 0x526   :  { %3345 = vmatpush.msrb.mxu3 %v3281_v46  ;;  %v3289_v46 = vld [vmem:[%s9605_s5 + $0x100] sm:$0xff] }
 0x527   :  { %v2714_v47 = vmax.f32 %v7956_v48, 0.0 }
 0x528   :  { %3346 = vmatpush.msrb.mxu3 %v3279_v45  ;;  %v3296_v45 = vld [vmem:[%s9605_s5 + $0x138] sm:$0xff] }
 0x529   :  { %2724 = vst.msk [vmem:[#allocation3 + $0x40] sm:$0xff] %vm73_vm8, %v2714_v47 }
 0x52a   :  { %v3114_v55 = vld [vmem:[#allocation3 + $0x1e] ss:$2 sm:$0xf]  ;;  %v3116_v57 = vld [vmem:[#allocation3 + $0x1f] ss:$2 sm:$0xf] }
 0x52b   :  { %v3117_v61 = vmax.f32 %v3114_v55, %v3116_v57  ;;  %v3277_v57 = vld [vmem:[%s9605_s5 + $0xa0] sm:$0xff] }
 0x52c   :  { %3347 = vmatpush.msrb.mxu3 %v3277_v57 }
 0x52d   :  { %v3118_v30 = vmax.f32 %v3112_v60, %v3117_v61  ;;  %v3275_v60 = vld [vmem:[%s9605_s5 + $0x90] sm:$0xff]  ;;  %v3273_v61 = vld [vmem:[%s9605_s5 + $0x80] sm:$0xff] }
 0x52e   :  { %3348 = vmatpush.msrb.mxu3 %v3275_v60  ;;  %v3288_v60 = vld [vmem:[%s9605_s5 + $0xf8] sm:$0xff] }
 0x52f   :  { %3119 = vst.msk [vmem:[#allocation6 + $0xd] sm:$0xf] %vm3106_vm1, %v3118_v30  ;;  %v3267_v30 = vld [vmem:[%s9605_s5 + $0x50] sm:$0xff] }
 0x530   :  { %v3133_v26 = vld [vmem:[#allocation3 + $0x3c] ss:$2 sm:$0xf]  ;;  %v3135_v28 = vld [vmem:[#allocation3 + $0x3d] ss:$2 sm:$0xf]  ;;  %3349 = vmatpush.msrb.mxu3 %v3273_v61 }
 0x531   :  { %v3136_v37 = vmax.f32 %v3133_v26, %v3135_v28  ;;  %v3308_v26 = vld [vmem:[%s9605_s5 + $0x198] sm:$0xff]  ;;  %v3299_v28 = vld [vmem:[%s9605_s5 + $0x150] sm:$0xff] }
 0x532   :  { %v2644_v54 = vpop.f32.mrf.mxu0  ;;  %3350 = vmatpush.msrb.mxu3 %v3271_v63 }
 0x533   :  { %v2645_v2 = vadd.f32 %v7839_v58, %v2644_v54  ;;  %v3265_v54 = vld [vmem:[%s9605_s5 + $0x40] sm:$0xff] }
 0x534   :  { %3351 = vmatpush.msrb.mxu3 %v3269_v0 }
 0x535   :  { %v7988_v3 = vadd.f32 %v7927_v13, %v2645_v2  ;;  %v3263_v2 = vld [vmem:[%s9605_s5 + $0x30] sm:$0xff] }
 0x536   :  { %v3153_v5 = vld [vmem:[#allocation6 + $0x6] sm:$0xff]  ;;  %3352 = vmatpush.msrb.mxu3 %v3267_v30  ;;  %v3286_v30 = vld [vmem:[%s9605_s5 + $0xe8] sm:$0xff] }
 0x537   :  { %v2711_v1 = vmax.f32 %v7988_v3, 0.0  ;;  %v3151_v6 = vld [vmem:[#allocation6 + $0xa] sm:$0xff]  ;;  %3194 = vrot.lane.b32.xlu1 %v3153_v5, %s5772_s24  ;;  %v3319_v5 = vld [vmem:[%s9605_s5 + $0x1f0] sm:$0xff] }
 0x538   :  { %v3148_v7 = vld [vmem:[#allocation6 + $0x9] sm:$0xff]  ;;  %v2656_v10 = vpop.f32.mrf.mxu3  ;;  %v5622_v9 = vpack.i.bf16 %v3151_v6, %v3150_v59  ;;  %3353 = vmatpush.msrb.mxu3 %v3265_v54 }
 0x539   :  { %v5617_v14 = vpack.i.bf16 %v3148_v7, %v3147_v4  ;;  %2721 = vst.msk [vmem:[#allocation3 + $0x28] sm:$0xff] %vm73_vm8, %v2711_v1  ;;  %v2657_v18 = vadd.f32 %v7839_v58, %v2656_v10  ;;  %v8008_v42 = vld [vmem:[#allocation6 + $0x8] sm:$0xff]  ;;  %v3261_v59 = vld [vmem:[%s9605_s5 + $0x20] sm:$0xff]  ;;  %v3259_v4 = vld [vmem:[%s9605_s5 + $0x10] sm:$0xff] }
 0x53a   :  { %5623 = vrot.lane.b32.xlu0 %v5622_v9, %s5774_s14  ;;  %3354 = vmatpush.msrb.mxu3 %v3263_v2  ;;  %v3257_v1 = vld [vmem:[%s9605_s5] sm:$0xff]  ;;  %v3315_v7 = vld [vmem:[%s9605_s5 + $0x1d0] sm:$0xff]  ;;  %v3320_v9 = vld [vmem:[%s9605_s5 + $0x1f8] sm:$0xff] }
 0x53b   :  { %5618 = vrot.lane.b32.xlu2 %v5617_v14, %s9652_s23  ;;  %v7996_v13 = vadd.f32 %v2703_v17, %v2657_v18  ;;  %v3317_v6 = vld [vmem:[%s9605_s5 + $0x1e0] sm:$0xff]  ;;  %v3311_v14 = vld [vmem:[%s9605_s5 + $0x1b0] sm:$0xff]  ;;  %3446 = vmatpush.msrb.mxu1 %v3320_v9  ;;  %v3318_v17 = vld [vmem:[%s9605_s5 + $0x1e8] sm:$0xff] }
 0x53c   :  { %3355 = vmatpush.msrb.mxu3 %v3261_v59  ;;  %v3313_v10 = vld [vmem:[%s9605_s5 + $0x1c0] sm:$0xff]  ;;  %v3284_v54 = vld [vmem:[%s9605_s5 + $0xd8] sm:$0xff] }
 0x53d   :  { %v2715_v19 = vmax.f32 %v7996_v13, 0.0  ;;  %v3309_v18 = vld [vmem:[%s9605_s5 + $0x1a0] sm:$0xff]  ;;  %3447 = vmatpush.msrb.mxu1 %v3318_v17  ;;  %v3272_v9 = vld [vmem:[%s9605_s5 + $0x78] sm:$0xff] }
 0x53e   :  { %3356 = vmatpush.msrb.mxu3 %v3259_v4  ;;  %v3282_v4 = vld [vmem:[%s9605_s5 + $0xc8] sm:$0xff] }
 0x53f   :  { %2725 = vst.msk [vmem:[#allocation3 + $0x48] sm:$0xff] %vm73_vm8, %v2715_v19  ;;  %v3316_v19 = vld [vmem:[%s9605_s5 + $0x1d8] sm:$0xff] }
 0x540   :  { %v3121_v24 = vld [vmem:[#allocation3 + $0x28] ss:$2 sm:$0xf]  ;;  %v3123_v27 = vld [vmem:[#allocation3 + $0x29] ss:$2 sm:$0xf]  ;;  %3357 = vmatpush.msrb.mxu3 %v3257_v1  ;;  %3448 = vmatpush.msrb.mxu1 %v3316_v19 }
 0x541   :  { %v3124_v29 = vmax.f32 %v3121_v24, %v3123_v27  ;;  %v3305_v24 = vld [vmem:[%s9605_s5 + $0x180] sm:$0xff]  ;;  %v3312_v27 = vld [vmem:[%s9605_s5 + $0x1b8] sm:$0xff] }
 0x542   :  { %3368 = vmatpush.msra.mxu3 %v3319_v5  ;;  %3449 = vmatpush.msrb.mxu1 %v3314_v22  ;;  %v3280_v5 = vld [vmem:[%s9605_s5 + $0xb8] sm:$0xff]  ;;  %v3266_v22 = vld [vmem:[%s9605_s5 + $0x48] sm:$0xff] }
 0x543   :  { %v3130_v31 = vmax.f32 %v3124_v29, %v3129_v23  ;;  %v3303_v29 = vld [vmem:[%s9605_s5 + $0x170] sm:$0xff]  ;;  %v3310_v23 = vld [vmem:[%s9605_s5 + $0x1a8] sm:$0xff]  ;;  %v3268_v19 = vld [vmem:[%s9605_s5 + $0x58] sm:$0xff] }
 0x544   :  { %3369 = vmatpush.msra.mxu3 %v3317_v6  ;;  %3450 = vmatpush.msrb.mxu1 %v3312_v27 }
 0x545   :  { %3131 = vst.msk [vmem:[#allocation6 + $0x13] sm:$0xf] %vm3106_vm1, %v3130_v31  ;;  %v3301_v31 = vld [vmem:[%s9605_s5 + $0x160] sm:$0xff] }
 0x546   :  { %v3138_v58 = vld [vmem:[#allocation3 + $0x46] ss:$2 sm:$0xf]  ;;  %v3140_v33 = vld [vmem:[#allocation3 + $0x47] ss:$2 sm:$0xf]  ;;  %3370 = vmatpush.msra.mxu3 %v3315_v7  ;;  %3451 = vmatpush.msrb.mxu1 %v3310_v23 }
 0x547   :  { %v3141_v34 = vmax.f32 %v3138_v58, %v3140_v33  ;;  %v3306_v58 = vld [vmem:[%s9605_s5 + $0x188] sm:$0xff]  ;;  %v3297_v33 = vld [vmem:[%s9605_s5 + $0x140] sm:$0xff]  ;;  %v3276_v7 = vld [vmem:[%s9605_s5 + $0x98] sm:$0xff] }
 0x548   :  { %3371 = vmatpush.msra.mxu3 %v3313_v10  ;;  %3452 = vmatpush.msrb.mxu1 %v3308_v26  ;;  %v3274_v10 = vld [vmem:[%s9605_s5 + $0x88] sm:$0xff]  ;;  %v3264_v23 = vld [vmem:[%s9605_s5 + $0x38] sm:$0xff] }
 0x549   :  { %v3142_v38 = vmax.f32 %v3136_v37, %v3141_v34  ;;  %v3304_v34 = vld [vmem:[%s9605_s5 + $0x178] sm:$0xff]  ;;  %v3295_v37 = vld [vmem:[%s9605_s5 + $0x130] sm:$0xff] }
 0x54a   :  { %3372 = vmatpush.msra.mxu3 %v3311_v14  ;;  %3453 = vmatpush.msrb.mxu1 %v3306_v58  ;;  %v3270_v14 = vld [vmem:[%s9605_s5 + $0x68] sm:$0xff]  ;;  %v3260_v58 = vld [vmem:[%s9605_s5 + $0x18] sm:$0xff] }
 0x54b   :  { %3143 = vst.msk [vmem:[#allocation6 + $0x19] sm:$0xf] %vm3106_vm1, %v3142_v38  ;;  %v3302_v38 = vld [vmem:[%s9605_s5 + $0x168] sm:$0xff] }
 0x54c   :  { %v3154_v8 = vld [vmem:[#allocation6 + $0xe] sm:$0xff]  ;;  %3373 = vmatpush.msra.mxu3 %v3309_v18  ;;  %3454 = vmatpush.msrb.mxu1 %v3304_v34 }
 0x54d   :  { %v3149_v40 = vld [vmem:[#allocation6 + $0x11] sm:$0xff]  ;;  %5356 = vmatmul.msk.f32.vlgmr.msra.gmra.mxu1 %vm73_vm8, %v3154_v8  ;;  %5359 = vmatmul.msk.f32.vlgmr.msrb.gmra.mxu2 %vm73_vm8, %v3154_v8 }
 0x54e   :  { %v5627_v11 = vpack.i.bf16 %v8008_v42, %v3149_v40  ;;  %3196 = vrot.lane.b32.xlu2 %v3154_v8, %s5772_s24  ;;  %v3160_v36 = vld [vmem:[#allocation6 + $0xc] sm:$0xff]  ;;  %3374 = vmatpush.msra.mxu3 %v3307_v20  ;;  %v3291_v40 = vld [vmem:[%s9605_s5 + $0x110] sm:$0xff] }
 0x54f   :  { %v3163_v52 = vld [vmem:[#allocation6 + $0xd] sm:$0xff]  ;;  %3455 = vmatpush.msrb.mxu1 %v3302_v38 }
 0x550   :  { %5628 = vrot.lane.b32.xlu0 %v5627_v11, %s9652_s23  ;;  %v8030_v21 = vld [vmem:[#allocation6 + $0x10] sm:$0xff]  ;;  %3375 = vmatpush.msra.mxu3 %v3305_v24  ;;  %v3298_v11 = vld [vmem:[%s9605_s5 + $0x148] sm:$0xff] }
 0x551   :  { %3456 = vmatpush.msrb.mxu1 %v3300_v32 }
 0x552   :  { %v3152_v50 = vld [vmem:[#allocation6 + $0x12] sm:$0xff]  ;;  %v3162_v56 = vld [vmem:[#allocation6 + $0x1c] sm:$0xff]  ;;  %3376 = vmatpush.msra.mxu3 %v3303_v29 }
 0x553   :  { %3186 = vrot.lane.b32.xlu1 %v3152_v50, %s5774_s14  ;;  %v3155_v47 = vld [vmem:[#allocation6 + $0x16] sm:$0xff]  ;;  %3457 = vmatpush.msrb.mxu1 %v3298_v11 }
 0x554   :  { %v3161_v49 = vld [vmem:[#allocation6 + $0x14] sm:$0xff]  ;;  %3377 = vmatpush.msra.mxu3 %v3301_v31 }
 0x555   :  { %5357 = vmatmul.msk.f32.gmra.mxu1 %vm73_vm8, %v3155_v47  ;;  %5360 = vmatmul.msk.f32.gmra.mxu2 %vm73_vm8, %v3155_v47  ;;  %v3164_v53 = vld [vmem:[#allocation6 + $0x15] sm:$0xff] }
 0x556   :  { %3198 = vrot.lane.b32.xlu2 %v3155_v47, %s5772_s24  ;;  %v3159_v55 = vld [vmem:[#allocation6 + $0x18] sm:$0xff]  ;;  %3378 = vmatpush.msra.mxu3 %v3299_v28  ;;  %v3157_v11 = vld [vmem:[#allocation6 + $0xf] sm:$0xff] }
 0x557   :  { %3458 = vmatpush.msrb.mxu1 %v3296_v45  ;;  %v3294_v47 = vld [vmem:[%s9605_s5 + $0x128] sm:$0xff] }
 0x558   :  { %3218 = vrot.lane.b32.xlu0 %v3160_v36, %s5774_s14  ;;  %3379 = vmatpush.msra.mxu3 %v3297_v33  ;;  %v3156_v33 = vld [vmem:[#allocation6 + $0x7] sm:$0xff] }
 0x559   :  { %3459 = vmatpush.msrb.mxu1 %v3294_v47 }
 0x55a   :  { %3380 = vmatpush.msra.mxu3 %v3295_v37  ;;  %v3258_v37 = vld [vmem:[%s9605_s5 + $0x8] sm:$0xff] }
 0x55b   :  { %3230 = vrot.lane.b32.xlu1 %v3163_v52, %s5772_s24  ;;  %v3292_v52 = vld [vmem:[%s9605_s5 + $0x118] sm:$0xff] }
 0x55c   :  { %3381 = vmatpush.msra.mxu3 %v3293_v62  ;;  %3460 = vmatpush.msrb.mxu1 %v3292_v52  ;;  %v3158_v52 = vld [vmem:[#allocation6 + $0x17] sm:$0xff] }
 0x55d   :  { %5358 = vmatmul.msk.f32.gmra.mxu1 %vm73_vm8, %v3166_v44  ;;  %5361 = vmatmul.msk.f32.gmra.mxu2 %vm73_vm8, %v3166_v44 }
 0x55e   :  { %3208 = vrot.lane.b32.xlu2 %v8030_v21, %s9652_s23  ;;  %3382 = vmatpush.msra.mxu3 %v3291_v40 }
 0x560   :  { %3220 = vrot.lane.b32.xlu0 %v3161_v49, %s5774_s14  ;;  %3383 = vmatpush.msra.mxu3 %v3289_v46 }
 0x563   :  { %3232 = vrot.lane.b32.xlu1 %v3164_v53, %s5772_s24  ;;  %v3144_v53 = vld [vmem:[#allocation6] sm:$0xff] }
 0x566   :  { %3210 = vrot.lane.b32.xlu2 %v3159_v55, %s9652_s23 }
 0x568   :  { %3222 = vrot.lane.b32.xlu0 %v3162_v56, %s5774_s14  ;;  %v3290_v56 = vld [vmem:[%s9605_s5 + $0x108] sm:$0xff] }
 0x569   :  { %3461 = vmatpush.msrb.mxu1 %v3290_v56 }
 0x56b   :  { %3234 = vrot.lane.b32.xlu1 %v3165_v51, %s5772_s24 }
 0x595   :  { %v5619_v8 = vpop.permute.xlu2 %5618 }
 0x596   :  { %v5620_v50 = vunpack.i.l.bf16 %v5619_v8  ;;  %v5621_v61 = vunpack.i.h.bf16 %v5619_v8 }
 0x598   :  { %v3239_v55 = vsel %vm73_vm8, %v3144_v53, %v5620_v50  ;;  %v3240_v2 = vsel %vm73_vm8, %v8008_v42, %v5621_v61  ;;  %v3278_v42 = vld [vmem:[%s9605_s5 + $0xa8] sm:$0xff] }
 0x5a8   :  { %v3197_v1 = vpop.permute.xlu2 %3196 }
 0x5a9   :  { %v3195_v51 = vpop.permute.xlu1 %3194 }
 0x5ac   :  { %v5624_v36 = vpop.permute.xlu0 %5623 }
 0x5ad   :  { %v5625_v49 = vunpack.i.l.bf16 %v5624_v36  ;;  %v5626_v0 = vunpack.i.h.bf16 %v5624_v36 }
 0x5af   :  { %v3242_v57 = vsel %vm80_vm11, %v3239_v55, %v5625_v49  ;;  %v3243_v59 = vsel %vm80_vm11, %v3240_v2, %v5626_v0 }
 0x5b0   :  { %v8176_v63 = vsel %vm2538_vm14, %v3242_v57, %v3195_v51  ;;  %v3246_v6 = vsel %vm2538_vm14, %v3243_v59, %v3197_v1  ;;  %v3199_v24 = vpop.permute.xlu2 %3198 }
 0x5b1   :  { %3358 = vmatmul.f32.vlgmr.msrb.gmra.mxu3 %v8176_v63 }
 0x5b2   :  { %3420 = vmatpush.msrb.mxu3 %v3288_v60  ;;  %v3329_v60 = vld [vmem:[%s9606_s6] sm:$0x3] }
 0x5b3   :  { %v3331_v0 = vperm.slane %v3329_v60, 0 }
 0x5b4   :  { %3421 = vmatpush.msrb.mxu3 %v3286_v30 }
 0x5b6   :  { %3422 = vmatpush.msrb.mxu3 %v3284_v54 }
 0x5b8   :  { %3423 = vmatpush.msrb.mxu3 %v3282_v4  ;;  %v3209_v8 = vpop.permute.xlu2 %3208 }
 0x5b9   :  { %3361 = vmatmul.f32.gmra.mxu3 %v3246_v6  ;;  %v3249_v44 = vsel %vm73_vm8, %v3157_v11, %v3209_v8 }
 0x5ba   :  { %3424 = vmatpush.msrb.mxu3 %v3280_v5 }
 0x5bc   :  { %3425 = vmatpush.msrb.mxu3 %v3278_v42 }
 0x5be   :  { %3426 = vmatpush.msrb.mxu3 %v3276_v7 }
 0x5c0   :  { %3427 = vmatpush.msrb.mxu3 %v3274_v10  ;;  %v3211_v47 = vpop.permute.xlu2 %3210 }
 0x5c1   :  { %v3250_v49 = vsel %vm73_vm8, %v3158_v52, %v3211_v47  ;;  %v3695_v47 = vld [vmem:[%s9607_s7 + $0xe0] sm:$0xff]  ;;  %v3693_v52 = vld [vmem:[%s9607_s7 + $0xd0] sm:$0xff] }
 0x5c2   :  { %v5629_v17 = vpop.permute.xlu0 %5628  ;;  %3428 = vmatpush.msrb.mxu3 %v3272_v9 }
 0x5c3   :  { %v5630_v18 = vunpack.i.l.bf16 %v5629_v17  ;;  %v5631_v26 = vunpack.i.h.bf16 %v5629_v17 }
 0x5c4   :  { %3429 = vmatpush.msrb.mxu3 %v3270_v14 }
 0x5c5   :  { %v3241_v20 = vsel %vm73_vm8, %v8030_v21, %v5630_v18  ;;  %v3187_v27 = vpop.permute.xlu1 %3186  ;;  %v3262_v21 = vld [vmem:[%s9605_s5 + $0x28] sm:$0xff]  ;;  %v3248_v34 = vsel %vm73_vm8, %v3156_v33, %v5631_v26 }
 0x5c6   :  { %3430 = vmatpush.msrb.mxu3 %v3268_v19  ;;  %v3244_v29 = vsel %vm80_vm11, %v3241_v20, %v3187_v27  ;;  %v8260_v27 = vperm.slane %v3329_v60, 1 }
 0x5c7   :  { %v3247_v31 = vsel %vm2538_vm14, %v3244_v29, %v3199_v24 }
 0x5c8   :  { %3431 = vmatpush.msrb.mxu3 %v3266_v22 }
 0x5c9   :  { %3364 = vmatmul.f32.gmra.mxu3 %v3247_v31 }
 0x5ca   :  { %v3219_v28 = vpop.permute.xlu0 %3218  ;;  %3432 = vmatpush.msrb.mxu3 %v3264_v23  ;;  %v3411_v54 = vpop.f32.mrf.mxu1 }
 0x5cb   :  { %v3251_v38 = vsel %vm80_vm11, %v3248_v34, %v3219_v28 }
 0x5cc   :  { %3433 = vmatpush.msrb.mxu3 %v3262_v21 }
 0x5cd   :  { %v3231_v62 = vpop.permute.xlu1 %3230 }
 0x5ce   :  { %3434 = vmatpush.msrb.mxu3 %v3260_v58  ;;  %v3254_v32 = vsel %vm2538_vm14, %v3251_v38, %v3231_v62 }
 0x5cf   :  { %3462 = vmatmul.f32.vlgmr.msrb.gmra.mxu1 %v3254_v32 }
 0x5d0   :  { %3435 = vmatpush.msrb.mxu3 %v3258_v37 }
 0x5d1   :  { %3384 = vmatmul.f32.vlgmr.msra.gmra.mxu3 %v3254_v32 }
 0x5d2   :  { %v3221_v40 = vpop.permute.xlu0 %3220  ;;  %v3414_v42 = vpop.f32.mrf.mxu1 }
 0x5d3   :  { %v3252_v46 = vsel %vm80_vm11, %v3249_v44, %v3221_v40  ;;  %v8269_v44 = vpop.f32.mrf.mxu2 }
 0x5d5   :  { %v3233_v45 = vpop.permute.xlu1 %3232 }
 0x5d6   :  { %v3255_v50 = vsel %vm2538_vm14, %v3252_v46, %v3233_v45  ;;  %v3697_v45 = vld [vmem:[%s9607_s7 + $0xf0] sm:$0xff] }
 0x5d7   :  { %3465 = vmatmul.f32.gmra.mxu1 %v3255_v50  ;;  %3820 = vmatpush.msra.mxu3 %v3697_v45  ;;  %v3743_v45 = vld [vmem:[%s9607_s7 + $0x260] sm:$0xff] }
 0x5d9   :  { %3387 = vmatmul.f32.gmra.mxu3 %v3255_v50  ;;  %v3729_v50 = vld [vmem:[%s9607_s7 + $0x1f0] sm:$0xff] }
 0x5da   :  { %v3223_v36 = vpop.permute.xlu0 %3222  ;;  %v3417_v18 = vpop.f32.mrf.mxu1  ;;  %3840 = vmatpush.msra.mxu2 %v3729_v50  ;;  %3821 = vmatpush.msra.mxu3 %v3695_v47  ;;  %v3673_v50 = vld [vmem:[%s9607_s7 + $0x30] sm:$0xff] }
 0x5db   :  { %v3253_v53 = vsel %vm80_vm11, %v3250_v49, %v3223_v36  ;;  %v3727_v36 = vld [vmem:[%s9607_s7 + $0x1e0] sm:$0xff]  ;;  %v3725_v49 = vld [vmem:[%s9607_s7 + $0x1d0] sm:$0xff] }
 0x5dc   :  { %3841 = vmatpush.msra.mxu2 %v3727_v36  ;;  %3822 = vmatpush.msra.mxu3 %v3693_v52  ;;  %v3705_v47 = vld [vmem:[%s9607_s7 + $0x130] sm:$0xff] }
 0x5dd   :  { %v3235_v55 = vpop.permute.xlu1 %3234  ;;  %v3741_v52 = vld [vmem:[%s9607_s7 + $0x250] sm:$0xff] }
 0x5de   :  { %v3256_v56 = vsel %vm2538_vm14, %v3253_v53, %v3235_v55  ;;  %v3761_v53 = vld [vmem:[%s9607_s7 + $0x2f0] sm:$0xff]  ;;  %v3691_v55 = vld [vmem:[%s9607_s7 + $0xc0] sm:$0xff]  ;;  %3842 = vmatpush.msra.mxu2 %v3725_v49 }
 0x5df   :  { %3468 = vmatmul.f32.gmra.mxu1 %v3256_v56  ;;  %3823 = vmatpush.msra.mxu3 %v3691_v55  ;;  %v3671_v49 = vld [vmem:[%s9607_s7 + $0x20] sm:$0xff] }
 0x5e0   :  { %3860 = vmatpush.msra.mxu1 %v3761_v53  ;;  %v3703_v53 = vld [vmem:[%s9607_s7 + $0x120] sm:$0xff] }
 0x5e1   :  { %3390 = vmatmul.f32.gmra.mxu3 %v3256_v56  ;;  %v3723_v56 = vld [vmem:[%s9607_s7 + $0x1c0] sm:$0xff] }
 0x5e2   :  { %3843 = vmatpush.msra.mxu2 %v3723_v56  ;;  %v3739_v55 = vld [vmem:[%s9607_s7 + $0x240] sm:$0xff]  ;;  %v3669_v56 = vld [vmem:[%s9607_s7 + $0x10] sm:$0xff] }
 0x5e9   :  { %3436 = vmatmul.f32.vlgmr.msrb.gmra.mxu3 %v8176_v63 }
 0x5f1   :  { %3439 = vmatmul.f32.gmra.mxu3 %v3246_v6 }
 0x5f9   :  { %3442 = vmatmul.f32.gmra.mxu3 %v3247_v31 }
 0x634   :  { %v3359_v51 = vpop.f32.mrf.mxu3 }
 0x635   :  { %v3360_v30 = vadd.f32 %v3359_v51, %v3331_v0  ;;  %v3759_v51 = vld [vmem:[%s9607_s7 + $0x2e0] sm:$0xff] }
 0x636   :  { %3861 = vmatpush.msra.mxu1 %v3759_v51  ;;  %v3701_v51 = vld [vmem:[%s9607_s7 + $0x110] sm:$0xff] }
 0x63c   :  { %v3362_v57 = vpop.f32.mrf.mxu3 }
 0x63d   :  { %v3363_v1 = vadd.f32 %v3362_v57, %v3331_v0 }
 0x64c   :  { %v3365_v61 = vpop.f32.mrf.mxu3  ;;  %v8267_v62 = vpop.f32.mrf.mxu1 }
 0x64d   :  { %v3366_v9 = vadd.f32 %v3365_v61, %v3331_v0  ;;  %v3689_v61 = vld [vmem:[%s9607_s7 + $0xb0] sm:$0xff] }
 0x64e   :  { %v3721_v0 = vld [vmem:[%s9607_s7 + $0x1b0] sm:$0xff]  ;;  %3824 = vmatpush.msra.mxu3 %v3689_v61  ;;  %v3699_v61 = vld [vmem:[%s9607_s7 + $0x100] sm:$0xff] }
 0x64f   :  { %3844 = vmatpush.msra.mxu2 %v3721_v0  ;;  %v3793_v0 = vld [vmem:[%s9607_s7 + $0x3f0] sm:$0xff] }
 0x654   :  { %v3385_v63 = vpop.f32.mrf.mxu3  ;;  %v3466_v60 = vpop.f32.mrf.mxu1 }
 0x655   :  { %v3386_v2 = vadd.f32 %v3385_v63, %v3360_v30  ;;  %v3757_v63 = vld [vmem:[%s9607_s7 + $0x2d0] sm:$0xff] }
 0x656   :  { %3862 = vmatpush.msra.mxu1 %v3757_v63 }
 0x657   :  { %v8249_v59 = vadd.f32 %v3411_v54, %v3386_v2  ;;  %v3687_v2 = vld [vmem:[%s9607_s7 + $0xa0] sm:$0xff] }
 0x658   :  { %3825 = vmatpush.msra.mxu3 %v3687_v2  ;;  %v3791_v2 = vld [vmem:[%s9607_s7 + $0x3e0] sm:$0xff] }
 0x659   :  { %v3498_v4 = vmax.f32 %v8249_v59, 0.0 }
 0x65b   :  { %3501 = vst.msk [vmem:[#allocation4] sm:$0xff] %vm80_vm11, %v3498_v4  ;;  %v3719_v4 = vld [vmem:[%s9607_s7 + $0x1a0] sm:$0xff] }
 0x65c   :  { %v3388_v5 = vpop.f32.mrf.mxu3  ;;  %3845 = vmatpush.msra.mxu2 %v3719_v4  ;;  %v3807_v4 = vld [vmem:[%s9607_s7 + $0x460] sm:$0xff] }
 0x65d   :  { %v3389_v6 = vadd.f32 %v3388_v5, %v3363_v1  ;;  %v3755_v5 = vld [vmem:[%s9607_s7 + $0x2c0] sm:$0xff] }
 0x65e   :  { %3863 = vmatpush.msra.mxu1 %v3755_v5  ;;  %v3789_v5 = vld [vmem:[%s9607_s7 + $0x3d0] sm:$0xff] }
 0x65f   :  { %v8253_v7 = vadd.f32 %v3414_v42, %v3389_v6  ;;  %v3492_v6 = vpop.f32.mrf.mxu2 }
 0x661   :  { %v3499_v10 = vmax.f32 %v8253_v7, 0.0 }
 0x662   :  { %v3615_v20 = vld [vmem:[#allocation4] ss:$2 sm:$0x3]  ;;  %v3617_v22 = vld [vmem:[#allocation4 + $0x1] ss:$2 sm:$0x3] }
 0x663   :  { %3502 = vst.msk [vmem:[#allocation4 + $0x8] sm:$0xff] %vm80_vm11, %v3499_v10  ;;  %v3618_v31 = vmax.f32 %v3615_v20, %v3617_v22  ;;  %v3685_v10 = vld [vmem:[%s9607_s7 + $0x90] sm:$0xff] }
 0x664   :  { %v3391_v14 = vpop.f32.mrf.mxu3  ;;  %3826 = vmatpush.msra.mxu3 %v3685_v10  ;;  %v3787_v10 = vld [vmem:[%s9607_s7 + $0x3c0] sm:$0xff] }
 0x665   :  { %v3392_v17 = vadd.f32 %v3391_v14, %v3366_v9  ;;  %v3717_v9 = vld [vmem:[%s9607_s7 + $0x190] sm:$0xff] }
 0x666   :  { %v3753_v14 = vld [vmem:[%s9607_s7 + $0x2b0] sm:$0xff]  ;;  %3846 = vmatpush.msra.mxu2 %v3717_v9  ;;  %v3698_v9 = vld [vmem:[%s9607_s7 + $0xf8] sm:$0xff] }
 0x667   :  { %v8257_v19 = vadd.f32 %v3417_v18, %v3392_v17  ;;  %v3683_v17 = vld [vmem:[%s9607_s7 + $0x80] sm:$0xff]  ;;  %3864 = vmatpush.msra.mxu1 %v3753_v14 }
 0x668   :  { %v3715_v18 = vld [vmem:[%s9607_s7 + $0x180] sm:$0xff]  ;;  %3827 = vmatpush.msra.mxu3 %v3683_v17  ;;  %v3785_v17 = vld [vmem:[%s9607_s7 + $0x3b0] sm:$0xff] }
 0x669   :  { %v3500_v24 = vmax.f32 %v8257_v19, 0.0  ;;  %3847 = vmatpush.msra.mxu2 %v3715_v18  ;;  %v3803_v14 = vld [vmem:[%s9607_s7 + $0x440] sm:$0xff]  ;;  %v3696_v18 = vld [vmem:[%s9607_s7 + $0xe8] sm:$0xff] }
 0x66a   :  { %v3620_v29 = vld [vmem:[#allocation4 + $0x6] ss:$2 sm:$0x3]  ;;  %v3622_v23 = vld [vmem:[#allocation4 + $0x7] ss:$2 sm:$0x3] }
 0x66b   :  { %v3623_v26 = vmax.f32 %v3620_v29, %v3622_v23  ;;  %3503 = vst.msk [vmem:[#allocation4 + $0x10] sm:$0xff] %vm80_vm11, %v3500_v24  ;;  %v3627_v33 = vld [vmem:[#allocation4 + $0xc] ss:$2 sm:$0x3]  ;;  %v3751_v24 = vld [vmem:[%s9607_s7 + $0x2a0] sm:$0xff]  ;;  %v3681_v29 = vld [vmem:[%s9607_s7 + $0x70] sm:$0xff] }
 0x66c   :  { %v3437_v21 = vpop.f32.mrf.mxu3  ;;  %v3629_v34 = vld [vmem:[#allocation4 + $0xd] ss:$2 sm:$0x3]  ;;  %v3713_v23 = vld [vmem:[%s9607_s7 + $0x170] sm:$0xff]  ;;  %3865 = vmatpush.msra.mxu1 %v3751_v24  ;;  %3828 = vmatpush.msra.mxu3 %v3681_v29  ;;  %v3799_v29 = vld [vmem:[%s9607_s7 + $0x420] sm:$0xff] }
 0x66d   :  { %v8264_v28 = vadd.f32 %v3437_v21, %v8260_v27  ;;  %v3624_v58 = vmax.f32 %v3618_v31, %v3623_v26  ;;  %v3630_v32 = vmax.f32 %v3627_v33, %v3629_v34  ;;  %v3469_v26 = vpop.f32.mrf.mxu1  ;;  %v3679_v21 = vld [vmem:[%s9607_s7 + $0x60] sm:$0xff]  ;;  %3848 = vmatpush.msra.mxu2 %v3713_v23  ;;  %v3694_v24 = vld [vmem:[%s9607_s7 + $0xd8] sm:$0xff]  ;;  %v3781_v23 = vld [vmem:[%s9607_s7 + $0x390] sm:$0xff] }
 0x66e   :  { %v3747_v34 = vld [vmem:[%s9607_s7 + $0x280] sm:$0xff]  ;;  %3829 = vmatpush.msra.mxu3 %v3679_v21  ;;  %v3692_v21 = vld [vmem:[%s9607_s7 + $0xc8] sm:$0xff] }
 0x66f   :  { %3625 = vst.msk [vmem:[#allocation7 + $0x5] sm:$0x3] %vm83_vm5, %v3624_v58  ;;  %v3711_v58 = vld [vmem:[%s9607_s7 + $0x160] sm:$0xff] }
 0x670   :  { %3849 = vmatpush.msra.mxu2 %v3711_v58  ;;  %v3777_v58 = vld [vmem:[%s9607_s7 + $0x370] sm:$0xff] }
 0x672   :  { %v3632_v37 = vld [vmem:[#allocation4 + $0x12] ss:$2 sm:$0x3]  ;;  %v3634_v38 = vld [vmem:[#allocation4 + $0x13] ss:$2 sm:$0x3] }
 0x673   :  { %v3635_v8 = vmax.f32 %v3632_v37, %v3634_v38  ;;  %v3495_v37 = vpop.f32.mrf.mxu2  ;;  %v3677_v38 = vld [vmem:[%s9607_s7 + $0x50] sm:$0xff] }
 0x674   :  { %v3440_v46 = vpop.f32.mrf.mxu3  ;;  %3830 = vmatpush.msra.mxu3 %v3677_v38  ;;  %v3773_v38 = vld [vmem:[%s9607_s7 + $0x350] sm:$0xff] }
 0x675   :  { %v3636_v40 = vmax.f32 %v3630_v32, %v3635_v8  ;;  %v3441_v57 = vadd.f32 %v3440_v46, %v8260_v27  ;;  %v3709_v32 = vld [vmem:[%s9607_s7 + $0x150] sm:$0xff] }
 0x676   :  { %v3639_v11 = vld [vmem:[#allocation7 + $0x1] sm:$0xff]  ;;  %v3745_v8 = vld [vmem:[%s9607_s7 + $0x270] sm:$0xff]  ;;  %3850 = vmatpush.msra.mxu2 %v3709_v32 }
 0x677   :  { %3648 = vrot.lane.b32.xlu0 %v3639_v11, %s5774_s14  ;;  %3637 = vst.msk [vmem:[#allocation7 + $0x9] sm:$0x3] %vm83_vm5, %v3636_v40  ;;  %v3467_v1 = vadd.f32 %v3466_v60, %v3441_v57  ;;  %v3675_v40 = vld [vmem:[%s9607_s7 + $0x40] sm:$0xff]  ;;  %v3737_v57 = vld [vmem:[%s9607_s7 + $0x230] sm:$0xff]  ;;  %v3686_v32 = vld [vmem:[%s9607_s7 + $0x98] sm:$0xff] }
 0x678   :  { %v3707_v11 = vld [vmem:[%s9607_s7 + $0x140] sm:$0xff]  ;;  %3831 = vmatpush.msra.mxu3 %v3675_v40  ;;  %v3684_v40 = vld [vmem:[%s9607_s7 + $0x88] sm:$0xff] }
 0x679   :  { %v3493_v20 = vadd.f32 %v3492_v6, %v3467_v1  ;;  %3851 = vmatpush.msra.mxu2 %v3707_v11  ;;  %v3667_v60 = vld [vmem:[%s9607_s7] sm:$0xff]  ;;  %v3733_v1 = vld [vmem:[%s9607_s7 + $0x210] sm:$0xff]  ;;  %v5364_v11 = vmul.f32 -1.442695, %v8257_v19 }
 0x67a   :  { %3832 = vmatpush.msra.mxu3 %v3673_v50  ;;  %v3805_v6 = vld [vmem:[%s9607_s7 + $0x450] sm:$0xff]  ;;  %v3767_v50 = vld [vmem:[%s9607_s7 + $0x320] sm:$0xff] }
 0x67b   :  { %5648 = vtanh.f32 %v3493_v20  ;;  %3852 = vmatpush.msra.mxu2 %v3705_v47  ;;  %v3801_v20 = vld [vmem:[%s9607_s7 + $0x430] sm:$0xff]  ;;  %v3680_v47 = vld [vmem:[%s9607_s7 + $0x68] sm:$0xff] }
 0x67c   :  { %v3443_v42 = vpop.f32.mrf.mxu3  ;;  %3833 = vmatpush.msra.mxu3 %v3671_v49  ;;  %v3765_v19 = vld [vmem:[%s9607_s7 + $0x310] sm:$0xff]  ;;  %v3676_v49 = vld [vmem:[%s9607_s7 + $0x48] sm:$0xff] }
 0x67d   :  { %v3444_v22 = vadd.f32 %v3443_v42, %v8260_v27  ;;  %v3749_v27 = vld [vmem:[%s9607_s7 + $0x290] sm:$0xff]  ;;  %3853 = vmatpush.msra.mxu2 %v3703_v53  ;;  %v3731_v42 = vld [vmem:[%s9607_s7 + $0x200] sm:$0xff]  ;;  %v3674_v53 = vld [vmem:[%s9607_s7 + $0x38] sm:$0xff] }
 0x67e   :  { %v3643_v30 = vld [vmem:[#allocation7 + $0x6] sm:$0xff]  ;;  %3866 = vmatpush.msra.mxu1 %v3749_v27  ;;  %3834 = vmatpush.msra.mxu3 %v3669_v56  ;;  %v3672_v56 = vld [vmem:[%s9607_s7 + $0x28] sm:$0xff] }
 0x67f   :  { %v3641_v54 = vld [vmem:[#allocation7 + $0x4] sm:$0xff]  ;;  %3656 = vrot.lane.b32.xlu1 %v3643_v30, %s5774_s14  ;;  %v3470_v33 = vadd.f32 %v3469_v26, %v3444_v22  ;;  %3854 = vmatpush.msra.mxu2 %v3701_v51  ;;  %v3809_v30 = vld [vmem:[%s9607_s7 + $0x470] sm:$0xff] }
 0x680   :  { %3652 = vrot.lane.b32.xlu2 %v3641_v54, %s5774_s14  ;;  %v3645_v31 = vld [vmem:[#allocation7 + $0x9] sm:$0xff]  ;;  %3867 = vmatpush.msra.mxu1 %v3747_v34  ;;  %v3670_v51 = vld [vmem:[%s9607_s7 + $0x18] sm:$0xff] }
 0x681   :  { %v3496_v46 = vadd.f32 %v3495_v37, %v3470_v33  ;;  %v5649_v36 = vpop.eup %5648  ;;  %v3735_v54 = vld [vmem:[%s9607_s7 + $0x220] sm:$0xff]  ;;  %3835 = vmatpush.msra.mxu3 %v3667_v60  ;;  %3855 = vmatpush.msra.mxu2 %v3699_v61  ;;  %v3690_v33 = vld [vmem:[%s9607_s7 + $0xb8] sm:$0xff]  ;;  %v3688_v37 = vld [vmem:[%s9607_s7 + $0xa8] sm:$0xff] }
 0x682   :  { %3868 = vmatpush.msra.mxu1 %v3745_v8  ;;  %v3783_v22 = vld [vmem:[%s9607_s7 + $0x3a0] sm:$0xff]  ;;  %v3668_v60 = vld [vmem:[%s9607_s7 + $0x8] sm:$0xff] }
 0x683   :  { %5650 = vtanh.f32 %v3496_v46  ;;  %3880 = vmatpush.msrb.mxu3 %v3793_v0  ;;  %3908 = vmatpush.msrb.mxu2 %v3809_v30  ;;  %v3779_v27 = vld [vmem:[%s9607_s7 + $0x380] sm:$0xff]  ;;  %v3769_v46 = vld [vmem:[%s9607_s7 + $0x330] sm:$0xff]  ;;  %v3730_v30 = vld [vmem:[%s9607_s7 + $0x1f8] sm:$0xff] }
 0x684   :  { %3869 = vmatpush.msra.mxu1 %v3743_v45  ;;  %v3795_v26 = vld [vmem:[%s9607_s7 + $0x400] sm:$0xff]  ;;  %v3682_v45 = vld [vmem:[%s9607_s7 + $0x78] sm:$0xff]  ;;  %5652 = vpow2.f32 %v5364_v11  ;;  %v3756_v11 = vld [vmem:[%s9607_s7 + $0x2c8] sm:$0xff] }
 0x685   :  { %3881 = vmatpush.msrb.mxu3 %v3791_v2  ;;  %3909 = vmatpush.msrb.mxu2 %v3807_v4  ;;  %v3775_v34 = vld [vmem:[%s9607_s7 + $0x360] sm:$0xff]  ;;  %v3728_v2 = vld [vmem:[%s9607_s7 + $0x1e8] sm:$0xff]  ;;  %v3726_v4 = vld [vmem:[%s9607_s7 + $0x1d8] sm:$0xff] }
 0x686   :  { %3870 = vmatpush.msra.mxu1 %v3741_v52  ;;  %v3771_v8 = vld [vmem:[%s9607_s7 + $0x340] sm:$0xff] }
 0x687   :  { %3882 = vmatpush.msrb.mxu3 %v3789_v5  ;;  %3910 = vmatpush.msrb.mxu2 %v3805_v6  ;;  %v3763_v52 = vld [vmem:[%s9607_s7 + $0x300] sm:$0xff]  ;;  %v3724_v5 = vld [vmem:[%s9607_s7 + $0x1c8] sm:$0xff] }
 0x688   :  { %3660 = vrot.lane.b32.xlu2 %v3645_v31, %s5774_s14  ;;  %3871 = vmatpush.msra.mxu1 %v3739_v55  ;;  %v3797_v31 = vld [vmem:[%s9607_s7 + $0x410] sm:$0xff]  ;;  %v3640_v0 = vld [vmem:[#allocation7 + $0x2] sm:$0xff] }
 0x689   :  { %v5651_v63 = vpop.eup %5650  ;;  %3883 = vmatpush.msrb.mxu3 %v3787_v10  ;;  %3911 = vmatpush.msrb.mxu2 %v3803_v14  ;;  %v8564_v10 = vld [vmem:[#allocation7 + $0xa] sm:$0xff] }
 0x68a   :  { %3872 = vmatpush.msra.mxu1 %v3737_v57  ;;  %v5653_v55 = vpop.eup %5652  ;;  %v3720_v14 = vld [vmem:[%s9607_s7 + $0x1a8] sm:$0xff] }
 0x68b   :  { %3884 = vmatpush.msrb.mxu3 %v3785_v17  ;;  %3912 = vmatpush.msrb.mxu2 %v3801_v20  ;;  %v3515_v57 = vadd.f32 1.0, %v5653_v55  ;;  %v3718_v17 = vld [vmem:[%s9607_s7 + $0x198] sm:$0xff]  ;;  %v3716_v20 = vld [vmem:[%s9607_s7 + $0x188] sm:$0xff] }
 0x68c   :  { %3873 = vmatpush.msra.mxu1 %v3735_v54 }
 0x68d   :  { %3885 = vmatpush.msrb.mxu3 %v3783_v22  ;;  %3913 = vmatpush.msrb.mxu2 %v3799_v29  ;;  %5654 = vrcp.f32 %v3515_v57  ;;  %v3638_v29 = vld [vmem:[#allocation7] sm:$0xff]  ;;  %vm3551_vm7 = vweird.f32 %v3515_v57 }
 0x68e   :  { %3874 = vmatpush.msra.mxu1 %v3733_v1 }
 0x68f   :  { %3886 = vmatpush.msrb.mxu3 %v3781_v23  ;;  %3914 = vmatpush.msrb.mxu2 %v3797_v31  ;;  %v3714_v23 = vld [vmem:[%s9607_s7 + $0x178] sm:$0xff] }
 0x690   :  { %3569 = vrot.lane.b32.xlu2 %v5649_v36, %s5774_s14  ;;  %3875 = vmatpush.msra.mxu1 %v3731_v42  ;;  %v3678_v36 = vld [vmem:[%s9607_s7 + $0x58] sm:$0xff] }
 0x691   :  { %3887 = vmatpush.msrb.mxu3 %v3779_v27  ;;  %3915 = vmatpush.msrb.mxu2 %v3795_v26  ;;  %v3722_v42 = vld [vmem:[%s9607_s7 + $0x1b8] sm:$0xff] }
 0x692   :  { %3920 = vmatpush.msrb.mxu1 %v3698_v9  ;;  %v3762_v31 = vld [vmem:[%s9607_s7 + $0x2f8] sm:$0xff] }
 0x693   :  { %3888 = vmatpush.msrb.mxu3 %v3777_v58  ;;  %v3760_v58 = vld [vmem:[%s9607_s7 + $0x2e8] sm:$0xff] }
 0x694   :  { %3921 = vmatpush.msrb.mxu1 %v3696_v18 }
 0x695   :  { %3889 = vmatpush.msrb.mxu3 %v3775_v34  ;;  %v3555_v34 = vand.u32 2147483647, %v3515_v57 }
 0x696   :  { %3922 = vmatpush.msrb.mxu1 %v3694_v24 }
 0x697   :  { %3890 = vmatpush.msrb.mxu3 %v3773_v38  ;;  %v3758_v38 = vld [vmem:[%s9607_s7 + $0x2d8] sm:$0xff]  ;;  %vm3556_vm10 = vcmp.eq.f32.partialorder %v3555_v34, 8.507059e+37 }
 0x698   :  { %3571 = vrot.lane.b32.xlu2 %v5651_v63, %s5774_s14  ;;  %3923 = vmatpush.msrb.mxu1 %v3692_v21  ;;  %v5655_v63 = vpop.eup %5654  ;;  %v3712_v21 = vld [vmem:[%s9607_s7 + $0x168] sm:$0xff]  ;;  %v3798_v34 = vld [vmem:[%s9607_s7 + $0x418] sm:$0xff] }
 0x699   :  { %3891 = vmatpush.msrb.mxu3 %v3771_v8  ;;  %v3547_v1 = vmul.f32 %v5655_v63, %v3515_v57  ;;  %vm3552_vm6 = vweird.f32 %v5655_v63 }
 0x69a   :  { %3924 = vmatpush.msrb.mxu1 %v3690_v33  ;;  %v3557_v33 = vand.u32 2147483648, %v3515_v57  ;;  %vm3553_vm9 = vmor %vm3551_vm7, %vm3552_vm6  ;;  %v3752_v57 = vld [vmem:[%s9607_s7 + $0x2a8] sm:$0xff]  ;;  %vm4052_vm6 = vcmask 521220  }
 0x69b   :  { %3892 = vmatpush.msrb.mxu3 %v3769_v46  ;;  %v3548_v9 = vsub.f32 1.0, %v3547_v1  ;;  %v3644_v46 = vld [vmem:[#allocation7 + $0x8] sm:$0xff]  ;;  %v3810_v1 = vld [vmem:[%s9607_s7 + $0x478] sm:$0xff] }
 0x69c   :  { %3925 = vmatpush.msrb.mxu1 %v3688_v37  ;;  %v3710_v37 = vld [vmem:[%s9607_s7 + $0x158] sm:$0xff]  ;;  %v3558_v8 = vor.u32 1.1754944e-38, %v3557_v33  ;;  %v3776_v33 = vld [vmem:[%s9607_s7 + $0x368] sm:$0xff] }
 0x69d   :  { %3893 = vmatpush.msrb.mxu3 %v3767_v50  ;;  %v3549_v18 = vmul.f32 %v5655_v63, %v3548_v9  ;;  %v3642_v50 = vld [vmem:[#allocation7 + $0x5] sm:$0xff]  ;;  %v3808_v9 = vld [vmem:[%s9607_s7 + $0x468] sm:$0xff] }
 0x69e   :  { %3926 = vmatpush.msrb.mxu1 %v3686_v32 }
 0x69f   :  { %3894 = vmatpush.msrb.mxu3 %v3765_v19  ;;  %v3550_v26 = vadd.f32 %v5655_v63, %v3549_v18  ;;  %v3742_v18 = vld [vmem:[%s9607_s7 + $0x258] sm:$0xff] }
 0x6a0   :  { %3927 = vmatpush.msrb.mxu1 %v3684_v40  ;;  %v3708_v40 = vld [vmem:[%s9607_s7 + $0x148] sm:$0xff] }
 0x6a1   :  { %3895 = vmatpush.msrb.mxu3 %v3763_v52  ;;  %v3554_v32 = vsel %vm3553_vm9, %v5655_v63, %v3550_v26  ;;  %v3754_v52 = vld [vmem:[%s9607_s7 + $0x2b8] sm:$0xff]  ;;  %v3700_v63 = vld [vmem:[%s9607_s7 + $0x108] sm:$0xff] }
 0x6a2   :  { %3928 = vmatpush.msrb.mxu1 %v3682_v45  ;;  %v3778_v26 = vld [vmem:[%s9607_s7 + $0x378] sm:$0xff] }
 0x6a4   :  { %3929 = vmatpush.msrb.mxu1 %v3680_v47  ;;  %v8607_v47 = vsel %vm3556_vm10, %v3558_v8, %v3554_v32  ;;  %v3796_v32 = vld [vmem:[%s9607_s7 + $0x408] sm:$0xff] }
 0x6a5   :  { %v3732_v8 = vld [vmem:[%s9607_s7 + $0x208] sm:$0xff] }
 0x6a6   :  { %3930 = vmatpush.msrb.mxu1 %v3678_v36  ;;  %v3706_v36 = vld [vmem:[%s9607_s7 + $0x138] sm:$0xff] }
 0x6a8   :  { %3931 = vmatpush.msrb.mxu1 %v3676_v49 }
 0x6aa   :  { %3932 = vmatpush.msrb.mxu1 %v3674_v53 }
 0x6ac   :  { %3933 = vmatpush.msrb.mxu1 %v3672_v56  ;;  %v3794_v56 = vld [vmem:[%s9607_s7 + $0x3f8] sm:$0xff] }
 0x6ae   :  { %3934 = vmatpush.msrb.mxu1 %v3670_v51  ;;  %v3704_v51 = vld [vmem:[%s9607_s7 + $0x128] sm:$0xff] }
 0x6b0   :  { %3935 = vmatpush.msrb.mxu1 %v3668_v60  ;;  %v3792_v60 = vld [vmem:[%s9607_s7 + $0x3e8] sm:$0xff] }
 0x6da   :  { %v3653_v61 = vpop.permute.xlu2 %3652 }
 0x6db   :  { %v8549_v54 = vsel %vm80_vm11, %v3640_v0, %v3653_v61  ;;  %v3702_v61 = vld [vmem:[%s9607_s7 + $0x118] sm:$0xff] }
 0x6dc   :  { %3856 = vmatmul.f32.vlgmr.msra.gmra.mxu2 %v8549_v54  ;;  %v3750_v0 = vld [vmem:[%s9607_s7 + $0x298] sm:$0xff] }
 0x6dd   :  { %3940 = vmatpush.msra.mxu2 %v3730_v30  ;;  %v3790_v30 = vld [vmem:[%s9607_s7 + $0x3d8] sm:$0xff] }
 0x6df   :  { %3941 = vmatpush.msra.mxu2 %v3728_v2  ;;  %v3748_v2 = vld [vmem:[%s9607_s7 + $0x288] sm:$0xff] }
 0x6e1   :  { %3942 = vmatpush.msra.mxu2 %v3726_v4  ;;  %v3788_v4 = vld [vmem:[%s9607_s7 + $0x3c8] sm:$0xff] }
 0x6e2   :  { %v3661_v6 = vpop.permute.xlu2 %3660 }
 0x6e3   :  { %3943 = vmatpush.msra.mxu2 %v3724_v5  ;;  %v8616_v49 = vsel %vm80_vm11, %v3644_v46, %v3661_v6  ;;  %v3786_v6 = vld [vmem:[%s9607_s7 + $0x3b8] sm:$0xff]  ;;  %v3768_v46 = vld [vmem:[%s9607_s7 + $0x328] sm:$0xff] }
 0x6e4   :  { %5365 = vmatmul.msk.f32.vlgmr.msrb.gmra.mxu2 %vm80_vm11, %v8564_v10 }
 0x6e5   :  { %3944 = vmatpush.msra.mxu2 %v3722_v42  ;;  %v3746_v42 = vld [vmem:[%s9607_s7 + $0x278] sm:$0xff] }
 0x6e7   :  { %3945 = vmatpush.msra.mxu2 %v3720_v14  ;;  %v3744_v14 = vld [vmem:[%s9607_s7 + $0x268] sm:$0xff] }
 0x6e9   :  { %3946 = vmatpush.msra.mxu2 %v3718_v17  ;;  %v3649_v24 = vpop.permute.xlu0 %3648  ;;  %v3784_v17 = vld [vmem:[%s9607_s7 + $0x3a8] sm:$0xff] }
 0x6ea   :  { %v8577_v22 = vpop.permute.xlu2 %3569  ;;  %v8586_v27 = vsel %vm80_vm11, %v3638_v29, %v3649_v24  ;;  %v3804_v24 = vld [vmem:[%s9607_s7 + $0x448] sm:$0xff] }
 0x6eb   :  { %3947 = vmatpush.msra.mxu2 %v3716_v20  ;;  %3836 = vmatmul.f32.vlgmr.msra.gmra.mxu3 %v8586_v27  ;;  %v3782_v20 = vld [vmem:[%s9607_s7 + $0x398] sm:$0xff]  ;;  %v3740_v29 = vld [vmem:[%s9607_s7 + $0x248] sm:$0xff] }
 0x6ec   :  { %3960 = vmatpush.msra.mxu3 %v3762_v31  ;;  %v3802_v31 = vld [vmem:[%s9607_s7 + $0x438] sm:$0xff] }
 0x6ed   :  { %3948 = vmatpush.msra.mxu2 %v3714_v23  ;;  %v3780_v23 = vld [vmem:[%s9607_s7 + $0x388] sm:$0xff] }
 0x6ee   :  { %3961 = vmatpush.msra.mxu3 %v3760_v58  ;;  %v3736_v58 = vld [vmem:[%s9607_s7 + $0x228] sm:$0xff] }
 0x6ef   :  { %3949 = vmatpush.msra.mxu2 %v3712_v21  ;;  %v3800_v21 = vld [vmem:[%s9607_s7 + $0x428] sm:$0xff] }
 0x6f0   :  { %3962 = vmatpush.msra.mxu3 %v3758_v38  ;;  %v3774_v38 = vld [vmem:[%s9607_s7 + $0x358] sm:$0xff] }
 0x6f1   :  { %3950 = vmatpush.msra.mxu2 %v3710_v37  ;;  %v3657_v45 = vpop.permute.xlu1 %3656  ;;  %v3734_v37 = vld [vmem:[%s9607_s7 + $0x218] sm:$0xff] }
 0x6f2   :  { %v3572_v19 = vpop.permute.xlu2 %3571  ;;  %v8619_v53 = vsel %vm80_vm11, %v3642_v50, %v3657_v45  ;;  %3963 = vmatpush.msra.mxu3 %v3756_v11  ;;  %v3770_v11 = vld [vmem:[%s9607_s7 + $0x338] sm:$0xff]  ;;  %v3764_v50 = vld [vmem:[%s9607_s7 + $0x308] sm:$0xff] }
 0x6f3   :  { %v3578_v55 = vmul.f32 %v3572_v19, %v8607_v47  ;;  %3951 = vmatpush.msra.mxu2 %v3708_v40  ;;  %3876 = vmatmul.f32.vlgmr.msra.gmra.mxu1 %v8619_v53  ;;  %v3772_v40 = vld [vmem:[%s9607_s7 + $0x348] sm:$0xff]  ;;  %v3766_v45 = vld [vmem:[%s9607_s7 + $0x318] sm:$0xff] }
 0x6f4   :  { %3896 = vmatmul.f32.vlgmr.msrb.gmra.mxu3 %v8616_v49  ;;  %3980 = vmatpush.msra.mxu1 %v3794_v56 }
 0x6f5   :  { %5656 = vtanh.f32 %v3578_v55  ;;  %3952 = vmatpush.msra.mxu2 %v3706_v36  ;;  %3964 = vmatpush.msra.mxu3 %v3754_v52  ;;  %v3811_v52 = vld [vmem:[%s9608_s8] sm:$0x3] }
 0x6f6   :  { %3981 = vmatpush.msra.mxu1 %v3792_v60 }
 0x6f7   :  { %3953 = vmatpush.msra.mxu2 %v3704_v51  ;;  %3965 = vmatpush.msra.mxu3 %v3752_v57 }
 0x6f8   :  { %3982 = vmatpush.msra.mxu1 %v3790_v30 }
 0x6f9   :  { %3954 = vmatpush.msra.mxu2 %v3702_v61  ;;  %3966 = vmatpush.msra.mxu3 %v3750_v0 }
 0x6fa   :  { %3983 = vmatpush.msra.mxu1 %v3788_v4 }
 0x6fb   :  { %v5657_v5 = vpop.eup %5656  ;;  %3955 = vmatpush.msra.mxu2 %v3700_v63  ;;  %3967 = vmatpush.msra.mxu3 %v3748_v2 }
 0x6fc   :  { %3956 = vmatmul.f32.vlgmr.msra.gmra.mxu2 %v8549_v54  ;;  %3589 = vrot.lane.b32.xlu2 %v5657_v5, %s9652_s23  ;;  %v3806_v54 = vld [vmem:[%s9607_s7 + $0x458] sm:$0xff] }
 0x6fd   :  { %4008 = vmatpush.msrb.mxu2 %v3810_v1  ;;  %3984 = vmatpush.msra.mxu1 %v3786_v6  ;;  %v3814_v1 = vperm.slane %v3811_v52, 1 }
 0x6fe   :  { %3968 = vmatpush.msra.mxu3 %v3746_v42  ;;  %3936 = vmatmul.f32.vlgmr.msrb.gmra.mxu1 %v8586_v27  ;;  %v3738_v27 = vld [vmem:[%s9607_s7 + $0x238] sm:$0xff] }
 0x6ff   :  { %4009 = vmatpush.msrb.mxu2 %v3808_v9  ;;  %3985 = vmatpush.msra.mxu1 %v3784_v17 }
 0x700   :  { %3969 = vmatpush.msra.mxu3 %v3744_v14 }
 0x701   :  { %4010 = vmatpush.msrb.mxu2 %v3806_v54  ;;  %3986 = vmatpush.msra.mxu1 %v3782_v20 }
 0x702   :  { %3970 = vmatpush.msra.mxu3 %v3742_v18 }
 0x703   :  { %4011 = vmatpush.msrb.mxu2 %v3804_v24  ;;  %3987 = vmatpush.msra.mxu1 %v3780_v23 }
 0x704   :  { %3971 = vmatpush.msra.mxu3 %v3740_v29 }
 0x705   :  { %4012 = vmatpush.msrb.mxu2 %v3802_v31  ;;  %3988 = vmatpush.msra.mxu1 %v3778_v26 }
 0x706   :  { %3972 = vmatpush.msra.mxu3 %v3738_v27 }
 0x707   :  { %4013 = vmatpush.msrb.mxu2 %v3800_v21  ;;  %3989 = vmatpush.msra.mxu1 %v3776_v33 }
 0x708   :  { %3973 = vmatpush.msra.mxu3 %v3736_v58 }
 0x709   :  { %4014 = vmatpush.msrb.mxu2 %v3798_v34  ;;  %3990 = vmatpush.msra.mxu1 %v3774_v38 }
 0x70a   :  { %3974 = vmatpush.msra.mxu3 %v3734_v37 }
 0x70b   :  { %4015 = vmatpush.msrb.mxu2 %v3796_v32  ;;  %3991 = vmatpush.msra.mxu1 %v3772_v40 }
 0x70c   :  { %3975 = vmatpush.msra.mxu3 %v3732_v8  ;;  %5366 = vmatmul.msk.f32.vlgmr.msrb.gmra.mxu2 %vm80_vm11, %v8564_v10 }
 0x70d   :  { %3976 = vmatmul.f32.vlgmr.msra.gmra.mxu3 %v8619_v53  ;;  %3992 = vmatpush.msra.mxu1 %v3770_v11  ;;  %v3813_v53 = vperm.slane %v3811_v52, 0  ;;  %v3464_v11 = vadd.f32 %v8267_v62, %v8264_v28 }
 0x70f   :  { %3993 = vmatpush.msra.mxu1 %v3768_v46  ;;  %v3490_v46 = vadd.f32 %v8269_v44, %v3464_v11  ;;  %v4073_v11 = vld [vmem:[%s9609_s9 + $0x28] sm:$0xff] }
 0x711   :  { %3994 = vmatpush.msra.mxu1 %v3766_v45 }
 0x713   :  { %3995 = vmatpush.msra.mxu1 %v3764_v50 }
 0x714   :  { %3996 = vmatmul.f32.vlgmr.msra.gmra.mxu1 %v8616_v49 }
 0x756   :  { %v3590_v10 = vpop.permute.xlu2 %3589 }
 0x757   :  { %v3596_v19 = vmul.f32 %v3590_v10, %v8607_v47 }
 0x759   :  { %v3599_v36 = vmax.f32 %v3596_v19, 0.0  ;;  %v5362_v19 = vmul.f32 -1.442695, %v8249_v59  ;;  %v4083_v59 = vld [vmem:[%s9609_s9 + $0x78] sm:$0xff] }
 0x75a   :  { %4104 = vmatpush.msrb.mxu3 %v4083_v59  ;;  %v4087_v59 = vld [vmem:[%s9609_s9 + $0x98] sm:$0xff] }
 0x75b   :  { %3607 = vrot.lane.b32.xlu2 %v3599_v36, %s9652_s23  ;;  %v5363_v36 = vmul.f32 -1.442695, %v8253_v7  ;;  %v4099_v7 = vld [vmem:[%s9609_s9 + $0xf8] sm:$0xff] }
 0x75c   :  { %4124 = vmatpush.msra.mxu2 %v4099_v7  ;;  %v4086_v7 = vld [vmem:[%s9609_s9 + $0x90] sm:$0xff] }
 0x75f   :  { %v3857_v55 = vpop.f32.mrf.mxu2 }
 0x767   :  { %v3917_v49 = vpop.f32.mrf.mxu2 }
 0x76e   :  { %v3837_v56 = vpop.f32.mrf.mxu3 }
 0x76f   :  { %v3838_v51 = vadd.f32 %v3837_v56, %v3813_v53  ;;  %v4082_v56 = vld [vmem:[%s9609_s9 + $0x70] sm:$0xff] }
 0x770   :  { %v3877_v60 = vpop.f32.mrf.mxu1  ;;  %4105 = vmatpush.msrb.mxu3 %v4082_v56 }
 0x771   :  { %v3858_v57 = vadd.f32 %v3857_v55, %v3838_v51 }
 0x773   :  { %v3878_v61 = vadd.f32 %v3877_v60, %v3858_v57  ;;  %v4098_v60 = vld [vmem:[%s9609_s9 + $0xf0] sm:$0xff] }
 0x774   :  { %4125 = vmatpush.msra.mxu2 %v4098_v60  ;;  %v4085_v60 = vld [vmem:[%s9609_s9 + $0x88] sm:$0xff] }
 0x777   :  { %v3897_v0 = vpop.f32.mrf.mxu3 }
 0x778   :  { %v3898_v30 = vadd.f32 %v3897_v0, %v3878_v61  ;;  %v4081_v61 = vld [vmem:[%s9609_s9 + $0x68] sm:$0xff] }
 0x779   :  { %v4097_v0 = vld [vmem:[%s9609_s9 + $0xe8] sm:$0xff]  ;;  %4106 = vmatpush.msrb.mxu3 %v4081_v61  ;;  %v4068_v61 = vld [vmem:[%s9609_s9] sm:$0xff] }
 0x77a   :  { %v3918_v63 = vadd.f32 %v3917_v49, %v3898_v30  ;;  %v4080_v30 = vld [vmem:[%s9609_s9 + $0x60] sm:$0xff]  ;;  %4126 = vmatpush.msra.mxu2 %v4097_v0 }
 0x77b   :  { %v3937_v5 = vpop.f32.mrf.mxu1  ;;  %v4096_v49 = vld [vmem:[%s9609_s9 + $0xe0] sm:$0xff]  ;;  %4107 = vmatpush.msrb.mxu3 %v4080_v30 }
 0x77c   :  { %v5367_v2 = vmul.f32 -1.442695, %v3918_v63  ;;  %v3938_v9 = vadd.f32 %v3937_v5, %v3814_v1  ;;  %4127 = vmatpush.msra.mxu2 %v4096_v49  ;;  %v4078_v1 = vld [vmem:[%s9609_s9 + $0x50] sm:$0xff]  ;;  %v4084_v0 = vld [vmem:[%s9609_s9 + $0x80] sm:$0xff] }
 0x77d   :  { %v4094_v5 = vld [vmem:[%s9609_s9 + $0xd0] sm:$0xff] }
 0x77e   :  { %5658 = vpow2.f32 %v5367_v2 }
 0x77f   :  { %v3957_v6 = vpop.f32.mrf.mxu2 }
 0x780   :  { %v3958_v17 = vadd.f32 %v3957_v6, %v3938_v9  ;;  %v4077_v9 = vld [vmem:[%s9609_s9 + $0x48] sm:$0xff] }
 0x784   :  { %v5659_v47 = vpop.eup %5658 }
 0x785   :  { %v4023_v4 = vadd.f32 1.0, %v5659_v47  ;;  %v4079_v47 = vld [vmem:[%s9609_s9 + $0x58] sm:$0xff] }
 0x786   :  { %4108 = vmatpush.msrb.mxu3 %v4079_v47 }
 0x787   :  { %5660 = vrcp.f32 %v4023_v4  ;;  %v4035_v21 = vand.u32 2147483648, %v4023_v4  ;;  %vm4029_vm15 = vweird.f32 %v4023_v4  ;;  %v4033_v58 = vand.u32 2147483647, %v4023_v4 }
 0x788   :  { %4109 = vmatpush.msrb.mxu3 %v4078_v1 }
 0x789   :  { %v4036_v34 = vor.u32 1.1754944e-38, %v4035_v21  ;;  %vm4034_vm3 = vcmp.eq.f32.partialorder %v4033_v58, 8.507059e+37 }
 0x78a   :  { %4110 = vmatpush.msrb.mxu3 %v4077_v9 }
 0x78d   :  { %v5661_v42 = vpop.eup %5660 }
 0x78e   :  { %v4025_v14 = vmul.f32 %v5661_v42, %v4023_v4  ;;  %vm4030_vm13 = vweird.f32 %v5661_v42  ;;  %v4095_v4 = vld [vmem:[%s9609_s9 + $0xd8] sm:$0xff] }
 0x78f   :  { %v4017_v31 = vpop.f32.mrf.mxu2  ;;  %vm4031_vm1 = vmor %vm4029_vm15, %vm4030_vm13  ;;  %4128 = vmatpush.msra.mxu2 %v4095_v4 }
 0x790   :  { %v4026_v54 = vsub.f32 1.0, %v4025_v14  ;;  %v3977_v18 = vpop.f32.mrf.mxu3  ;;  %v4093_v14 = vld [vmem:[%s9609_s9 + $0xc8] sm:$0xff] }
 0x791   :  { %v3978_v20 = vadd.f32 %v3977_v18, %v3958_v17  ;;  %v3997_v24 = vpop.f32.mrf.mxu1  ;;  %4129 = vmatpush.msra.mxu2 %v4094_v5  ;;  %v4092_v18 = vld [vmem:[%s9609_s9 + $0xc0] sm:$0xff] }
 0x792   :  { %v4027_v29 = vmul.f32 %v5661_v42, %v4026_v54  ;;  %v4076_v54 = vld [vmem:[%s9609_s9 + $0x40] sm:$0xff] }
 0x793   :  { %v3998_v23 = vadd.f32 %v3997_v24, %v3978_v20  ;;  %4130 = vmatpush.msra.mxu2 %v4093_v14  ;;  %4111 = vmatpush.msrb.mxu3 %v4076_v54 }
 0x794   :  { %v4028_v26 = vadd.f32 %v5661_v42, %v4027_v29 }
 0x795   :  { %v4018_v27 = vadd.f32 %v4017_v31, %v3998_v23  ;;  %v4075_v31 = vld [vmem:[%s9609_s9 + $0x38] sm:$0xff]  ;;  %4131 = vmatpush.msra.mxu2 %v4092_v18 }
 0x796   :  { %v4032_v33 = vsel %vm4031_vm1, %v5661_v42, %v4028_v26  ;;  %4112 = vmatpush.msrb.mxu3 %v4075_v31 }
 0x797   :  { %5662 = vtanh.f32 %v4018_v27  ;;  %v4037_v38 = vsel %vm4034_vm3, %v4036_v34, %v4032_v33  ;;  %v4091_v27 = vld [vmem:[%s9609_s9 + $0xb8] sm:$0xff]  ;;  %v4074_v34 = vld [vmem:[%s9609_s9 + $0x30] sm:$0xff] }
 0x798   :  { %4132 = vmatpush.msra.mxu2 %v4091_v27  ;;  %4113 = vmatpush.msrb.mxu3 %v4074_v34 }
 0x79a   :  { %4114 = vmatpush.msrb.mxu3 %v4073_v11 }
 0x79d   :  { %v5663_v37 = vpop.eup %5662 }
 0x79e   :  { %v4040_v32 = vmul.f32 %v5663_v37, %v4037_v38  ;;  %v4090_v37 = vld [vmem:[%s9609_s9 + $0xb0] sm:$0xff] }
 0x79f   :  { %4133 = vmatpush.msra.mxu2 %v4090_v37 }
 0x7a0   :  { %5664 = vtanh.f32 %v4040_v32 }
 0x7a1   :  { %5666 = vtanh.f32 %v3490_v46  ;;  %v4089_v46 = vld [vmem:[%s9609_s9 + $0xa8] sm:$0xff] }
 0x7a2   :  { %5668 = vpow2.f32 %v5362_v19  ;;  %v4072_v19 = vld [vmem:[%s9609_s9 + $0x20] sm:$0xff]  ;;  %4134 = vmatpush.msra.mxu2 %v4089_v46 }
 0x7a3   :  { %5670 = vpow2.f32 %v5363_v36  ;;  %v4088_v36 = vld [vmem:[%s9609_s9 + $0xa0] sm:$0xff]  ;;  %4115 = vmatpush.msrb.mxu3 %v4072_v19 }
 0x7a4   :  { %4135 = vmatpush.msra.mxu2 %v4088_v36 }
 0x7a6   :  { %v5665_v8 = vpop.eup %5664  ;;  %4136 = vmatpush.msra.mxu2 %v4087_v59 }
 0x7a7   :  { %4043 = vrot.lane.b32.xlu0 %v5665_v8, %s5774_s14  ;;  %v5667_v10 = vpop.eup %5666 }
 0x7a8   :  { %v5669_v52 = vpop.eup %5668  ;;  %4137 = vmatpush.msra.mxu2 %v4086_v7 }
 0x7a9   :  { %v5671_v53 = vpop.eup %5670  ;;  %v8759_v55 = vadd.f32 1.0, %v5669_v52 }
 0x7aa   :  { %v8761_v28 = vadd.f32 1.0, %v5671_v53  ;;  %4138 = vmatpush.msra.mxu2 %v4085_v60 }
 0x7ab   :  { %5672 = vrcp.f32 %v8759_v55  ;;  %vm3521_vm10 = vweird.f32 %v8759_v55  ;;  %v3527_v23 = vand.u32 2147483648, %v8759_v55  ;;  %v3525_v58 = vand.u32 2147483647, %v8759_v55 }
 0x7ac   :  { %5674 = vrcp.f32 %v8761_v28  ;;  %v3542_v29 = vand.u32 2147483648, %v8761_v28  ;;  %v3540_v26 = vand.u32 2147483647, %v8761_v28  ;;  %4139 = vmatpush.msra.mxu2 %v4084_v0 }
 0x7ad   :  { %vm3526_vm3 = vcmp.eq.f32.partialorder %v3525_v58, 8.507059e+37 }
 0x7ae   :  { %v3543_v8 = vor.u32 1.1754944e-38, %v3542_v29  ;;  %vm3541_vm1 = vcmp.eq.f32.partialorder %v3540_v26, 8.507059e+37 }
 0x7b1   :  { %v8765_v62 = vpop.eup %5672 }
 0x7b2   :  { %v8767_v44 = vpop.eup %5674  ;;  %v3517_v57 = vmul.f32 %v8765_v62, %v8759_v55  ;;  %vm3522_vm7 = vweird.f32 %v8765_v62 }
 0x7b3   :  { %v3532_v51 = vmul.f32 %v8767_v44, %v8761_v28  ;;  %vm3537_vm9 = vweird.f32 %v8767_v44  ;;  %vm8841_vm13 = vmor %vm3521_vm10, %vm3522_vm7 }
 0x7b4   :  { %v3518_v2 = vsub.f32 1.0, %v3517_v57  ;;  %v4069_v57 = vld [vmem:[%s9609_s9 + $0x8] sm:$0xff] }
 0x7b5   :  { %v3608_v40 = vpop.permute.xlu2 %3607  ;;  %v3533_v63 = vsub.f32 1.0, %v3532_v51 }
 0x7b6   :  { %3614 = vst.msk [vmem:[#allocation9 + $0x10] sm:$0xff] %vm73_vm8, %v3608_v40  ;;  %v3519_v42 = vmul.f32 %v8765_v62, %v3518_v2  ;;  %v3528_v40 = vor.u32 1.1754944e-38, %v3527_v23 }
 0x7b7   :  { %v3534_v6 = vmul.f32 %v8767_v44, %v3533_v63 }
 0x7b8   :  { %v3520_v24 = vadd.f32 %v8765_v62, %v3519_v42 }
 0x7b9   :  { %v3535_v20 = vadd.f32 %v8767_v44, %v3534_v6 }
 0x7ba   :  { %v3524_v32 = vsel %vm8841_vm13, %v8765_v62, %v3520_v24 }
 0x7bd   :  { %v4214_v26 = vld [vmem:[#allocation9 + $0x12] ss:$2 sm:$0x3]  ;;  %v4229_v37 = vld [vmem:[#allocation9 + $0x13] ss:$2 sm:$0x3] }
 0x7be   :  { %v4231_v46 = vrot.slane %v4229_v37, 5 }
 0x819   :  { %v4044_v45 = vpop.permute.xlu0 %4043 }
 0x81a   :  { %v4046_v50 = vmul.f32 %v4044_v45, %v4037_v38 }
 0x81c   :  { %4048 = vrot.lane.b32.xlu1 %v4046_v50, %s5774_s14  ;;  %v3529_v50 = vsel %vm3526_vm3, %v3528_v40, %v3524_v32 }
 0x824   :  { %3567 = vrot.lane.b32.xlu1 %v5667_v10, %s5774_s14 }
 0x88e   :  { %v4049_v17 = vpop.permute.xlu1 %4048 }
 0x88f   :  { %4051 = vst.msk [vmem:[#allocation10] sm:$0x3] %vm83_vm5, %v4049_v17  ;;  %vm3536_vm5 = vweird.f32 %v8761_v28 }
 0x890   :  { %4053 = vst.msk [vmem:[#allocation10 - $0x1] sm:$0x30] %vm4052_vm6, %v4049_v17  ;;  %vm8848_vm15 = vmor %vm3536_vm5, %vm3537_vm9  ;;  %vm90_vm6 = vcmask 254976  }
 0x891   :  { %v3539_v38 = vsel %vm8848_vm15, %v8767_v44, %v3535_v20  ;;  %v4071_v44 = vld [vmem:[%s9609_s9 + $0x18] sm:$0xff]  ;;  %v5644_v20 = vld [vmem:[%s9610_s10] ss:$0 sm:$0xff]  ;;  %91 = vst.msk [vmem:[#allocation11 + $0x18] sm:$0x3] %vm90_vm6, %v5770_v39 }
 0x892   :  { %v3544_v45 = vsel %vm3541_vm1, %v3543_v8, %v3539_v38  ;;  %4116 = vmatpush.msrb.mxu3 %v4071_v44  ;;  %v4216_v8 = vrot.slane %v4214_v26, 5 }
 0x893   :  { %v3577_v52 = vmul.f32 %v8577_v22, %v3544_v45  ;;  %v4070_v22 = vld [vmem:[%s9609_s9 + $0x10] sm:$0xff] }
 0x894   :  { %4117 = vmatpush.msrb.mxu3 %v4070_v22 }
 0x896   :  { %v3568_v10 = vpop.permute.xlu1 %3567  ;;  %4118 = vmatpush.msrb.mxu3 %v4069_v57 }
 0x897   :  { %v3576_v53 = vmul.f32 %v3568_v10, %v3529_v50  ;;  %v4055_v55 = vld [vmem:[#allocation10 + $0x1] sm:$0x3f] }
 0x898   :  { %v4057_v28 = vld [vmem:[#allocation10 + $0x4] sm:$0x3f]  ;;  %4119 = vmatpush.msrb.mxu3 %v4068_v61 }
 0x899   :  { %v5632_v62 = vpack.i.bf16 %v4057_v28, %v4055_v55  ;;  %5676 = vtanh.f32 %v3576_v53  ;;  %v4054_v2 = vld [vmem:[#allocation10] sm:$0x3f] }
 0x89a   :  { %5678 = vtanh.f32 %v3577_v52  ;;  %v4056_v47 = vld [vmem:[#allocation10 + $0x3] sm:$0x3f] }
 0x89b   :  { %5633 = vrot.lane.b32.xlu0 %v5632_v62, %s5774_s14  ;;  %5680 = vtanh.f32 %v7843_v12 }
 0x89c   :  { %5682 = vtanh.f32 %v7852_v25 }
 0x89d   :  { %5684 = vtanh.f32 %v7941_v35 }
 0x89e   :  { %5686 = vtanh.f32 %v7930_v15 }
 0x89f   :  { %v5677_v56 = vpop.eup %5676  ;;  %5688 = vtanh.f32 %v7951_v43 }
 0x8a0   :  { %3585 = vrot.lane.b32.xlu1 %v5677_v56, %s9652_s23  ;;  %v5679_v51 = vpop.eup %5678  ;;  %5690 = vtanh.f32 %v7988_v3 }
 0x8a1   :  { %v5681_v57 = vpop.eup %5680  ;;  %5692 = vtanh.f32 %v7956_v48 }
 0x8a2   :  { %v5683_v61 = vpop.eup %5682 }
 0x8a3   :  { %3587 = vrot.lane.b32.xlu0 %v5679_v51, %s9652_s23 }
 0x90d   :  { %v5634_v30 = vpop.permute.xlu0 %5633 }
 0x90e   :  { %v5636_v49 = vunpack.i.h.bf16 %v5634_v30  ;;  %v5635_v63 = vunpack.i.l.bf16 %v5634_v30  ;;  %v5685_v30 = vpop.eup %5684 }
 0x910   :  { %v4066_v4 = vsel %vm80_vm11, %v4054_v2, %v5635_v63  ;;  %v4067_v1 = vsel %vm80_vm11, %v4056_v47, %v5636_v49  ;;  %v5687_v49 = vpop.eup %5686 }
 0x911   :  { %4120 = vmatmul.f32.vlgmr.msrb.gmra.mxu3 %v4066_v4  ;;  %4140 = vmatmul.f32.vlgmr.msra.gmra.mxu2 %v4067_v1  ;;  %v5689_v63 = vpop.eup %5688  ;;  %v5347_v4 = vmul.f32 -1.442695, %v7852_v25 }
 0x912   :  { %v3586_v5 = vpop.permute.xlu1 %3585  ;;  %v5691_v2 = vpop.eup %5690 }
 0x913   :  { %v3594_v6 = vmul.f32 %v3586_v5, %v3529_v50  ;;  %v5693_v47 = vpop.eup %5692  ;;  %5694 = vpow2.f32 %v5347_v4 }
 0x915   :  { %v3588_v42 = vpop.permute.xlu0 %3587  ;;  %v3597_v9 = vmax.f32 %v3594_v6, 0.0 }
 0x916   :  { %v3595_v14 = vmul.f32 %v3588_v42, %v3544_v45  ;;  %v5350_v42 = vmul.f32 -1.442695, %v7951_v43 }
 0x917   :  { %3603 = vrot.lane.b32.xlu1 %v3597_v9, %s9652_s23 }
 0x918   :  { %v3598_v17 = vmax.f32 %v3595_v14, 0.0 }
 0x919   :  { %v5695_v5 = vpop.eup %5694 }
 0x91a   :  { %3605 = vrot.lane.b32.xlu0 %v3598_v17, %s9652_s23  ;;  %v2757_v6 = vadd.f32 1.0, %v5695_v5 }
 0x91c   :  { %5696 = vrcp.f32 %v2757_v6  ;;  %vm2786_vm9 = vweird.f32 %v2757_v6 }
 0x91d   :  { %5698 = vpow2.f32 %v5350_v42 }
 0x922   :  { %v5697_v14 = vpop.eup %5696 }
 0x923   :  { %v2782_v25 = vmul.f32 %v5697_v14, %v2757_v6  ;;  %vm2787_vm7 = vweird.f32 %v5697_v14 }
 0x924   :  { %vm2788_vm10 = vmor %vm2786_vm9, %vm2787_vm7 }
 0x989   :  { %v3604_v54 = vpop.permute.xlu1 %3603 }
 0x98a   :  { %3612 = vst.msk [vmem:[#allocation9] sm:$0xff] %vm73_vm8, %v3604_v54  ;;  %v4251_v54 = vld [vmem:[#allocation11 + $0x15] sm:$0xf] }
 0x98c   :  { %v3606_v18 = vpop.permute.xlu0 %3605 }
 0x98d   :  { %3613 = vst.msk [vmem:[#allocation9 + $0x8] sm:$0xff] %vm73_vm8, %v3606_v18  ;;  %v5699_v18 = vpop.eup %5698 }
 0x98e   :  { %v8944_v43 = vadd.f32 1.0, %v5699_v18 }
 0x990   :  { %vm2831_vm15 = vweird.f32 %v8944_v43 }
 0x991   :  { %v4149_v24 = vld [vmem:[#allocation9 + $0x1] ss:$2 sm:$0x3]  ;;  %v4145_v40 = vld [vmem:[#allocation9] ss:$2 sm:$0x3] }
 0x992   :  { %4151 = vrot.lane.b32.xlu1 %v4149_v24, %s9652_s23 }
 0x994   :  { %v4121_v29 = vpop.f32.mrf.mxu3  ;;  %v4162_v23 = vld [vmem:[#allocation9 + $0x6] ss:$2 sm:$0x3]  ;;  %v4199_v27 = vld [vmem:[#allocation9 + $0xd] ss:$2 sm:$0x3]  ;;  %v4141_v58 = vpop.f32.mrf.mxu2 }
 0x995   :  { %v4122_v31 = vadd.f32 %v5644_v20, %v4121_v29  ;;  %4164 = vrot.lane.b32.xlu2 %v4162_v23, %s5774_s14  ;;  %v4188_v21 = vld [vmem:[#allocation9 + $0xc] ss:$2 sm:$0x3]  ;;  %v4201_v33 = vrot.slane %v4199_v27, 5  ;;  %v5348_v20 = vmul.f32 -1.442695, %v7930_v15 }
 0x996   :  { %v4190_v38 = vrot.slane %v4188_v21, 5  ;;  %v4175_v10 = vld [vmem:[#allocation9 + $0x7] ss:$2 sm:$0x3]  ;;  %v5346_v29 = vmul.f32 -1.442695, %v7843_v12 }
 0x997   :  { %v4142_v34 = vadd.f32 %v4141_v58, %v4122_v31  ;;  %4202 = vrot.lane.b32.xlu0 %v4201_v33, %s9652_s23  ;;  %v2783_v23 = vsub.f32 1.0, %v2782_v25  ;;  %5700 = vpow2.f32 %v5348_v20  ;;  %v5351_v27 = vmul.f32 -1.442695, %v7988_v3 }
 0x998   :  { %5702 = vrcp.f32 %v8944_v43  ;;  %v5349_v15 = vmul.f32 -1.442695, %v7941_v35  ;;  %v2792_v12 = vand.u32 2147483648, %v2757_v6  ;;  %v5354_v3 = vmul.f32 -1.442695, %v7956_v48 }
 0x999   :  { %v4144_v32 = vmax.f32 %v4142_v34, 0.0  ;;  %5704 = vpow2.f32 %v5346_v29  ;;  %v2784_v31 = vmul.f32 %v5697_v14, %v2783_v23 }
 0x99a   :  { %4217 = vrot.lane.b32.xlu1 %v4216_v8, %s5774_s14  ;;  %5706 = vpow2.f32 %v5351_v27 }
 0x99b   :  { %v4192_v11 = vadd.f32 %v4190_v38, %v4144_v32  ;;  %v4146_v45 = vadd.f32 %v4145_v40, %v4144_v32  ;;  %v2785_v33 = vadd.f32 %v5697_v14, %v2784_v31  ;;  %5708 = vpow2.f32 %v5349_v15  ;;  %v4254_v31 = vld [vmem:[#allocation11 + $0x16] sm:$0xf] }
 0x99d   :  { %v4194_v50 = vrot.slane %v4192_v11, 3  ;;  %4232 = vrot.lane.b32.xlu2 %v4231_v46, %s5772_s24  ;;  %4147 = vst [vmem:[#allocation11] ss:$2 sm:$0x3] %v4146_v45  ;;  %v5701_v21 = vpop.eup %5700  ;;  %v2789_v8 = vsel %vm2788_vm10, %v5697_v14, %v2785_v33  ;;  %v2793_v46 = vor.u32 1.1754944e-38, %v2792_v12 }
 0x99e   :  { %v8950_v34 = vpop.eup %5702  ;;  %v8952_v38 = vadd.f32 1.0, %v5701_v21 }
 0x99f   :  { %4197 = vst [vmem:[#allocation11 + $0xa] ss:$2 sm:$0x3] %v4194_v50  ;;  %4177 = vrot.lane.b32.xlu0 %v4175_v10, %s5772_s24  ;;  %v5705_v37 = vpop.eup %5704  ;;  %v2827_v35 = vmul.f32 %v8950_v34, %v8944_v43  ;;  %vm2832_vm13 = vweird.f32 %v8950_v34 }
 0x9a0   :  { %v8957_v40 = vadd.f32 1.0, %v5705_v37  ;;  %5710 = vrcp.f32 %v8952_v38  ;;  %v5707_v45 = vpop.eup %5706  ;;  %vm2833_vm1 = vmor %vm2831_vm15, %vm2832_vm13  ;;  %vm2801_vm7 = vweird.f32 %v8952_v38  ;;  %v2805_v21 = vand.u32 2147483647, %v8952_v38 }
 0x9a1   :  { %5712 = vpow2.f32 %v5354_v3 }
 0x9a2   :  { %5714 = vrcp.f32 %v8957_v40  ;;  %vm2806_vm13 = vcmp.eq.f32.partialorder %v2805_v21, 8.507059e+37  ;;  %v4314_v21 = vld [vmem:[%s9611_s11 + $0x70] sm:$0xff] }
 0x9ef   :  { %v4165_v19 = vpop.permute.xlu2 %4164 }
 0x9f0   :  { %v4167_v36 = vadd.f32 %v4165_v19, %v4144_v32 }
 0x9f2   :  { %4169 = vrot.lane.b32.xlu1 %v4167_v36, %s5774_s14 }
 0x9f7   :  { %v4233_v51 = vpop.permute.xlu2 %4232 }
 0x9f8   :  { %v4235_v60 = vadd.f32 %v4233_v51, %v4144_v32 }
 0x9fa   :  { %v4237_v0 = vrot.slane %v4235_v60, 3 }
 0xa04   :  { %v4152_v52 = vpop.permute.xlu1 %4151 }
 0xa05   :  { %v4154_v53 = vadd.f32 %v4152_v52, %v4144_v32 }
 0xa07   :  { %4156 = vrot.lane.b32.xlu0 %v4154_v53, %s5772_s24  ;;  %v2828_v53 = vsub.f32 1.0, %v2827_v35 }
 0xa09   :  { %v4203_v55 = vpop.permute.xlu0 %4202 }
 0xa0a   :  { %v4205_v28 = vadd.f32 %v4203_v55, %v4144_v32  ;;  %v5709_v55 = vpop.eup %5708 }
 0xa0c   :  { %v4218_v62 = vpop.permute.xlu1 %4217  ;;  %v4207_v44 = vrot.slane %v4205_v28, 3  ;;  %v8965_v28 = vadd.f32 1.0, %v5707_v45 }
 0xa0d   :  { %v4220_v59 = vadd.f32 %v4218_v62, %v4144_v32  ;;  %v8968_v62 = vpop.eup %5710 }
 0xa0e   :  { %v2797_v51 = vmul.f32 %v8968_v62, %v8952_v38  ;;  %vm2802_vm6 = vweird.f32 %v8968_v62 }
 0xa0f   :  { %v4222_v22 = vrot.slane %v4220_v59, 3  ;;  %4208 = vrot.lane.b32.xlu0 %v4207_v44, %s5772_s24  ;;  %v2829_v44 = vmul.f32 %v8950_v34, %v2828_v53  ;;  %v8971_v59 = vadd.f32 1.0, %v5709_v55  ;;  %vm9019_vm9 = vmor %vm2801_vm7, %vm2802_vm6  ;;  %v2852_v55 = vand.u32 2147483648, %v8965_v28 }
 0xa10   :  { %vm2846_vm6 = vweird.f32 %v8965_v28 }
 0xa11   :  { %v4178_v7 = vpop.permute.xlu0 %4177  ;;  %4223 = vrot.lane.b32.xlu1 %v4222_v22, %s5774_s14 }
 0xa12   :  { %v4180_v56 = vadd.f32 %v4178_v7, %v4144_v32  ;;  %v2790_v32 = vand.u32 2147483647, %v2757_v6  ;;  %v5713_v7 = vpop.eup %5712 }
 0xa14   :  { %4182 = vrot.lane.b32.xlu2 %v4180_v56, %s9652_s23  ;;  %vm2791_vm5 = vcmp.eq.f32.partialorder %v2790_v32, 8.507059e+37  ;;  %v8975_v56 = vpop.eup %5714 }
 0xa15   :  { %v8961_v50 = vsel %vm2791_vm5, %v2793_v46, %v2789_v8  ;;  %vm2772_vm10 = vweird.f32 %v8975_v56  ;;  %vm2771_vm5 = vweird.f32 %v8957_v40  ;;  %v2777_v8 = vand.u32 2147483648, %v8957_v40 }
 0xa16   :  { %vm9034_vm15 = vmor %vm2771_vm5, %vm2772_vm10  ;;  %v2775_v46 = vand.u32 2147483647, %v8957_v40  ;;  %vm2816_vm10 = vweird.f32 %v8971_v59 }
 0xa17   :  { %2936 = vrot.lane.b32.xlu0 %v5681_v57, %s5772_s24 }
 0xa19   :  { %2938 = vrot.lane.b32.xlu1 %v5683_v61, %s5772_s24  ;;  %v2830_v61 = vadd.f32 %v8950_v34, %v2829_v44 }
 0xa1c   :  { %4238 = vrot.lane.b32.xlu2 %v4237_v0, %s9652_s23  ;;  %v8985_v0 = vadd.f32 1.0, %v5713_v7 }
 0xa21   :  { %2942 = vrot.lane.b32.xlu1 %v5685_v30, %s5772_s24 }
 0xa24   :  { %2940 = vrot.lane.b32.xlu2 %v5687_v49, %s5772_s24  ;;  %v2837_v49 = vand.u32 2147483648, %v8944_v43 }
 0xa26   :  { %v2838_v6 = vor.u32 1.1754944e-38, %v2837_v49  ;;  %v2853_v49 = vor.u32 1.1754944e-38, %v2852_v55  ;;  %v5353_v55 = vmul.f32 -1.442695, %v7946_v41 }
 0xa29   :  { %2944 = vrot.lane.b32.xlu1 %v5689_v63, %s5772_s24  ;;  %v2767_v63 = vmul.f32 %v8975_v56, %v8957_v40  ;;  %v2778_v40 = vor.u32 1.1754944e-38, %v2777_v8 }
 0xa2b   :  { %v2768_v42 = vsub.f32 1.0, %v2767_v63 }
 0xa31   :  { %2946 = vrot.lane.b32.xlu1 %v5691_v2, %s5772_s24  ;;  %v2835_v2 = vand.u32 2147483647, %v8944_v43 }
 0xa33   :  { %vm2836_vm3 = vcmp.eq.f32.partialorder %v2835_v2, 8.507059e+37 }
 0xa39   :  { %2952 = vrot.lane.b32.xlu1 %v5693_v47, %s5772_s24  ;;  %v2798_v47 = vsub.f32 1.0, %v2797_v51 }
 0xa3b   :  { %v2799_v14 = vmul.f32 %v8968_v62, %v2798_v47  ;;  %v2820_v47 = vand.u32 2147483647, %v8971_v59 }
 0xa3d   :  { %v2800_v23 = vadd.f32 %v8968_v62, %v2799_v14  ;;  %v2897_v14 = vand.u32 2147483648, %v8985_v0 }
 0xa3f   :  { %v2804_v12 = vsel %vm9019_vm9, %v8968_v62, %v2800_v23  ;;  %v2850_v62 = vand.u32 2147483647, %v8965_v28 }
 0xa41   :  { %4274 = vrot.lane.b32.xlu1 %v4251_v54, %s5774_s14 }
 0xa64   :  { %v4170_v1 = vpop.permute.xlu1 %4169 }
 0xa65   :  { %4173 = vst [vmem:[#allocation11 + $0x5] ss:$2 sm:$0x3] %v4170_v1  ;;  %v2834_v1 = vsel %vm2833_vm1, %v8950_v34, %v2830_v61 }
 0xa6e   :  { %v4183_v9 = vpop.permute.xlu2 %4182 }
 0xa6f   :  { %4186 = vst [vmem:[#allocation11 + $0x6] ss:$2 sm:$0x3] %v4183_v9 }
 0xa76   :  { %v4239_v17 = vpop.permute.xlu2 %4238 }
 0xa77   :  { %4242 = vst [vmem:[#allocation11 + $0x10] ss:$2 sm:$0x3] %v4239_v17  ;;  %v9002_v17 = vsel %vm2836_vm3, %v2838_v6, %v2834_v1  ;;  %vm2776_vm3 = vcmp.eq.f32.partialorder %v2775_v46, 8.507059e+37  ;;  %v4304_v46 = vld [vmem:[%s9611_s11 + $0x20] sm:$0xff] }
 0xa79   :  { %v4157_v24 = vpop.permute.xlu0 %4156 }
 0xa7a   :  { %4160 = vst [vmem:[#allocation11 + $0x1] ss:$2 sm:$0x3] %v4157_v24  ;;  %v2769_v24 = vmul.f32 %v8975_v56, %v2768_v42 }
 0xa7c   :  { %v2770_v15 = vadd.f32 %v8975_v56, %v2769_v24 }
 0xa7e   :  { %v2941_v3 = vpop.permute.xlu2 %2940 }
 0xa81   :  { %v4209_v26 = vpop.permute.xlu0 %4208  ;;  %v4246_v19 = vld [vmem:[#allocation11 + $0x1] sm:$0xff] }
 0xa82   :  { %4212 = vst [vmem:[#allocation11 + $0xb] ss:$2 sm:$0x3] %v4209_v26  ;;  %v2807_v26 = vand.u32 2147483648, %v8952_v38 }
 0xa83   :  { %v4224_v58 = vpop.permute.xlu1 %4223 }
 0xa84   :  { %4227 = vst [vmem:[#allocation11 + $0xf] ss:$2 sm:$0x3] %v4224_v58  ;;  %v2808_v32 = vor.u32 1.1754944e-38, %v2807_v26  ;;  %v5352_v26 = vmul.f32 -1.442695, %v7935_v16 }
 0xa85   :  { %v4313_v58 = vld [vmem:[%s9611_s11 + $0x68] sm:$0xff] }
 0xa86   :  { %v9040_v45 = vsel %vm2806_vm13, %v2808_v32, %v2804_v12  ;;  %vm2851_vm13 = vcmp.eq.f32.partialorder %v2850_v62, 8.507059e+37  ;;  %v4310_v12 = vld [vmem:[%s9611_s11 + $0x50] sm:$0xff]  ;;  %v4307_v32 = vld [vmem:[%s9611_s11 + $0x38] sm:$0xff] }
 0xa89   :  { %v4249_v11 = vld [vmem:[#allocation11 + $0x5] sm:$0xff]  ;;  %v2937_v53 = vpop.permute.xlu0 %2936 }
 0xa8a   :  { %4270 = vrot.lane.b32.xlu2 %v4249_v11, %s5774_s14  ;;  %v4252_v30 = vld [vmem:[#allocation11 + $0x6] sm:$0xff] }
 0xa8b   :  { %v2939_v10 = vpop.permute.xlu1 %2938  ;;  %v4247_v36 = vld [vmem:[#allocation11 + $0x9] sm:$0xff]  ;;  %v4248_v44 = vld [vmem:[#allocation11 + $0x11] sm:$0xf] }
 0xa8c   :  { %v2967_v48 = vmul.f32 %v2939_v10, %v8961_v50  ;;  %v5637_v52 = vpack.i.bf16 %v4247_v36, %v4246_v19  ;;  %v4250_v22 = vld [vmem:[#allocation11 + $0xd] sm:$0xff]  ;;  %v2774_v10 = vsel %vm9034_vm15, %v8975_v56, %v2770_v15  ;;  %v4312_v15 = vld [vmem:[%s9611_s11 + $0x60] sm:$0xff] }
 0xa8d   :  { %v4253_v20 = vld [vmem:[#allocation11 + $0xe] sm:$0xff] }
 0xa8e   :  { %5716 = vtanh.f32 %v2967_v48  ;;  %5638 = vrot.lane.b32.xlu0 %v5637_v52, %s9652_s23  ;;  %v2968_v48 = vmul.f32 %v2941_v3, %v9040_v45  ;;  %v4306_v3 = vld [vmem:[%s9611_s11 + $0x30] sm:$0xff] }
 0xa8f   :  { %5718 = vrcp.f32 %v8965_v28 }
 0xa90   :  { %5720 = vtanh.f32 %v7935_v16 }
 0xa91   :  { %5722 = vrcp.f32 %v8971_v59 }
 0xa92   :  { %4272 = vrot.lane.b32.xlu2 %v4250_v22, %s5774_s14  ;;  %5724 = vrcp.f32 %v8985_v0  ;;  %v9054_v22 = vsel %vm2776_vm3, %v2778_v40, %v2774_v10  ;;  %vm2891_vm3 = vweird.f32 %v8985_v0  ;;  %v4303_v10 = vld [vmem:[%s9611_s11 + $0x18] sm:$0xff]  ;;  %s5776_s14 = smov 104  }
 0xa93   :  { %v8980_v57 = vpop.permute.xlu1 %2942 }
 0xa94   :  { %v5717_v60 = vpop.eup %5716 }
 0xa95   :  { %2998 = vrot.lane.b32.xlu1 %v5717_v60, %s9648_s18  ;;  %v8994_v4 = vpop.eup %5718  ;;  %v2966_v60 = vmul.f32 %v2937_v53, %v9054_v22  ;;  %v4300_v53 = vld [vmem:[%s9611_s11] sm:$0xff] }
 0xa96   :  { %4282 = vrot.lane.b32.xlu0 %v4252_v30, %s5772_s24  ;;  %v5721_v5 = vpop.eup %5720  ;;  %v2842_v18 = vmul.f32 %v8994_v4, %v8965_v28  ;;  %vm2847_vm1 = vweird.f32 %v8994_v4  ;;  %v2822_v30 = vand.u32 2147483648, %v8971_v59 }
 0xa97   :  { %v8999_v9 = vpop.eup %5722  ;;  %vm9058_vm9 = vmor %vm2846_vm6, %vm2847_vm1  ;;  %vm2821_vm1 = vcmp.eq.f32.partialorder %v2820_v47, 8.507059e+37 }
 0xa98   :  { %v2812_v43 = vmul.f32 %v8999_v9, %v8971_v59  ;;  %v9011_v29 = vpop.eup %5724  ;;  %v2843_v27 = vsub.f32 1.0, %v2842_v18  ;;  %vm2817_vm7 = vweird.f32 %v8999_v9  ;;  %v2823_v42 = vor.u32 1.1754944e-38, %v2822_v30 }
 0xa99   :  { %v2887_v34 = vmul.f32 %v9011_v29, %v8985_v0  ;;  %vm9070_vm5 = vmor %vm2816_vm10, %vm2817_vm7  ;;  %vm2892_vm15 = vweird.f32 %v9011_v29 }
 0xa9a   :  { %2948 = vrot.lane.b32.xlu2 %v5721_v5, %s5772_s24  ;;  %v2813_v33 = vsub.f32 1.0, %v2812_v43  ;;  %v2844_v37 = vmul.f32 %v8994_v4, %v2843_v27  ;;  %vm2893_vm6 = vmor %vm2891_vm3, %vm2892_vm15 }
 0xa9b   :  { %v2945_v54 = vpop.permute.xlu1 %2944  ;;  %v2888_v36 = vsub.f32 1.0, %v2887_v34 }
 0xa9c   :  { %v2970_v25 = vmul.f32 %v2945_v54, %v9002_v17  ;;  %v2814_v19 = vmul.f32 %v8999_v9, %v2813_v33  ;;  %v2845_v52 = vadd.f32 %v8994_v4, %v2844_v37  ;;  %v4311_v33 = vld [vmem:[%s9611_s11 + $0x58] sm:$0xff]  ;;  %v4309_v37 = vld [vmem:[%s9611_s11 + $0x48] sm:$0xff] }
 0xa9d   :  { %v2889_v61 = vmul.f32 %v9011_v29, %v2888_v36 }
 0xa9e   :  { %5726 = vtanh.f32 %v2970_v25  ;;  %4284 = vrot.lane.b32.xlu0 %v4253_v20, %s5772_s24  ;;  %v2815_v7 = vadd.f32 %v8999_v9, %v2814_v19  ;;  %v2849_v28 = vsel %vm9058_vm9, %v8994_v4, %v2845_v52  ;;  %v2898_v20 = vor.u32 1.1754944e-38, %v2897_v14  ;;  %v4301_v52 = vld [vmem:[%s9611_s11 + $0x8] sm:$0xff] }
 0xa9f   :  { %5728 = vtanh.f32 %v7946_v41  ;;  %v9078_v4 = vsel %vm2851_vm13, %v2853_v49, %v2849_v28  ;;  %v2890_v6 = vadd.f32 %v9011_v29, %v2889_v61  ;;  %v4243_v14 = vld [vmem:[#allocation11] sm:$0xff] }
 0xaa0   :  { %5730 = vtanh.f32 %v7996_v13  ;;  %v2819_v1 = vsel %vm9070_vm5, %v8999_v9, %v2815_v7  ;;  %v2895_v9 = vand.u32 2147483647, %v8985_v0 }
 0xaa1   :  { %5732 = vtanh.f32 %v2968_v48  ;;  %v9087_v54 = vsel %vm2821_vm1, %v2823_v42, %v2819_v1  ;;  %v2894_v25 = vsel %vm2893_vm6, %v9011_v29, %v2890_v6  ;;  %v4315_v29 = vld [vmem:[%s9611_s11 + $0x78] sm:$0xff]  ;;  %v4302_v48 = vld [vmem:[%s9611_s11 + $0x10] sm:$0xff] }
 0xaa2   :  { %4286 = vrot.lane.b32.xlu2 %v4254_v31, %s5772_s24  ;;  %5734 = vtanh.f32 %v2966_v60  ;;  %v2969_v18 = vmul.f32 %v8980_v57, %v9087_v54  ;;  %vm2896_vm7 = vcmp.eq.f32.partialorder %v2895_v9, 8.507059e+37  ;;  %4320 = vmatpush.msrb.mxu1 %v4315_v29  ;;  %v5355_v60 = vmul.f32 -1.442695, %v7996_v13 }
 0xaa3   :  { %v2947_v51 = vpop.permute.xlu1 %2946  ;;  %v9093_v23 = vsel %vm2896_vm7, %v2898_v20, %v2894_v25 }
 0xaa4   :  { %v5727_v38 = vpop.eup %5726  ;;  %v2971_v5 = vmul.f32 %v2947_v51, %v9078_v4  ;;  %4321 = vmatpush.msrb.mxu1 %v4314_v21 }
 0xaa5   :  { %v5729_v35 = vpop.eup %5728  ;;  %3004 = vrot.lane.b32.xlu1 %v5727_v38, %s9648_s18  ;;  %v4308_v38 = vld [vmem:[%s9611_s11 + $0x40] sm:$0xff] }
 0xaa6   :  { %2950 = vrot.lane.b32.xlu0 %v5729_v35, %s5772_s24  ;;  %v5731_v63 = vpop.eup %5730  ;;  %5736 = vtanh.f32 %v2971_v5  ;;  %4322 = vmatpush.msrb.mxu1 %v4313_v58  ;;  %v4305_v35 = vld [vmem:[%s9611_s11 + $0x28] sm:$0xff] }
 0xaa7   :  { %v5733_v59 = vpop.eup %5732  ;;  %5738 = vtanh.f32 %v2969_v18 }
 0xaa8   :  { %v5735_v43 = vpop.eup %5734  ;;  %4323 = vmatpush.msrb.mxu1 %v4312_v15 }
 0xaaa   :  { %4262 = vrot.lane.b32.xlu2 %v4248_v44, %s9652_s23  ;;  %4324 = vmatpush.msrb.mxu1 %v4311_v33 }
 0xaab   :  { %v2953_v24 = vpop.permute.xlu1 %2952 }
 0xaac   :  { %v2974_v0 = vmul.f32 %v2953_v24, %v9093_v23  ;;  %v5737_v31 = vpop.eup %5736  ;;  %4325 = vmatpush.msrb.mxu1 %v4310_v12 }
 0xaad   :  { %v5739_v27 = vpop.eup %5738 }
 0xaae   :  { %2954 = vrot.lane.b32.xlu0 %v5731_v63, %s5772_s24  ;;  %5740 = vtanh.f32 %v2974_v0  ;;  %4326 = vmatpush.msrb.mxu1 %v4309_v37 }
 0xaaf   :  { %5742 = vpow2.f32 %v5352_v26  ;;  %v4244_v26 = vld [vmem:[#allocation11 + $0x8] sm:$0xff] }
 0xab0   :  { %4327 = vmatpush.msrb.mxu1 %v4308_v38  ;;  %v4245_v38 = vld [vmem:[#allocation11 + $0x10] sm:$0xf] }
 0xab2   :  { %3000 = vrot.lane.b32.xlu2 %v5733_v59, %s9648_s18  ;;  %4328 = vmatpush.msrb.mxu1 %v4307_v32 }
 0xab3   :  { %v4275_v1 = vpop.permute.xlu1 %4274 }
 0xab4   :  { %v5741_v57 = vpop.eup %5740  ;;  %4329 = vmatpush.msrb.mxu1 %v4306_v3 }
 0xab5   :  { %v5743_v16 = vpop.eup %5742 }
 0xab6   :  { %2996 = vrot.lane.b32.xlu0 %v5735_v43, %s9648_s18  ;;  %v2762_v34 = vadd.f32 1.0, %v5743_v16  ;;  %4330 = vmatpush.msrb.mxu1 %v4305_v35 }
 0xab8   :  { %5744 = vrcp.f32 %v2762_v34  ;;  %4331 = vmatpush.msrb.mxu1 %v4304_v46  ;;  %v2867_v7 = vand.u32 2147483648, %v2762_v34  ;;  %vm2861_vm10 = vweird.f32 %v2762_v34  ;;  %v2865_v56 = vand.u32 2147483647, %v2762_v34 }
 0xab9   :  { %5746 = vpow2.f32 %v5353_v55 }
 0xaba   :  { %3006 = vrot.lane.b32.xlu2 %v5737_v31, %s9648_s18  ;;  %4332 = vmatpush.msrb.mxu1 %v4303_v10  ;;  %v2868_v28 = vor.u32 1.1754944e-38, %v2867_v7  ;;  %vm2866_vm13 = vcmp.eq.f32.partialorder %v2865_v56, 8.507059e+37  ;;  %5748 = vpow2.f32 %v5355_v60 }
 0xabc   :  { %4333 = vmatpush.msrb.mxu1 %v4302_v48 }
 0xabe   :  { %3002 = vrot.lane.b32.xlu0 %v5739_v27, %s9648_s18  ;;  %v5745_v8 = vpop.eup %5744  ;;  %4334 = vmatpush.msrb.mxu1 %v4301_v52 }
 0xabf   :  { %v2857_v11 = vmul.f32 %v5745_v8, %v2762_v34  ;;  %vm2862_vm9 = vweird.f32 %v5745_v8  ;;  %v5747_v49 = vpop.eup %5746 }
 0xac0   :  { %4335 = vmatpush.msrb.mxu1 %v4300_v53  ;;  %vm2863_vm5 = vmor %vm2861_vm10, %vm2862_vm9  ;;  %v2763_v63 = vadd.f32 1.0, %v5747_v49  ;;  %v5749_v2 = vpop.eup %5748 }
 0xac1   :  { %v2858_v36 = vsub.f32 1.0, %v2857_v11  ;;  %v2765_v5 = vadd.f32 1.0, %v5749_v2 }
 0xac2   :  { %3012 = vrot.lane.b32.xlu2 %v5741_v57, %s9648_s18  ;;  %v2882_v32 = vand.u32 2147483648, %v2763_v63  ;;  %vm2876_vm1 = vweird.f32 %v2763_v63 }
 0xac3   :  { %v2859_v40 = vmul.f32 %v5745_v8, %v2858_v36  ;;  %vm2906_vm9 = vweird.f32 %v2765_v5  ;;  %v2910_v7 = vand.u32 2147483647, %v2765_v5 }
 0xac4   :  { %v2883_v46 = vor.u32 1.1754944e-38, %v2882_v32 }
 0xac5   :  { %v2860_v44 = vadd.f32 %v5745_v8, %v2859_v40 }
 0xac7   :  { %v2864_v51 = vsel %vm2863_vm5, %v5745_v8, %v2860_v44  ;;  %v2880_v8 = vand.u32 2147483647, %v2763_v63  ;;  %v2912_v44 = vand.u32 2147483648, %v2765_v5  ;;  %vm2911_vm5 = vcmp.eq.f32.partialorder %v2910_v7, 8.507059e+37 }
 0xac8   :  { %v9151_v61 = vsel %vm2866_vm13, %v2868_v28, %v2864_v51  ;;  %vm4529_vm13 = vcmask 1040384  }
 0xac9   :  { %vm2881_vm6 = vcmp.eq.f32.partialorder %v2880_v8, 8.507059e+37  ;;  %v2913_v51 = vor.u32 1.1754944e-38, %v2912_v44 }
 0xae4   :  { %v4271_v19 = vpop.permute.xlu2 %4270 }
 0xaec   :  { %v4273_v62 = vpop.permute.xlu2 %4272 }
 0xaf4   :  { %v2949_v30 = vpop.permute.xlu2 %2948 }
 0xaf5   :  { %v2972_v41 = vmul.f32 %v2949_v30, %v9151_v61 }
 0xaf7   :  { %5750 = vtanh.f32 %v2972_v41 }
 0xaf8   :  { %5752 = vrcp.f32 %v2763_v63 }
 0xaf9   :  { %5754 = vrcp.f32 %v2765_v5 }
 0xafc   :  { %v4287_v18 = vpop.permute.xlu2 %4286 }
 0xafd   :  { %v5751_v47 = vpop.eup %5750 }
 0xafe   :  { %3008 = vrot.lane.b32.xlu0 %v5751_v47, %s9648_s18  ;;  %v5753_v42 = vpop.eup %5752 }
 0xaff   :  { %v2872_v9 = vmul.f32 %v5753_v42, %v2763_v63  ;;  %v5755_v57 = vpop.eup %5754  ;;  %vm2877_vm15 = vweird.f32 %v5753_v42 }
 0xb00   :  { %v5639_v6 = vpop.permute.xlu0 %5638  ;;  %v2902_v15 = vmul.f32 %v5755_v57, %v2765_v5  ;;  %vm2878_vm3 = vmor %vm2876_vm1, %vm2877_vm15  ;;  %vm2907_vm7 = vweird.f32 %v5755_v57  ;;  %vm102_vm15 = vcmask 123904  }
 0xb01   :  { %v5640_v13 = vunpack.i.l.bf16 %v5639_v6  ;;  %v5641_v0 = vunpack.i.h.bf16 %v5639_v6  ;;  %v2873_v27 = vsub.f32 1.0, %v2872_v9  ;;  %vm2908_vm10 = vmor %vm2906_vm9, %vm2907_vm7  ;;  %103 = vst.msk [vmem:[#allocation12 + $0x50] sm:$0x3] %vm102_vm15, %v5770_v39 }
 0xb02   :  { %v2903_v37 = vsub.f32 1.0, %v2902_v15 }
 0xb03   :  { %v4291_v59 = vsel %vm73_vm8, %v4243_v14, %v5640_v13  ;;  %v4292_v21 = vsel %vm73_vm8, %v4244_v26, %v5641_v0  ;;  %v2874_v58 = vmul.f32 %v5753_v42, %v2873_v27 }
 0xb04   :  { %v4294_v43 = vsel %vm80_vm11, %v4291_v59, %v4271_v19  ;;  %v4263_v33 = vpop.permute.xlu2 %4262  ;;  %v2904_v11 = vmul.f32 %v5755_v57, %v2903_v37 }
 0xb05   :  { %v2875_v12 = vadd.f32 %v5753_v42, %v2874_v58  ;;  %v4293_v3 = vsel %vm73_vm8, %v4245_v38, %v4263_v33 }
 0xb06   :  { %v4296_v10 = vsel %vm80_vm11, %v4293_v3, %v4275_v1  ;;  %v2905_v55 = vadd.f32 %v5755_v57, %v2904_v11 }
 0xb07   :  { %v2999_v25 = vpop.permute.xlu1 %2998  ;;  %v2879_v35 = vsel %vm2878_vm3, %v5753_v42, %v2875_v12  ;;  %v4299_v53 = vsel %vm2538_vm14, %v4296_v10, %v4287_v18 }
 0xb08   :  { %v3027_v20 = vmul.f32 %v2999_v25, %v8961_v50  ;;  %v4283_v24 = vpop.permute.xlu0 %4282  ;;  %v4295_v50 = vsel %vm80_vm11, %v4292_v21, %v4273_v62  ;;  %v2884_v48 = vsel %vm2881_vm6, %v2883_v46, %v2879_v35  ;;  %v2909_v56 = vsel %vm2908_vm10, %v5755_v57, %v2905_v55  ;;  %v5645_v57 = vld [vmem:[%s9612_s12] ss:$0 sm:$0xff] }
 0xb09   :  { %v4297_v31 = vsel %vm2538_vm14, %v4294_v43, %v4283_v24 }
 0xb0a   :  { %v3037_v29 = vmax.f32 %v3027_v20, 0.0  ;;  %4336 = vmatmul.f32.vlgmr.msrb.gmra.mxu1 %v4297_v31 }
 0xb0c   :  { %3058 = vrot.lane.b32.xlu2 %v3037_v29, %s5773_s13  ;;  %v3001_v49 = vpop.permute.xlu2 %3000 }
 0xb0d   :  { %v3028_v1 = vmul.f32 %v3001_v49, %v9040_v45 }
 0xb0f   :  { %v3038_v42 = vmax.f32 %v3028_v1, 0.0 }
 0xb10   :  { %v4285_v16 = vpop.permute.xlu0 %4284 }
 0xb11   :  { %v4298_v34 = vsel %vm2538_vm14, %v4295_v50, %v4285_v16  ;;  %vm4400_vm14 = vcmask 1042432  }
 0xb12   :  { %4339 = vmatmul.f32.gmra.mxu1 %v4298_v34 }
 0xb14   :  { %v3007_v13 = vpop.permute.xlu2 %3006 }
 0xb15   :  { %v3031_v59 = vmul.f32 %v3007_v13, %v9078_v4 }
 0xb17   :  { %v3005_v19 = vpop.permute.xlu1 %3004 }
 0xb18   :  { %v3030_v36 = vmul.f32 %v3005_v19, %v9002_v17  ;;  %v2951_v52 = vpop.permute.xlu0 %2950  ;;  %v2914_v17 = vsel %vm2911_vm5, %v2913_v51, %v2909_v56 }
 0xb19   :  { %v2973_v40 = vmul.f32 %v2951_v52, %v2884_v48 }
 0xb1a   :  { %v3040_v62 = vmax.f32 %v3030_v36, 0.0  ;;  %4342 = vmatmul.f32.gmra.mxu1 %v4299_v53 }
 0xb1b   :  { %5756 = vtanh.f32 %v2973_v40 }
 0xb1c   :  { %3064 = vrot.lane.b32.xlu2 %v3040_v62, %s5773_s13  ;;  %v3013_v9 = vpop.permute.xlu2 %3012 }
 0xb1d   :  { %v3034_v18 = vmul.f32 %v3013_v9, %v9093_v23 }
 0xb1f   :  { %v3044_v25 = vmax.f32 %v3034_v18, 0.0 }
 0xb20   :  { %v2955_v60 = vpop.permute.xlu0 %2954 }
 0xb21   :  { %v5757_v28 = vpop.eup %5756  ;;  %v2975_v30 = vmul.f32 %v2955_v60, %v2914_v17 }
 0xb22   :  { %3010 = vrot.lane.b32.xlu1 %v5757_v28, %s9648_s18 }
 0xb23   :  { %5758 = vtanh.f32 %v2975_v30 }
 0xb28   :  { %v2997_v41 = vpop.permute.xlu0 %2996 }
 0xb29   :  { %v5759_v63 = vpop.eup %5758  ;;  %v3026_v2 = vmul.f32 %v2997_v41, %v9054_v22  ;;  %v3041_v22 = vmax.f32 %v3031_v59, 0.0 }
 0xb2a   :  { %3014 = vrot.lane.b32.xlu1 %v5759_v63, %s9648_s18 }
 0xb2b   :  { %v3036_v47 = vmax.f32 %v3026_v2, 0.0 }
 0xb2d   :  { %3056 = vrot.lane.b32.xlu0 %v3036_v47, %s5773_s13 }
 0xb30   :  { %v3003_v5 = vpop.permute.xlu0 %3002 }
 0xb31   :  { %v3029_v6 = vmul.f32 %v3003_v5, %v9087_v54 }
 0xb33   :  { %v3039_v14 = vmax.f32 %v3029_v6, 0.0 }
 0xb35   :  { %3060 = vrot.lane.b32.xlu0 %v3038_v42, %s5773_s13  ;;  %3062 = vrot.lane.b32.xlu1 %v3039_v14, %s5773_s13 }
 0xb3d   :  { %3066 = vrot.lane.b32.xlu0 %v3041_v22, %s5773_s13 }
 0xb45   :  { %3072 = vrot.lane.b32.xlu0 %v3044_v25, %s5773_s13 }
 0xb66   :  { %v3059_v45 = vpop.permute.xlu2 %3058 }
 0xb67   :  { %3087 = vst.msk [vmem:[#allocation8 + $0x8] sm:$0xff] %vm58_vm4, %v3059_v45 }
 0xb70   :  { %v3009_v54 = vpop.permute.xlu0 %3008 }
 0xb71   :  { %v3032_v20 = vmul.f32 %v3009_v54, %v9151_v61 }
 0xb73   :  { %v3042_v24 = vmax.f32 %v3032_v20, 0.0 }
 0xb75   :  { %3068 = vrot.lane.b32.xlu1 %v3042_v24, %s5773_s13 }
 0xb76   :  { %v3065_v43 = vpop.permute.xlu2 %3064 }
 0xb77   :  { %3090 = vst.msk [vmem:[#allocation8 + $0x20] sm:$0xff] %vm58_vm4, %v3065_v43 }
 0xb87   :  { %v4337_v29 = vpop.f32.mrf.mxu1 }
 0xb88   :  { %v4338_v21 = vadd.f32 %v5645_v57, %v4337_v29 }
 0xb8a   :  { %v9190_v58 = vmax.f32 %v4338_v21, 0.0 }
 0xb8f   :  { %v4340_v12 = vpop.f32.mrf.mxu1 }
 0xb90   :  { %v4341_v37 = vadd.f32 %v5645_v57, %v4340_v12 }
 0xb92   :  { %v9199_v10 = vmax.f32 %v4341_v37, 0.0 }
 0xb94   :  { %v3011_v4 = vpop.permute.xlu1 %3010 }
 0xb95   :  { %v3033_v0 = vmul.f32 %v3011_v4, %v2884_v48 }
 0xb97   :  { %v3043_v31 = vmax.f32 %v3033_v0, 0.0  ;;  %v4343_v63 = vpop.f32.mrf.mxu1 }
 0xb98   :  { %v4344_v2 = vadd.f32 %v5645_v57, %v4343_v63 }
 0xb99   :  { %3070 = vrot.lane.b32.xlu2 %v3043_v31, %s5773_s13 }
 0xb9a   :  { %v9212_v59 = vmax.f32 %v4344_v2, 0.0 }
 0xb9c   :  { %v3015_v23 = vpop.permute.xlu1 %3014 }
 0xb9d   :  { %v3035_v27 = vmul.f32 %v3015_v23, %v2914_v17 }
 0xb9f   :  { %v3045_v26 = vmax.f32 %v3035_v27, 0.0  ;;  %v3057_v61 = vpop.permute.xlu0 %3056 }
 0xba0   :  { %3086 = vst.msk [vmem:[#allocation8] sm:$0xff] %vm58_vm4, %v3057_v61 }
 0xba1   :  { %3074 = vrot.lane.b32.xlu1 %v3045_v26, %s5773_s13 }
 0xba7   :  { %v3063_v15 = vpop.permute.xlu1 %3062  ;;  %v3061_v33 = vpop.permute.xlu0 %3060  ;;  %v4353_v16 = vld [vmem:[#allocation8 + $0x1] ss:$2 sm:$0xf]  ;;  %v4349_v50 = vld [vmem:[#allocation8] ss:$2 sm:$0xf] }
 0xba8   :  { %3089 = vst.msk [vmem:[#allocation8 + $0x18] sm:$0xff] %vm58_vm4, %v3063_v15  ;;  %4355 = vrot.lane.b32.xlu2 %v4353_v16, %s9648_s18  ;;  %v4350_v34 = vadd.f32 %v4349_v50, %v9190_v58 }
 0xba9   :  { %3088 = vst.msk [vmem:[#allocation8 + $0x10] sm:$0xff] %vm58_vm4, %v3061_v33 }
 0xbaa   :  { %4351 = vst [vmem:[#allocation12] ss:$2 sm:$0xf] %v4350_v34 }
 0xbaf   :  { %v3067_v38 = vpop.permute.xlu0 %3066  ;;  %v4446_v35 = vld [vmem:[#allocation8 + $0x1f] ss:$2 sm:$0xf]  ;;  %v4427_v19 = vld [vmem:[#allocation8 + $0x1e] ss:$2 sm:$0xf] }
 0xbb0   :  { %3091 = vst.msk [vmem:[#allocation8 + $0x28] sm:$0xff] %vm58_vm4, %v3067_v38  ;;  %v4379_v32 = vld [vmem:[#allocation8 + $0xb] ss:$2 sm:$0xf]  ;;  %v4448_v40 = vrot.slane %v4446_v35, 3  ;;  %v4429_v53 = vrot.slane %v4427_v19, 3 }
 0xbb1   :  { %4381 = vrot.lane.b32.xlu1 %v4379_v32, %s5771_s1  ;;  %v4366_v3 = vld [vmem:[#allocation8 + $0xa] ss:$2 sm:$0xf]  ;;  %v4408_v8 = vld [vmem:[#allocation8 + $0x15] ss:$2 sm:$0xf] }
 0xbb2   :  { %4368 = vrot.lane.b32.xlu0 %v4366_v3, %s9652_s23  ;;  %v4410_v11 = vrot.slane %v4408_v8, 3  ;;  %v4392_v46 = vld [vmem:[#allocation8 + $0x14] ss:$2 sm:$0xf] }
 0xbb3   :  { %v4394_v36 = vrot.slane %v4392_v46, 3 }
 0xbb4   :  { %4411 = vrot.lane.b32.xlu2 %v4410_v11, %s9648_s18 }
 0xbb5   :  { %v4396_v48 = vadd.f32 %v4394_v36, %v9190_v58  ;;  %v4397_v52 = vadd.f32 %v4394_v36, %v9199_v10 }
 0xbb7   :  { %v4465_v55 = vld [vmem:[#allocation8 + $0x28] ss:$2 sm:$0xf]  ;;  %v3073_v62 = vpop.permute.xlu0 %3072  ;;  %v4476_v44 = vld [vmem:[#allocation8 + $0x29] ss:$2 sm:$0xf] }
 0xbb8   :  { %v4467_v7 = vrot.slane %v4465_v55, 6  ;;  %3094 = vst.msk [vmem:[#allocation8 + $0x40] sm:$0xff] %vm58_vm4, %v3073_v62  ;;  %v4478_v56 = vrot.slane %v4476_v44, 6  ;;  %v4401_v51 = vrot.slane %v4396_v48, 5  ;;  %v4402_v17 = vrot.slane %v4397_v52, 5 }
 0xbb9   :  { %4449 = vrot.lane.b32.xlu1 %v4448_v40, %s5771_s1 }
 0xbba   :  { %4430 = vrot.lane.b32.xlu0 %v4429_v53, %s9652_s23  ;;  %v4403_v60 = vsel %vm4400_vm14, %v4401_v51, %v4402_v17  ;;  %v4469_v28 = vadd.f32 %v4467_v7, %v9199_v10 }
 0xbbb   :  { %4406 = vst [vmem:[#allocation12 + $0x12] ss:$2 sm:$0xf] %v4403_v60 }
 0xbbc   :  { %4479 = vrot.lane.b32.xlu2 %v4478_v56, %s9648_s18  ;;  %v4471_v30 = vrot.slane %v4469_v28, 2 }
 0xbbe   :  { %4474 = vst [vmem:[#allocation12 + $0x24] ss:$2 sm:$0xf] %v4471_v30 }
 0xbe7   :  { %v3069_v49 = vpop.permute.xlu1 %3068 }
 0xbe8   :  { %3092 = vst.msk [vmem:[#allocation8 + $0x30] sm:$0xff] %vm58_vm4, %v3069_v49 }
 0xbf3   :  { %v3071_v41 = vpop.permute.xlu2 %3070 }
 0xbf4   :  { %3093 = vst.msk [vmem:[#allocation8 + $0x38] sm:$0xff] %vm58_vm4, %v3071_v41 }
 0xbfb   :  { %v4506_v47 = vld [vmem:[#allocation8 + $0x33] ss:$2 sm:$0xf]  ;;  %v4491_v1 = vld [vmem:[#allocation8 + $0x32] ss:$2 sm:$0xf] }
 0xbfc   :  { %v4508_v5 = vrot.slane %v4506_v47, 6  ;;  %v4493_v6 = vrot.slane %v4491_v1, 6  ;;  %v4537_v13 = vld [vmem:[#allocation8 + $0x3d] ss:$2 sm:$0xf] }
 0xbfd   :  { %v4539_v42 = vrot.slane %v4537_v13, 1  ;;  %v4521_v14 = vld [vmem:[#allocation8 + $0x3c] ss:$2 sm:$0xf] }
 0xbfe   :  { %4509 = vrot.lane.b32.xlu1 %v4508_v5, %s5771_s1  ;;  %4494 = vrot.lane.b32.xlu0 %v4493_v6, %s9652_s23  ;;  %v4523_v22 = vrot.slane %v4521_v14, 1 }
 0xbff   :  { %4540 = vrot.lane.b32.xlu2 %v4539_v42, %s9648_s18 }
 0xc00   :  { %v4525_v9 = vadd.f32 %v4523_v22, %v9199_v10  ;;  %v4526_v18 = vadd.f32 %v4523_v22, %v9212_v59 }
 0xc02   :  { %v4356_v25 = vpop.permute.xlu2 %4355  ;;  %v4530_v45 = vrot.slane %v4525_v9, 7  ;;  %v4531_v54 = vrot.slane %v4526_v18, 7 }
 0xc03   :  { %v4358_v20 = vadd.f32 %v4356_v25, %v9190_v58 }
 0xc04   :  { %v4532_v24 = vsel %vm4529_vm13, %v4530_v45, %v4531_v54 }
 0xc05   :  { %4535 = vst [vmem:[#allocation12 + $0x36] ss:$2 sm:$0xf] %v4532_v24 }
 0xc06   :  { %4360 = vrot.lane.b32.xlu0 %v4358_v20, %s5775_s19 }
 0xc0e   :  { %v4412_v31 = vpop.permute.xlu2 %4411 }
 0xc0f   :  { %v4414_v29 = vadd.f32 %v4412_v31, %v9190_v58  ;;  %v4415_v26 = vadd.f32 %v4412_v31, %v9199_v10 }
 0xc11   :  { %v4418_v21 = vrot.slane %v4414_v29, 5  ;;  %v4419_v15 = vrot.slane %v4415_v26, 5 }
 0xc13   :  { %v3075_v43 = vpop.permute.xlu1 %3074  ;;  %v4420_v38 = vsel %vm4400_vm14, %v4418_v21, %v4419_v15 }
 0xc14   :  { %3095 = vst.msk [vmem:[#allocation8 + $0x48] sm:$0xff] %vm58_vm4, %v3075_v43 }
 0xc16   :  { %v4480_v34 = vpop.permute.xlu2 %4479 }
 0xc17   :  { %v4482_v46 = vadd.f32 %v4480_v34, %v9199_v10 }
 0xc19   :  { %v4484_v52 = vrot.slane %v4482_v46, 2 }
 0xc1b   :  { %v4556_v4 = vld [vmem:[#allocation8 + $0x46] ss:$2 sm:$0xf]  ;;  %v4575_v33 = vld [vmem:[#allocation8 + $0x47] ss:$2 sm:$0xf] }
 0xc1c   :  { %v4558_v0 = vrot.slane %v4556_v4, 1  ;;  %v4577_v32 = vrot.slane %v4575_v33, 1 }
 0xc1e   :  { %4559 = vrot.lane.b32.xlu0 %v4558_v0, %s9652_s23 }
 0xc23   :  { %v4382_v23 = vpop.permute.xlu1 %4381 }
 0xc24   :  { %v4384_v27 = vadd.f32 %v4382_v23, %v9190_v58  ;;  %v4369_v57 = vpop.permute.xlu0 %4368 }
 0xc25   :  { %v4371_v61 = vadd.f32 %v4369_v57, %v9190_v58 }
 0xc26   :  { %4386 = vrot.lane.b32.xlu2 %v4384_v27, %s5773_s13 }
 0xc27   :  { %4373 = vrot.lane.b32.xlu1 %v4371_v61, %s5772_s24 }
 0xc2b   :  { %v4450_v16 = vpop.permute.xlu1 %4449 }
 0xc2c   :  { %v4431_v50 = vpop.permute.xlu0 %4430  ;;  %v4452_v3 = vadd.f32 %v4450_v16, %v9190_v58  ;;  %v4453_v8 = vadd.f32 %v4450_v16, %v9199_v10 }
 0xc2d   :  { %v4433_v12 = vadd.f32 %v4431_v50, %v9190_v58  ;;  %v4434_v37 = vadd.f32 %v4431_v50, %v9199_v10 }
 0xc2e   :  { %4421 = vrot.lane.b32.xlu2 %v4420_v38, %s5775_s19  ;;  %v4456_v36 = vrot.slane %v4452_v3, 5  ;;  %v4457_v48 = vrot.slane %v4453_v8, 5 }
 0xc2f   :  { %v4437_v35 = vrot.slane %v4433_v12, 5  ;;  %v4438_v11 = vrot.slane %v4434_v37, 5  ;;  %4578 = vrot.lane.b32.xlu1 %v4577_v32, %s5771_s1 }
 0xc30   :  { %v4458_v58 = vsel %vm4400_vm14, %v4456_v36, %v4457_v48 }
 0xc31   :  { %v4439_v19 = vsel %vm4400_vm14, %v4437_v35, %v4438_v11 }
 0xc32   :  { %4440 = vrot.lane.b32.xlu0 %v4439_v19, %s5772_s24 }
 0xc36   :  { %4485 = vrot.lane.b32.xlu2 %v4484_v52, %s5775_s19 }
 0xc37   :  { %4459 = vrot.lane.b32.xlu1 %v4458_v58, %s5773_s13 }
 0xc59   :  { %v4541_v40 = vpop.permute.xlu2 %4540 }
 0xc5a   :  { %v4543_v53 = vadd.f32 %v4541_v40, %v9199_v10  ;;  %v4544_v55 = vadd.f32 %v4541_v40, %v9212_v59 }
 0xc5c   :  { %v4547_v62 = vrot.slane %v4543_v53, 7  ;;  %v4548_v44 = vrot.slane %v4544_v55, 7 }
 0xc5e   :  { %v4549_v7 = vsel %vm4529_vm13, %v4547_v62, %v4548_v44 }
 0xc5f   :  { %4550 = vrot.lane.b32.xlu2 %v4549_v7, %s5775_s19 }
 0xc70   :  { %v4510_v56 = vpop.permute.xlu1 %4509  ;;  %v4495_v51 = vpop.permute.xlu0 %4494 }
 0xc71   :  { %v4512_v17 = vadd.f32 %v4510_v56, %v9199_v10  ;;  %v4497_v60 = vadd.f32 %v4495_v51, %v9199_v10 }
 0xc73   :  { %v4514_v28 = vrot.slane %v4512_v17, 2  ;;  %v4499_v30 = vrot.slane %v4497_v60, 2 }
 0xc75   :  { %4515 = vrot.lane.b32.xlu1 %v4514_v28, %s5773_s13  ;;  %4500 = vrot.lane.b32.xlu0 %v4499_v30, %s5772_s24 }
 0xc78   :  { %v4361_v49 = vpop.permute.xlu0 %4360 }
 0xc79   :  { %4364 = vst [vmem:[#allocation12 + $0x1] ss:$2 sm:$0xf] %v4361_v49 }
 0xc80   :  { %v4387_v41 = vpop.permute.xlu2 %4386  ;;  %v4602_v63 = vld [vmem:[#allocation12 + $0x1] sm:$0xff] }
 0xc81   :  { %4390 = vst [vmem:[#allocation12 + $0xa] ss:$2 sm:$0xf] %v4387_v41  ;;  %4630 = vrot.lane.b32.xlu0 %v4602_v63, %s9648_s18  ;;  %v4593_v36 = vld [vmem:[#allocation12] sm:$0xff] }
 0xc88   :  { %v4422_v2 = vpop.permute.xlu2 %4421 }
 0xc89   :  { %4425 = vst [vmem:[#allocation12 + $0x13] ss:$2 sm:$0xf] %v4422_v2 }
 0xc90   :  { %v4486_v47 = vpop.permute.xlu2 %4485  ;;  %v4560_v1 = vpop.permute.xlu0 %4559  ;;  %v4604_v31 = vld [vmem:[#allocation12 + $0x11] sm:$0xff] }
 0xc91   :  { %4489 = vst [vmem:[#allocation12 + $0x25] ss:$2 sm:$0xf] %v4486_v47  ;;  %v4562_v5 = vadd.f32 %v4560_v1, %v9199_v10  ;;  %v4563_v6 = vadd.f32 %v4560_v1, %v9212_v59  ;;  %v4595_v41 = vld [vmem:[#allocation12 + $0x10] sm:$0xff] }
 0xc93   :  { %v4566_v13 = vrot.slane %v4562_v5, 7  ;;  %v4567_v42 = vrot.slane %v4563_v6, 7  ;;  %v4620_v5 = vld [vmem:[#allocation12 + $0x4a] sm:$0xff] }
 0xc95   :  { %v4568_v14 = vsel %vm4529_vm13, %v4566_v13, %v4567_v42  ;;  %v4611_v13 = vld [vmem:[#allocation12 + $0x49] sm:$0xff] }
 0xc96   :  { %4569 = vrot.lane.b32.xlu2 %v4568_v14, %s5772_s24 }
 0xc99   :  { %v4374_v22 = vpop.permute.xlu1 %4373 }
 0xc9a   :  { %4377 = vst [vmem:[#allocation12 + $0x9] ss:$2 sm:$0xf] %v4374_v22 }
 0xca1   :  { %v4579_v9 = vpop.permute.xlu1 %4578  ;;  %v4603_v18 = vld [vmem:[#allocation12 + $0x9] sm:$0xff] }
 0xca2   :  { %v4581_v25 = vadd.f32 %v4579_v9, %v9199_v10  ;;  %v4582_v45 = vadd.f32 %v4579_v9, %v9212_v59  ;;  %4658 = vrot.lane.b32.xlu1 %v4603_v18, %s9652_s23  ;;  %4632 = vrot.lane.b32.xlu2 %v4603_v18, %s9648_s18  ;;  %v4612_v0 = vld [vmem:[#allocation12 + $0xa] sm:$0xff]  ;;  %v4613_v10 = vld [vmem:[#allocation12 + $0x12] sm:$0xff] }
 0xca3   :  { %v4594_v7 = vld [vmem:[#allocation12 + $0x8] sm:$0xff] }
 0xca4   :  { %v4585_v54 = vrot.slane %v4581_v25, 7  ;;  %v4586_v20 = vrot.slane %v4582_v45, 7  ;;  %v4441_v24 = vpop.permute.xlu0 %4440 }
 0xca5   :  { %4444 = vst [vmem:[#allocation12 + $0x1b] ss:$2 sm:$0xf] %v4441_v24 }
 0xca6   :  { %v4587_v43 = vsel %vm4529_vm13, %v4585_v54, %v4586_v20 }
 0xca7   :  { %4588 = vrot.lane.b32.xlu0 %v4587_v43, %s5773_s13  ;;  %s9667_s13 = sld [smem:[#allocation17_spill]] }
 0xca9   :  { %v4460_v4 = vpop.permute.xlu1 %4459 }
 0xcaa   :  { %4463 = vst [vmem:[#allocation12 + $0x1c] ss:$2 sm:$0xf] %v4460_v4  ;;  %4694 = vrot.lane.b32.xlu1 %v4612_v0, %s5771_s1  ;;  %4634 = vrot.lane.b32.xlu2 %v4604_v31, %s9648_s18 }
 0xcad   :  { %v4755_v21 = vld [vmem:[%s9667_s13 + $0x38] sm:$0xff]  ;;  %v4754_v15 = vld [vmem:[%s9667_s13 + $0x30] sm:$0xff]  ;;  %v4753_v33 = vld [vmem:[%s9667_s13 + $0x28] sm:$0xff] }
 0xcae   :  { %4795 = vmatpush.msra.mxu3 %v4755_v21  ;;  %v4752_v12 = vld [vmem:[%s9667_s13 + $0x20] sm:$0xff]  ;;  %v4751_v37 = vld [vmem:[%s9667_s13 + $0x18] sm:$0xff]  ;;  %v4750_v38 = vld [vmem:[%s9667_s13 + $0x10] sm:$0xff] }
 0xcaf   :  { %4660 = vrot.lane.b32.xlu0 %v4604_v31, %s9652_s23  ;;  %v4749_v8 = vld [vmem:[%s9667_s13 + $0x8] sm:$0xff]  ;;  %v4748_v35 = vld [vmem:[%s9667_s13] sm:$0xff] }
 0xcb0   :  { %4796 = vmatpush.msra.mxu3 %v4754_v15 }
 0xcb1   :  { %v4605_v59 = vld [vmem:[#allocation12 + $0x19] sm:$0xff]  ;;  %v4606_v57 = vld [vmem:[#allocation12 + $0x21] sm:$0xff] }
 0xcb2   :  { %4696 = vrot.lane.b32.xlu1 %v4613_v10, %s5771_s1  ;;  %4636 = vrot.lane.b32.xlu2 %v4605_v59, %s9648_s18  ;;  %v4614_v27 = vld [vmem:[#allocation12 + $0x1a] sm:$0xff]  ;;  %v4615_v29 = vld [vmem:[#allocation12 + $0x22] sm:$0xff] }
 0xcb3   :  { %4797 = vmatpush.msra.mxu3 %v4753_v33  ;;  %v4596_v14 = vld [vmem:[#allocation12 + $0x18] sm:$0xff]  ;;  %v4597_v54 = vld [vmem:[#allocation12 + $0x20] sm:$0xff] }
 0xcb5   :  { %4798 = vmatpush.msra.mxu3 %v4752_v12 }
 0xcb7   :  { %4662 = vrot.lane.b32.xlu0 %v4605_v59, %s9652_s23  ;;  %4799 = vmatpush.msra.mxu3 %v4751_v37 }
 0xcb9   :  { %v4551_v23 = vpop.permute.xlu2 %4550  ;;  %4800 = vmatpush.msra.mxu3 %v4750_v38 }
 0xcba   :  { %4554 = vst [vmem:[#allocation12 + $0x37] ss:$2 sm:$0xf] %v4551_v23  ;;  %4698 = vrot.lane.b32.xlu1 %v4614_v27, %s5771_s1  ;;  %4638 = vrot.lane.b32.xlu2 %v4606_v57, %s9648_s18 }
 0xcbb   :  { %4801 = vmatpush.msra.mxu3 %v4749_v8 }
 0xcbd   :  { %4802 = vmatpush.msra.mxu3 %v4748_v35 }
 0xcbf   :  { %4664 = vrot.lane.b32.xlu0 %v4606_v57, %s9652_s23 }
 0xcc2   :  { %4700 = vrot.lane.b32.xlu1 %v4615_v29, %s5771_s1 }
 0xce7   :  { %v4516_v26 = vpop.permute.xlu1 %4515  ;;  %v4501_v61 = vpop.permute.xlu0 %4500 }
 0xce8   :  { %4519 = vst [vmem:[#allocation12 + $0x2e] ss:$2 sm:$0xf] %v4516_v26 }
 0xce9   :  { %4504 = vst [vmem:[#allocation12 + $0x2d] ss:$2 sm:$0xf] %v4501_v61 }
 0xcf0   :  { %v4570_v16 = vpop.permute.xlu2 %4569  ;;  %v4616_v50 = vld [vmem:[#allocation12 + $0x2a] sm:$0xff]  ;;  %v4617_v32 = vld [vmem:[#allocation12 + $0x32] sm:$0xff] }
 0xcf1   :  { %v4607_v34 = vld [vmem:[#allocation12 + $0x29] sm:$0xff]  ;;  %4573 = vst [vmem:[#allocation12 + $0x3f] ss:$2 sm:$0xf] %v4570_v16  ;;  %4702 = vrot.lane.b32.xlu1 %v4616_v50, %s5771_s1  ;;  %v4608_v3 = vld [vmem:[#allocation12 + $0x31] sm:$0xff] }
 0xcf2   :  { %4640 = vrot.lane.b32.xlu2 %v4607_v34, %s9648_s18  ;;  %4666 = vrot.lane.b32.xlu0 %v4607_v34, %s9652_s23  ;;  %v4598_v10 = vld [vmem:[#allocation12 + $0x28] sm:$0xff]  ;;  %v4599_v61 = vld [vmem:[#allocation12 + $0x30] sm:$0xff] }
 0xcf3   :  { %v4631_v11 = vpop.permute.xlu0 %4630 }
 0xcf4   :  { %v4721_v48 = vsel %vm58_vm4, %v4593_v36, %v4631_v11 }
 0xcf8   :  { %v4600_v12 = vld [vmem:[#allocation12 + $0x38] sm:$0xff] }
 0xcf9   :  { %4704 = vrot.lane.b32.xlu1 %v4617_v32, %s5771_s1 }
 0xcfa   :  { %4642 = vrot.lane.b32.xlu2 %v4608_v3, %s9648_s18  ;;  %4668 = vrot.lane.b32.xlu0 %v4608_v3, %s9652_s23 }
 0xcfc   :  { %v4633_v52 = vpop.permute.xlu2 %4632 }
 0xcfd   :  { %v4722_v39 = vsel %vm58_vm4, %v4594_v7, %v4633_v52 }
 0xd04   :  { %v4635_v60 = vpop.permute.xlu2 %4634 }
 0xd05   :  { %v4723_v63 = vsel %vm58_vm4, %v4595_v41, %v4635_v60 }
 0xd0c   :  { %v4637_v6 = vpop.permute.xlu2 %4636 }
 0xd0d   :  { %v4724_v22 = vsel %vm58_vm4, %v4596_v14, %v4637_v6 }
 0xd14   :  { %v4659_v46 = vpop.permute.xlu1 %4658  ;;  %v4639_v45 = vpop.permute.xlu2 %4638 }
 0xd15   :  { %v4730_v58 = vsel %vm73_vm8, %v4721_v48, %v4659_v46  ;;  %v4725_v24 = vsel %vm58_vm4, %v4597_v54, %v4639_v45 }
 0xd19   :  { %v4589_v19 = vpop.permute.xlu0 %4588 }
 0xd1a   :  { %4592 = vst [vmem:[#allocation12 + $0x40] ss:$2 sm:$0xf] %v4589_v19 }
 0xd1c   :  { %v4695_v40 = vpop.permute.xlu1 %4694 }
 0xd1d   :  { %v4739_v53 = vsel %vm2506_vm12, %v4730_v58, %v4695_v40 }
 0xd1e   :  { %5368 = vmatmul.msk.f32.vlgmr.msra.gmra.mxu3 %vm80_vm11, %v4739_v53 }
 0xd21   :  { %v4661_v55 = vpop.permute.xlu0 %4660  ;;  %v4618_v62 = vld [vmem:[#allocation12 + $0x3a] sm:$0xff]  ;;  %v4619_v30 = vld [vmem:[#allocation12 + $0x42] sm:$0xff] }
 0xd22   :  { %v4609_v44 = vld [vmem:[#allocation12 + $0x39] sm:$0xff]  ;;  %4706 = vrot.lane.b32.xlu1 %v4618_v62, %s5771_s1  ;;  %v4731_v56 = vsel %vm73_vm8, %v4722_v39, %v4661_v55  ;;  %v4610_v49 = vld [vmem:[#allocation12 + $0x41] sm:$0xff] }
 0xd23   :  { %4644 = vrot.lane.b32.xlu2 %v4609_v44, %s9648_s18  ;;  %4670 = vrot.lane.b32.xlu0 %v4609_v44, %s9652_s23  ;;  %v4601_v36 = vld [vmem:[#allocation12 + $0x40] sm:$0xff] }
 0xd24   :  { %v4697_v51 = vpop.permute.xlu1 %4696 }
 0xd25   :  { %v4740_v17 = vsel %vm2506_vm12, %v4731_v56, %v4697_v51 }
 0xd26   :  { %5369 = vmatmul.msk.f32.gmra.mxu3 %vm80_vm11, %v4740_v17 }
 0xd29   :  { %v4663_v28 = vpop.permute.xlu0 %4662 }
 0xd2a   :  { %4708 = vrot.lane.b32.xlu1 %v4619_v30, %s5771_s1  ;;  %v4732_v2 = vsel %vm73_vm8, %v4723_v63, %v4663_v28 }
 0xd2b   :  { %4646 = vrot.lane.b32.xlu2 %v4610_v49, %s9648_s18  ;;  %4672 = vrot.lane.b32.xlu0 %v4610_v49, %s9652_s23 }
 0xd2c   :  { %v4699_v47 = vpop.permute.xlu1 %4698 }
 0xd2d   :  { %v4741_v1 = vsel %vm2506_vm12, %v4732_v2, %v4699_v47 }
 0xd2e   :  { %5370 = vmatmul.msk.f32.gmra.mxu3 %vm80_vm11, %v4741_v1  ;;  %v5048_v1 = vld [vmem:[%s9669_s26] sm:$0xff] }
 0xd2f   :  { %5164 = vmatpush.msra.mxu1 %v5048_v1  ;;  %5425 = vmatpush.msrb.mxu2 %v5048_v1 }
 0xd31   :  { %v4665_v42 = vpop.permute.xlu0 %4664 }
 0xd32   :  { %4710 = vrot.lane.b32.xlu1 %v4620_v5, %s5771_s1  ;;  %v4733_v9 = vsel %vm73_vm8, %v4724_v22, %v4665_v42  ;;  %s9668_s1 = sld [smem:[#allocation18_spill]] }
 0xd33   :  { %4674 = vrot.lane.b32.xlu0 %v4611_v13, %s9652_s23 }
 0xd34   :  { %v4701_v18 = vpop.permute.xlu1 %4700 }
 0xd35   :  { %v4742_v25 = vsel %vm2506_vm12, %v4733_v9, %v4701_v18 }
 0xd36   :  { %5371 = vmatmul.msk.f32.gmra.mxu3 %vm80_vm11, %v4742_v25 }
 0xd38   :  { %v9344_v8 = vld [vmem:[%s9668_s1] ss:$0 sm:$0xff] }
 0xd4c   :  { %v4641_v31 = vpop.permute.xlu2 %4640 }
 0xd4d   :  { %v4726_v23 = vsel %vm58_vm4, %v4598_v10, %v4641_v31 }
 0xd54   :  { %v4643_v26 = vpop.permute.xlu2 %4642 }
 0xd55   :  { %v4727_v15 = vsel %vm58_vm4, %v4599_v61, %v4643_v26 }
 0xd63   :  { %v4703_v20 = vpop.permute.xlu1 %4702 }
 0xd64   :  { %v4667_v43 = vpop.permute.xlu0 %4666 }
 0xd65   :  { %v4734_v4 = vsel %vm73_vm8, %v4725_v24, %v4667_v43 }
 0xd66   :  { %v4743_v0 = vsel %vm2506_vm12, %v4734_v4, %v4703_v20 }
 0xd67   :  { %5372 = vmatmul.msk.f32.gmra.mxu3 %vm80_vm11, %v4743_v0 }
 0xd6b   :  { %v4705_v59 = vpop.permute.xlu1 %4704 }
 0xd6c   :  { %v4669_v27 = vpop.permute.xlu0 %4668 }
 0xd6d   :  { %v4735_v57 = vsel %vm73_vm8, %v4726_v23, %v4669_v27 }
 0xd6e   :  { %v4744_v29 = vsel %vm2506_vm12, %v4735_v57, %v4705_v59 }
 0xd6f   :  { %5373 = vmatmul.msk.f32.gmra.mxu3 %vm80_vm11, %v4744_v29 }
 0xd7d   :  { %v4645_v34 = vpop.permute.xlu2 %4644 }
 0xd7e   :  { %v4728_v38 = vsel %vm58_vm4, %v4600_v12, %v4645_v34 }
 0xd85   :  { %v4647_v46 = vpop.permute.xlu2 %4646 }
 0xd86   :  { %v4729_v58 = vsel %vm58_vm4, %v4601_v36, %v4647_v46  ;;  %vm4859_vm4 = vcmask 1046528  }
 0xd94   :  { %v4707_v21 = vpop.permute.xlu1 %4706 }
 0xd95   :  { %v4671_v33 = vpop.permute.xlu0 %4670 }
 0xd96   :  { %v4736_v16 = vsel %vm73_vm8, %v4727_v15, %v4671_v33 }
 0xd97   :  { %v4745_v50 = vsel %vm2506_vm12, %v4736_v16, %v4707_v21 }
 0xd98   :  { %5374 = vmatmul.msk.f32.gmra.mxu3 %vm80_vm11, %v4745_v50 }
 0xd9c   :  { %v4709_v37 = vpop.permute.xlu1 %4708 }
 0xd9d   :  { %v4673_v32 = vpop.permute.xlu0 %4672 }
 0xd9e   :  { %v4737_v3 = vsel %vm73_vm8, %v4728_v38, %v4673_v32 }
 0xd9f   :  { %v4746_v35 = vsel %vm2506_vm12, %v4737_v3, %v4709_v37 }
 0xda0   :  { %5375 = vmatmul.msk.f32.gmra.mxu3 %vm80_vm11, %v4746_v35 }
 0xda1   :  { %v4804_v11 = vpop.f32.mrf.mxu3 }
 0xda2   :  { %v4805_v19 = vadd.f32 %v9344_v8, %v4804_v11 }
 0xda4   :  { %v4831_v48 = vmax.f32 %v4805_v19, 0.0  ;;  %v4711_v52 = vpop.permute.xlu1 %4710 }
 0xda5   :  { %v4675_v40 = vpop.permute.xlu0 %4674 }
 0xda6   :  { %4840 = vst [vmem:[#allocation13] ss:$2 sm:$0xff] %v4831_v48  ;;  %v4738_v53 = vsel %vm73_vm8, %v4729_v58, %v4675_v40  ;;  %4852 = vrot.lane.b32.xlu1 %v4831_v48, %s5776_s14  ;;  %4847 = vrot.lane.b32.xlu0 %v4831_v48, %s5775_s19  ;;  %vm4882_vm8 = vcmask 1045504  }
 0xda7   :  { %v4747_v55 = vsel %vm2506_vm12, %v4738_v53, %v4711_v52  ;;  %4842 = vrot.lane.b32.xlu2 %v4831_v48, %s5777_s22  ;;  %v22_v53 = vstv %s9670_s28  ;;  %vm5262_vm12 = vcmask 7168  }
 0xda8   :  { %5376 = vmatmul.msk.f32.gmra.mxu3 %vm80_vm11, %v4747_v55  ;;  %vm4905_vm11 = vcmask 1044480   ;;  %23 = vst [vmem:[#allocation14] sm:$0x1] %v22_v53 }
 0xda9   :  { %v4807_v62 = vpop.f32.mrf.mxu3 }
 0xdaa   :  { %v4808_v44 = vadd.f32 %v9344_v8, %v4807_v62 }
 0xdac   :  { %v4832_v39 = vmax.f32 %v4808_v44, 0.0 }
 0xdae   :  { %v4860_v17 = vrot.slane %v4832_v39, 1 }
 0xdb1   :  { %v4810_v7 = vpop.f32.mrf.mxu3 }
 0xdb2   :  { %v4811_v56 = vadd.f32 %v9344_v8, %v4810_v7 }
 0xdb4   :  { %v4833_v51 = vmax.f32 %v4811_v56, 0.0 }
 0xdb6   :  { %v4861_v60 = vrot.slane %v4833_v51, 1  ;;  %v4883_v63 = vrot.slane %v4833_v51, 2  ;;  %v9414_v51 = vld [vmem:[#allocation14] ss:$0 sm:$0xff] }
 0xdb8   :  { %v4862_v28 = vsel %vm4859_vm4, %v4860_v17, %v4861_v60 }
 0xdb9   :  { %v4813_v30 = vpop.f32.mrf.mxu3  ;;  %4865 = vst [vmem:[#allocation13 + $0x20] ss:$2 sm:$0xff] %v4862_v28  ;;  %4866 = vrot.lane.b32.xlu2 %v4862_v28, %s5777_s22 }
 0xdba   :  { %v4814_v49 = vadd.f32 %v9344_v8, %v4813_v30 }
 0xdbc   :  { %v4834_v41 = vmax.f32 %v4814_v49, 0.0 }
 0xdbe   :  { %v4884_v2 = vrot.slane %v4834_v41, 2  ;;  %v4906_v42 = vrot.slane %v4834_v41, 3 }
 0xdc0   :  { %v9360_v47 = vsel %vm4882_vm8, %v4883_v63, %v4884_v2 }
 0xdc1   :  { %4871 = vrot.lane.b32.xlu2 %v4862_v28, %s5775_s19  ;;  %4888 = vst [vmem:[#allocation13 + $0x40] ss:$2 sm:$0xff] %v9360_v47 }
 0xdc9   :  { %4889 = vrot.lane.b32.xlu2 %v9360_v47, %s5777_s22 }
 0xdd1   :  { %4894 = vrot.lane.b32.xlu2 %v9360_v47, %s5775_s19 }
 0xdea   :  { %v4816_v5 = vpop.f32.mrf.mxu3 }
 0xdeb   :  { %v4817_v6 = vadd.f32 %v9344_v8, %v4816_v5 }
 0xded   :  { %v4835_v13 = vmax.f32 %v4817_v6, 0.0 }
 0xdef   :  { %v4907_v14 = vrot.slane %v4835_v13, 3  ;;  %v4928_v45 = vrot.slane %v4835_v13, 4 }
 0xdf1   :  { %v9372_v22 = vsel %vm4905_vm11, %v4906_v42, %v4907_v14 }
 0xdf2   :  { %v4819_v9 = vpop.f32.mrf.mxu3  ;;  %4911 = vst [vmem:[#allocation13 + $0x60] ss:$2 sm:$0xff] %v9372_v22  ;;  %4912 = vrot.lane.b32.xlu2 %v9372_v22, %s5777_s22 }
 0xdf3   :  { %v4820_v18 = vadd.f32 %v9344_v8, %v4819_v9 }
 0xdf5   :  { %v4836_v25 = vmax.f32 %v4820_v18, 0.0 }
 0xdf7   :  { %v4929_v54 = vrot.slane %v4836_v25, 4  ;;  %v4950_v29 = vrot.slane %v4836_v25, 5 }
 0xdf9   :  { %v4930_v20 = vsel %vm1856_vm0, %v4928_v45, %v4929_v54  ;;  %vm4972_vm0 = vcmask 1041408  }
 0xdfa   :  { %4933 = vst [vmem:[#allocation13 + $0x80] ss:$2 sm:$0xff] %v4930_v20  ;;  %4944 = vrot.lane.b32.xlu1 %v4930_v20, %s5776_s14  ;;  %4939 = vrot.lane.b32.xlu0 %v4930_v20, %s5775_s19 }
 0xdfb   :  { %4917 = vrot.lane.b32.xlu2 %v9372_v22, %s5775_s19 }
 0xe01   :  { %v4843_v24 = vpop.permute.xlu2 %4842 }
 0xe02   :  { %4846 = vst [vmem:[#allocation13 + $0x1] ss:$2 sm:$0xff] %v4843_v24  ;;  %4876 = vrot.lane.b32.xlu0 %v4862_v28, %s5776_s14 }
 0xe03   :  { %4934 = vrot.lane.b32.xlu2 %v4930_v20, %s5777_s22 }
 0xe09   :  { %v5016_v43 = vld [vmem:[#allocation13] sm:$0xff]  ;;  %v5017_v4 = vld [vmem:[#allocation13 + $0x8] sm:$0xff] }
 0xe0a   :  { %5377 = vmatmul.msk.f32.vlgmr.msra.gmra.mxu1 %vm1481_vm2, %v5016_v43 }
 0xe12   :  { %5378 = vmatmul.msk.f32.gmra.mxu1 %vm1481_vm2, %v5017_v4 }
 0xe13   :  { %v4867_v0 = vpop.permute.xlu2 %4866 }
 0xe14   :  { %4870 = vst [vmem:[#allocation13 + $0x21] ss:$2 sm:$0xff] %v4867_v0 }
 0xe18   :  { %v4853_v31 = vpop.permute.xlu1 %4852  ;;  %v4848_v10 = vpop.permute.xlu0 %4847 }
 0xe19   :  { %4856 = vst [vmem:[#allocation13 + $0x11] ss:$2 sm:$0xff] %v4853_v31 }
 0xe1a   :  { %4851 = vst [vmem:[#allocation13 + $0x10] ss:$2 sm:$0xff] %v4848_v10 }
 0xe1b   :  { %v4822_v59 = vpop.f32.mrf.mxu3  ;;  %v4872_v23 = vpop.permute.xlu2 %4871  ;;  %v5020_v36 = vld [vmem:[#allocation13 + $0x20] sm:$0xff]  ;;  %v5021_v52 = vld [vmem:[#allocation13 + $0x28] sm:$0xff] }
 0xe1c   :  { %v4823_v27 = vadd.f32 %v9344_v8, %v4822_v59  ;;  %4875 = vst [vmem:[#allocation13 + $0x30] ss:$2 sm:$0xff] %v4872_v23 }
 0xe1e   :  { %v4837_v57 = vmax.f32 %v4823_v27, 0.0 }
 0xe20   :  { %v4951_v26 = vrot.slane %v4837_v57, 5  ;;  %v4973_v34 = vrot.slane %v4837_v57, 6 }
 0xe21   :  { %v5018_v61 = vld [vmem:[#allocation13 + $0x10] sm:$0xff]  ;;  %v5019_v37 = vld [vmem:[#allocation13 + $0x18] sm:$0xff] }
 0xe22   :  { %5379 = vmatmul.msk.f32.gmra.mxu1 %vm1481_vm2, %v5018_v61  ;;  %v4952_v21 = vsel %vm4400_vm14, %v4950_v29, %v4951_v26 }
 0xe23   :  { %v4825_v15 = vpop.f32.mrf.mxu3  ;;  %4955 = vst [vmem:[#allocation13 + $0xa0] ss:$2 sm:$0xff] %v4952_v21  ;;  %4956 = vrot.lane.b32.xlu1 %v4952_v21, %s5777_s22  ;;  %4961 = vrot.lane.b32.xlu0 %v4952_v21, %s5775_s19  ;;  %v4890_v33 = vpop.permute.xlu2 %4889 }
 0xe24   :  { %v4826_v16 = vadd.f32 %v9344_v8, %v4825_v15  ;;  %4893 = vst [vmem:[#allocation13 + $0x41] ss:$2 sm:$0xff] %v4890_v33 }
 0xe26   :  { %v4838_v50 = vmax.f32 %v4826_v16, 0.0 }
 0xe28   :  { %v4974_v12 = vrot.slane %v4838_v50, 6  ;;  %v4995_v46 = vrot.slane %v4838_v50, 7 }
 0xe2a   :  { %5380 = vmatmul.msk.f32.gmra.mxu1 %vm1481_vm2, %v5019_v37  ;;  %v4975_v38 = vsel %vm4972_vm0, %v4973_v34, %v4974_v12 }
 0xe2b   :  { %v4828_v32 = vpop.f32.mrf.mxu3  ;;  %4966 = vrot.lane.b32.xlu1 %v4952_v21, %s5776_s14  ;;  %4899 = vrot.lane.b32.xlu0 %v9360_v47, %s5776_s14  ;;  %v4895_v3 = vpop.permute.xlu2 %4894  ;;  %4978 = vst [vmem:[#allocation13 + $0xc0] ss:$2 sm:$0xff] %v4975_v38  ;;  %v5024_v28 = vld [vmem:[#allocation13 + $0x40] sm:$0xff]  ;;  %v5025_v41 = vld [vmem:[#allocation13 + $0x48] sm:$0xff] }
 0xe2c   :  { %v4829_v35 = vadd.f32 %v9344_v8, %v4828_v32  ;;  %4898 = vst [vmem:[#allocation13 + $0x50] ss:$2 sm:$0xff] %v4895_v3 }
 0xe2e   :  { %v4839_v11 = vmax.f32 %v4829_v35, 0.0 }
 0xe30   :  { %v4996_v19 = vrot.slane %v4839_v11, 7 }
 0xe32   :  { %5381 = vmatmul.msk.f32.gmra.mxu1 %vm1481_vm2, %v5020_v36  ;;  %v4997_v48 = vsel %vm4529_vm13, %v4995_v46, %v4996_v19 }
 0xe33   :  { %4979 = vrot.lane.b32.xlu1 %v4975_v38, %s5777_s22  ;;  %4984 = vrot.lane.b32.xlu0 %v4975_v38, %s5775_s19  ;;  %5000 = vst [vmem:[#allocation13 + $0xe0] ss:$2 sm:$0xff] %v4997_v48 }
 0xe3a   :  { %5382 = vmatmul.msk.f32.gmra.mxu1 %vm1481_vm2, %v5021_v52 }
 0xe3b   :  { %4989 = vrot.lane.b32.xlu1 %v4975_v38, %s5776_s14  ;;  %4922 = vrot.lane.b32.xlu0 %v9372_v22, %s5776_s14 }
 0xe43   :  { %5001 = vrot.lane.b32.xlu1 %v4997_v48, %s5777_s22  ;;  %5006 = vrot.lane.b32.xlu0 %v4997_v48, %s5775_s19 }
 0xe4b   :  { %5011 = vrot.lane.b32.xlu1 %v4997_v48, %s5776_s14 }
 0xe4c   :  { %v4913_v8 = vpop.permute.xlu2 %4912 }
 0xe4d   :  { %4916 = vst [vmem:[#allocation13 + $0x61] ss:$2 sm:$0xff] %v4913_v8 }
 0xe54   :  { %v5028_v59 = vld [vmem:[#allocation13 + $0x60] sm:$0xff]  ;;  %v5029_v26 = vld [vmem:[#allocation13 + $0x68] sm:$0xff] }
 0xe55   :  { %v4918_v58 = vpop.permute.xlu2 %4917 }
 0xe56   :  { %4921 = vst [vmem:[#allocation13 + $0x70] ss:$2 sm:$0xff] %v4918_v58 }
 0xe5d   :  { %v4935_v40 = vpop.permute.xlu2 %4934 }
 0xe5e   :  { %4938 = vst [vmem:[#allocation13 + $0x81] ss:$2 sm:$0xff] %v4935_v40 }
 0xe65   :  { %v5032_v50 = vld [vmem:[#allocation13 + $0x80] sm:$0xff]  ;;  %v5033_v12 = vld [vmem:[#allocation13 + $0x88] sm:$0xff] }
 0xe6c   :  { %v4945_v55 = vpop.permute.xlu1 %4944  ;;  %v4940_v62 = vpop.permute.xlu0 %4939 }
 0xe6d   :  { %4948 = vst [vmem:[#allocation13 + $0x91] ss:$2 sm:$0xff] %v4945_v55 }
 0xe6e   :  { %4943 = vst [vmem:[#allocation13 + $0x90] ss:$2 sm:$0xff] %v4940_v62 }
 0xe74   :  { %v4877_v44 = vpop.permute.xlu0 %4876 }
 0xe75   :  { %4880 = vst [vmem:[#allocation13 + $0x31] ss:$2 sm:$0xff] %v4877_v44  ;;  %v5035_v7 = vld [vmem:[#allocation13 + $0x98] sm:$0xff]  ;;  %v5034_v38 = vld [vmem:[#allocation13 + $0x90] sm:$0xff] }
 0xe76   :  { %5396 = vmatmul.msk.f32.vlgmr.msrb.gmra.mxu2 %vm1481_vm2, %v5035_v7 }
 0xe7c   :  { %v5022_v39 = vld [vmem:[#allocation13 + $0x30] sm:$0xff]  ;;  %v5023_v56 = vld [vmem:[#allocation13 + $0x38] sm:$0xff] }
 0xe7d   :  { %5383 = vmatmul.msk.f32.gmra.mxu1 %vm1481_vm2, %v5022_v39 }
 0xe85   :  { %5384 = vmatmul.msk.f32.gmra.mxu1 %vm1481_vm2, %v5023_v56 }
 0xe87   :  { %v5166_v17 = vpop.f32.mrf.mxu1 }
 0xe88   :  { %v5167_v60 = vadd.f32 %v9414_v51, %v5166_v17 }
 0xe8a   :  { %5263 = vst.msk [vmem:[%s9671_s17] sm:$0xff] %vm5262_vm12, %v5167_v60 }
 0xe8d   :  { %5385 = vmatmul.msk.f32.gmra.mxu1 %vm1481_vm2, %v5024_v28 }
 0xe8f   :  { %v5169_v30 = vpop.f32.mrf.mxu1 }
 0xe90   :  { %v5170_v49 = vadd.f32 %v9414_v51, %v5169_v30 }
 0xe92   :  { %5264 = vst.msk [vmem:[%s9671_s17 + $0x8] sm:$0xff] %vm5262_vm12, %v5170_v49 }
 0xe95   :  { %v4957_v63 = vpop.permute.xlu1 %4956  ;;  %v4962_v2 = vpop.permute.xlu0 %4961  ;;  %5386 = vmatmul.msk.f32.gmra.mxu1 %vm1481_vm2, %v5025_v41 }
 0xe96   :  { %4960 = vst [vmem:[#allocation13 + $0xa1] ss:$2 sm:$0xff] %v4957_v63 }
 0xe97   :  { %4965 = vst [vmem:[#allocation13 + $0xb0] ss:$2 sm:$0xff] %v4962_v2 }
 0xe9d   :  { %v4967_v47 = vpop.permute.xlu1 %4966  ;;  %v4900_v1 = vpop.permute.xlu0 %4899  ;;  %v5036_v5 = vld [vmem:[#allocation13 + $0xa0] sm:$0xff]  ;;  %v5037_v22 = vld [vmem:[#allocation13 + $0xa8] sm:$0xff] }
 0xe9e   :  { %4970 = vst [vmem:[#allocation13 + $0xb1] ss:$2 sm:$0xff] %v4967_v47  ;;  %5397 = vmatmul.msk.f32.gmra.mxu2 %vm1481_vm2, %v5036_v5 }
 0xe9f   :  { %4903 = vst [vmem:[#allocation13 + $0x51] ss:$2 sm:$0xff] %v4900_v1  ;;  %v5172_v6 = vpop.f32.mrf.mxu1 }
 0xea0   :  { %v5173_v13 = vadd.f32 %v9414_v51, %v5172_v6 }
 0xea2   :  { %5265 = vst.msk [vmem:[%s9671_s17 + $0x10] sm:$0xff] %vm5262_vm12, %v5173_v13 }
 0xea5   :  { %v4980_v42 = vpop.permute.xlu1 %4979  ;;  %v4985_v14 = vpop.permute.xlu0 %4984  ;;  %v5038_v20 = vld [vmem:[#allocation13 + $0xb0] sm:$0xff]  ;;  %v5039_v10 = vld [vmem:[#allocation13 + $0xb8] sm:$0xff] }
 0xea6   :  { %4983 = vst [vmem:[#allocation13 + $0xc1] ss:$2 sm:$0xff] %v4980_v42  ;;  %v5026_v9 = vld [vmem:[#allocation13 + $0x50] sm:$0xff]  ;;  %5398 = vmatmul.msk.f32.gmra.mxu2 %vm1481_vm2, %v5037_v22  ;;  %v5027_v24 = vld [vmem:[#allocation13 + $0x58] sm:$0xff] }
 0xea7   :  { %4988 = vst [vmem:[#allocation13 + $0xd0] ss:$2 sm:$0xff] %v4985_v14  ;;  %5387 = vmatmul.msk.f32.gmra.mxu1 %vm1481_vm2, %v5026_v9  ;;  %v5175_v18 = vpop.f32.mrf.mxu1 }
 0xea8   :  { %v5176_v25 = vadd.f32 %v9414_v51, %v5175_v18 }
 0xeaa   :  { %5266 = vst.msk [vmem:[%s9671_s17 + $0x18] sm:$0xff] %vm5262_vm12, %v5176_v25 }
 0xead   :  { %v4990_v45 = vpop.permute.xlu1 %4989  ;;  %v4923_v54 = vpop.permute.xlu0 %4922  ;;  %v5040_v29 = vld [vmem:[#allocation13 + $0xc0] sm:$0xff]  ;;  %v5041_v61 = vld [vmem:[#allocation13 + $0xc8] sm:$0xff] }
 0xeae   :  { %4993 = vst [vmem:[#allocation13 + $0xd1] ss:$2 sm:$0xff] %v4990_v45  ;;  %5399 = vmatmul.msk.f32.gmra.mxu2 %vm1481_vm2, %v5038_v20 }
 0xeaf   :  { %4926 = vst [vmem:[#allocation13 + $0x71] ss:$2 sm:$0xff] %v4923_v54  ;;  %5388 = vmatmul.msk.f32.gmra.mxu1 %vm1481_vm2, %v5027_v24  ;;  %v5178_v43 = vpop.f32.mrf.mxu1 }
 0xeb0   :  { %v5179_v4 = vadd.f32 %v9414_v51, %v5178_v43 }
 0xeb2   :  { %5267 = vst.msk [vmem:[%s9671_s17 + $0x20] sm:$0xff] %vm5262_vm12, %v5179_v4 }
 0xeb5   :  { %v5002_v0 = vpop.permute.xlu1 %5001  ;;  %v5007_v31 = vpop.permute.xlu0 %5006  ;;  %v5042_v15 = vld [vmem:[#allocation13 + $0xd0] sm:$0xff]  ;;  %v5043_v16 = vld [vmem:[#allocation13 + $0xd8] sm:$0xff] }
 0xeb6   :  { %5005 = vst [vmem:[#allocation13 + $0xe1] ss:$2 sm:$0xff] %v5002_v0  ;;  %5400 = vmatmul.msk.f32.gmra.mxu2 %vm1481_vm2, %v5039_v10  ;;  %v5030_v21 = vld [vmem:[#allocation13 + $0x70] sm:$0xff]  ;;  %v5031_v33 = vld [vmem:[#allocation13 + $0x78] sm:$0xff] }
 0xeb7   :  { %5010 = vst [vmem:[#allocation13 + $0xf0] ss:$2 sm:$0xff] %v5007_v31  ;;  %5389 = vmatmul.msk.f32.gmra.mxu1 %vm1481_vm2, %v5028_v59  ;;  %v5181_v23 = vpop.f32.mrf.mxu1 }
 0xeb8   :  { %v5182_v27 = vadd.f32 %v9414_v51, %v5181_v23 }
 0xeba   :  { %5268 = vst.msk [vmem:[%s9671_s17 + $0x28] sm:$0xff] %vm5262_vm12, %v5182_v27 }
 0xebd   :  { %v5012_v57 = vpop.permute.xlu1 %5011  ;;  %v5044_v34 = vld [vmem:[#allocation13 + $0xe0] sm:$0xff]  ;;  %v5045_v37 = vld [vmem:[#allocation13 + $0xe8] sm:$0xff] }
 0xebe   :  { %5015 = vst [vmem:[#allocation13 + $0xf1] ss:$2 sm:$0xff] %v5012_v57  ;;  %5401 = vmatmul.msk.f32.gmra.mxu2 %vm1481_vm2, %v5040_v29 }
 0xebf   :  { %5390 = vmatmul.msk.f32.gmra.mxu1 %vm1481_vm2, %v5029_v26 }
 0xec5   :  { %v5046_v32 = vld [vmem:[#allocation13 + $0xf0] sm:$0xff]  ;;  %v5047_v3 = vld [vmem:[#allocation13 + $0xf8] sm:$0xff] }
 0xec6   :  { %5402 = vmatmul.msk.f32.gmra.mxu2 %vm1481_vm2, %v5041_v61 }
 0xec7   :  { %5391 = vmatmul.msk.f32.gmra.mxu1 %vm1481_vm2, %v5030_v21 }
 0xece   :  { %5403 = vmatmul.msk.f32.gmra.mxu2 %vm1481_vm2, %v5042_v15 }
 0xecf   :  { %5392 = vmatmul.msk.f32.gmra.mxu1 %vm1481_vm2, %v5031_v33 }
 0xed6   :  { %5404 = vmatmul.msk.f32.gmra.mxu2 %vm1481_vm2, %v5043_v16 }
 0xed7   :  { %5393 = vmatmul.msk.f32.gmra.mxu1 %vm1481_vm2, %v5032_v50 }
 0xede   :  { %5405 = vmatmul.msk.f32.gmra.mxu2 %vm1481_vm2, %v5044_v34 }
 0xedf   :  { %5394 = vmatmul.msk.f32.gmra.mxu1 %vm1481_vm2, %v5033_v12 }
 0xee6   :  { %5406 = vmatmul.msk.f32.gmra.mxu2 %vm1481_vm2, %v5045_v37 }
 0xee7   :  { %5395 = vmatmul.msk.f32.gmra.mxu1 %vm1481_vm2, %v5034_v38 }
 0xeee   :  { %5407 = vmatmul.msk.f32.gmra.mxu2 %vm1481_vm2, %v5046_v32 }
 0xef6   :  { %5408 = vmatmul.msk.f32.gmra.mxu2 %vm1481_vm2, %v5047_v3 }
 0xef9   :  { %v5223_v35 = vpop.f32.mrf.mxu2 }
 0xefa   :  { %v5224_v11 = vadd.f32 %v9414_v51, %v5223_v35  ;;  %v5184_v46 = vpop.f32.mrf.mxu1 }
 0xefb   :  { %v5185_v19 = vadd.f32 %v9414_v51, %v5184_v46 }
 0xefc   :  { %5282 = vst.msk [vmem:[%s9671_s17 + $0x98] sm:$0xff] %vm5262_vm12, %v5224_v11 }
 0xefd   :  { %5269 = vst.msk [vmem:[%s9671_s17 + $0x30] sm:$0xff] %vm5262_vm12, %v5185_v19 }
 0xf02   :  { %v5187_v36 = vpop.f32.mrf.mxu1 }
 0xf03   :  { %v5188_v48 = vadd.f32 %v9414_v51, %v5187_v36 }
 0xf05   :  { %5270 = vst.msk [vmem:[%s9671_s17 + $0x38] sm:$0xff] %vm5262_vm12, %v5188_v48 }
 0xf0a   :  { %v5190_v52 = vpop.f32.mrf.mxu1 }
 0xf0b   :  { %v5191_v8 = vadd.f32 %v9414_v51, %v5190_v52 }
 0xf0d   :  { %5271 = vst.msk [vmem:[%s9671_s17 + $0x40] sm:$0xff] %vm5262_vm12, %v5191_v8 }
 0xf12   :  { %v5193_v58 = vpop.f32.mrf.mxu1 }
 0xf13   :  { %v5194_v40 = vadd.f32 %v9414_v51, %v5193_v58 }
 0xf15   :  { %5272 = vst.msk [vmem:[%s9671_s17 + $0x48] sm:$0xff] %vm5262_vm12, %v5194_v40 }
 0xf21   :  { %v5226_v53 = vpop.f32.mrf.mxu2 }
 0xf22   :  { %v5227_v55 = vadd.f32 %v9414_v51, %v5226_v53 }
 0xf24   :  { %5283 = vst.msk [vmem:[%s9671_s17 + $0xa0] sm:$0xff] %vm5262_vm12, %v5227_v55  ;;  %v5196_v62 = vpop.f32.mrf.mxu1 }
 0xf25   :  { %v5197_v44 = vadd.f32 %v9414_v51, %v5196_v62 }
 0xf27   :  { %5273 = vst.msk [vmem:[%s9671_s17 + $0x50] sm:$0xff] %vm5262_vm12, %v5197_v44 }
 0xf29   :  { %v5229_v7 = vpop.f32.mrf.mxu2 }
 0xf2a   :  { %v5230_v39 = vadd.f32 %v9414_v51, %v5229_v7 }
 0xf2c   :  { %5284 = vst.msk [vmem:[%s9671_s17 + $0xa8] sm:$0xff] %vm5262_vm12, %v5230_v39  ;;  %v5199_v56 = vpop.f32.mrf.mxu1 }
 0xf2d   :  { %v5200_v17 = vadd.f32 %v9414_v51, %v5199_v56 }
 0xf2f   :  { %5274 = vst.msk [vmem:[%s9671_s17 + $0x58] sm:$0xff] %vm5262_vm12, %v5200_v17 }
 0xf31   :  { %v5232_v60 = vpop.f32.mrf.mxu2 }
 0xf32   :  { %v5233_v28 = vadd.f32 %v9414_v51, %v5232_v60 }
 0xf34   :  { %5285 = vst.msk [vmem:[%s9671_s17 + $0xb0] sm:$0xff] %vm5262_vm12, %v5233_v28  ;;  %v5202_v30 = vpop.f32.mrf.mxu1 }
 0xf35   :  { %v5203_v49 = vadd.f32 %v9414_v51, %v5202_v30 }
 0xf37   :  { %5275 = vst.msk [vmem:[%s9671_s17 + $0x60] sm:$0xff] %vm5262_vm12, %v5203_v49 }
 0xf39   :  { %v5235_v41 = vpop.f32.mrf.mxu2 }
 0xf3a   :  { %v5236_v63 = vadd.f32 %v9414_v51, %v5235_v41 }
 0xf3c   :  { %5286 = vst.msk [vmem:[%s9671_s17 + $0xb8] sm:$0xff] %vm5262_vm12, %v5236_v63  ;;  %v5205_v2 = vpop.f32.mrf.mxu1 }
 0xf3d   :  { %v5206_v47 = vadd.f32 %v9414_v51, %v5205_v2 }
 0xf3f   :  { %5276 = vst.msk [vmem:[%s9671_s17 + $0x68] sm:$0xff] %vm5262_vm12, %v5206_v47 }
 0xf41   :  { %v5238_v1 = vpop.f32.mrf.mxu2 }
 0xf42   :  { %v5239_v5 = vadd.f32 %v9414_v51, %v5238_v1 }
 0xf44   :  { %5287 = vst.msk [vmem:[%s9671_s17 + $0xc0] sm:$0xff] %vm5262_vm12, %v5239_v5  ;;  %v5208_v6 = vpop.f32.mrf.mxu1 }
 0xf45   :  { %v5209_v13 = vadd.f32 %v9414_v51, %v5208_v6 }
 0xf47   :  { %5277 = vst.msk [vmem:[%s9671_s17 + $0x70] sm:$0xff] %vm5262_vm12, %v5209_v13 }
 0xf49   :  { %v5241_v42 = vpop.f32.mrf.mxu2 }
 0xf4a   :  { %v5242_v14 = vadd.f32 %v9414_v51, %v5241_v42 }
 0xf4c   :  { %5288 = vst.msk [vmem:[%s9671_s17 + $0xc8] sm:$0xff] %vm5262_vm12, %v5242_v14  ;;  %v5211_v22 = vpop.f32.mrf.mxu1 }
 0xf4d   :  { %v5212_v9 = vadd.f32 %v9414_v51, %v5211_v22 }
 0xf4f   :  { %5278 = vst.msk [vmem:[%s9671_s17 + $0x78] sm:$0xff] %vm5262_vm12, %v5212_v9 }
 0xf51   :  { %v5244_v18 = vpop.f32.mrf.mxu2 }
 0xf52   :  { %v5245_v25 = vadd.f32 %v9414_v51, %v5244_v18 }
 0xf54   :  { %5289 = vst.msk [vmem:[%s9671_s17 + $0xd0] sm:$0xff] %vm5262_vm12, %v5245_v25  ;;  %v5214_v45 = vpop.f32.mrf.mxu1 }
 0xf55   :  { %v5215_v54 = vadd.f32 %v9414_v51, %v5214_v45 }
 0xf57   :  { %5279 = vst.msk [vmem:[%s9671_s17 + $0x80] sm:$0xff] %vm5262_vm12, %v5215_v54 }
 0xf59   :  { %v5247_v20 = vpop.f32.mrf.mxu2 }
 0xf5a   :  { %v5248_v24 = vadd.f32 %v9414_v51, %v5247_v20 }
 0xf5c   :  { %5290 = vst.msk [vmem:[%s9671_s17 + $0xd8] sm:$0xff] %vm5262_vm12, %v5248_v24  ;;  %v5217_v43 = vpop.f32.mrf.mxu1 }
 0xf5d   :  { %v5218_v4 = vadd.f32 %v9414_v51, %v5217_v43 }
 0xf5f   :  { %5280 = vst.msk [vmem:[%s9671_s17 + $0x88] sm:$0xff] %vm5262_vm12, %v5218_v4 }
 0xf61   :  { %v5250_v0 = vpop.f32.mrf.mxu2 }
 0xf62   :  { %v5251_v31 = vadd.f32 %v9414_v51, %v5250_v0 }
 0xf64   :  { %5291 = vst.msk [vmem:[%s9671_s17 + $0xe0] sm:$0xff] %vm5262_vm12, %v5251_v31  ;;  %v5220_v10 = vpop.f32.mrf.mxu1 }
 0xf65   :  { %v5221_v59 = vadd.f32 %v9414_v51, %v5220_v10 }
 0xf67   :  { %5281 = vst.msk [vmem:[%s9671_s17 + $0x90] sm:$0xff] %vm5262_vm12, %v5221_v59 }
 0xf69   :  { %v5253_v23 = vpop.f32.mrf.mxu2 }
 0xf6a   :  { %v5254_v27 = vadd.f32 %v9414_v51, %v5253_v23 }
 0xf6c   :  { %5292 = vst.msk [vmem:[%s9671_s17 + $0xe8] sm:$0xff] %vm5262_vm12, %v5254_v27 }
 0xf71   :  { %v5256_v57 = vpop.f32.mrf.mxu2 }
 0xf72   :  { %v5257_v29 = vadd.f32 %v9414_v51, %v5256_v57 }
 0xf74   :  { %5293 = vst.msk [vmem:[%s9671_s17 + $0xf0] sm:$0xff] %vm5262_vm12, %v5257_v29 }
 0xf79   :  { %v5259_v26 = vpop.f32.mrf.mxu2 }
 0xf7a   :  { %v5260_v61 = vadd.f32 %v9414_v51, %v5259_v26 }
 0xf7c   :  { %5294 = vst.msk [vmem:[%s9671_s17 + $0xf8] sm:$0xff] %vm5262_vm12, %v5260_v61 }

</bundles_post_ra>
